<compile_context>
chip_gen: v6e
topology: v6e:2x2x1
jax: 0.10.0
libtpu: 0.0.40
codegen_flags: <defaults>
</compile_context>

<pallas_src>
import functools

import jax
import jax.numpy as jnp
from jax.experimental import pallas as pl
from jax.experimental.pallas import tpu as pltpu

EPS = 1e-5


def _round_up(x, m):
    return (x + m - 1) // m * m


# ---------------------------------------------------------------------------
# Fused conv matmul: (patches @ weights) * bn_scale + bn_bias (+ residual) (+ ReLU)
# ---------------------------------------------------------------------------

def _fused_matmul_kernel(a_ref, b_ref, s_ref, c_ref, *rest, relu, has_res):
    if has_res:
        r_ref, o_ref, acc_ref = rest
    else:
        r_ref = None
        o_ref, acc_ref = rest

    k = pl.program_id(2)

    @pl.when(k == 0)
    def _init():
        acc_ref[...] = jnp.zeros_like(acc_ref)

    acc_ref[...] += jnp.dot(a_ref[...], b_ref[...],
                            preferred_element_type=jnp.float32)

    @pl.when(k == pl.num_programs(2) - 1)
    def _finalize():
        y = acc_ref[...] * s_ref[...] + c_ref[...]        # folded BN (f32 epilogue)
        if has_res:
            y = y + r_ref[...]                            # fused residual add
        if relu:
            y = jnp.maximum(y, 0.0)
        o_ref[...] = y


def pallas_conv_matmul(a, b, scale, bias, residual, relu):
    """a: (M, K) f32 im2col patches, b: (K, C) f32 weights. Returns (M, C) f32."""
    M, K = a.shape
    _, C = b.shape

    tm = 256 if M >= 256 else _round_up(M, 16)
    tk = 128
    tn = 128
    Mp = _round_up(M, tm)
    Kp = _round_up(K, tk)
    Np = _round_up(C, tn)

    # bf16 MXU inputs (zero padding is numerically safe); BN scale/bias stay f32.
    a_p = jnp.pad(a, ((0, Mp - M), (0, Kp - K))).astype(jnp.bfloat16)
    b_p = jnp.pad(b, ((0, Kp - K), (0, Np - C))).astype(jnp.bfloat16)
    s_p = jnp.pad(scale.reshape(1, C), ((0, 0), (0, Np - C)))
    c_p = jnp.pad(bias.reshape(1, C), ((0, 0), (0, Np - C)))

    inputs = [a_p, b_p, s_p, c_p]
    in_specs = [
        pl.BlockSpec((tm, tk), lambda i, j, k: (i, k)),
        pl.BlockSpec((tk, tn), lambda i, j, k: (k, j)),
        pl.BlockSpec((1, tn), lambda i, j, k: (0, j)),
        pl.BlockSpec((1, tn), lambda i, j, k: (0, j)),
    ]
    has_res = residual is not None
    if has_res:
        r_p = jnp.pad(residual, ((0, Mp - M), (0, Np - C)))
        inputs.append(r_p)
        in_specs.append(pl.BlockSpec((tm, tn), lambda i, j, k: (i, j)))

    grid = (Mp // tm, Np // tn, Kp // tk)
    kern = functools.partial(_fused_matmul_kernel, relu=relu, has_res=has_res)
    out = pl.pallas_call(
        kern,
        out_shape=jax.ShapeDtypeStruct((Mp, Np), jnp.float32),
        grid=grid,
        in_specs=in_specs,
        out_specs=pl.BlockSpec((tm, tn), lambda i, j, k: (i, j)),
        scratch_shapes=[pltpu.VMEM((tm, tn), jnp.float32)],
        compiler_params=pltpu.CompilerParams(
            dimension_semantics=("parallel", "parallel", "arbitrary"),
            vmem_limit_bytes=32 * 1024 * 1024),
        cost_estimate=pl.CostEstimate(
            flops=2 * Mp * Kp * Np,
            transcendentals=0,
            bytes_accessed=(a_p.size + b_p.size) * 2 + Mp * Np * 4),
    )(*inputs)
    return out[:M, :C]


def conv_bn_act(x, w, bn, *, stride, pad, relu, residual=None):
    """x: NHWC f32. w: (Cout, Cin, kh, kw) (PyTorch layout). Returns NHWC f32.

    Computes relu?( BN(conv(x, w)) [+ residual] ) with BN folded into the matmul epilogue.
    """
    N, H, W, Cin = x.shape
    Cout, Cin2, kh, kw = w.shape
    assert Cin == Cin2
    Ho = (H + 2 * pad - kh) // stride + 1
    Wo = (W + 2 * pad - kw) // stride + 1
    xp = jnp.pad(x, ((0, 0), (pad, pad), (pad, pad), (0, 0)))
    cols = [xp[:, i:i + stride * Ho:stride, j:j + stride * Wo:stride, :]
            for i in range(kh) for j in range(kw)]
    patches = jnp.concatenate(cols, axis=-1).reshape(N * Ho * Wo, kh * kw * Cin)
    wm = jnp.transpose(w, (2, 3, 1, 0)).reshape(kh * kw * Cin, Cout)

    # fold BN in f32 BEFORE any bf16 cast
    scale = bn["gamma"] * jax.lax.rsqrt(bn["var"] + EPS)
    bias = bn["beta"] - bn["mean"] * scale

    res2d = residual.reshape(N * Ho * Wo, Cout) if residual is not None else None
    y = pallas_conv_matmul(patches, wm, scale, bias, res2d, relu)
    return y.reshape(N, Ho, Wo, Cout)


# ---------------------------------------------------------------------------
# MaxPool2d(kernel=3, stride=2, padding=1): single kernel, running max over 9 taps
# ---------------------------------------------------------------------------

def _maxpool_kernel(p_ref, o_ref, *, n_imgs, Ho, Wo):
    x = p_ref[...]                       # (4*N, Hq, Wq, C) phase-decomposed, -inf padded
    out = None
    for di in range(3):
        for dj in range(3):
            p = (di % 2) * 2 + (dj % 2)
            t = x[p * n_imgs:(p + 1) * n_imgs,
                  di // 2:di // 2 + Ho,
                  dj // 2:dj // 2 + Wo, :]
            out = t if out is None else jnp.maximum(out, t)
    o_ref[...] = out


def maxpool3x3s2(x):
    """MaxPool2d(kernel=3, stride=2, padding=1). x: NHWC f32."""
    N, H, W, C = x.shape
    assert H % 2 == 0 and W % 2 == 0
    Ho = (H + 2 - 3) // 2 + 1
    Wo = (W + 2 - 3) // 2 + 1
    xp = jnp.pad(x, ((0, 0), (1, 1), (1, 1), (0, 0)), constant_values=-jnp.inf)
    Hq, Wq = (H + 2) // 2, (W + 2) // 2
    # 2x2 phase decomposition (single 1x copy) so all 9 pool taps are contiguous slices.
    phases = jnp.concatenate(
        [xp[:, a::2, b::2, :] for a in (0, 1) for b in (0, 1)], axis=0)  # (4N, Hq, Wq, C)
    kern = functools.partial(_maxpool_kernel, n_imgs=N, Ho=Ho, Wo=Wo)
    return pl.pallas_call(
        kern,
        out_shape=jax.ShapeDtypeStruct((N, Ho, Wo, C), jnp.float32),
        grid=(1,),
        in_specs=[pl.BlockSpec((4 * N, Hq, Wq, C), lambda i: (0, 0, 0, 0))],
        out_specs=pl.BlockSpec((N, Ho, Wo, C), lambda i: (0, 0, 0, 0)),
    )(phases)


# ---------------------------------------------------------------------------
# MIL head: avg-pool -> tanh attention -> instance softmax -> bag embedding -> classifier
# ---------------------------------------------------------------------------

def _mil_kernel(f_ref, v_ref, w_ref, wc_ref, bc_ref, o_ref):
    f = f_ref[...]                                                     # (N, HW, C)
    h = jnp.sum(f, axis=1) * (1.0 / f.shape[1])                        # (N, C) spatial avg
    a = jnp.tanh(jnp.dot(h, v_ref[...],
                         preferred_element_type=jnp.float32))          # (N, L)
    s = jnp.dot(a, w_ref[...], preferred_element_type=jnp.float32)     # (N, 1)
    s = s - jnp.max(s, axis=0, keepdims=True)
    e = jnp.exp(s)
    att = e * pl.reciprocal(jnp.sum(e, axis=0, keepdims=True), approx=True)
    z = jnp.sum(att * h, axis=0, keepdims=True)                        # (1, C) bag embedding
    o_ref[...] = (jnp.dot(z, wc_ref[...], preferred_element_type=jnp.float32)
                  + bc_ref[...])                                       # (1, n_classes)


def pallas_mil(feats_nhwc, p):
    N, H, W, C = feats_nhwc.shape
    f = feats_nhwc.reshape(N, H * W, C)
    L = p["V"].shape[1]
    ncls = p["Wc"].shape[1]
    return pl.pallas_call(
        _mil_kernel,
        out_shape=jax.ShapeDtypeStruct((1, ncls), jnp.float32),
        grid=(1,),
        in_specs=[pl.BlockSpec((N, H * W, C), lambda i: (0, 0, 0)),
                  pl.BlockSpec((C, L), lambda i: (0, 0)),
                  pl.BlockSpec((L, 1), lambda i: (0, 0)),
                  pl.BlockSpec((C, ncls), lambda i: (0, 0)),
                  pl.BlockSpec((1, ncls), lambda i: (0, 0))],
        out_specs=pl.BlockSpec((1, ncls), lambda i: (0, 0)),
    )(f, p["V"], p["w"], p["Wc"], p["bc"])


# ---------------------------------------------------------------------------
# Full model
# ---------------------------------------------------------------------------

def basic_block(x, p, stride):
    """ResNet BasicBlock; residual add + ReLU fused into conv2's matmul epilogue."""
    if "down_conv" in p:
        identity = conv_bn_act(x, p["down_conv"], p["down_bn"],
                               stride=stride, pad=0, relu=False)
    else:
        identity = x
    out = conv_bn_act(x, p["conv1"], p["bn1"], stride=stride, pad=1, relu=True)
    out = conv_bn_act(out, p["conv2"], p["bn2"], stride=1, pad=1, relu=True,
                      residual=identity)
    return out


def full_mil_model_feats(x_nchw, params):
    x = jnp.transpose(x_nchw, (0, 2, 3, 1)).astype(jnp.float32)   # NCHW -> NHWC
    x = conv_bn_act(x, params["conv1"], params["bn1"], stride=2, pad=3, relu=True)
    x = maxpool3x3s2(x)
    x = basic_block(x, params["layer1"], stride=1)
    x = basic_block(x, params["layer2"], stride=2)
    x = basic_block(x, params["layer3"], stride=2)
    feats = basic_block(x, params["layer4"], stride=2)
    out = pallas_mil(feats, params["mil"])
    feats_nchw = jnp.transpose(feats, (0, 3, 1, 2))               # back to NCHW
    return out, feats_nchw


# ---------------------------------------------------------------------------
# Deterministic synthetic parameters
# ---------------------------------------------------------------------------

def init_params(key, base_ch=16, att_dim=32, n_classes=3):
    keys = iter(jax.random.split(key, 128))

    def conv_w(cout, cin, k):
        return jax.random.normal(next(keys), (cout, cin, k, k), jnp.float32) * 0.05

    def bn_p(c):
        return dict(gamma=jnp.ones((c,), jnp.float32),
                    beta=jnp.zeros((c,), jnp.float32),
                    mean=jax.random.normal(next(keys), (c,), jnp.float32) * 0.01,
                    var=jnp.ones((c,), jnp.float32))

    def block_p(cin, cout, stride):
        p = dict(conv1=conv_w(cout, cin, 3), bn1=bn_p(cout),
                 conv2=conv_w(cout, cout, 3), bn2=bn_p(cout))
        if stride != 1 or cin != cout:
            p["down_conv"] = conv_w(cout, cin, 1)
            p["down_bn"] = bn_p(cout)
        return p

    c1, c2, c3, c4 = base_ch, base_ch * 2, base_ch * 4, base_ch * 8
    params = dict(
        conv1=conv_w(c1, 3, 7),
        bn1=bn_p(c1),
        layer1=block_p(c1, c1, 1),
        layer2=block_p(c1, c2, 2),
        layer3=block_p(c2, c3, 2),
        layer4=block_p(c3, c4, 2),
        mil=dict(
            V=jax.random.normal(next(keys), (c4, att_dim), jnp.float32) * 0.05,
            w=jax.random.normal(next(keys), (att_dim, 1), jnp.float32) * 0.05,
            Wc=jax.random.normal(next(keys), (c4, n_classes), jnp.float32) * 0.05,
            bc=jnp.zeros((1, n_classes), jnp.float32),
        ),
    )
    return params


if __name__ == "__main__":
    key = jax.random.PRNGKey(0)
    k_params, k_x = jax.random.split(key)

    params = init_params(k_params)
    # x is a bag of N=2 RGB patches of size 64x64 (NCHW, as in PyTorch).
    x = jax.random.normal(k_x, (2, 3, 64, 64), jnp.float32)

    fwd = jax.jit(full_mil_model_feats)
    out, feats = fwd(x, params)
    jax.block_until_ready((out, feats))

    assert out.shape == (1, 3), out.shape
    assert feats.shape == (2, 128, 2, 2), feats.shape
    assert jnp.all(jnp.isfinite(out)) and jnp.all(jnp.isfinite(feats))
    print("KERNEL_OK")
</pallas_src>

<mosaic_0001>
module attributes {stable_mosaic.version = 11 : i64} {
  func.func @_fused_matmul_kernel(%arg0: i32, %arg1: i32, %arg2: i32, %arg3: memref<256x128xbf16, #tpu.memory_space<vmem>>, %arg4: memref<128x128xbf16, #tpu.memory_space<vmem>>, %arg5: memref<1x128xf32, #tpu.memory_space<vmem>>, %arg6: memref<1x128xf32, #tpu.memory_space<vmem>>, %arg7: memref<256x128xf32, #tpu.memory_space<vmem>>, %arg8: memref<256x128xf32, #tpu.memory_space<vmem>>) attributes {dimension_semantics = [#tpu.dimension_semantics<parallel>, #tpu.dimension_semantics<parallel>, #tpu.dimension_semantics<arbitrary>], iteration_bounds = array<i64: 8, 1, 2>, scalar_prefetch = 0 : i64, scratch_operands = 1 : i64, tpu.core_type = #tpu.core_type<tc>, window_params = [{transform_indices = @transform_0, window_bounds = array<i64: 256, 128>}, {transform_indices = @transform_1, window_bounds = array<i64: 128, 128>}, {transform_indices = @transform_2, window_bounds = array<i64: 1, 128>}, {transform_indices = @transform_3, window_bounds = array<i64: 1, 128>}, {transform_indices = @transform_4, window_bounds = array<i64: 256, 128>}]} {
    %c0_i32 = arith.constant 0 : i32
    %0 = arith.cmpi eq, %arg2, %c0_i32 : i32
    %1 = arith.extui %0 : i1 to i32
    %c0_i32_0 = arith.constant 0 : i32
    %2 = arith.cmpi ne, %1, %c0_i32_0 : i32
    scf.if %2 {
      %cst_9 = arith.constant 0.000000e+00 : f32
      %12 = vector.broadcast %cst_9 : f32 to vector<256x128xf32>
      %c0_10 = arith.constant 0 : index
      %c0_11 = arith.constant 0 : index
      %13 = vector.load %arg8[%c0_10, %c0_11] : memref<256x128xf32, #tpu.memory_space<vmem>>, vector<256x128xf32>
      tpu.vector_store %arg8[%c0_10, %c0_11], %12 {strides = array<i32>} : memref<256x128xf32, #tpu.memory_space<vmem>>, vector<256x128xf32>,
    } else {
    }
    %c0 = arith.constant 0 : index
    %c0_1 = arith.constant 0 : index
    %3 = vector.load %arg8[%c0, %c0_1] : memref<256x128xf32, #tpu.memory_space<vmem>>, vector<256x128xf32>
    %c0_2 = arith.constant 0 : index
    %c0_3 = arith.constant 0 : index
    %4 = vector.load %arg3[%c0_2, %c0_3] : memref<256x128xbf16, #tpu.memory_space<vmem>>, vector<256x128xbf16>
    %c0_4 = arith.constant 0 : index
    %c0_5 = arith.constant 0 : index
    %5 = vector.load %arg4[%c0_4, %c0_5] : memref<128x128xbf16, #tpu.memory_space<vmem>>, vector<128x128xbf16>
    %cst = arith.constant dense<0.000000e+00> : vector<256x128xf32>
    %6 = tpu.matmul %4, %5, %cst {dimension_numbers = #tpu.dot_dimension_numbers<[1], [0], [0], [1], [0, 0, 1, 1], [], []>} : vector<256x128xbf16>, vector<128x128xbf16>, vector<256x128xf32> -> vector<256x128xf32>
    %7 = arith.addf %3, %6 : vector<256x128xf32>
    %c0_6 = arith.constant 0 : index
    %c0_7 = arith.constant 0 : index
    %8 = vector.load %arg8[%c0_6, %c0_7] : memref<256x128xf32, #tpu.memory_space<vmem>>, vector<256x128xf32>
    tpu.vector_store %arg8[%c0_6, %c0_7], %7 {strides = array<i32>} : memref<256x128xf32, #tpu.memory_space<vmem>>, vector<256x128xf32>,
    %c1_i32 = arith.constant 1 : i32
    %9 = arith.cmpi eq, %arg2, %c1_i32 : i32
    %10 = arith.extui %9 : i1 to i32
    %c0_i32_8 = arith.constant 0 : i32
    %11 = arith.cmpi ne, %10, %c0_i32_8 : i32
    scf.if %11 {
      %c0_9 = arith.constant 0 : index
      %c0_10 = arith.constant 0 : index
      %12 = vector.load %arg8[%c0_9, %c0_10] : memref<256x128xf32, #tpu.memory_space<vmem>>, vector<256x128xf32>
      %c0_11 = arith.constant 0 : index
      %c0_12 = arith.constant 0 : index
      %13 = vector.load %arg5[%c0_11, %c0_12] : memref<1x128xf32, #tpu.memory_space<vmem>>, vector<1x128xf32>
      %14 = vector.broadcast %13 : vector<1x128xf32> to vector<256x128xf32>
      %15 = arith.mulf %12, %14 : vector<256x128xf32>
      %c0_13 = arith.constant 0 : index
      %c0_14 = arith.constant 0 : index
      %16 = vector.load %arg6[%c0_13, %c0_14] : memref<1x128xf32, #tpu.memory_space<vmem>>, vector<1x128xf32>
      %17 = vector.broadcast %16 : vector<1x128xf32> to vector<256x128xf32>
      %18 = arith.addf %15, %17 : vector<256x128xf32>
      %cst_15 = arith.constant 0.000000e+00 : f32
      %19 = vector.broadcast %cst_15 : f32 to vector<256x128xf32>
      %20 = arith.maximumf %18, %19 : vector<256x128xf32>
      %c0_16 = arith.constant 0 : index
      %c0_17 = arith.constant 0 : index
      %21 = vector.load %arg7[%c0_16, %c0_17] : memref<256x128xf32, #tpu.memory_space<vmem>>, vector<256x128xf32>
      tpu.vector_store %arg7[%c0_16, %c0_17], %20 {strides = array<i32>} : memref<256x128xf32, #tpu.memory_space<vmem>>, vector<256x128xf32>,
    } else {
    }
    return
  }
  func.func @transform_0(%arg0: i32, %arg1: i32, %arg2: i32) -> (i32, i32) {
    %c0_i32 = arith.constant 0 : i32
    return %arg0, %arg2 : i32, i32
  }
  func.func @transform_1(%arg0: i32, %arg1: i32, %arg2: i32) -> (i32, i32) {
    %c0_i32 = arith.constant 0 : i32
    return %arg2, %arg1 : i32, i32
  }
  func.func @transform_2(%arg0: i32, %arg1: i32, %arg2: i32) -> (i32, i32) {
    %c0_i32 = arith.constant 0 : i32
    %c0_i32_0 = arith.constant 0 : i32
    return %c0_i32, %arg1 : i32, i32
  }
  func.func @transform_3(%arg0: i32, %arg1: i32, %arg2: i32) -> (i32, i32) {
    %c0_i32 = arith.constant 0 : i32
    %c0_i32_0 = arith.constant 0 : i32
    return %c0_i32, %arg1 : i32, i32
  }
  func.func @transform_4(%arg0: i32, %arg1: i32, %arg2: i32) -> (i32, i32) {
    %c0_i32 = arith.constant 0 : i32
    return %arg0, %arg1 : i32, i32
  }
}

module attributes {stable_mosaic.version = 11 : i64} {
  func.func @_maxpool_kernel(%arg0: i32, %arg1: memref<8x17x17x16xf32, #tpu.memory_space<vmem>>, %arg2: memref<2x16x16x16xf32, #tpu.memory_space<vmem>>) attributes {dimension_semantics = [#tpu.dimension_semantics<arbitrary>], iteration_bounds = array<i64: 1>, scalar_prefetch = 0 : i64, scratch_operands = 0 : i64, tpu.core_type = #tpu.core_type<tc>, window_params = [{pipeline_mode = #tpu.pipeline_mode<synchronous>, transform_indices = @transform_0, window_bounds = array<i64: 8, 17, 17, 16>}, {pipeline_mode = #tpu.pipeline_mode<synchronous>, transform_indices = @transform_1, window_bounds = array<i64: 2, 16, 16, 16>}]} {
    %c0 = arith.constant 0 : index
    %c0_0 = arith.constant 0 : index
    %c0_1 = arith.constant 0 : index
    %c0_2 = arith.constant 0 : index
    %0 = vector.load %arg1[%c0, %c0_0, %c0_1, %c0_2] : memref<8x17x17x16xf32, #tpu.memory_space<vmem>>, vector<8x17x17x16xf32>
    %1 = vector.extract_strided_slice %0 {offsets = [0, 0, 0, 0], sizes = [2, 16, 16, 16], strides = [1, 1, 1, 1]} : vector<8x17x17x16xf32> to vector<2x16x16x16xf32>
    %2 = vector.extract_strided_slice %0 {offsets = [2, 0, 0, 0], sizes = [2, 16, 16, 16], strides = [1, 1, 1, 1]} : vector<8x17x17x16xf32> to vector<2x16x16x16xf32>
    %3 = arith.maximumf %1, %2 : vector<2x16x16x16xf32>
    %4 = vector.extract_strided_slice %0 {offsets = [0, 0, 1, 0], sizes = [2, 16, 16, 16], strides = [1, 1, 1, 1]} : vector<8x17x17x16xf32> to vector<2x16x16x16xf32>
    %5 = arith.maximumf %3, %4 : vector<2x16x16x16xf32>
    %6 = vector.extract_strided_slice %0 {offsets = [4, 0, 0, 0], sizes = [2, 16, 16, 16], strides = [1, 1, 1, 1]} : vector<8x17x17x16xf32> to vector<2x16x16x16xf32>
    %7 = arith.maximumf %5, %6 : vector<2x16x16x16xf32>
    %8 = vector.extract_strided_slice %0 {offsets = [6, 0, 0, 0], sizes = [2, 16, 16, 16], strides = [1, 1, 1, 1]} : vector<8x17x17x16xf32> to vector<2x16x16x16xf32>
    %9 = arith.maximumf %7, %8 : vector<2x16x16x16xf32>
    %10 = vector.extract_strided_slice %0 {offsets = [4, 0, 1, 0], sizes = [2, 16, 16, 16], strides = [1, 1, 1, 1]} : vector<8x17x17x16xf32> to vector<2x16x16x16xf32>
    %11 = arith.maximumf %9, %10 : vector<2x16x16x16xf32>
    %12 = vector.extract_strided_slice %0 {offsets = [0, 1, 0, 0], sizes = [2, 16, 16, 16], strides = [1, 1, 1, 1]} : vector<8x17x17x16xf32> to vector<2x16x16x16xf32>
    %13 = arith.maximumf %11, %12 : vector<2x16x16x16xf32>
    %14 = vector.extract_strided_slice %0 {offsets = [2, 1, 0, 0], sizes = [2, 16, 16, 16], strides = [1, 1, 1, 1]} : vector<8x17x17x16xf32> to vector<2x16x16x16xf32>
    %15 = arith.maximumf %13, %14 : vector<2x16x16x16xf32>
    %16 = vector.extract_strided_slice %0 {offsets = [0, 1, 1, 0], sizes = [2, 16, 16, 16], strides = [1, 1, 1, 1]} : vector<8x17x17x16xf32> to vector<2x16x16x16xf32>
    %17 = arith.maximumf %15, %16 : vector<2x16x16x16xf32>
    %c0_3 = arith.constant 0 : index
    %c0_4 = arith.constant 0 : index
    %c0_5 = arith.constant 0 : index
    %c0_6 = arith.constant 0 : index
    %18 = vector.load %arg2[%c0_3, %c0_4, %c0_5, %c0_6] : memref<2x16x16x16xf32, #tpu.memory_space<vmem>>, vector<2x16x16x16xf32>
    tpu.vector_store %arg2[%c0_3, %c0_4, %c0_5, %c0_6], %17 {strides = array<i32>} : memref<2x16x16x16xf32, #tpu.memory_space<vmem>>, vector<2x16x16x16xf32>,
    return
  }
  func.func @transform_0(%arg0: i32) -> (i32, i32, i32, i32) {
    %c0_i32 = arith.constant 0 : i32
    %c0_i32_0 = arith.constant 0 : i32
    %c0_i32_1 = arith.constant 0 : i32
    %c0_i32_2 = arith.constant 0 : i32
    %c0_i32_3 = arith.constant 0 : i32
    return %c0_i32, %c0_i32_0, %c0_i32_1, %c0_i32_2 : i32, i32, i32, i32
  }
  func.func @transform_1(%arg0: i32) -> (i32, i32, i32, i32) {
    %c0_i32 = arith.constant 0 : i32
    %c0_i32_0 = arith.constant 0 : i32
    %c0_i32_1 = arith.constant 0 : i32
    %c0_i32_2 = arith.constant 0 : i32
    %c0_i32_3 = arith.constant 0 : i32
    return %c0_i32, %c0_i32_0, %c0_i32_1, %c0_i32_2 : i32, i32, i32, i32
  }
}

module attributes {stable_mosaic.version = 11 : i64} {
  func.func @_fused_matmul_kernel(%arg0: i32, %arg1: i32, %arg2: i32, %arg3: memref<256x128xbf16, #tpu.memory_space<vmem>>, %arg4: memref<128x128xbf16, #tpu.memory_space<vmem>>, %arg5: memref<1x128xf32, #tpu.memory_space<vmem>>, %arg6: memref<1x128xf32, #tpu.memory_space<vmem>>, %arg7: memref<256x128xf32, #tpu.memory_space<vmem>>, %arg8: memref<256x128xf32, #tpu.memory_space<vmem>>) attributes {dimension_semantics = [#tpu.dimension_semantics<parallel>, #tpu.dimension_semantics<parallel>, #tpu.dimension_semantics<arbitrary>], iteration_bounds = array<i64: 2, 1, 2>, scalar_prefetch = 0 : i64, scratch_operands = 1 : i64, tpu.core_type = #tpu.core_type<tc>, window_params = [{transform_indices = @transform_0, window_bounds = array<i64: 256, 128>}, {transform_indices = @transform_1, window_bounds = array<i64: 128, 128>}, {transform_indices = @transform_2, window_bounds = array<i64: 1, 128>}, {transform_indices = @transform_3, window_bounds = array<i64: 1, 128>}, {transform_indices = @transform_4, window_bounds = array<i64: 256, 128>}]} {
    %c0_i32 = arith.constant 0 : i32
    %0 = arith.cmpi eq, %arg2, %c0_i32 : i32
    %1 = arith.extui %0 : i1 to i32
    %c0_i32_0 = arith.constant 0 : i32
    %2 = arith.cmpi ne, %1, %c0_i32_0 : i32
    scf.if %2 {
      %cst_9 = arith.constant 0.000000e+00 : f32
      %12 = vector.broadcast %cst_9 : f32 to vector<256x128xf32>
      %c0_10 = arith.constant 0 : index
      %c0_11 = arith.constant 0 : index
      %13 = vector.load %arg8[%c0_10, %c0_11] : memref<256x128xf32, #tpu.memory_space<vmem>>, vector<256x128xf32>
      tpu.vector_store %arg8[%c0_10, %c0_11], %12 {strides = array<i32>} : memref<256x128xf32, #tpu.memory_space<vmem>>, vector<256x128xf32>,
    } else {
    }
    %c0 = arith.constant 0 : index
    %c0_1 = arith.constant 0 : index
    %3 = vector.load %arg8[%c0, %c0_1] : memref<256x128xf32, #tpu.memory_space<vmem>>, vector<256x128xf32>
    %c0_2 = arith.constant 0 : index
    %c0_3 = arith.constant 0 : index
    %4 = vector.load %arg3[%c0_2, %c0_3] : memref<256x128xbf16, #tpu.memory_space<vmem>>, vector<256x128xbf16>
    %c0_4 = arith.constant 0 : index
    %c0_5 = arith.constant 0 : index
    %5 = vector.load %arg4[%c0_4, %c0_5] : memref<128x128xbf16, #tpu.memory_space<vmem>>, vector<128x128xbf16>
    %cst = arith.constant dense<0.000000e+00> : vector<256x128xf32>
    %6 = tpu.matmul %4, %5, %cst {dimension_numbers = #tpu.dot_dimension_numbers<[1], [0], [0], [1], [0, 0, 1, 1], [], []>} : vector<256x128xbf16>, vector<128x128xbf16>, vector<256x128xf32> -> vector<256x128xf32>
    %7 = arith.addf %3, %6 : vector<256x128xf32>
    %c0_6 = arith.constant 0 : index
    %c0_7 = arith.constant 0 : index
    %8 = vector.load %arg8[%c0_6, %c0_7] : memref<256x128xf32, #tpu.memory_space<vmem>>, vector<256x128xf32>
    tpu.vector_store %arg8[%c0_6, %c0_7], %7 {strides = array<i32>} : memref<256x128xf32, #tpu.memory_space<vmem>>, vector<256x128xf32>,
    %c1_i32 = arith.constant 1 : i32
    %9 = arith.cmpi eq, %arg2, %c1_i32 : i32
    %10 = arith.extui %9 : i1 to i32
    %c0_i32_8 = arith.constant 0 : i32
    %11 = arith.cmpi ne, %10, %c0_i32_8 : i32
    scf.if %11 {
      %c0_9 = arith.constant 0 : index
      %c0_10 = arith.constant 0 : index
      %12 = vector.load %arg8[%c0_9, %c0_10] : memref<256x128xf32, #tpu.memory_space<vmem>>, vector<256x128xf32>
      %c0_11 = arith.constant 0 : index
      %c0_12 = arith.constant 0 : index
      %13 = vector.load %arg5[%c0_11, %c0_12] : memref<1x128xf32, #tpu.memory_space<vmem>>, vector<1x128xf32>
      %14 = vector.broadcast %13 : vector<1x128xf32> to vector<256x128xf32>
      %15 = arith.mulf %12, %14 : vector<256x128xf32>
      %c0_13 = arith.constant 0 : index
      %c0_14 = arith.constant 0 : index
      %16 = vector.load %arg6[%c0_13, %c0_14] : memref<1x128xf32, #tpu.memory_space<vmem>>, vector<1x128xf32>
      %17 = vector.broadcast %16 : vector<1x128xf32> to vector<256x128xf32>
      %18 = arith.addf %15, %17 : vector<256x128xf32>
      %cst_15 = arith.constant 0.000000e+00 : f32
      %19 = vector.broadcast %cst_15 : f32 to vector<256x128xf32>
      %20 = arith.maximumf %18, %19 : vector<256x128xf32>
      %c0_16 = arith.constant 0 : index
      %c0_17 = arith.constant 0 : index
      %21 = vector.load %arg7[%c0_16, %c0_17] : memref<256x128xf32, #tpu.memory_space<vmem>>, vector<256x128xf32>
      tpu.vector_store %arg7[%c0_16, %c0_17], %20 {strides = array<i32>} : memref<256x128xf32, #tpu.memory_space<vmem>>, vector<256x128xf32>,
    } else {
    }
    return
  }
  func.func @transform_0(%arg0: i32, %arg1: i32, %arg2: i32) -> (i32, i32) {
    %c0_i32 = arith.constant 0 : i32
    return %arg0, %arg2 : i32, i32
  }
  func.func @transform_1(%arg0: i32, %arg1: i32, %arg2: i32) -> (i32, i32) {
    %c0_i32 = arith.constant 0 : i32
    return %arg2, %arg1 : i32, i32
  }
  func.func @transform_2(%arg0: i32, %arg1: i32, %arg2: i32) -> (i32, i32) {
    %c0_i32 = arith.constant 0 : i32
    %c0_i32_0 = arith.constant 0 : i32
    return %c0_i32, %arg1 : i32, i32
  }
  func.func @transform_3(%arg0: i32, %arg1: i32, %arg2: i32) -> (i32, i32) {
    %c0_i32 = arith.constant 0 : i32
    %c0_i32_0 = arith.constant 0 : i32
    return %c0_i32, %arg1 : i32, i32
  }
  func.func @transform_4(%arg0: i32, %arg1: i32, %arg2: i32) -> (i32, i32) {
    %c0_i32 = arith.constant 0 : i32
    return %arg0, %arg1 : i32, i32
  }
}

module attributes {stable_mosaic.version = 11 : i64} {
  func.func @_fused_matmul_kernel(%arg0: i32, %arg1: i32, %arg2: i32, %arg3: memref<256x128xbf16, #tpu.memory_space<vmem>>, %arg4: memref<128x128xbf16, #tpu.memory_space<vmem>>, %arg5: memref<1x128xf32, #tpu.memory_space<vmem>>, %arg6: memref<1x128xf32, #tpu.memory_space<vmem>>, %arg7: memref<256x128xf32, #tpu.memory_space<vmem>>, %arg8: memref<256x128xf32, #tpu.memory_space<vmem>>, %arg9: memref<256x128xf32, #tpu.memory_space<vmem>>) attributes {dimension_semantics = [#tpu.dimension_semantics<parallel>, #tpu.dimension_semantics<parallel>, #tpu.dimension_semantics<arbitrary>], iteration_bounds = array<i64: 2, 1, 2>, scalar_prefetch = 0 : i64, scratch_operands = 1 : i64, tpu.core_type = #tpu.core_type<tc>, window_params = [{transform_indices = @transform_0, window_bounds = array<i64: 256, 128>}, {transform_indices = @transform_1, window_bounds = array<i64: 128, 128>}, {transform_indices = @transform_2, window_bounds = array<i64: 1, 128>}, {transform_indices = @transform_3, window_bounds = array<i64: 1, 128>}, {transform_indices = @transform_4, window_bounds = array<i64: 256, 128>}, {transform_indices = @transform_5, window_bounds = array<i64: 256, 128>}]} {
    %c0_i32 = arith.constant 0 : i32
    %0 = arith.cmpi eq, %arg2, %c0_i32 : i32
    %1 = arith.extui %0 : i1 to i32
    %c0_i32_0 = arith.constant 0 : i32
    %2 = arith.cmpi ne, %1, %c0_i32_0 : i32
    scf.if %2 {
      %cst_9 = arith.constant 0.000000e+00 : f32
      %12 = vector.broadcast %cst_9 : f32 to vector<256x128xf32>
      %c0_10 = arith.constant 0 : index
      %c0_11 = arith.constant 0 : index
      %13 = vector.load %arg9[%c0_10, %c0_11] : memref<256x128xf32, #tpu.memory_space<vmem>>, vector<256x128xf32>
      tpu.vector_store %arg9[%c0_10, %c0_11], %12 {strides = array<i32>} : memref<256x128xf32, #tpu.memory_space<vmem>>, vector<256x128xf32>,
    } else {
    }
    %c0 = arith.constant 0 : index
    %c0_1 = arith.constant 0 : index
    %3 = vector.load %arg9[%c0, %c0_1] : memref<256x128xf32, #tpu.memory_space<vmem>>, vector<256x128xf32>
    %c0_2 = arith.constant 0 : index
    %c0_3 = arith.constant 0 : index
    %4 = vector.load %arg3[%c0_2, %c0_3] : memref<256x128xbf16, #tpu.memory_space<vmem>>, vector<256x128xbf16>
    %c0_4 = arith.constant 0 : index
    %c0_5 = arith.constant 0 : index
    %5 = vector.load %arg4[%c0_4, %c0_5] : memref<128x128xbf16, #tpu.memory_space<vmem>>, vector<128x128xbf16>
    %cst = arith.constant dense<0.000000e+00> : vector<256x128xf32>
    %6 = tpu.matmul %4, %5, %cst {dimension_numbers = #tpu.dot_dimension_numbers<[1], [0], [0], [1], [0, 0, 1, 1], [], []>} : vector<256x128xbf16>, vector<128x128xbf16>, vector<256x128xf32> -> vector<256x128xf32>
    %7 = arith.addf %3, %6 : vector<256x128xf32>
    %c0_6 = arith.constant 0 : index
    %c0_7 = arith.constant 0 : index
    %8 = vector.load %arg9[%c0_6, %c0_7] : memref<256x128xf32, #tpu.memory_space<vmem>>, vector<256x128xf32>
    tpu.vector_store %arg9[%c0_6, %c0_7], %7 {strides = array<i32>} : memref<256x128xf32, #tpu.memory_space<vmem>>, vector<256x128xf32>,
    %c1_i32 = arith.constant 1 : i32
    %9 = arith.cmpi eq, %arg2, %c1_i32 : i32
    %10 = arith.extui %9 : i1 to i32
    %c0_i32_8 = arith.constant 0 : i32
    %11 = arith.cmpi ne, %10, %c0_i32_8 : i32
    scf.if %11 {
      %c0_9 = arith.constant 0 : index
      %c0_10 = arith.constant 0 : index
      %12 = vector.load %arg9[%c0_9, %c0_10] : memref<256x128xf32, #tpu.memory_space<vmem>>, vector<256x128xf32>
      %c0_11 = arith.constant 0 : index
      %c0_12 = arith.constant 0 : index
      %13 = vector.load %arg5[%c0_11, %c0_12] : memref<1x128xf32, #tpu.memory_space<vmem>>, vector<1x128xf32>
      %14 = vector.broadcast %13 : vector<1x128xf32> to vector<256x128xf32>
      %15 = arith.mulf %12, %14 : vector<256x128xf32>
      %c0_13 = arith.constant 0 : index
      %c0_14 = arith.constant 0 : index
      %16 = vector.load %arg6[%c0_13, %c0_14] : memref<1x128xf32, #tpu.memory_space<vmem>>, vector<1x128xf32>
      %17 = vector.broadcast %16 : vector<1x128xf32> to vector<256x128xf32>
      %18 = arith.addf %15, %17 : vector<256x128xf32>
      %c0_15 = arith.constant 0 : index
      %c0_16 = arith.constant 0 : index
      %19 = vector.load %arg7[%c0_15, %c0_16] : memref<256x128xf32, #tpu.memory_space<vmem>>, vector<256x128xf32>
      %20 = arith.addf %18, %19 : vector<256x128xf32>
      %cst_17 = arith.constant 0.000000e+00 : f32
      %21 = vector.broadcast %cst_17 : f32 to vector<256x128xf32>
      %22 = arith.maximumf %20, %21 : vector<256x128xf32>
      %c0_18 = arith.constant 0 : index
      %c0_19 = arith.constant 0 : index
      %23 = vector.load %arg8[%c0_18, %c0_19] : memref<256x128xf32, #tpu.memory_space<vmem>>, vector<256x128xf32>
      tpu.vector_store %arg8[%c0_18, %c0_19], %22 {strides = array<i32>} : memref<256x128xf32, #tpu.memory_space<vmem>>, vector<256x128xf32>,
    } else {
    }
    return
  }
  func.func @transform_0(%arg0: i32, %arg1: i32, %arg2: i32) -> (i32, i32) {
    %c0_i32 = arith.constant 0 : i32
    return %arg0, %arg2 : i32, i32
  }
  func.func @transform_1(%arg0: i32, %arg1: i32, %arg2: i32) -> (i32, i32) {
    %c0_i32 = arith.constant 0 : i32
    return %arg2, %arg1 : i32, i32
  }
  func.func @transform_2(%arg0: i32, %arg1: i32, %arg2: i32) -> (i32, i32) {
    %c0_i32 = arith.constant 0 : i32
    %c0_i32_0 = arith.constant 0 : i32
    return %c0_i32, %arg1 : i32, i32
  }
  func.func @transform_3(%arg0: i32, %arg1: i32, %arg2: i32) -> (i32, i32) {
    %c0_i32 = arith.constant 0 : i32
    %c0_i32_0 = arith.constant 0 : i32
    return %c0_i32, %arg1 : i32, i32
  }
  func.func @transform_4(%arg0: i32, %arg1: i32, %arg2: i32) -> (i32, i32) {
    %c0_i32 = arith.constant 0 : i32
    return %arg0, %arg1 : i32, i32
  }
  func.func @transform_5(%arg0: i32, %arg1: i32, %arg2: i32) -> (i32, i32) {
    %c0_i32 = arith.constant 0 : i32
    return %arg0, %arg1 : i32, i32
  }
}

module attributes {stable_mosaic.version = 11 : i64} {
  func.func @_fused_matmul_kernel(%arg0: i32, %arg1: i32, %arg2: i32, %arg3: memref<128x128xbf16, #tpu.memory_space<vmem>>, %arg4: memref<128x128xbf16, #tpu.memory_space<vmem>>, %arg5: memref<1x128xf32, #tpu.memory_space<vmem>>, %arg6: memref<1x128xf32, #tpu.memory_space<vmem>>, %arg7: memref<128x128xf32, #tpu.memory_space<vmem>>, %arg8: memref<128x128xf32, #tpu.memory_space<vmem>>) attributes {dimension_semantics = [#tpu.dimension_semantics<parallel>, #tpu.dimension_semantics<parallel>, #tpu.dimension_semantics<arbitrary>], iteration_bounds = array<i64: 1, 1, 2>, scalar_prefetch = 0 : i64, scratch_operands = 1 : i64, tpu.core_type = #tpu.core_type<tc>, window_params = [{transform_indices = @transform_0, window_bounds = array<i64: 128, 128>}, {transform_indices = @transform_1, window_bounds = array<i64: 128, 128>}, {transform_indices = @transform_2, window_bounds = array<i64: 1, 128>}, {transform_indices = @transform_3, window_bounds = array<i64: 1, 128>}, {transform_indices = @transform_4, window_bounds = array<i64: 128, 128>}]} {
    %c0_i32 = arith.constant 0 : i32
    %0 = arith.cmpi eq, %arg2, %c0_i32 : i32
    %1 = arith.extui %0 : i1 to i32
    %c0_i32_0 = arith.constant 0 : i32
    %2 = arith.cmpi ne, %1, %c0_i32_0 : i32
    scf.if %2 {
      %cst_9 = arith.constant 0.000000e+00 : f32
      %12 = vector.broadcast %cst_9 : f32 to vector<128x128xf32>
      %c0_10 = arith.constant 0 : index
      %c0_11 = arith.constant 0 : index
      %13 = vector.load %arg8[%c0_10, %c0_11] : memref<128x128xf32, #tpu.memory_space<vmem>>, vector<128x128xf32>
      tpu.vector_store %arg8[%c0_10, %c0_11], %12 {strides = array<i32>} : memref<128x128xf32, #tpu.memory_space<vmem>>, vector<128x128xf32>,
    } else {
    }
    %c0 = arith.constant 0 : index
    %c0_1 = arith.constant 0 : index
    %3 = vector.load %arg8[%c0, %c0_1] : memref<128x128xf32, #tpu.memory_space<vmem>>, vector<128x128xf32>
    %c0_2 = arith.constant 0 : index
    %c0_3 = arith.constant 0 : index
    %4 = vector.load %arg3[%c0_2, %c0_3] : memref<128x128xbf16, #tpu.memory_space<vmem>>, vector<128x128xbf16>
    %c0_4 = arith.constant 0 : index
    %c0_5 = arith.constant 0 : index
    %5 = vector.load %arg4[%c0_4, %c0_5] : memref<128x128xbf16, #tpu.memory_space<vmem>>, vector<128x128xbf16>
    %cst = arith.constant dense<0.000000e+00> : vector<128x128xf32>
    %6 = tpu.matmul %4, %5, %cst {dimension_numbers = #tpu.dot_dimension_numbers<[1], [0], [0], [1], [0, 0, 1, 1], [], []>} : vector<128x128xbf16>, vector<128x128xbf16>, vector<128x128xf32> -> vector<128x128xf32>
    %7 = arith.addf %3, %6 : vector<128x128xf32>
    %c0_6 = arith.constant 0 : index
    %c0_7 = arith.constant 0 : index
    %8 = vector.load %arg8[%c0_6, %c0_7] : memref<128x128xf32, #tpu.memory_space<vmem>>, vector<128x128xf32>
    tpu.vector_store %arg8[%c0_6, %c0_7], %7 {strides = array<i32>} : memref<128x128xf32, #tpu.memory_space<vmem>>, vector<128x128xf32>,
    %c1_i32 = arith.constant 1 : i32
    %9 = arith.cmpi eq, %arg2, %c1_i32 : i32
    %10 = arith.extui %9 : i1 to i32
    %c0_i32_8 = arith.constant 0 : i32
    %11 = arith.cmpi ne, %10, %c0_i32_8 : i32
    scf.if %11 {
      %c0_9 = arith.constant 0 : index
      %c0_10 = arith.constant 0 : index
      %12 = vector.load %arg8[%c0_9, %c0_10] : memref<128x128xf32, #tpu.memory_space<vmem>>, vector<128x128xf32>
      %c0_11 = arith.constant 0 : index
      %c0_12 = arith.constant 0 : index
      %13 = vector.load %arg5[%c0_11, %c0_12] : memref<1x128xf32, #tpu.memory_space<vmem>>, vector<1x128xf32>
      %14 = vector.broadcast %13 : vector<1x128xf32> to vector<128x128xf32>
      %15 = arith.mulf %12, %14 : vector<128x128xf32>
      %c0_13 = arith.constant 0 : index
      %c0_14 = arith.constant 0 : index
      %16 = vector.load %arg6[%c0_13, %c0_14] : memref<1x128xf32, #tpu.memory_space<vmem>>, vector<1x128xf32>
      %17 = vector.broadcast %16 : vector<1x128xf32> to vector<128x128xf32>
      %18 = arith.addf %15, %17 : vector<128x128xf32>
      %cst_15 = arith.constant 0.000000e+00 : f32
      %19 = vector.broadcast %cst_15 : f32 to vector<128x128xf32>
      %20 = arith.maximumf %18, %19 : vector<128x128xf32>
      %c0_16 = arith.constant 0 : index
      %c0_17 = arith.constant 0 : index
      %21 = vector.load %arg7[%c0_16, %c0_17] : memref<128x128xf32, #tpu.memory_space<vmem>>, vector<128x128xf32>
      tpu.vector_store %arg7[%c0_16, %c0_17], %20 {strides = array<i32>} : memref<128x128xf32, #tpu.memory_space<vmem>>, vector<128x128xf32>,
    } else {
    }
    return
  }
  func.func @transform_0(%arg0: i32, %arg1: i32, %arg2: i32) -> (i32, i32) {
    %c0_i32 = arith.constant 0 : i32
    return %arg0, %arg2 : i32, i32
  }
  func.func @transform_1(%arg0: i32, %arg1: i32, %arg2: i32) -> (i32, i32) {
    %c0_i32 = arith.constant 0 : i32
    return %arg2, %arg1 : i32, i32
  }
  func.func @transform_2(%arg0: i32, %arg1: i32, %arg2: i32) -> (i32, i32) {
    %c0_i32 = arith.constant 0 : i32
    %c0_i32_0 = arith.constant 0 : i32
    return %c0_i32, %arg1 : i32, i32
  }
  func.func @transform_3(%arg0: i32, %arg1: i32, %arg2: i32) -> (i32, i32) {
    %c0_i32 = arith.constant 0 : i32
    %c0_i32_0 = arith.constant 0 : i32
    return %c0_i32, %arg1 : i32, i32
  }
  func.func @transform_4(%arg0: i32, %arg1: i32, %arg2: i32) -> (i32, i32) {
    %c0_i32 = arith.constant 0 : i32
    return %arg0, %arg1 : i32, i32
  }
}

module attributes {stable_mosaic.version = 11 : i64} {
  func.func @_fused_matmul_kernel(%arg0: i32, %arg1: i32, %arg2: i32, %arg3: memref<128x128xbf16, #tpu.memory_space<vmem>>, %arg4: memref<128x128xbf16, #tpu.memory_space<vmem>>, %arg5: memref<1x128xf32, #tpu.memory_space<vmem>>, %arg6: memref<1x128xf32, #tpu.memory_space<vmem>>, %arg7: memref<128x128xf32, #tpu.memory_space<vmem>>, %arg8: memref<128x128xf32, #tpu.memory_space<vmem>>) attributes {dimension_semantics = [#tpu.dimension_semantics<parallel>, #tpu.dimension_semantics<parallel>, #tpu.dimension_semantics<arbitrary>], iteration_bounds = array<i64: 1, 1, 1>, scalar_prefetch = 0 : i64, scratch_operands = 1 : i64, tpu.core_type = #tpu.core_type<tc>, window_params = [{transform_indices = @transform_0, window_bounds = array<i64: 128, 128>}, {transform_indices = @transform_1, window_bounds = array<i64: 128, 128>}, {transform_indices = @transform_2, window_bounds = array<i64: 1, 128>}, {transform_indices = @transform_3, window_bounds = array<i64: 1, 128>}, {transform_indices = @transform_4, window_bounds = array<i64: 128, 128>}]} {
    %c0_i32 = arith.constant 0 : i32
    %0 = arith.cmpi eq, %arg2, %c0_i32 : i32
    %1 = arith.extui %0 : i1 to i32
    %c0_i32_0 = arith.constant 0 : i32
    %2 = arith.cmpi ne, %1, %c0_i32_0 : i32
    scf.if %2 {
      %cst_10 = arith.constant 0.000000e+00 : f32
      %12 = vector.broadcast %cst_10 : f32 to vector<128x128xf32>
      %c0_11 = arith.constant 0 : index
      %c0_12 = arith.constant 0 : index
      %13 = vector.load %arg8[%c0_11, %c0_12] : memref<128x128xf32, #tpu.memory_space<vmem>>, vector<128x128xf32>
      tpu.vector_store %arg8[%c0_11, %c0_12], %12 {strides = array<i32>} : memref<128x128xf32, #tpu.memory_space<vmem>>, vector<128x128xf32>,
    } else {
    }
    %c0 = arith.constant 0 : index
    %c0_1 = arith.constant 0 : index
    %3 = vector.load %arg8[%c0, %c0_1] : memref<128x128xf32, #tpu.memory_space<vmem>>, vector<128x128xf32>
    %c0_2 = arith.constant 0 : index
    %c0_3 = arith.constant 0 : index
    %4 = vector.load %arg3[%c0_2, %c0_3] : memref<128x128xbf16, #tpu.memory_space<vmem>>, vector<128x128xbf16>
    %c0_4 = arith.constant 0 : index
    %c0_5 = arith.constant 0 : index
    %5 = vector.load %arg4[%c0_4, %c0_5] : memref<128x128xbf16, #tpu.memory_space<vmem>>, vector<128x128xbf16>
    %cst = arith.constant dense<0.000000e+00> : vector<128x128xf32>
    %6 = tpu.matmul %4, %5, %cst {dimension_numbers = #tpu.dot_dimension_numbers<[1], [0], [0], [1], [0, 0, 1, 1], [], []>} : vector<128x128xbf16>, vector<128x128xbf16>, vector<128x128xf32> -> vector<128x128xf32>
    %7 = arith.addf %3, %6 : vector<128x128xf32>
    %c0_6 = arith.constant 0 : index
    %c0_7 = arith.constant 0 : index
    %8 = vector.load %arg8[%c0_6, %c0_7] : memref<128x128xf32, #tpu.memory_space<vmem>>, vector<128x128xf32>
    tpu.vector_store %arg8[%c0_6, %c0_7], %7 {strides = array<i32>} : memref<128x128xf32, #tpu.memory_space<vmem>>, vector<128x128xf32>,
    %c0_i32_8 = arith.constant 0 : i32
    %9 = arith.cmpi eq, %arg2, %c0_i32_8 : i32
    %10 = arith.extui %9 : i1 to i32
    %c0_i32_9 = arith.constant 0 : i32
    %11 = arith.cmpi ne, %10, %c0_i32_9 : i32
    scf.if %11 {
      %c0_10 = arith.constant 0 : index
      %c0_11 = arith.constant 0 : index
      %12 = vector.load %arg8[%c0_10, %c0_11] : memref<128x128xf32, #tpu.memory_space<vmem>>, vector<128x128xf32>
      %c0_12 = arith.constant 0 : index
      %c0_13 = arith.constant 0 : index
      %13 = vector.load %arg5[%c0_12, %c0_13] : memref<1x128xf32, #tpu.memory_space<vmem>>, vector<1x128xf32>
      %14 = vector.broadcast %13 : vector<1x128xf32> to vector<128x128xf32>
      %15 = arith.mulf %12, %14 : vector<128x128xf32>
      %c0_14 = arith.constant 0 : index
      %c0_15 = arith.constant 0 : index
      %16 = vector.load %arg6[%c0_14, %c0_15] : memref<1x128xf32, #tpu.memory_space<vmem>>, vector<1x128xf32>
      %17 = vector.broadcast %16 : vector<1x128xf32> to vector<128x128xf32>
      %18 = arith.addf %15, %17 : vector<128x128xf32>
      %c0_16 = arith.constant 0 : index
      %c0_17 = arith.constant 0 : index
      %19 = vector.load %arg7[%c0_16, %c0_17] : memref<128x128xf32, #tpu.memory_space<vmem>>, vector<128x128xf32>
      tpu.vector_store %arg7[%c0_16, %c0_17], %18 {strides = array<i32>} : memref<128x128xf32, #tpu.memory_space<vmem>>, vector<128x128xf32>,
    } else {
    }
    return
  }
  func.func @transform_0(%arg0: i32, %arg1: i32, %arg2: i32) -> (i32, i32) {
    %c0_i32 = arith.constant 0 : i32
    return %arg0, %arg2 : i32, i32
  }
  func.func @transform_1(%arg0: i32, %arg1: i32, %arg2: i32) -> (i32, i32) {
    %c0_i32 = arith.constant 0 : i32
    return %arg2, %arg1 : i32, i32
  }
  func.func @transform_2(%arg0: i32, %arg1: i32, %arg2: i32) -> (i32, i32) {
    %c0_i32 = arith.constant 0 : i32
    %c0_i32_0 = arith.constant 0 : i32
    return %c0_i32, %arg1 : i32, i32
  }
  func.func @transform_3(%arg0: i32, %arg1: i32, %arg2: i32) -> (i32, i32) {
    %c0_i32 = arith.constant 0 : i32
    %c0_i32_0 = arith.constant 0 : i32
    return %c0_i32, %arg1 : i32, i32
  }
  func.func @transform_4(%arg0: i32, %arg1: i32, %arg2: i32) -> (i32, i32) {
    %c0_i32 = arith.constant 0 : i32
    return %arg0, %arg1 : i32, i32
  }
}

module attributes {stable_mosaic.version = 11 : i64} {
  func.func @_fused_matmul_kernel(%arg0: i32, %arg1: i32, %arg2: i32, %arg3: memref<128x128xbf16, #tpu.memory_space<vmem>>, %arg4: memref<128x128xbf16, #tpu.memory_space<vmem>>, %arg5: memref<1x128xf32, #tpu.memory_space<vmem>>, %arg6: memref<1x128xf32, #tpu.memory_space<vmem>>, %arg7: memref<128x128xf32, #tpu.memory_space<vmem>>, %arg8: memref<128x128xf32, #tpu.memory_space<vmem>>, %arg9: memref<128x128xf32, #tpu.memory_space<vmem>>) attributes {dimension_semantics = [#tpu.dimension_semantics<parallel>, #tpu.dimension_semantics<parallel>, #tpu.dimension_semantics<arbitrary>], iteration_bounds = array<i64: 1, 1, 3>, scalar_prefetch = 0 : i64, scratch_operands = 1 : i64, tpu.core_type = #tpu.core_type<tc>, window_params = [{transform_indices = @transform_0, window_bounds = array<i64: 128, 128>}, {transform_indices = @transform_1, window_bounds = array<i64: 128, 128>}, {transform_indices = @transform_2, window_bounds = array<i64: 1, 128>}, {transform_indices = @transform_3, window_bounds = array<i64: 1, 128>}, {transform_indices = @transform_4, window_bounds = array<i64: 128, 128>}, {transform_indices = @transform_5, window_bounds = array<i64: 128, 128>}]} {
    %c0_i32 = arith.constant 0 : i32
    %0 = arith.cmpi eq, %arg2, %c0_i32 : i32
    %1 = arith.extui %0 : i1 to i32
    %c0_i32_0 = arith.constant 0 : i32
    %2 = arith.cmpi ne, %1, %c0_i32_0 : i32
    scf.if %2 {
      %cst_9 = arith.constant 0.000000e+00 : f32
      %12 = vector.broadcast %cst_9 : f32 to vector<128x128xf32>
      %c0_10 = arith.constant 0 : index
      %c0_11 = arith.constant 0 : index
      %13 = vector.load %arg9[%c0_10, %c0_11] : memref<128x128xf32, #tpu.memory_space<vmem>>, vector<128x128xf32>
      tpu.vector_store %arg9[%c0_10, %c0_11], %12 {strides = array<i32>} : memref<128x128xf32, #tpu.memory_space<vmem>>, vector<128x128xf32>,
    } else {
    }
    %c0 = arith.constant 0 : index
    %c0_1 = arith.constant 0 : index
    %3 = vector.load %arg9[%c0, %c0_1] : memref<128x128xf32, #tpu.memory_space<vmem>>, vector<128x128xf32>
    %c0_2 = arith.constant 0 : index
    %c0_3 = arith.constant 0 : index
    %4 = vector.load %arg3[%c0_2, %c0_3] : memref<128x128xbf16, #tpu.memory_space<vmem>>, vector<128x128xbf16>
    %c0_4 = arith.constant 0 : index
    %c0_5 = arith.constant 0 : index
    %5 = vector.load %arg4[%c0_4, %c0_5] : memref<128x128xbf16, #tpu.memory_space<vmem>>, vector<128x128xbf16>
    %cst = arith.constant dense<0.000000e+00> : vector<128x128xf32>
    %6 = tpu.matmul %4, %5, %cst {dimension_numbers = #tpu.dot_dimension_numbers<[1], [0], [0], [1], [0, 0, 1, 1], [], []>} : vector<128x128xbf16>, vector<128x128xbf16>, vector<128x128xf32> -> vector<128x128xf32>
    %7 = arith.addf %3, %6 : vector<128x128xf32>
    %c0_6 = arith.constant 0 : index
    %c0_7 = arith.constant 0 : index
    %8 = vector.load %arg9[%c0_6, %c0_7] : memref<128x128xf32, #tpu.memory_space<vmem>>, vector<128x128xf32>
    tpu.vector_store %arg9[%c0_6, %c0_7], %7 {strides = array<i32>} : memref<128x128xf32, #tpu.memory_space<vmem>>, vector<128x128xf32>,
    %c2_i32 = arith.constant 2 : i32
    %9 = arith.cmpi eq, %arg2, %c2_i32 : i32
    %10 = arith.extui %9 : i1 to i32
    %c0_i32_8 = arith.constant 0 : i32
    %11 = arith.cmpi ne, %10, %c0_i32_8 : i32
    scf.if %11 {
      %c0_9 = arith.constant 0 : index
      %c0_10 = arith.constant 0 : index
      %12 = vector.load %arg9[%c0_9, %c0_10] : memref<128x128xf32, #tpu.memory_space<vmem>>, vector<128x128xf32>
      %c0_11 = arith.constant 0 : index
      %c0_12 = arith.constant 0 : index
      %13 = vector.load %arg5[%c0_11, %c0_12] : memref<1x128xf32, #tpu.memory_space<vmem>>, vector<1x128xf32>
      %14 = vector.broadcast %13 : vector<1x128xf32> to vector<128x128xf32>
      %15 = arith.mulf %12, %14 : vector<128x128xf32>
      %c0_13 = arith.constant 0 : index
      %c0_14 = arith.constant 0 : index
      %16 = vector.load %arg6[%c0_13, %c0_14] : memref<1x128xf32, #tpu.memory_space<vmem>>, vector<1x128xf32>
      %17 = vector.broadcast %16 : vector<1x128xf32> to vector<128x128xf32>
      %18 = arith.addf %15, %17 : vector<128x128xf32>
      %c0_15 = arith.constant 0 : index
      %c0_16 = arith.constant 0 : index
      %19 = vector.load %arg7[%c0_15, %c0_16] : memref<128x128xf32, #tpu.memory_space<vmem>>, vector<128x128xf32>
      %20 = arith.addf %18, %19 : vector<128x128xf32>
      %cst_17 = arith.constant 0.000000e+00 : f32
      %21 = vector.broadcast %cst_17 : f32 to vector<128x128xf32>
      %22 = arith.maximumf %20, %21 : vector<128x128xf32>
      %c0_18 = arith.constant 0 : index
      %c0_19 = arith.constant 0 : index
      %23 = vector.load %arg8[%c0_18, %c0_19] : memref<128x128xf32, #tpu.memory_space<vmem>>, vector<128x128xf32>
      tpu.vector_store %arg8[%c0_18, %c0_19], %22 {strides = array<i32>} : memref<128x128xf32, #tpu.memory_space<vmem>>, vector<128x128xf32>,
    } else {
    }
    return
  }
  func.func @transform_0(%arg0: i32, %arg1: i32, %arg2: i32) -> (i32, i32) {
    %c0_i32 = arith.constant 0 : i32
    return %arg0, %arg2 : i32, i32
  }
  func.func @transform_1(%arg0: i32, %arg1: i32, %arg2: i32) -> (i32, i32) {
    %c0_i32 = arith.constant 0 : i32
    return %arg2, %arg1 : i32, i32
  }
  func.func @transform_2(%arg0: i32, %arg1: i32, %arg2: i32) -> (i32, i32) {
    %c0_i32 = arith.constant 0 : i32
    %c0_i32_0 = arith.constant 0 : i32
    return %c0_i32, %arg1 : i32, i32
  }
  func.func @transform_3(%arg0: i32, %arg1: i32, %arg2: i32) -> (i32, i32) {
    %c0_i32 = arith.constant 0 : i32
    %c0_i32_0 = arith.constant 0 : i32
    return %c0_i32, %arg1 : i32, i32
  }
  func.func @transform_4(%arg0: i32, %arg1: i32, %arg2: i32) -> (i32, i32) {
    %c0_i32 = arith.constant 0 : i32
    return %arg0, %arg1 : i32, i32
  }
  func.func @transform_5(%arg0: i32, %arg1: i32, %arg2: i32) -> (i32, i32) {
    %c0_i32 = arith.constant 0 : i32
    return %arg0, %arg1 : i32, i32
  }
}

module attributes {stable_mosaic.version = 11 : i64} {
  func.func @_fused_matmul_kernel(%arg0: i32, %arg1: i32, %arg2: i32, %arg3: memref<32x128xbf16, #tpu.memory_space<vmem>>, %arg4: memref<128x128xbf16, #tpu.memory_space<vmem>>, %arg5: memref<1x128xf32, #tpu.memory_space<vmem>>, %arg6: memref<1x128xf32, #tpu.memory_space<vmem>>, %arg7: memref<32x128xf32, #tpu.memory_space<vmem>>, %arg8: memref<32x128xf32, #tpu.memory_space<vmem>>) attributes {dimension_semantics = [#tpu.dimension_semantics<parallel>, #tpu.dimension_semantics<parallel>, #tpu.dimension_semantics<arbitrary>], iteration_bounds = array<i64: 1, 1, 3>, scalar_prefetch = 0 : i64, scratch_operands = 1 : i64, tpu.core_type = #tpu.core_type<tc>, window_params = [{transform_indices = @transform_0, window_bounds = array<i64: 32, 128>}, {transform_indices = @transform_1, window_bounds = array<i64: 128, 128>}, {transform_indices = @transform_2, window_bounds = array<i64: 1, 128>}, {transform_indices = @transform_3, window_bounds = array<i64: 1, 128>}, {transform_indices = @transform_4, window_bounds = array<i64: 32, 128>}]} {
    %c0_i32 = arith.constant 0 : i32
    %0 = arith.cmpi eq, %arg2, %c0_i32 : i32
    %1 = arith.extui %0 : i1 to i32
    %c0_i32_0 = arith.constant 0 : i32
    %2 = arith.cmpi ne, %1, %c0_i32_0 : i32
    scf.if %2 {
      %cst_9 = arith.constant 0.000000e+00 : f32
      %12 = vector.broadcast %cst_9 : f32 to vector<32x128xf32>
      %c0_10 = arith.constant 0 : index
      %c0_11 = arith.constant 0 : index
      %13 = vector.load %arg8[%c0_10, %c0_11] : memref<32x128xf32, #tpu.memory_space<vmem>>, vector<32x128xf32>
      tpu.vector_store %arg8[%c0_10, %c0_11], %12 {strides = array<i32>} : memref<32x128xf32, #tpu.memory_space<vmem>>, vector<32x128xf32>,
    } else {
    }
    %c0 = arith.constant 0 : index
    %c0_1 = arith.constant 0 : index
    %3 = vector.load %arg8[%c0, %c0_1] : memref<32x128xf32, #tpu.memory_space<vmem>>, vector<32x128xf32>
    %c0_2 = arith.constant 0 : index
    %c0_3 = arith.constant 0 : index
    %4 = vector.load %arg3[%c0_2, %c0_3] : memref<32x128xbf16, #tpu.memory_space<vmem>>, vector<32x128xbf16>
    %c0_4 = arith.constant 0 : index
    %c0_5 = arith.constant 0 : index
    %5 = vector.load %arg4[%c0_4, %c0_5] : memref<128x128xbf16, #tpu.memory_space<vmem>>, vector<128x128xbf16>
    %cst = arith.constant dense<0.000000e+00> : vector<32x128xf32>
    %6 = tpu.matmul %4, %5, %cst {dimension_numbers = #tpu.dot_dimension_numbers<[1], [0], [0], [1], [0, 0, 1, 1], [], []>} : vector<32x128xbf16>, vector<128x128xbf16>, vector<32x128xf32> -> vector<32x128xf32>
    %7 = arith.addf %3, %6 : vector<32x128xf32>
    %c0_6 = arith.constant 0 : index
    %c0_7 = arith.constant 0 : index
    %8 = vector.load %arg8[%c0_6, %c0_7] : memref<32x128xf32, #tpu.memory_space<vmem>>, vector<32x128xf32>
    tpu.vector_store %arg8[%c0_6, %c0_7], %7 {strides = array<i32>} : memref<32x128xf32, #tpu.memory_space<vmem>>, vector<32x128xf32>,
    %c2_i32 = arith.constant 2 : i32
    %9 = arith.cmpi eq, %arg2, %c2_i32 : i32
    %10 = arith.extui %9 : i1 to i32
    %c0_i32_8 = arith.constant 0 : i32
    %11 = arith.cmpi ne, %10, %c0_i32_8 : i32
    scf.if %11 {
      %c0_9 = arith.constant 0 : index
      %c0_10 = arith.constant 0 : index
      %12 = vector.load %arg8[%c0_9, %c0_10] : memref<32x128xf32, #tpu.memory_space<vmem>>, vector<32x128xf32>
      %c0_11 = arith.constant 0 : index
      %c0_12 = arith.constant 0 : index
      %13 = vector.load %arg5[%c0_11, %c0_12] : memref<1x128xf32, #tpu.memory_space<vmem>>, vector<1x128xf32>
      %14 = vector.broadcast %13 : vector<1x128xf32> to vector<32x128xf32>
      %15 = arith.mulf %12, %14 : vector<32x128xf32>
      %c0_13 = arith.constant 0 : index
      %c0_14 = arith.constant 0 : index
      %16 = vector.load %arg6[%c0_13, %c0_14] : memref<1x128xf32, #tpu.memory_space<vmem>>, vector<1x128xf32>
      %17 = vector.broadcast %16 : vector<1x128xf32> to vector<32x128xf32>
      %18 = arith.addf %15, %17 : vector<32x128xf32>
      %cst_15 = arith.constant 0.000000e+00 : f32
      %19 = vector.broadcast %cst_15 : f32 to vector<32x128xf32>
      %20 = arith.maximumf %18, %19 : vector<32x128xf32>
      %c0_16 = arith.constant 0 : index
      %c0_17 = arith.constant 0 : index
      %21 = vector.load %arg7[%c0_16, %c0_17] : memref<32x128xf32, #tpu.memory_space<vmem>>, vector<32x128xf32>
      tpu.vector_store %arg7[%c0_16, %c0_17], %20 {strides = array<i32>} : memref<32x128xf32, #tpu.memory_space<vmem>>, vector<32x128xf32>,
    } else {
    }
    return
  }
  func.func @transform_0(%arg0: i32, %arg1: i32, %arg2: i32) -> (i32, i32) {
    %c0_i32 = arith.constant 0 : i32
    return %arg0, %arg2 : i32, i32
  }
  func.func @transform_1(%arg0: i32, %arg1: i32, %arg2: i32) -> (i32, i32) {
    %c0_i32 = arith.constant 0 : i32
    return %arg2, %arg1 : i32, i32
  }
  func.func @transform_2(%arg0: i32, %arg1: i32, %arg2: i32) -> (i32, i32) {
    %c0_i32 = arith.constant 0 : i32
    %c0_i32_0 = arith.constant 0 : i32
    return %c0_i32, %arg1 : i32, i32
  }
  func.func @transform_3(%arg0: i32, %arg1: i32, %arg2: i32) -> (i32, i32) {
    %c0_i32 = arith.constant 0 : i32
    %c0_i32_0 = arith.constant 0 : i32
    return %c0_i32, %arg1 : i32, i32
  }
  func.func @transform_4(%arg0: i32, %arg1: i32, %arg2: i32) -> (i32, i32) {
    %c0_i32 = arith.constant 0 : i32
    return %arg0, %arg1 : i32, i32
  }
}

module attributes {stable_mosaic.version = 11 : i64} {
  func.func @_fused_matmul_kernel(%arg0: i32, %arg1: i32, %arg2: i32, %arg3: memref<32x128xbf16, #tpu.memory_space<vmem>>, %arg4: memref<128x128xbf16, #tpu.memory_space<vmem>>, %arg5: memref<1x128xf32, #tpu.memory_space<vmem>>, %arg6: memref<1x128xf32, #tpu.memory_space<vmem>>, %arg7: memref<32x128xf32, #tpu.memory_space<vmem>>, %arg8: memref<32x128xf32, #tpu.memory_space<vmem>>) attributes {dimension_semantics = [#tpu.dimension_semantics<parallel>, #tpu.dimension_semantics<parallel>, #tpu.dimension_semantics<arbitrary>], iteration_bounds = array<i64: 1, 1, 1>, scalar_prefetch = 0 : i64, scratch_operands = 1 : i64, tpu.core_type = #tpu.core_type<tc>, window_params = [{transform_indices = @transform_0, window_bounds = array<i64: 32, 128>}, {transform_indices = @transform_1, window_bounds = array<i64: 128, 128>}, {transform_indices = @transform_2, window_bounds = array<i64: 1, 128>}, {transform_indices = @transform_3, window_bounds = array<i64: 1, 128>}, {transform_indices = @transform_4, window_bounds = array<i64: 32, 128>}]} {
    %c0_i32 = arith.constant 0 : i32
    %0 = arith.cmpi eq, %arg2, %c0_i32 : i32
    %1 = arith.extui %0 : i1 to i32
    %c0_i32_0 = arith.constant 0 : i32
    %2 = arith.cmpi ne, %1, %c0_i32_0 : i32
    scf.if %2 {
      %cst_10 = arith.constant 0.000000e+00 : f32
      %12 = vector.broadcast %cst_10 : f32 to vector<32x128xf32>
      %c0_11 = arith.constant 0 : index
      %c0_12 = arith.constant 0 : index
      %13 = vector.load %arg8[%c0_11, %c0_12] : memref<32x128xf32, #tpu.memory_space<vmem>>, vector<32x128xf32>
      tpu.vector_store %arg8[%c0_11, %c0_12], %12 {strides = array<i32>} : memref<32x128xf32, #tpu.memory_space<vmem>>, vector<32x128xf32>,
    } else {
    }
    %c0 = arith.constant 0 : index
    %c0_1 = arith.constant 0 : index
    %3 = vector.load %arg8[%c0, %c0_1] : memref<32x128xf32, #tpu.memory_space<vmem>>, vector<32x128xf32>
    %c0_2 = arith.constant 0 : index
    %c0_3 = arith.constant 0 : index
    %4 = vector.load %arg3[%c0_2, %c0_3] : memref<32x128xbf16, #tpu.memory_space<vmem>>, vector<32x128xbf16>
    %c0_4 = arith.constant 0 : index
    %c0_5 = arith.constant 0 : index
    %5 = vector.load %arg4[%c0_4, %c0_5] : memref<128x128xbf16, #tpu.memory_space<vmem>>, vector<128x128xbf16>
    %cst = arith.constant dense<0.000000e+00> : vector<32x128xf32>
    %6 = tpu.matmul %4, %5, %cst {dimension_numbers = #tpu.dot_dimension_numbers<[1], [0], [0], [1], [0, 0, 1, 1], [], []>} : vector<32x128xbf16>, vector<128x128xbf16>, vector<32x128xf32> -> vector<32x128xf32>
    %7 = arith.addf %3, %6 : vector<32x128xf32>
    %c0_6 = arith.constant 0 : index
    %c0_7 = arith.constant 0 : index
    %8 = vector.load %arg8[%c0_6, %c0_7] : memref<32x128xf32, #tpu.memory_space<vmem>>, vector<32x128xf32>
    tpu.vector_store %arg8[%c0_6, %c0_7], %7 {strides = array<i32>} : memref<32x128xf32, #tpu.memory_space<vmem>>, vector<32x128xf32>,
    %c0_i32_8 = arith.constant 0 : i32
    %9 = arith.cmpi eq, %arg2, %c0_i32_8 : i32
    %10 = arith.extui %9 : i1 to i32
    %c0_i32_9 = arith.constant 0 : i32
    %11 = arith.cmpi ne, %10, %c0_i32_9 : i32
    scf.if %11 {
      %c0_10 = arith.constant 0 : index
      %c0_11 = arith.constant 0 : index
      %12 = vector.load %arg8[%c0_10, %c0_11] : memref<32x128xf32, #tpu.memory_space<vmem>>, vector<32x128xf32>
      %c0_12 = arith.constant 0 : index
      %c0_13 = arith.constant 0 : index
      %13 = vector.load %arg5[%c0_12, %c0_13] : memref<1x128xf32, #tpu.memory_space<vmem>>, vector<1x128xf32>
      %14 = vector.broadcast %13 : vector<1x128xf32> to vector<32x128xf32>
      %15 = arith.mulf %12, %14 : vector<32x128xf32>
      %c0_14 = arith.constant 0 : index
      %c0_15 = arith.constant 0 : index
      %16 = vector.load %arg6[%c0_14, %c0_15] : memref<1x128xf32, #tpu.memory_space<vmem>>, vector<1x128xf32>
      %17 = vector.broadcast %16 : vector<1x128xf32> to vector<32x128xf32>
      %18 = arith.addf %15, %17 : vector<32x128xf32>
      %c0_16 = arith.constant 0 : index
      %c0_17 = arith.constant 0 : index
      %19 = vector.load %arg7[%c0_16, %c0_17] : memref<32x128xf32, #tpu.memory_space<vmem>>, vector<32x128xf32>
      tpu.vector_store %arg7[%c0_16, %c0_17], %18 {strides = array<i32>} : memref<32x128xf32, #tpu.memory_space<vmem>>, vector<32x128xf32>,
    } else {
    }
    return
  }
  func.func @transform_0(%arg0: i32, %arg1: i32, %arg2: i32) -> (i32, i32) {
    %c0_i32 = arith.constant 0 : i32
    return %arg0, %arg2 : i32, i32
  }
  func.func @transform_1(%arg0: i32, %arg1: i32, %arg2: i32) -> (i32, i32) {
    %c0_i32 = arith.constant 0 : i32
    return %arg2, %arg1 : i32, i32
  }
  func.func @transform_2(%arg0: i32, %arg1: i32, %arg2: i32) -> (i32, i32) {
    %c0_i32 = arith.constant 0 : i32
    %c0_i32_0 = arith.constant 0 : i32
    return %c0_i32, %arg1 : i32, i32
  }
  func.func @transform_3(%arg0: i32, %arg1: i32, %arg2: i32) -> (i32, i32) {
    %c0_i32 = arith.constant 0 : i32
    %c0_i32_0 = arith.constant 0 : i32
    return %c0_i32, %arg1 : i32, i32
  }
  func.func @transform_4(%arg0: i32, %arg1: i32, %arg2: i32) -> (i32, i32) {
    %c0_i32 = arith.constant 0 : i32
    return %arg0, %arg1 : i32, i32
  }
}

module attributes {stable_mosaic.version = 11 : i64} {
  func.func @_fused_matmul_kernel(%arg0: i32, %arg1: i32, %arg2: i32, %arg3: memref<32x128xbf16, #tpu.memory_space<vmem>>, %arg4: memref<128x128xbf16, #tpu.memory_space<vmem>>, %arg5: memref<1x128xf32, #tpu.memory_space<vmem>>, %arg6: memref<1x128xf32, #tpu.memory_space<vmem>>, %arg7: memref<32x128xf32, #tpu.memory_space<vmem>>, %arg8: memref<32x128xf32, #tpu.memory_space<vmem>>, %arg9: memref<32x128xf32, #tpu.memory_space<vmem>>) attributes {dimension_semantics = [#tpu.dimension_semantics<parallel>, #tpu.dimension_semantics<parallel>, #tpu.dimension_semantics<arbitrary>], iteration_bounds = array<i64: 1, 1, 5>, scalar_prefetch = 0 : i64, scratch_operands = 1 : i64, tpu.core_type = #tpu.core_type<tc>, window_params = [{transform_indices = @transform_0, window_bounds = array<i64: 32, 128>}, {transform_indices = @transform_1, window_bounds = array<i64: 128, 128>}, {transform_indices = @transform_2, window_bounds = array<i64: 1, 128>}, {transform_indices = @transform_3, window_bounds = array<i64: 1, 128>}, {transform_indices = @transform_4, window_bounds = array<i64: 32, 128>}, {transform_indices = @transform_5, window_bounds = array<i64: 32, 128>}]} {
    %c0_i32 = arith.constant 0 : i32
    %0 = arith.cmpi eq, %arg2, %c0_i32 : i32
    %1 = arith.extui %0 : i1 to i32
    %c0_i32_0 = arith.constant 0 : i32
    %2 = arith.cmpi ne, %1, %c0_i32_0 : i32
    scf.if %2 {
      %cst_9 = arith.constant 0.000000e+00 : f32
      %12 = vector.broadcast %cst_9 : f32 to vector<32x128xf32>
      %c0_10 = arith.constant 0 : index
      %c0_11 = arith.constant 0 : index
      %13 = vector.load %arg9[%c0_10, %c0_11] : memref<32x128xf32, #tpu.memory_space<vmem>>, vector<32x128xf32>
      tpu.vector_store %arg9[%c0_10, %c0_11], %12 {strides = array<i32>} : memref<32x128xf32, #tpu.memory_space<vmem>>, vector<32x128xf32>,
    } else {
    }
    %c0 = arith.constant 0 : index
    %c0_1 = arith.constant 0 : index
    %3 = vector.load %arg9[%c0, %c0_1] : memref<32x128xf32, #tpu.memory_space<vmem>>, vector<32x128xf32>
    %c0_2 = arith.constant 0 : index
    %c0_3 = arith.constant 0 : index
    %4 = vector.load %arg3[%c0_2, %c0_3] : memref<32x128xbf16, #tpu.memory_space<vmem>>, vector<32x128xbf16>
    %c0_4 = arith.constant 0 : index
    %c0_5 = arith.constant 0 : index
    %5 = vector.load %arg4[%c0_4, %c0_5] : memref<128x128xbf16, #tpu.memory_space<vmem>>, vector<128x128xbf16>
    %cst = arith.constant dense<0.000000e+00> : vector<32x128xf32>
    %6 = tpu.matmul %4, %5, %cst {dimension_numbers = #tpu.dot_dimension_numbers<[1], [0], [0], [1], [0, 0, 1, 1], [], []>} : vector<32x128xbf16>, vector<128x128xbf16>, vector<32x128xf32> -> vector<32x128xf32>
    %7 = arith.addf %3, %6 : vector<32x128xf32>
    %c0_6 = arith.constant 0 : index
    %c0_7 = arith.constant 0 : index
    %8 = vector.load %arg9[%c0_6, %c0_7] : memref<32x128xf32, #tpu.memory_space<vmem>>, vector<32x128xf32>
    tpu.vector_store %arg9[%c0_6, %c0_7], %7 {strides = array<i32>} : memref<32x128xf32, #tpu.memory_space<vmem>>, vector<32x128xf32>,
    %c4_i32 = arith.constant 4 : i32
    %9 = arith.cmpi eq, %arg2, %c4_i32 : i32
    %10 = arith.extui %9 : i1 to i32
    %c0_i32_8 = arith.constant 0 : i32
    %11 = arith.cmpi ne, %10, %c0_i32_8 : i32
    scf.if %11 {
      %c0_9 = arith.constant 0 : index
      %c0_10 = arith.constant 0 : index
      %12 = vector.load %arg9[%c0_9, %c0_10] : memref<32x128xf32, #tpu.memory_space<vmem>>, vector<32x128xf32>
      %c0_11 = arith.constant 0 : index
      %c0_12 = arith.constant 0 : index
      %13 = vector.load %arg5[%c0_11, %c0_12] : memref<1x128xf32, #tpu.memory_space<vmem>>, vector<1x128xf32>
      %14 = vector.broadcast %13 : vector<1x128xf32> to vector<32x128xf32>
      %15 = arith.mulf %12, %14 : vector<32x128xf32>
      %c0_13 = arith.constant 0 : index
      %c0_14 = arith.constant 0 : index
      %16 = vector.load %arg6[%c0_13, %c0_14] : memref<1x128xf32, #tpu.memory_space<vmem>>, vector<1x128xf32>
      %17 = vector.broadcast %16 : vector<1x128xf32> to vector<32x128xf32>
      %18 = arith.addf %15, %17 : vector<32x128xf32>
      %c0_15 = arith.constant 0 : index
      %c0_16 = arith.constant 0 : index
      %19 = vector.load %arg7[%c0_15, %c0_16] : memref<32x128xf32, #tpu.memory_space<vmem>>, vector<32x128xf32>
      %20 = arith.addf %18, %19 : vector<32x128xf32>
      %cst_17 = arith.constant 0.000000e+00 : f32
      %21 = vector.broadcast %cst_17 : f32 to vector<32x128xf32>
      %22 = arith.maximumf %20, %21 : vector<32x128xf32>
      %c0_18 = arith.constant 0 : index
      %c0_19 = arith.constant 0 : index
      %23 = vector.load %arg8[%c0_18, %c0_19] : memref<32x128xf32, #tpu.memory_space<vmem>>, vector<32x128xf32>
      tpu.vector_store %arg8[%c0_18, %c0_19], %22 {strides = array<i32>} : memref<32x128xf32, #tpu.memory_space<vmem>>, vector<32x128xf32>,
    } else {
    }
    return
  }
  func.func @transform_0(%arg0: i32, %arg1: i32, %arg2: i32) -> (i32, i32) {
    %c0_i32 = arith.constant 0 : i32
    return %arg0, %arg2 : i32, i32
  }
  func.func @transform_1(%arg0: i32, %arg1: i32, %arg2: i32) -> (i32, i32) {
    %c0_i32 = arith.constant 0 : i32
    return %arg2, %arg1 : i32, i32
  }
  func.func @transform_2(%arg0: i32, %arg1: i32, %arg2: i32) -> (i32, i32) {
    %c0_i32 = arith.constant 0 : i32
    %c0_i32_0 = arith.constant 0 : i32
    return %c0_i32, %arg1 : i32, i32
  }
  func.func @transform_3(%arg0: i32, %arg1: i32, %arg2: i32) -> (i32, i32) {
    %c0_i32 = arith.constant 0 : i32
    %c0_i32_0 = arith.constant 0 : i32
    return %c0_i32, %arg1 : i32, i32
  }
  func.func @transform_4(%arg0: i32, %arg1: i32, %arg2: i32) -> (i32, i32) {
    %c0_i32 = arith.constant 0 : i32
    return %arg0, %arg1 : i32, i32
  }
  func.func @transform_5(%arg0: i32, %arg1: i32, %arg2: i32) -> (i32, i32) {
    %c0_i32 = arith.constant 0 : i32
    return %arg0, %arg1 : i32, i32
  }
}

module attributes {stable_mosaic.version = 11 : i64} {
  func.func @_fused_matmul_kernel(%arg0: i32, %arg1: i32, %arg2: i32, %arg3: memref<16x128xbf16, #tpu.memory_space<vmem>>, %arg4: memref<128x128xbf16, #tpu.memory_space<vmem>>, %arg5: memref<1x128xf32, #tpu.memory_space<vmem>>, %arg6: memref<1x128xf32, #tpu.memory_space<vmem>>, %arg7: memref<16x128xf32, #tpu.memory_space<vmem>>, %arg8: memref<16x128xf32, #tpu.memory_space<vmem>>) attributes {dimension_semantics = [#tpu.dimension_semantics<parallel>, #tpu.dimension_semantics<parallel>, #tpu.dimension_semantics<arbitrary>], iteration_bounds = array<i64: 1, 1, 5>, scalar_prefetch = 0 : i64, scratch_operands = 1 : i64, tpu.core_type = #tpu.core_type<tc>, window_params = [{transform_indices = @transform_0, window_bounds = array<i64: 16, 128>}, {transform_indices = @transform_1, window_bounds = array<i64: 128, 128>}, {transform_indices = @transform_2, window_bounds = array<i64: 1, 128>}, {transform_indices = @transform_3, window_bounds = array<i64: 1, 128>}, {transform_indices = @transform_4, window_bounds = array<i64: 16, 128>}]} {
    %c0_i32 = arith.constant 0 : i32
    %0 = arith.cmpi eq, %arg2, %c0_i32 : i32
    %1 = arith.extui %0 : i1 to i32
    %c0_i32_0 = arith.constant 0 : i32
    %2 = arith.cmpi ne, %1, %c0_i32_0 : i32
    scf.if %2 {
      %cst_9 = arith.constant 0.000000e+00 : f32
      %12 = vector.broadcast %cst_9 : f32 to vector<16x128xf32>
      %c0_10 = arith.constant 0 : index
      %c0_11 = arith.constant 0 : index
      %13 = vector.load %arg8[%c0_10, %c0_11] : memref<16x128xf32, #tpu.memory_space<vmem>>, vector<16x128xf32>
      tpu.vector_store %arg8[%c0_10, %c0_11], %12 {strides = array<i32>} : memref<16x128xf32, #tpu.memory_space<vmem>>, vector<16x128xf32>,
    } else {
    }
    %c0 = arith.constant 0 : index
    %c0_1 = arith.constant 0 : index
    %3 = vector.load %arg8[%c0, %c0_1] : memref<16x128xf32, #tpu.memory_space<vmem>>, vector<16x128xf32>
    %c0_2 = arith.constant 0 : index
    %c0_3 = arith.constant 0 : index
    %4 = vector.load %arg3[%c0_2, %c0_3] : memref<16x128xbf16, #tpu.memory_space<vmem>>, vector<16x128xbf16>
    %c0_4 = arith.constant 0 : index
    %c0_5 = arith.constant 0 : index
    %5 = vector.load %arg4[%c0_4, %c0_5] : memref<128x128xbf16, #tpu.memory_space<vmem>>, vector<128x128xbf16>
    %cst = arith.constant dense<0.000000e+00> : vector<16x128xf32>
    %6 = tpu.matmul %4, %5, %cst {dimension_numbers = #tpu.dot_dimension_numbers<[1], [0], [0], [1], [0, 0, 1, 1], [], []>} : vector<16x128xbf16>, vector<128x128xbf16>, vector<16x128xf32> -> vector<16x128xf32>
    %7 = arith.addf %3, %6 : vector<16x128xf32>
    %c0_6 = arith.constant 0 : index
    %c0_7 = arith.constant 0 : index
    %8 = vector.load %arg8[%c0_6, %c0_7] : memref<16x128xf32, #tpu.memory_space<vmem>>, vector<16x128xf32>
    tpu.vector_store %arg8[%c0_6, %c0_7], %7 {strides = array<i32>} : memref<16x128xf32, #tpu.memory_space<vmem>>, vector<16x128xf32>,
    %c4_i32 = arith.constant 4 : i32
    %9 = arith.cmpi eq, %arg2, %c4_i32 : i32
    %10 = arith.extui %9 : i1 to i32
    %c0_i32_8 = arith.constant 0 : i32
    %11 = arith.cmpi ne, %10, %c0_i32_8 : i32
    scf.if %11 {
      %c0_9 = arith.constant 0 : index
      %c0_10 = arith.constant 0 : index
      %12 = vector.load %arg8[%c0_9, %c0_10] : memref<16x128xf32, #tpu.memory_space<vmem>>, vector<16x128xf32>
      %c0_11 = arith.constant 0 : index
      %c0_12 = arith.constant 0 : index
      %13 = vector.load %arg5[%c0_11, %c0_12] : memref<1x128xf32, #tpu.memory_space<vmem>>, vector<1x128xf32>
      %14 = vector.broadcast %13 : vector<1x128xf32> to vector<16x128xf32>
      %15 = arith.mulf %12, %14 : vector<16x128xf32>
      %c0_13 = arith.constant 0 : index
      %c0_14 = arith.constant 0 : index
      %16 = vector.load %arg6[%c0_13, %c0_14] : memref<1x128xf32, #tpu.memory_space<vmem>>, vector<1x128xf32>
      %17 = vector.broadcast %16 : vector<1x128xf32> to vector<16x128xf32>
      %18 = arith.addf %15, %17 : vector<16x128xf32>
      %cst_15 = arith.constant 0.000000e+00 : f32
      %19 = vector.broadcast %cst_15 : f32 to vector<16x128xf32>
      %20 = arith.maximumf %18, %19 : vector<16x128xf32>
      %c0_16 = arith.constant 0 : index
      %c0_17 = arith.constant 0 : index
      %21 = vector.load %arg7[%c0_16, %c0_17] : memref<16x128xf32, #tpu.memory_space<vmem>>, vector<16x128xf32>
      tpu.vector_store %arg7[%c0_16, %c0_17], %20 {strides = array<i32>} : memref<16x128xf32, #tpu.memory_space<vmem>>, vector<16x128xf32>,
    } else {
    }
    return
  }
  func.func @transform_0(%arg0: i32, %arg1: i32, %arg2: i32) -> (i32, i32) {
    %c0_i32 = arith.constant 0 : i32
    return %arg0, %arg2 : i32, i32
  }
  func.func @transform_1(%arg0: i32, %arg1: i32, %arg2: i32) -> (i32, i32) {
    %c0_i32 = arith.constant 0 : i32
    return %arg2, %arg1 : i32, i32
  }
  func.func @transform_2(%arg0: i32, %arg1: i32, %arg2: i32) -> (i32, i32) {
    %c0_i32 = arith.constant 0 : i32
    %c0_i32_0 = arith.constant 0 : i32
    return %c0_i32, %arg1 : i32, i32
  }
  func.func @transform_3(%arg0: i32, %arg1: i32, %arg2: i32) -> (i32, i32) {
    %c0_i32 = arith.constant 0 : i32
    %c0_i32_0 = arith.constant 0 : i32
    return %c0_i32, %arg1 : i32, i32
  }
  func.func @transform_4(%arg0: i32, %arg1: i32, %arg2: i32) -> (i32, i32) {
    %c0_i32 = arith.constant 0 : i32
    return %arg0, %arg1 : i32, i32
  }
}

module attributes {stable_mosaic.version = 11 : i64} {
  func.func @_fused_matmul_kernel(%arg0: i32, %arg1: i32, %arg2: i32, %arg3: memref<16x128xbf16, #tpu.memory_space<vmem>>, %arg4: memref<128x128xbf16, #tpu.memory_space<vmem>>, %arg5: memref<1x128xf32, #tpu.memory_space<vmem>>, %arg6: memref<1x128xf32, #tpu.memory_space<vmem>>, %arg7: memref<16x128xf32, #tpu.memory_space<vmem>>, %arg8: memref<16x128xf32, #tpu.memory_space<vmem>>) attributes {dimension_semantics = [#tpu.dimension_semantics<parallel>, #tpu.dimension_semantics<parallel>, #tpu.dimension_semantics<arbitrary>], iteration_bounds = array<i64: 1, 1, 1>, scalar_prefetch = 0 : i64, scratch_operands = 1 : i64, tpu.core_type = #tpu.core_type<tc>, window_params = [{transform_indices = @transform_0, window_bounds = array<i64: 16, 128>}, {transform_indices = @transform_1, window_bounds = array<i64: 128, 128>}, {transform_indices = @transform_2, window_bounds = array<i64: 1, 128>}, {transform_indices = @transform_3, window_bounds = array<i64: 1, 128>}, {transform_indices = @transform_4, window_bounds = array<i64: 16, 128>}]} {
    %c0_i32 = arith.constant 0 : i32
    %0 = arith.cmpi eq, %arg2, %c0_i32 : i32
    %1 = arith.extui %0 : i1 to i32
    %c0_i32_0 = arith.constant 0 : i32
    %2 = arith.cmpi ne, %1, %c0_i32_0 : i32
    scf.if %2 {
      %cst_10 = arith.constant 0.000000e+00 : f32
      %12 = vector.broadcast %cst_10 : f32 to vector<16x128xf32>
      %c0_11 = arith.constant 0 : index
      %c0_12 = arith.constant 0 : index
      %13 = vector.load %arg8[%c0_11, %c0_12] : memref<16x128xf32, #tpu.memory_space<vmem>>, vector<16x128xf32>
      tpu.vector_store %arg8[%c0_11, %c0_12], %12 {strides = array<i32>} : memref<16x128xf32, #tpu.memory_space<vmem>>, vector<16x128xf32>,
    } else {
    }
    %c0 = arith.constant 0 : index
    %c0_1 = arith.constant 0 : index
    %3 = vector.load %arg8[%c0, %c0_1] : memref<16x128xf32, #tpu.memory_space<vmem>>, vector<16x128xf32>
    %c0_2 = arith.constant 0 : index
    %c0_3 = arith.constant 0 : index
    %4 = vector.load %arg3[%c0_2, %c0_3] : memref<16x128xbf16, #tpu.memory_space<vmem>>, vector<16x128xbf16>
    %c0_4 = arith.constant 0 : index
    %c0_5 = arith.constant 0 : index
    %5 = vector.load %arg4[%c0_4, %c0_5] : memref<128x128xbf16, #tpu.memory_space<vmem>>, vector<128x128xbf16>
    %cst = arith.constant dense<0.000000e+00> : vector<16x128xf32>
    %6 = tpu.matmul %4, %5, %cst {dimension_numbers = #tpu.dot_dimension_numbers<[1], [0], [0], [1], [0, 0, 1, 1], [], []>} : vector<16x128xbf16>, vector<128x128xbf16>, vector<16x128xf32> -> vector<16x128xf32>
    %7 = arith.addf %3, %6 : vector<16x128xf32>
    %c0_6 = arith.constant 0 : index
    %c0_7 = arith.constant 0 : index
    %8 = vector.load %arg8[%c0_6, %c0_7] : memref<16x128xf32, #tpu.memory_space<vmem>>, vector<16x128xf32>
    tpu.vector_store %arg8[%c0_6, %c0_7], %7 {strides = array<i32>} : memref<16x128xf32, #tpu.memory_space<vmem>>, vector<16x128xf32>,
    %c0_i32_8 = arith.constant 0 : i32
    %9 = arith.cmpi eq, %arg2, %c0_i32_8 : i32
    %10 = arith.extui %9 : i1 to i32
    %c0_i32_9 = arith.constant 0 : i32
    %11 = arith.cmpi ne, %10, %c0_i32_9 : i32
    scf.if %11 {
      %c0_10 = arith.constant 0 : index
      %c0_11 = arith.constant 0 : index
      %12 = vector.load %arg8[%c0_10, %c0_11] : memref<16x128xf32, #tpu.memory_space<vmem>>, vector<16x128xf32>
      %c0_12 = arith.constant 0 : index
      %c0_13 = arith.constant 0 : index
      %13 = vector.load %arg5[%c0_12, %c0_13] : memref<1x128xf32, #tpu.memory_space<vmem>>, vector<1x128xf32>
      %14 = vector.broadcast %13 : vector<1x128xf32> to vector<16x128xf32>
      %15 = arith.mulf %12, %14 : vector<16x128xf32>
      %c0_14 = arith.constant 0 : index
      %c0_15 = arith.constant 0 : index
      %16 = vector.load %arg6[%c0_14, %c0_15] : memref<1x128xf32, #tpu.memory_space<vmem>>, vector<1x128xf32>
      %17 = vector.broadcast %16 : vector<1x128xf32> to vector<16x128xf32>
      %18 = arith.addf %15, %17 : vector<16x128xf32>
      %c0_16 = arith.constant 0 : index
      %c0_17 = arith.constant 0 : index
      %19 = vector.load %arg7[%c0_16, %c0_17] : memref<16x128xf32, #tpu.memory_space<vmem>>, vector<16x128xf32>
      tpu.vector_store %arg7[%c0_16, %c0_17], %18 {strides = array<i32>} : memref<16x128xf32, #tpu.memory_space<vmem>>, vector<16x128xf32>,
    } else {
    }
    return
  }
  func.func @transform_0(%arg0: i32, %arg1: i32, %arg2: i32) -> (i32, i32) {
    %c0_i32 = arith.constant 0 : i32
    return %arg0, %arg2 : i32, i32
  }
  func.func @transform_1(%arg0: i32, %arg1: i32, %arg2: i32) -> (i32, i32) {
    %c0_i32 = arith.constant 0 : i32
    return %arg2, %arg1 : i32, i32
  }
  func.func @transform_2(%arg0: i32, %arg1: i32, %arg2: i32) -> (i32, i32) {
    %c0_i32 = arith.constant 0 : i32
    %c0_i32_0 = arith.constant 0 : i32
    return %c0_i32, %arg1 : i32, i32
  }
  func.func @transform_3(%arg0: i32, %arg1: i32, %arg2: i32) -> (i32, i32) {
    %c0_i32 = arith.constant 0 : i32
    %c0_i32_0 = arith.constant 0 : i32
    return %c0_i32, %arg1 : i32, i32
  }
  func.func @transform_4(%arg0: i32, %arg1: i32, %arg2: i32) -> (i32, i32) {
    %c0_i32 = arith.constant 0 : i32
    return %arg0, %arg1 : i32, i32
  }
}

module attributes {stable_mosaic.version = 11 : i64} {
  func.func @_fused_matmul_kernel(%arg0: i32, %arg1: i32, %arg2: i32, %arg3: memref<16x128xbf16, #tpu.memory_space<vmem>>, %arg4: memref<128x128xbf16, #tpu.memory_space<vmem>>, %arg5: memref<1x128xf32, #tpu.memory_space<vmem>>, %arg6: memref<1x128xf32, #tpu.memory_space<vmem>>, %arg7: memref<16x128xf32, #tpu.memory_space<vmem>>, %arg8: memref<16x128xf32, #tpu.memory_space<vmem>>, %arg9: memref<16x128xf32, #tpu.memory_space<vmem>>) attributes {dimension_semantics = [#tpu.dimension_semantics<parallel>, #tpu.dimension_semantics<parallel>, #tpu.dimension_semantics<arbitrary>], iteration_bounds = array<i64: 1, 1, 9>, scalar_prefetch = 0 : i64, scratch_operands = 1 : i64, tpu.core_type = #tpu.core_type<tc>, window_params = [{transform_indices = @transform_0, window_bounds = array<i64: 16, 128>}, {transform_indices = @transform_1, window_bounds = array<i64: 128, 128>}, {transform_indices = @transform_2, window_bounds = array<i64: 1, 128>}, {transform_indices = @transform_3, window_bounds = array<i64: 1, 128>}, {transform_indices = @transform_4, window_bounds = array<i64: 16, 128>}, {transform_indices = @transform_5, window_bounds = array<i64: 16, 128>}]} {
    %c0_i32 = arith.constant 0 : i32
    %0 = arith.cmpi eq, %arg2, %c0_i32 : i32
    %1 = arith.extui %0 : i1 to i32
    %c0_i32_0 = arith.constant 0 : i32
    %2 = arith.cmpi ne, %1, %c0_i32_0 : i32
    scf.if %2 {
      %cst_9 = arith.constant 0.000000e+00 : f32
      %12 = vector.broadcast %cst_9 : f32 to vector<16x128xf32>
      %c0_10 = arith.constant 0 : index
      %c0_11 = arith.constant 0 : index
      %13 = vector.load %arg9[%c0_10, %c0_11] : memref<16x128xf32, #tpu.memory_space<vmem>>, vector<16x128xf32>
      tpu.vector_store %arg9[%c0_10, %c0_11], %12 {strides = array<i32>} : memref<16x128xf32, #tpu.memory_space<vmem>>, vector<16x128xf32>,
    } else {
    }
    %c0 = arith.constant 0 : index
    %c0_1 = arith.constant 0 : index
    %3 = vector.load %arg9[%c0, %c0_1] : memref<16x128xf32, #tpu.memory_space<vmem>>, vector<16x128xf32>
    %c0_2 = arith.constant 0 : index
    %c0_3 = arith.constant 0 : index
    %4 = vector.load %arg3[%c0_2, %c0_3] : memref<16x128xbf16, #tpu.memory_space<vmem>>, vector<16x128xbf16>
    %c0_4 = arith.constant 0 : index
    %c0_5 = arith.constant 0 : index
    %5 = vector.load %arg4[%c0_4, %c0_5] : memref<128x128xbf16, #tpu.memory_space<vmem>>, vector<128x128xbf16>
    %cst = arith.constant dense<0.000000e+00> : vector<16x128xf32>
    %6 = tpu.matmul %4, %5, %cst {dimension_numbers = #tpu.dot_dimension_numbers<[1], [0], [0], [1], [0, 0, 1, 1], [], []>} : vector<16x128xbf16>, vector<128x128xbf16>, vector<16x128xf32> -> vector<16x128xf32>
    %7 = arith.addf %3, %6 : vector<16x128xf32>
    %c0_6 = arith.constant 0 : index
    %c0_7 = arith.constant 0 : index
    %8 = vector.load %arg9[%c0_6, %c0_7] : memref<16x128xf32, #tpu.memory_space<vmem>>, vector<16x128xf32>
    tpu.vector_store %arg9[%c0_6, %c0_7], %7 {strides = array<i32>} : memref<16x128xf32, #tpu.memory_space<vmem>>, vector<16x128xf32>,
    %c8_i32 = arith.constant 8 : i32
    %9 = arith.cmpi eq, %arg2, %c8_i32 : i32
    %10 = arith.extui %9 : i1 to i32
    %c0_i32_8 = arith.constant 0 : i32
    %11 = arith.cmpi ne, %10, %c0_i32_8 : i32
    scf.if %11 {
      %c0_9 = arith.constant 0 : index
      %c0_10 = arith.constant 0 : index
      %12 = vector.load %arg9[%c0_9, %c0_10] : memref<16x128xf32, #tpu.memory_space<vmem>>, vector<16x128xf32>
      %c0_11 = arith.constant 0 : index
      %c0_12 = arith.constant 0 : index
      %13 = vector.load %arg5[%c0_11, %c0_12] : memref<1x128xf32, #tpu.memory_space<vmem>>, vector<1x128xf32>
      %14 = vector.broadcast %13 : vector<1x128xf32> to vector<16x128xf32>
      %15 = arith.mulf %12, %14 : vector<16x128xf32>
      %c0_13 = arith.constant 0 : index
      %c0_14 = arith.constant 0 : index
      %16 = vector.load %arg6[%c0_13, %c0_14] : memref<1x128xf32, #tpu.memory_space<vmem>>, vector<1x128xf32>
      %17 = vector.broadcast %16 : vector<1x128xf32> to vector<16x128xf32>
      %18 = arith.addf %15, %17 : vector<16x128xf32>
      %c0_15 = arith.constant 0 : index
      %c0_16 = arith.constant 0 : index
      %19 = vector.load %arg7[%c0_15, %c0_16] : memref<16x128xf32, #tpu.memory_space<vmem>>, vector<16x128xf32>
      %20 = arith.addf %18, %19 : vector<16x128xf32>
      %cst_17 = arith.constant 0.000000e+00 : f32
      %21 = vector.broadcast %cst_17 : f32 to vector<16x128xf32>
      %22 = arith.maximumf %20, %21 : vector<16x128xf32>
      %c0_18 = arith.constant 0 : index
      %c0_19 = arith.constant 0 : index
      %23 = vector.load %arg8[%c0_18, %c0_19] : memref<16x128xf32, #tpu.memory_space<vmem>>, vector<16x128xf32>
      tpu.vector_store %arg8[%c0_18, %c0_19], %22 {strides = array<i32>} : memref<16x128xf32, #tpu.memory_space<vmem>>, vector<16x128xf32>,
    } else {
    }
    return
  }
  func.func @transform_0(%arg0: i32, %arg1: i32, %arg2: i32) -> (i32, i32) {
    %c0_i32 = arith.constant 0 : i32
    return %arg0, %arg2 : i32, i32
  }
  func.func @transform_1(%arg0: i32, %arg1: i32, %arg2: i32) -> (i32, i32) {
    %c0_i32 = arith.constant 0 : i32
    return %arg2, %arg1 : i32, i32
  }
  func.func @transform_2(%arg0: i32, %arg1: i32, %arg2: i32) -> (i32, i32) {
    %c0_i32 = arith.constant 0 : i32
    %c0_i32_0 = arith.constant 0 : i32
    return %c0_i32, %arg1 : i32, i32
  }
  func.func @transform_3(%arg0: i32, %arg1: i32, %arg2: i32) -> (i32, i32) {
    %c0_i32 = arith.constant 0 : i32
    %c0_i32_0 = arith.constant 0 : i32
    return %c0_i32, %arg1 : i32, i32
  }
  func.func @transform_4(%arg0: i32, %arg1: i32, %arg2: i32) -> (i32, i32) {
    %c0_i32 = arith.constant 0 : i32
    return %arg0, %arg1 : i32, i32
  }
  func.func @transform_5(%arg0: i32, %arg1: i32, %arg2: i32) -> (i32, i32) {
    %c0_i32 = arith.constant 0 : i32
    return %arg0, %arg1 : i32, i32
  }
}

module attributes {stable_mosaic.version = 11 : i64} {
  func.func @_mil_kernel(%arg0: i32, %arg1: memref<2x4x128xf32, #tpu.memory_space<vmem>>, %arg2: memref<128x32xf32, #tpu.memory_space<vmem>>, %arg3: memref<32x1xf32, #tpu.memory_space<vmem>>, %arg4: memref<128x3xf32, #tpu.memory_space<vmem>>, %arg5: memref<1x3xf32, #tpu.memory_space<vmem>>, %arg6: memref<1x3xf32, #tpu.memory_space<vmem>>) attributes {dimension_semantics = [#tpu.dimension_semantics<arbitrary>], iteration_bounds = array<i64: 1>, scalar_prefetch = 0 : i64, scratch_operands = 0 : i64, tpu.core_type = #tpu.core_type<tc>, window_params = [{pipeline_mode = #tpu.pipeline_mode<synchronous>, transform_indices = @transform_0, window_bounds = array<i64: 2, 4, 128>}, {pipeline_mode = #tpu.pipeline_mode<synchronous>, transform_indices = @transform_1, window_bounds = array<i64: 128, 32>}, {pipeline_mode = #tpu.pipeline_mode<synchronous>, transform_indices = @transform_2, window_bounds = array<i64: 32, 1>}, {pipeline_mode = #tpu.pipeline_mode<synchronous>, transform_indices = @transform_3, window_bounds = array<i64: 128, 3>}, {pipeline_mode = #tpu.pipeline_mode<synchronous>, transform_indices = @transform_4, window_bounds = array<i64: 1, 3>}, {pipeline_mode = #tpu.pipeline_mode<synchronous>, transform_indices = @transform_5, window_bounds = array<i64: 1, 3>}]} {
    %c0 = arith.constant 0 : index
    %c0_0 = arith.constant 0 : index
    %c0_1 = arith.constant 0 : index
    %0 = vector.load %arg1[%c0, %c0_0, %c0_1] : memref<2x4x128xf32, #tpu.memory_space<vmem>>, vector<2x4x128xf32>
    %cst = arith.constant dense<0.000000e+00> : vector<2x128xf32>
    %1 = vector.multi_reduction <add>, %0, %cst [1] : vector<2x4x128xf32> to vector<2x128xf32>
    %cst_2 = arith.constant 2.500000e-01 : f32
    %2 = vector.broadcast %cst_2 : f32 to vector<2x128xf32>
    %3 = arith.mulf %1, %2 : vector<2x128xf32>
    %c0_3 = arith.constant 0 : index
    %c0_4 = arith.constant 0 : index
    %4 = vector.load %arg2[%c0_3, %c0_4] : memref<128x32xf32, #tpu.memory_space<vmem>>, vector<128x32xf32>
    %cst_5 = arith.constant dense<0.000000e+00> : vector<2x32xf32>
    %5 = tpu.matmul %3, %4, %cst_5 {dimension_numbers = #tpu.dot_dimension_numbers<[1], [0], [0], [1], [0, 0, 1, 1], [], []>} : vector<2x128xf32>, vector<128x32xf32>, vector<2x32xf32> -> vector<2x32xf32>
    %6 = math.tanh %5 : vector<2x32xf32>
    %c0_6 = arith.constant 0 : index
    %c0_7 = arith.constant 0 : index
    %7 = vector.load %arg3[%c0_6, %c0_7] : memref<32x1xf32, #tpu.memory_space<vmem>>, vector<32x1xf32>
    %cst_8 = arith.constant dense<0.000000e+00> : vector<2x1xf32>
    %8 = tpu.matmul %6, %7, %cst_8 {dimension_numbers = #tpu.dot_dimension_numbers<[1], [0], [0], [1], [0, 0, 1, 1], [], []>} : vector<2x32xf32>, vector<32x1xf32>, vector<2x1xf32> -> vector<2x1xf32>
    %cst_9 = arith.constant dense<0xFF800000> : vector<1xf32>
    %9 = vector.multi_reduction <maximumf>, %8, %cst_9 [0] : vector<2x1xf32> to vector<1xf32>
    %10 = vector.shape_cast %9 : vector<1xf32> to vector<1x1xf32>
    %11 = vector.broadcast %10 : vector<1x1xf32> to vector<2x1xf32>
    %12 = arith.subf %8, %11 : vector<2x1xf32>
    %13 = math.exp %12 : vector<2x1xf32>
    %cst_10 = arith.constant dense<0.000000e+00> : vector<1xf32>
    %14 = vector.multi_reduction <add>, %13, %cst_10 [0] : vector<2x1xf32> to vector<1xf32>
    %15 = vector.shape_cast %14 : vector<1xf32> to vector<1x1xf32>
    %16 = tpu.reciprocal %15 {approx = true} : vector<1x1xf32> -> vector<1x1xf32>
    %17 = vector.broadcast %16 : vector<1x1xf32> to vector<2x1xf32>
    %18 = arith.mulf %13, %17 : vector<2x1xf32>
    %19 = vector.broadcast %18 : vector<2x1xf32> to vector<2x128xf32>
    %20 = arith.mulf %19, %3 : vector<2x128xf32>
    %cst_11 = arith.constant dense<0.000000e+00> : vector<128xf32>
    %21 = vector.multi_reduction <add>, %20, %cst_11 [0] : vector<2x128xf32> to vector<128xf32>
    %22 = vector.shape_cast %21 : vector<128xf32> to vector<1x128xf32>
    %c0_12 = arith.constant 0 : index
    %c0_13 = arith.constant 0 : index
    %23 = vector.load %arg4[%c0_12, %c0_13] : memref<128x3xf32, #tpu.memory_space<vmem>>, vector<128x3xf32>
    %cst_14 = arith.constant dense<0.000000e+00> : vector<1x3xf32>
    %24 = tpu.matmul %22, %23, %cst_14 {dimension_numbers = #tpu.dot_dimension_numbers<[1], [0], [0], [1], [0, 0, 1, 1], [], []>} : vector<1x128xf32>, vector<128x3xf32>, vector<1x3xf32> -> vector<1x3xf32>
    %c0_15 = arith.constant 0 : index
    %c0_16 = arith.constant 0 : index
    %25 = vector.load %arg5[%c0_15, %c0_16] : memref<1x3xf32, #tpu.memory_space<vmem>>, vector<1x3xf32>
    %26 = arith.addf %24, %25 : vector<1x3xf32>
    %c0_17 = arith.constant 0 : index
    %c0_18 = arith.constant 0 : index
    %27 = vector.load %arg6[%c0_17, %c0_18] : memref<1x3xf32, #tpu.memory_space<vmem>>, vector<1x3xf32>
    tpu.vector_store %arg6[%c0_17, %c0_18], %26 {strides = array<i32>} : memref<1x3xf32, #tpu.memory_space<vmem>>, vector<1x3xf32>,
    return
  }
  func.func @transform_0(%arg0: i32) -> (i32, i32, i32) {
    %c0_i32 = arith.constant 0 : i32
    %c0_i32_0 = arith.constant 0 : i32
    %c0_i32_1 = arith.constant 0 : i32
    %c0_i32_2 = arith.constant 0 : i32
    return %c0_i32, %c0_i32_0, %c0_i32_1 : i32, i32, i32
  }
  func.func @transform_1(%arg0: i32) -> (i32, i32) {
    %c0_i32 = arith.constant 0 : i32
    %c0_i32_0 = arith.constant 0 : i32
    %c0_i32_1 = arith.constant 0 : i32
    return %c0_i32, %c0_i32_0 : i32, i32
  }
  func.func @transform_2(%arg0: i32) -> (i32, i32) {
    %c0_i32 = arith.constant 0 : i32
    %c0_i32_0 = arith.constant 0 : i32
    %c0_i32_1 = arith.constant 0 : i32
    return %c0_i32, %c0_i32_0 : i32, i32
  }
  func.func @transform_3(%arg0: i32) -> (i32, i32) {
    %c0_i32 = arith.constant 0 : i32
    %c0_i32_0 = arith.constant 0 : i32
    %c0_i32_1 = arith.constant 0 : i32
    return %c0_i32, %c0_i32_0 : i32, i32
  }
  func.func @transform_4(%arg0: i32) -> (i32, i32) {
    %c0_i32 = arith.constant 0 : i32
    %c0_i32_0 = arith.constant 0 : i32
    %c0_i32_1 = arith.constant 0 : i32
    return %c0_i32, %c0_i32_0 : i32, i32
  }
  func.func @transform_5(%arg0: i32) -> (i32, i32) {
    %c0_i32 = arith.constant 0 : i32
    %c0_i32_0 = arith.constant 0 : i32
    %c0_i32_1 = arith.constant 0 : i32
    return %c0_i32, %c0_i32_0 : i32, i32
  }
}

</mosaic_0001>

<bundles_post_ra>
// kernel: full_mil_model_feats.14
= control target key start
LH: loop header
LB: loop body
LE: loop exit
PB: predicated region body
PF: predicated region fallthrough
CT: control target
= control target key end

     0   :  { %s1550_s15 = smov 0   ;;  %s1552_s16 = smov 0   ;;  %s1848_s0 = inlined_call_operand.vmem [shape: bf16[2048,256], index: 0, kind: input, shape index: {}]   ;;  %s1849_s1 = inlined_call_operand.vmem [shape: bf16[256,128], index: 1, kind: input, shape index: {}]   ;;  %s1850_s2 = inlined_call_operand.vmem [shape: f32[1,128], index: 2, kind: input, shape index: {}]   ;;  %s1851_s3 = inlined_call_operand.vmem [shape: f32[1,128], index: 3, kind: input, shape index: {}]   ;;  %s1852_s4 = inlined_call_operand.vmem [shape: f32[2048,128], index: 4, kind: output, shape index: {}]  }
   0x1   :  { %s1554_s17 = smov 0   ;;  %s1556_s18 = smov 0  }
   0x2   :  { %s1558_s19 = smov 0   ;;  %s1560_s20 = smov 0  }
   0x3   :  { %s1562_s21 = smov 0  }
   0x4 LB: > { %s26_s22 = sadd.s32 1, %s1514_s19  ;;  %s33_s23 = sadd.s32 1, %s1518_s20  ;;  %s1522_s21 = sphi %s1562_s21, %s14_s21   ;;  %s1518_s20 = sphi %s1560_s20, %s1858_s20   ;;  %s1514_s19 = sphi %s1558_s19, %s1857_s19   ;;  %s1510_s18 = sphi %s1556_s18, %s1856_s18   ;;  %s1506_s17 = sphi %s1554_s17, %s1855_s17   ;;  %s1502_s16 = sphi %s1552_s16, %s1854_s16   ;;  %s1498_s15 = sphi %s1550_s15, %s1853_s15  }
   0x5   : > { %p27_p0 = scmp.ge.s32.totalorder %s26_s22, 2  ;;  %p49_p1 = scmp.ne.s32.totalorder %s1502_s16, %s1498_s15 }
   0x6   : > { %p50_p2 = scmp.eq.s32.totalorder %s1522_s21, 0  ;;  %s42_s27 = sadd.s32 1, %s1502_s16 }
   0x7   : > { %s1860_s22 = smov (%p27_p0, %s26_s22), 0  ;;  %s1862_s23 = smov (!%p27_p0, %s33_s23), %s1518_s20 }
   0x8   : > { %p51_p3 = por %p50_p2, %p49_p1  ;;  %p35_p4 = scmp.ge.s32.totalorder %s1862_s23, 8 }
   0x9   : > { %s38_s24 = ssub.s32 %s1514_s19, %s1860_s22  ;;  %p1257_p6 = scmp.ge.s32.totalorder %s1522_s21, 16 }
   0xa   : > { %s1864_s23 = smov (%p35_p4, %s1862_s23), 0 }
   0xb   : > { %s37_s25 = ssub.s32 %s1518_s20, %s1864_s23  ;;  %195 = sbr.rel (%p1257_p6) target bundleno = 43 (0x2b), region = 24 }
   0xc   : > { %s39_s26 = sor.u32 %s38_s24, %s37_s25 }
   0xd   : > { %p40_p5 = scmp.eq.s32.totalorder %s39_s26, 0 }
   0xf   : > { %s1601_s28 = scalar_select %p40_p5, %s1502_s16, %s42_s27  }
  0x10   : > { %198 = sbr.rel (!%p51_p3) target bundleno = 43 (0x2b), region = 28  ;;  %s200_s29 = sand.u32 (%p51_p3), 1, %s1502_s16  }
  0x11   : > { %s1298_s30 = sshll.u32 (%p51_p3), %s1518_s20, 6  ;;  %s1258_s5 = sshll.u32 (%p51_p3), %s200_s29, 7 }
  0x12   : > { %s205_s6 = sadd.s32 (%p51_p3), %s1514_s19, %s1298_s30  ;;  %s1615_s11 = scalar_lea.vmem (%p51_p3), [#allocation3], %s1258_s5 }
  0x13   : > { %s1261_s7 = sshll.u32 (%p51_p3), %s205_s6, 2 }
  0x14   : > { %s1610_s10 = scalar_lea.vmem (%p51_p3), %s1848_s0, %s1261_s7 }
  0x15   : > { %v224_v0 = vld [vmem:[%s1610_s10] sm:$0xf]  ;;  %v226_v1 = vld [vmem:[%s1610_s10 + $0x8] sm:$0xf]  ;;  %v228_v2 = vld [vmem:[%s1610_s10 + $0x10] sm:$0xf] }
  0x16   : > { %225 = vst [vmem:[%s1615_s11] sm:$0xf] %v224_v0  ;;  %227 = vst [vmem:[%s1615_s11 + $0x4] sm:$0xf] %v226_v1  ;;  %v230_v3 = vld [vmem:[%s1610_s10 + $0x18] sm:$0xf] }
  0x17   : > { %229 = vst [vmem:[%s1615_s11 + $0x8] sm:$0xf] %v228_v2  ;;  %v232_v4 = vld [vmem:[%s1610_s10 + $0x20] sm:$0xf]  ;;  %v234_v5 = vld [vmem:[%s1610_s10 + $0x28] sm:$0xf] }
  0x18   : > { %231 = vst [vmem:[%s1615_s11 + $0xc] sm:$0xf] %v230_v3  ;;  %233 = vst [vmem:[%s1615_s11 + $0x10] sm:$0xf] %v232_v4  ;;  %v236_v6 = vld [vmem:[%s1610_s10 + $0x30] sm:$0xf] }
  0x19   : > { %235 = vst [vmem:[%s1615_s11 + $0x14] sm:$0xf] %v234_v5  ;;  %v238_v7 = vld [vmem:[%s1610_s10 + $0x38] sm:$0xf]  ;;  %v240_v8 = vld [vmem:[%s1610_s10 + $0x40] sm:$0xf] }
  0x1a   : > { %237 = vst [vmem:[%s1615_s11 + $0x18] sm:$0xf] %v236_v6  ;;  %239 = vst [vmem:[%s1615_s11 + $0x1c] sm:$0xf] %v238_v7  ;;  %v242_v9 = vld [vmem:[%s1610_s10 + $0x48] sm:$0xf] }
  0x1b   : > { %241 = vst [vmem:[%s1615_s11 + $0x20] sm:$0xf] %v240_v8  ;;  %v244_v10 = vld [vmem:[%s1610_s10 + $0x50] sm:$0xf]  ;;  %v246_v11 = vld [vmem:[%s1610_s10 + $0x58] sm:$0xf] }
  0x1c   : > { %243 = vst [vmem:[%s1615_s11 + $0x24] sm:$0xf] %v242_v9  ;;  %245 = vst [vmem:[%s1615_s11 + $0x28] sm:$0xf] %v244_v10  ;;  %v248_v12 = vld [vmem:[%s1610_s10 + $0x60] sm:$0xf] }
  0x1d   : > { %247 = vst [vmem:[%s1615_s11 + $0x2c] sm:$0xf] %v246_v11  ;;  %v250_v13 = vld [vmem:[%s1610_s10 + $0x68] sm:$0xf]  ;;  %v252_v14 = vld [vmem:[%s1610_s10 + $0x70] sm:$0xf] }
  0x1e   : > { %249 = vst [vmem:[%s1615_s11 + $0x30] sm:$0xf] %v248_v12  ;;  %251 = vst [vmem:[%s1615_s11 + $0x34] sm:$0xf] %v250_v13  ;;  %v254_v15 = vld [vmem:[%s1610_s10 + $0x78] sm:$0xf] }
  0x1f   : > { %253 = vst [vmem:[%s1615_s11 + $0x38] sm:$0xf] %v252_v14  ;;  %v256_v16 = vld [vmem:[%s1610_s10 + $0x80] sm:$0xf]  ;;  %v258_v17 = vld [vmem:[%s1610_s10 + $0x88] sm:$0xf] }
  0x20   : > { %255 = vst [vmem:[%s1615_s11 + $0x3c] sm:$0xf] %v254_v15  ;;  %257 = vst [vmem:[%s1615_s11 + $0x40] sm:$0xf] %v256_v16  ;;  %v260_v18 = vld [vmem:[%s1610_s10 + $0x90] sm:$0xf] }
  0x21   : > { %259 = vst [vmem:[%s1615_s11 + $0x44] sm:$0xf] %v258_v17  ;;  %v262_v19 = vld [vmem:[%s1610_s10 + $0x98] sm:$0xf]  ;;  %v264_v20 = vld [vmem:[%s1610_s10 + $0xa0] sm:$0xf] }
  0x22   : > { %261 = vst [vmem:[%s1615_s11 + $0x48] sm:$0xf] %v260_v18  ;;  %263 = vst [vmem:[%s1615_s11 + $0x4c] sm:$0xf] %v262_v19  ;;  %v266_v21 = vld [vmem:[%s1610_s10 + $0xa8] sm:$0xf] }
  0x23   : > { %265 = vst [vmem:[%s1615_s11 + $0x50] sm:$0xf] %v264_v20  ;;  %v268_v22 = vld [vmem:[%s1610_s10 + $0xb0] sm:$0xf]  ;;  %v270_v23 = vld [vmem:[%s1610_s10 + $0xb8] sm:$0xf] }
  0x24   : > { %267 = vst [vmem:[%s1615_s11 + $0x54] sm:$0xf] %v266_v21  ;;  %269 = vst [vmem:[%s1615_s11 + $0x58] sm:$0xf] %v268_v22  ;;  %v272_v24 = vld [vmem:[%s1610_s10 + $0xc0] sm:$0xf] }
  0x25   : > { %271 = vst [vmem:[%s1615_s11 + $0x5c] sm:$0xf] %v270_v23  ;;  %v274_v25 = vld [vmem:[%s1610_s10 + $0xc8] sm:$0xf]  ;;  %v276_v26 = vld [vmem:[%s1610_s10 + $0xd0] sm:$0xf] }
  0x26   : > { %273 = vst [vmem:[%s1615_s11 + $0x60] sm:$0xf] %v272_v24  ;;  %275 = vst [vmem:[%s1615_s11 + $0x64] sm:$0xf] %v274_v25  ;;  %v278_v27 = vld [vmem:[%s1610_s10 + $0xd8] sm:$0xf] }
  0x27   : > { %277 = vst [vmem:[%s1615_s11 + $0x68] sm:$0xf] %v276_v26  ;;  %v280_v28 = vld [vmem:[%s1610_s10 + $0xe0] sm:$0xf]  ;;  %v282_v29 = vld [vmem:[%s1610_s10 + $0xe8] sm:$0xf] }
  0x28   : > { %279 = vst [vmem:[%s1615_s11 + $0x6c] sm:$0xf] %v278_v27  ;;  %281 = vst [vmem:[%s1615_s11 + $0x70] sm:$0xf] %v280_v28  ;;  %v284_v30 = vld [vmem:[%s1610_s10 + $0xf0] sm:$0xf] }
  0x29   : > { %283 = vst [vmem:[%s1615_s11 + $0x74] sm:$0xf] %v282_v29  ;;  %v286_v31 = vld [vmem:[%s1610_s10 + $0xf8] sm:$0xf]  ;;  %285 = vst [vmem:[%s1615_s11 + $0x78] sm:$0xf] %v284_v30 }
  0x2a   : > { %287 = vst [vmem:[%s1615_s11 + $0x7c] sm:$0xf] %v286_v31 }
  0x2b PF: > { %p1262_p7 = scmp.ge.s32.totalorder %s1522_s21, 1  ;;  %p386_p8 = scmp.lt.s32.totalorder %s1522_s21, 17 }
  0x2d   : > { %p387_p9 = pnand %p1262_p7, %p386_p8 }
  0x2e   : > { %s393_s12 = sand.u32 (!%p387_p9), 1, %s1498_s15   ;;  %s1264_s13 = sshll.u32 (!%p387_p9), %s1506_s17, 4 }
  0x2f   : > { %390 = sbr.rel (%p387_p9) target bundleno = 367 (0x16f), region = 73  ;;  %s1263_s14 = sshll.u32 (!%p387_p9), %s393_s12, 7 }
  0x30   : > { %p437_p10 = scmp.lt.s32.totalorder (!%p387_p9), %s1264_s13, 31  ;;  %s1266_s24 = sshll.u32 (!%p387_p9), %s1510_s18, 5 }
  0x31   : > { %p452_p11 = scmp.lt.s32.totalorder (!%p387_p9), %s1266_s24, 255  ;;  %s1693_s15 = scalar_lea.vmem (!%p387_p9), [#allocation3], %s1263_s14 }
  0x32   : > { %p1268_p12 = scmp.ne.s32.totalorder (!%p387_p9), %s1506_s17, 0 }
  0x34   : > { %s1866_s13 = smov (!%p437_p10, %s1264_s13), 31  ;;  %s1868_s24 = smov (!%p452_p11, %s1266_s24), 255 }
  0x35   : > { %s1265_s25 = sshll.u32 %s1866_s13, 2  ;;  %s1267_s30 = sshll.u32 %s1868_s24, 3 }
  0x36   : > { %s1686_s29 = scalar_lea.vmem %s1849_s1, %s1265_s25  ;;  %s1691_s7 = scalar_lea.vmem %s1852_s4, %s1267_s30 }
  0x37   : > { %464 = sbr.rel (%p1268_p12) target bundleno = 77 (0x4d), region = 81 }
  0x3c   : > { %v1524_v32 = vmov 0.0  }
  0x3d   : > { %465 = vst [vmem:[#allocation2 + $0xb0] sm:$0xff] %v1524_v32  ;;  %466 = vst [vmem:[#allocation2] sm:$0xff] %v1524_v32 }
  0x3e   : > { %467 = vst [vmem:[#allocation2 + $0xd8] sm:$0xff] %v1524_v32  ;;  %468 = vst [vmem:[#allocation2 + $0x18] sm:$0xff] %v1524_v32 }
  0x3f   : > { %469 = vst [vmem:[#allocation2 + $0x50] sm:$0xff] %v1524_v32  ;;  %470 = vst [vmem:[#allocation2 + $0x68] sm:$0xff] %v1524_v32 }
  0x40   : > { %471 = vst [vmem:[#allocation2 + $0x30] sm:$0xff] %v1524_v32  ;;  %472 = vst [vmem:[#allocation2 + $0x48] sm:$0xff] %v1524_v32 }
  0x41   : > { %473 = vst [vmem:[#allocation2 + $0x80] sm:$0xff] %v1524_v32  ;;  %474 = vst [vmem:[#allocation2 + $0x88] sm:$0xff] %v1524_v32 }
  0x42   : > { %475 = vst [vmem:[#allocation2 + $0xe8] sm:$0xff] %v1524_v32  ;;  %476 = vst [vmem:[#allocation2 + $0xb8] sm:$0xff] %v1524_v32 }
  0x43   : > { %477 = vst [vmem:[#allocation2 + $0x60] sm:$0xff] %v1524_v32  ;;  %478 = vst [vmem:[#allocation2 + $0xf0] sm:$0xff] %v1524_v32 }
  0x44   : > { %479 = vst [vmem:[#allocation2 + $0x8] sm:$0xff] %v1524_v32  ;;  %480 = vst [vmem:[#allocation2 + $0x78] sm:$0xff] %v1524_v32 }
  0x45   : > { %481 = vst [vmem:[#allocation2 + $0x38] sm:$0xff] %v1524_v32  ;;  %482 = vst [vmem:[#allocation2 + $0x58] sm:$0xff] %v1524_v32 }
  0x46   : > { %483 = vst [vmem:[#allocation2 + $0x40] sm:$0xff] %v1524_v32  ;;  %484 = vst [vmem:[#allocation2 + $0xc8] sm:$0xff] %v1524_v32 }
  0x47   : > { %485 = vst [vmem:[#allocation2 + $0xe0] sm:$0xff] %v1524_v32  ;;  %486 = vst [vmem:[#allocation2 + $0x90] sm:$0xff] %v1524_v32 }
  0x48   : > { %487 = vst [vmem:[#allocation2 + $0x70] sm:$0xff] %v1524_v32  ;;  %488 = vst [vmem:[#allocation2 + $0xc0] sm:$0xff] %v1524_v32 }
  0x49   : > { %489 = vst [vmem:[#allocation2 + $0xa8] sm:$0xff] %v1524_v32  ;;  %490 = vst [vmem:[#allocation2 + $0xd0] sm:$0xff] %v1524_v32 }
  0x4a   : > { %491 = vst [vmem:[#allocation2 + $0x10] sm:$0xff] %v1524_v32  ;;  %492 = vst [vmem:[#allocation2 + $0x28] sm:$0xff] %v1524_v32 }
  0x4b   : > { %493 = vst [vmem:[#allocation2 + $0xa0] sm:$0xff] %v1524_v32  ;;  %494 = vst [vmem:[#allocation2 + $0xf8] sm:$0xff] %v1524_v32 }
  0x4c   : > { %495 = vst [vmem:[#allocation2 + $0x20] sm:$0xff] %v1524_v32  ;;  %496 = vst [vmem:[#allocation2 + $0x98] sm:$0xff] %v1524_v32 }
  0x4d PF: > { %v1444_v33 = vld [vmem:[%s1686_s29 + $0x38] sm:$0xff]   ;;  %v1445_v34 = vld [vmem:[%s1686_s29 + $0x30] sm:$0xff]   ;;  %v1446_v35 = vld [vmem:[%s1686_s29 + $0x28] sm:$0xff]   ;;  %p1293_p13 = scmp.ne.s32.totalorder %s1506_s17, 1 }
  0x4e   : > { %1323 = vmatprep.subr.bf16.mxu0 %v1444_v33  ;;  %1371 = vmatprep.subr.bf16.mxu1 %v1444_v33  ;;  %v1447_v36 = vld [vmem:[%s1686_s29 + $0x20] sm:$0xff]   ;;  %v1448_v39 = vld [vmem:[%s1686_s29 + $0x18] sm:$0xff]   ;;  %v1449_v40 = vld [vmem:[%s1686_s29 + $0x10] sm:$0xff]  }
  0x4f   : > { %1324 = vmatpush3.bf16.msra.mxu0 %v1444_v33  ;;  %1379 = vmatpush3.bf16.msra.mxu1 %v1444_v33  ;;  %v1452_v37 = vld [vmem:[%s1693_s15] sm:$0xff]   ;;  %v1450_v41 = vld [vmem:[%s1686_s29 + $0x8] sm:$0xff]   ;;  %v1456_v45 = vld [vmem:[%s1693_s15 + $0x10] sm:$0xff]  }
  0x50   : > { %1325 = vmatprep.subr.bf16.mxu0 %v1445_v34  ;;  %1372 = vmatprep.subr.bf16.mxu1 %v1445_v34  ;;  %v1453_v38 = vld [vmem:[%s1693_s15 + $0x40] sm:$0xff]   ;;  %v1454_v43 = vld [vmem:[%s1693_s15 + $0x8] sm:$0xff]   ;;  %v1457_v46 = vld [vmem:[%s1693_s15 + $0x50] sm:$0xff]  }
  0x51   : > { %1339 = vmatprep.mubr.bf16.mxu0 %v1452_v37  ;;  %1355 = vmatprep.mubr.bf16.mxu1 %v1453_v38  ;;  %v1451_v42 = vld [vmem:[%s1686_s29] sm:$0xff]   ;;  %v1455_v44 = vld [vmem:[%s1693_s15 + $0x48] sm:$0xff]   ;;  %v1458_v47 = vld [vmem:[%s1693_s15 + $0x18] sm:$0xff]  }
  0x52   : > { %v1459_v48 = vld [vmem:[%s1693_s15 + $0x58] sm:$0xff]   ;;  %v1460_v49 = vld [vmem:[%s1693_s15 + $0x20] sm:$0xff]   ;;  %v1462_v51 = vld [vmem:[%s1693_s15 + $0x28] sm:$0xff]  }
  0x53   : > { %1326 = vmatpush3.bf16.msra.mxu0 %v1445_v34  ;;  %1380 = vmatpush3.bf16.msra.mxu1 %v1445_v34  ;;  %v1461_v50 = vld [vmem:[%s1693_s15 + $0x60] sm:$0xff]   ;;  %v1463_v52 = vld [vmem:[%s1693_s15 + $0x68] sm:$0xff]   ;;  %v1464_v53 = vld [vmem:[%s1693_s15 + $0x30] sm:$0xff]  }
  0x54   : > { %1327 = vmatprep.subr.bf16.mxu0 %v1446_v35  ;;  %1373 = vmatprep.subr.bf16.mxu1 %v1446_v35  ;;  %v1465_v54 = vld [vmem:[%s1693_s15 + $0x70] sm:$0xff]   ;;  %v1466_v55 = vld [vmem:[%s1693_s15 + $0x38] sm:$0xff]   ;;  %v515_v58 = vld [vmem:[#allocation2 + $0x40] sm:$0xff] }
  0x55   : > { %v1467_v56 = vld [vmem:[%s1693_s15 + $0x78] sm:$0xff]   ;;  %v497_v61 = vld [vmem:[#allocation2 + $0xb0] sm:$0xff]  ;;  %v516_v4 = vld [vmem:[#allocation2 + $0xc8] sm:$0xff] }
  0x56   : > { %v499_v57 = vld [vmem:[#allocation2 + $0xd8] sm:$0xff]  ;;  %v498_v9 = vld [vmem:[#allocation2] sm:$0xff]  ;;  %v503_v15 = vld [vmem:[#allocation2 + $0x30] sm:$0xff] }
  0x57   : > { %1328 = vmatpush3.bf16.msra.mxu0 %v1446_v35  ;;  %1381 = vmatpush3.bf16.msra.mxu1 %v1446_v35  ;;  %v513_v62 = vld [vmem:[#allocation2 + $0x38] sm:$0xff]  ;;  %v519_v16 = vld [vmem:[#allocation2 + $0x70] sm:$0xff]  ;;  %v517_v22 = vld [vmem:[#allocation2 + $0xe0] sm:$0xff] }
  0x58   : > { %1329 = vmatprep.subr.bf16.mxu0 %v1447_v36  ;;  %1374 = vmatprep.subr.bf16.mxu1 %v1447_v36  ;;  %v500_v3 = vld [vmem:[#allocation2 + $0x18] sm:$0xff]  ;;  %v501_v21 = vld [vmem:[#allocation2 + $0x50] sm:$0xff]  ;;  %v504_v27 = vld [vmem:[#allocation2 + $0x48] sm:$0xff] }
  0x59   : > { %v514_v10 = vld [vmem:[#allocation2 + $0x58] sm:$0xff]  ;;  %v520_v28 = vld [vmem:[#allocation2 + $0xc0] sm:$0xff]  ;;  %v502_v33 = vld [vmem:[#allocation2 + $0x68] sm:$0xff] }
  0x5a   : > { %v518_v34 = vld [vmem:[#allocation2 + $0x90] sm:$0xff] }
  0x5b   : > { %1330 = vmatpush3.bf16.msra.mxu0 %v1447_v36  ;;  %1382 = vmatpush3.bf16.msra.mxu1 %v1447_v36 }
  0x5c   : > { %1331 = vmatprep.subr.bf16.mxu0 %v1448_v39  ;;  %1375 = vmatprep.subr.bf16.mxu1 %v1448_v39 }
  0x5f   : > { %1332 = vmatpush3.bf16.msra.mxu0 %v1448_v39  ;;  %1383 = vmatpush3.bf16.msra.mxu1 %v1448_v39  ;;  %v507_v39 = vld [vmem:[#allocation2 + $0xe8] sm:$0xff] }
  0x60   : > { %1333 = vmatprep.subr.bf16.mxu0 %v1449_v40  ;;  %1376 = vmatprep.subr.bf16.mxu1 %v1449_v40 }
  0x63   : > { %1334 = vmatpush3.bf16.msra.mxu0 %v1449_v40  ;;  %1384 = vmatpush3.bf16.msra.mxu1 %v1449_v40  ;;  %v523_v40 = vld [vmem:[#allocation2 + $0x10] sm:$0xff] }
  0x64   : > { %1335 = vmatprep.subr.bf16.mxu0 %v1450_v41  ;;  %1377 = vmatprep.subr.bf16.mxu1 %v1450_v41 }
  0x67   : > { %1336 = vmatpush3.bf16.msra.mxu0 %v1450_v41  ;;  %1385 = vmatpush3.bf16.msra.mxu1 %v1450_v41 }
  0x68   : > { %1337 = vmatprep.subr.bf16.mxu0 %v1451_v42  ;;  %1378 = vmatprep.subr.bf16.mxu1 %v1451_v42 }
  0x6b   : > { %1338 = vmatpush3.bf16.msra.mxu0 %v1451_v42  ;;  %1386 = vmatpush3.bf16.msra.mxu1 %v1451_v42 }
  0x6e   : > { %1340 = vmatmul.mubr.bf16.vlgmr.msra.gmra.mxu0 %v1454_v43  ;;  %1356 = vmatmul.mubr.bf16.vlgmr.msra.gmra.mxu1 %v1455_v44 }
  0x6f   : > { %1343 = vmatprep.mubr.bf16.mxu0 %v1456_v45  ;;  %1359 = vmatprep.mubr.bf16.mxu1 %v1457_v46  ;;  %v505_v45 = vld [vmem:[#allocation2 + $0x80] sm:$0xff]  ;;  %v521_v46 = vld [vmem:[#allocation2 + $0xa8] sm:$0xff] }
  0x76   : > { %1344 = vmatmul.mubr.bf16.gmra.mxu0 %v1458_v47  ;;  %1360 = vmatmul.mubr.bf16.gmra.mxu1 %v1459_v48 }
  0x77   : > { %1347 = vmatprep.mubr.bf16.mxu0 %v1460_v49  ;;  %1363 = vmatprep.mubr.bf16.mxu1 %v1461_v50 }
  0x7e   : > { %1348 = vmatmul.mubr.bf16.gmra.mxu0 %v1462_v51  ;;  %1364 = vmatmul.mubr.bf16.gmra.mxu1 %v1463_v52  ;;  %v508_v51 = vld [vmem:[#allocation2 + $0xb8] sm:$0xff]  ;;  %v524_v52 = vld [vmem:[#allocation2 + $0x28] sm:$0xff] }
  0x7f   : > { %1351 = vmatprep.mubr.bf16.mxu0 %v1464_v53  ;;  %1367 = vmatprep.mubr.bf16.mxu1 %v1465_v54 }
  0x86   : > { %1352 = vmatmul.mubr.bf16.gmra.mxu0 %v1466_v55  ;;  %1368 = vmatmul.mubr.bf16.gmra.mxu1 %v1467_v56 }
 0x12e   : > { %v1341_v59 = vpop.f32.mrf.mxu0  ;;  %v1357_v60 = vpop.f32.mrf.mxu1 }
 0x12f   : > { %v884_v63 = vadd.f32 %v1341_v59, %v499_v57  ;;  %v900_v0 = vadd.f32 %v1357_v60, %v515_v58  ;;  %v506_v57 = vld [vmem:[#allocation2 + $0x88] sm:$0xff]  ;;  %v522_v58 = vld [vmem:[#allocation2 + $0xd0] sm:$0xff] }
 0x130   : > { %v755_v1 = vpop.f32.mrf.mxu0  ;;  %v819_v2 = vpop.f32.mrf.mxu1 }
 0x131   : > { %916 = vst [vmem:[#allocation2 + $0xd8] sm:$0xff] %v884_v63  ;;  %932 = vst [vmem:[#allocation2 + $0x40] sm:$0xff] %v900_v0  ;;  %v882_v5 = vadd.f32 %v755_v1, %v497_v61  ;;  %v898_v6 = vadd.f32 %v819_v2, %v513_v62  ;;  %v511_v63 = vld [vmem:[#allocation2 + $0x8] sm:$0xff]  ;;  %v527_v0 = vld [vmem:[#allocation2 + $0x20] sm:$0xff] }
 0x132   : > { %v1342_v7 = vpop.f32.mrf.mxu0  ;;  %v1358_v8 = vpop.f32.mrf.mxu1 }
 0x133   : > { %914 = vst [vmem:[#allocation2 + $0xb0] sm:$0xff] %v882_v5  ;;  %930 = vst [vmem:[#allocation2 + $0x38] sm:$0xff] %v898_v6  ;;  %v885_v11 = vadd.f32 %v1342_v7, %v500_v3  ;;  %v901_v12 = vadd.f32 %v1358_v8, %v516_v4  ;;  %v509_v5 = vld [vmem:[#allocation2 + $0x60] sm:$0xff] }
 0x134   : > { %v758_v13 = vpop.f32.mrf.mxu0  ;;  %v822_v14 = vpop.f32.mrf.mxu1  ;;  %v525_v6 = vld [vmem:[#allocation2 + $0xa0] sm:$0xff] }
 0x135   : > { %917 = vst [vmem:[#allocation2 + $0x18] sm:$0xff] %v885_v11  ;;  %933 = vst [vmem:[#allocation2 + $0xc8] sm:$0xff] %v901_v12  ;;  %v883_v17 = vadd.f32 %v758_v13, %v498_v9  ;;  %v899_v18 = vadd.f32 %v822_v14, %v514_v10  ;;  %v512_v11 = vld [vmem:[#allocation2 + $0x78] sm:$0xff] }
 0x136   : > { %v1345_v19 = vpop.f32.mrf.mxu0  ;;  %v1361_v20 = vpop.f32.mrf.mxu1  ;;  %v528_v12 = vld [vmem:[#allocation2 + $0x98] sm:$0xff] }
 0x137   : > { %915 = vst [vmem:[#allocation2] sm:$0xff] %v883_v17  ;;  %931 = vst [vmem:[#allocation2 + $0x58] sm:$0xff] %v899_v18  ;;  %v888_v23 = vadd.f32 %v1345_v19, %v503_v15  ;;  %v904_v24 = vadd.f32 %v1361_v20, %v519_v16  ;;  %v510_v17 = vld [vmem:[#allocation2 + $0xf0] sm:$0xff]  ;;  %v526_v18 = vld [vmem:[#allocation2 + $0xf8] sm:$0xff] }
 0x138   : > { %v771_v25 = vpop.f32.mrf.mxu0  ;;  %v835_v26 = vpop.f32.mrf.mxu1 }
 0x139   : > { %920 = vst [vmem:[#allocation2 + $0x30] sm:$0xff] %v888_v23  ;;  %936 = vst [vmem:[#allocation2 + $0x70] sm:$0xff] %v904_v24  ;;  %v886_v29 = vadd.f32 %v771_v25, %v501_v21  ;;  %v902_v30 = vadd.f32 %v835_v26, %v517_v22 }
 0x13a   : > { %v1346_v31 = vpop.f32.mrf.mxu0  ;;  %v1362_v32 = vpop.f32.mrf.mxu1 }
 0x13b   : > { %918 = vst [vmem:[#allocation2 + $0x50] sm:$0xff] %v886_v29  ;;  %934 = vst [vmem:[#allocation2 + $0xe0] sm:$0xff] %v902_v30  ;;  %v889_v35 = vadd.f32 %v1346_v31, %v504_v27  ;;  %v905_v36 = vadd.f32 %v1362_v32, %v520_v28 }
 0x13c   : > { %v774_v37 = vpop.f32.mrf.mxu0  ;;  %v838_v38 = vpop.f32.mrf.mxu1 }
 0x13d   : > { %921 = vst [vmem:[#allocation2 + $0x48] sm:$0xff] %v889_v35  ;;  %937 = vst [vmem:[#allocation2 + $0xc0] sm:$0xff] %v905_v36  ;;  %v887_v41 = vadd.f32 %v774_v37, %v502_v33  ;;  %v903_v42 = vadd.f32 %v838_v38, %v518_v34 }
 0x13e   : > { %v1349_v43 = vpop.f32.mrf.mxu0  ;;  %v1365_v44 = vpop.f32.mrf.mxu1 }
 0x13f   : > { %919 = vst [vmem:[#allocation2 + $0x68] sm:$0xff] %v887_v41  ;;  %935 = vst [vmem:[#allocation2 + $0x90] sm:$0xff] %v903_v42  ;;  %v892_v47 = vadd.f32 %v1349_v43, %v507_v39  ;;  %v908_v48 = vadd.f32 %v1365_v44, %v523_v40 }
 0x140   : > { %v787_v49 = vpop.f32.mrf.mxu0  ;;  %v851_v50 = vpop.f32.mrf.mxu1 }
 0x141   : > { %924 = vst [vmem:[#allocation2 + $0xe8] sm:$0xff] %v892_v47  ;;  %940 = vst [vmem:[#allocation2 + $0x10] sm:$0xff] %v908_v48  ;;  %v890_v53 = vadd.f32 %v787_v49, %v505_v45  ;;  %v906_v54 = vadd.f32 %v851_v50, %v521_v46 }
 0x142   : > { %v1350_v55 = vpop.f32.mrf.mxu0  ;;  %v1366_v56 = vpop.f32.mrf.mxu1 }
 0x143   : > { %922 = vst [vmem:[#allocation2 + $0x80] sm:$0xff] %v890_v53  ;;  %938 = vst [vmem:[#allocation2 + $0xa8] sm:$0xff] %v906_v54  ;;  %v893_v59 = vadd.f32 %v1350_v55, %v508_v51  ;;  %v909_v60 = vadd.f32 %v1366_v56, %v524_v52 }
 0x144   : > { %v790_v61 = vpop.f32.mrf.mxu0  ;;  %v854_v62 = vpop.f32.mrf.mxu1 }
 0x145   : > { %925 = vst [vmem:[#allocation2 + $0xb8] sm:$0xff] %v893_v59  ;;  %941 = vst [vmem:[#allocation2 + $0x28] sm:$0xff] %v909_v60  ;;  %v891_v1 = vadd.f32 %v790_v61, %v506_v57  ;;  %v907_v2 = vadd.f32 %v854_v62, %v522_v58 }
 0x146   : > { %v1353_v3 = vpop.f32.mrf.mxu0  ;;  %v1369_v4 = vpop.f32.mrf.mxu1 }
 0x147   : > { %923 = vst [vmem:[#allocation2 + $0x88] sm:$0xff] %v891_v1  ;;  %939 = vst [vmem:[#allocation2 + $0xd0] sm:$0xff] %v907_v2  ;;  %v896_v7 = vadd.f32 %v1353_v3, %v511_v63  ;;  %v912_v8 = vadd.f32 %v1369_v4, %v527_v0 }
 0x148   : > { %v803_v9 = vpop.f32.mrf.mxu0  ;;  %v867_v10 = vpop.f32.mrf.mxu1 }
 0x149   : > { %928 = vst [vmem:[#allocation2 + $0x8] sm:$0xff] %v896_v7  ;;  %944 = vst [vmem:[#allocation2 + $0x20] sm:$0xff] %v912_v8  ;;  %v894_v13 = vadd.f32 %v803_v9, %v509_v5  ;;  %v910_v14 = vadd.f32 %v867_v10, %v525_v6 }
 0x14a   : > { %v1354_v15 = vpop.f32.mrf.mxu0  ;;  %v1370_v16 = vpop.f32.mrf.mxu1 }
 0x14b   : > { %926 = vst [vmem:[#allocation2 + $0x60] sm:$0xff] %v894_v13  ;;  %942 = vst [vmem:[#allocation2 + $0xa0] sm:$0xff] %v910_v14  ;;  %v897_v19 = vadd.f32 %v1354_v15, %v512_v11  ;;  %v913_v20 = vadd.f32 %v1370_v16, %v528_v12  ;;  %949 = sbr.rel (%p1293_p13) target bundleno = 367 (0x16f), region = 85 }
 0x14c   : > { %v806_v21 = vpop.f32.mrf.mxu0  ;;  %v870_v22 = vpop.f32.mrf.mxu1 }
 0x14d   : > { %929 = vst [vmem:[#allocation2 + $0x78] sm:$0xff] %v897_v19  ;;  %945 = vst [vmem:[#allocation2 + $0x98] sm:$0xff] %v913_v20  ;;  %v895_v23 = vadd.f32 %v806_v21, %v510_v17  ;;  %v911_v24 = vadd.f32 %v870_v22, %v526_v18 }
 0x14f   : > { %927 = vst [vmem:[#allocation2 + $0xf0] sm:$0xff] %v895_v23  ;;  %943 = vst [vmem:[#allocation2 + $0xf8] sm:$0xff] %v911_v24 }
 0x150   : > { %v950_v25 = vld [vmem:[#allocation2 + $0xb0] sm:$0xff]  ;;  %v1724_v26 = vld [vmem:[%s1850_s2] ss:$0 sm:$0xff]  ;;  %v952_v30 = vld [vmem:[#allocation2 + $0xd8] sm:$0xff] }
 0x151   : > { %v1729_v27 = vld [vmem:[%s1851_s3] ss:$0 sm:$0xff]  ;;  %v989_v28 = vmul.f32 %v1724_v26, %v950_v25  ;;  %v953_v31 = vld [vmem:[#allocation2 + $0x18] sm:$0xff]  ;;  %v991_v33 = vmul.f32 %v1724_v26, %v952_v30  ;;  %v954_v35 = vld [vmem:[#allocation2 + $0x50] sm:$0xff] }
 0x152   : > { %v951_v29 = vld [vmem:[#allocation2] sm:$0xff]  ;;  %v992_v34 = vmul.f32 %v1724_v26, %v953_v31  ;;  %v955_v36 = vld [vmem:[#allocation2 + $0x68] sm:$0xff]  ;;  %v956_v37 = vld [vmem:[#allocation2 + $0x30] sm:$0xff]  ;;  %v993_v39 = vmul.f32 %v1724_v26, %v954_v35 }
 0x153   : > { %v990_v32 = vmul.f32 %v1724_v26, %v951_v29  ;;  %v1028_v38 = vadd.f32 %v1729_v27, %v989_v28  ;;  %v994_v40 = vmul.f32 %v1724_v26, %v955_v36  ;;  %v995_v41 = vmul.f32 %v1724_v26, %v956_v37  ;;  %v957_v42 = vld [vmem:[#allocation2 + $0x48] sm:$0xff]  ;;  %v958_v47 = vld [vmem:[#allocation2 + $0x80] sm:$0xff]  ;;  %v961_v54 = vld [vmem:[#allocation2 + $0xb8] sm:$0xff] }
 0x154   : > { %v1030_v44 = vadd.f32 %v1729_v27, %v991_v33  ;;  %v1031_v45 = vadd.f32 %v1729_v27, %v992_v34  ;;  %v996_v46 = vmul.f32 %v1724_v26, %v957_v42  ;;  %v1032_v49 = vadd.f32 %v1729_v27, %v993_v39  ;;  %v959_v52 = vld [vmem:[#allocation2 + $0x88] sm:$0xff]  ;;  %v962_v59 = vld [vmem:[#allocation2 + $0x60] sm:$0xff]  ;;  %v965_v2 = vld [vmem:[#allocation2 + $0x78] sm:$0xff] }
 0x155   : > { %v1029_v43 = vadd.f32 %v1729_v27, %v990_v32  ;;  %v1060_v48 = vmax.f32 %v1028_v38, 0.0  ;;  %v1033_v50 = vadd.f32 %v1729_v27, %v994_v40  ;;  %v1034_v51 = vadd.f32 %v1729_v27, %v995_v41  ;;  %v960_v53 = vld [vmem:[#allocation2 + $0xe8] sm:$0xff]  ;;  %v966_v15 = vld [vmem:[#allocation2 + $0x38] sm:$0xff]  ;;  %v968_v21 = vld [vmem:[#allocation2 + $0x40] sm:$0xff] }
 0x156   : > { %v1062_v56 = vmax.f32 %v1030_v44, 0.0  ;;  %v1063_v57 = vmax.f32 %v1031_v45, 0.0  ;;  %v1035_v58 = vadd.f32 %v1729_v27, %v996_v46  ;;  %v963_v60 = vld [vmem:[#allocation2 + $0xf0] sm:$0xff]  ;;  %v964_v61 = vld [vmem:[#allocation2 + $0x8] sm:$0xff]  ;;  %v1064_v62 = vmax.f32 %v1032_v49, 0.0  ;;  %v967_v20 = vld [vmem:[#allocation2 + $0x58] sm:$0xff] }
 0x157   : > { %v1061_v55 = vmax.f32 %v1029_v43, 0.0  ;;  %1092 = vst [vmem:[%s1691_s7] sm:$0xff] %v1060_v48  ;;  %v1065_v63 = vmax.f32 %v1033_v50, 0.0  ;;  %v1066_v0 = vmax.f32 %v1034_v51, 0.0  ;;  %v997_v1 = vmul.f32 %v1724_v26, %v958_v47  ;;  %v969_v22 = vld [vmem:[#allocation2 + $0xc8] sm:$0xff]  ;;  %v970_v29 = vld [vmem:[#allocation2 + $0xe0] sm:$0xff]  ;;  %v971_v30 = vld [vmem:[#allocation2 + $0x90] sm:$0xff] }
 0x158   : > { %1094 = vst [vmem:[%s1691_s7 + $0x10] sm:$0xff] %v1062_v56  ;;  %1095 = vst [vmem:[%s1691_s7 + $0x18] sm:$0xff] %v1063_v57  ;;  %v1067_v3 = vmax.f32 %v1035_v58, 0.0  ;;  %v998_v4 = vmul.f32 %v1724_v26, %v959_v52  ;;  %v999_v5 = vmul.f32 %v1724_v26, %v960_v53  ;;  %v1000_v6 = vmul.f32 %v1724_v26, %v961_v54  ;;  %v972_v31 = vld [vmem:[#allocation2 + $0x70] sm:$0xff]  ;;  %v973_v36 = vld [vmem:[#allocation2 + $0xc0] sm:$0xff] }
 0x159   : > { %1093 = vst [vmem:[%s1691_s7 + $0x8] sm:$0xff] %v1061_v55  ;;  %1096 = vst [vmem:[%s1691_s7 + $0x20] sm:$0xff] %v1064_v62  ;;  %v1036_v7 = vadd.f32 %v1729_v27, %v997_v1  ;;  %v1001_v8 = vmul.f32 %v1724_v26, %v962_v59  ;;  %v1002_v9 = vmul.f32 %v1724_v26, %v963_v60  ;;  %v974_v49 = vld [vmem:[#allocation2 + $0xa8] sm:$0xff]  ;;  %v975_v54 = vld [vmem:[#allocation2 + $0xd0] sm:$0xff] }
 0x15a   : > { %1097 = vst [vmem:[%s1691_s7 + $0x28] sm:$0xff] %v1065_v63  ;;  %1098 = vst [vmem:[%s1691_s7 + $0x30] sm:$0xff] %v1066_v0  ;;  %v1003_v10 = vmul.f32 %v1724_v26, %v964_v61  ;;  %v1037_v11 = vadd.f32 %v1729_v27, %v998_v4  ;;  %v1038_v12 = vadd.f32 %v1729_v27, %v999_v5  ;;  %v976_v55 = vld [vmem:[#allocation2 + $0x10] sm:$0xff]  ;;  %v977_v56 = vld [vmem:[#allocation2 + $0x28] sm:$0xff] }
 0x15b   : > { %1099 = vst [vmem:[%s1691_s7 + $0x38] sm:$0xff] %v1067_v3  ;;  %v1039_v13 = vadd.f32 %v1729_v27, %v1000_v6  ;;  %v1004_v14 = vmul.f32 %v1724_v26, %v965_v2  ;;  %v1068_v16 = vmax.f32 %v1036_v7, 0.0  ;;  %v1040_v17 = vadd.f32 %v1729_v27, %v1001_v8  ;;  %v978_v61 = vld [vmem:[#allocation2 + $0xa0] sm:$0xff]  ;;  %v979_v62 = vld [vmem:[#allocation2 + $0xf8] sm:$0xff] }
 0x15c   : > { %v1041_v18 = vadd.f32 %v1729_v27, %v1002_v9  ;;  %v1042_v19 = vadd.f32 %v1729_v27, %v1003_v10  ;;  %v1069_v23 = vmax.f32 %v1037_v11, 0.0  ;;  %v1070_v24 = vmax.f32 %v1038_v12, 0.0  ;;  %v980_v63 = vld [vmem:[#allocation2 + $0x20] sm:$0xff]  ;;  %v981_v4 = vld [vmem:[#allocation2 + $0x98] sm:$0xff] }
 0x15d   : > { %v1071_v25 = vmax.f32 %v1039_v13, 0.0  ;;  %v1043_v28 = vadd.f32 %v1729_v27, %v1004_v14  ;;  %1100 = vst [vmem:[%s1691_s7 + $0x40] sm:$0xff] %v1068_v16  ;;  %v1072_v32 = vmax.f32 %v1040_v17, 0.0  ;;  %v1005_v35 = vmul.f32 %v1724_v26, %v966_v15 }
 0x15e   : > { %v1073_v33 = vmax.f32 %v1041_v18, 0.0  ;;  %v1074_v34 = vmax.f32 %v1042_v19, 0.0  ;;  %1101 = vst [vmem:[%s1691_s7 + $0x48] sm:$0xff] %v1069_v23  ;;  %1102 = vst [vmem:[%s1691_s7 + $0x50] sm:$0xff] %v1070_v24  ;;  %v1006_v38 = vmul.f32 %v1724_v26, %v967_v20  ;;  %v1007_v39 = vmul.f32 %v1724_v26, %v968_v21 }
 0x15f   : > { %1103 = vst [vmem:[%s1691_s7 + $0x58] sm:$0xff] %v1071_v25  ;;  %v1075_v37 = vmax.f32 %v1043_v28, 0.0  ;;  %v1008_v40 = vmul.f32 %v1724_v26, %v969_v22  ;;  %1104 = vst [vmem:[%s1691_s7 + $0x60] sm:$0xff] %v1072_v32  ;;  %v1044_v41 = vadd.f32 %v1729_v27, %v1005_v35  ;;  %v1009_v42 = vmul.f32 %v1724_v26, %v970_v29 }
 0x160   : > { %1105 = vst [vmem:[%s1691_s7 + $0x68] sm:$0xff] %v1073_v33  ;;  %1106 = vst [vmem:[%s1691_s7 + $0x70] sm:$0xff] %v1074_v34  ;;  %v1010_v43 = vmul.f32 %v1724_v26, %v971_v30  ;;  %v1011_v44 = vmul.f32 %v1724_v26, %v972_v31  ;;  %v1045_v45 = vadd.f32 %v1729_v27, %v1006_v38 }
 0x161   : > { %1107 = vst [vmem:[%s1691_s7 + $0x78] sm:$0xff] %v1075_v37  ;;  %v1046_v46 = vadd.f32 %v1729_v27, %v1007_v39  ;;  %v1047_v47 = vadd.f32 %v1729_v27, %v1008_v40  ;;  %v1012_v48 = vmul.f32 %v1724_v26, %v973_v36  ;;  %v1076_v50 = vmax.f32 %v1044_v41, 0.0 }
 0x162   : > { %v1048_v51 = vadd.f32 %v1729_v27, %v1009_v42  ;;  %v1049_v52 = vadd.f32 %v1729_v27, %v1010_v43  ;;  %v1050_v53 = vadd.f32 %v1729_v27, %v1011_v44  ;;  %v1077_v57 = vmax.f32 %v1045_v45, 0.0 }
 0x163   : > { %v1078_v58 = vmax.f32 %v1046_v46, 0.0  ;;  %v1079_v59 = vmax.f32 %v1047_v47, 0.0  ;;  %v1051_v60 = vadd.f32 %v1729_v27, %v1012_v48  ;;  %1108 = vst [vmem:[%s1691_s7 + $0x80] sm:$0xff] %v1076_v50  ;;  %v1013_v3 = vmul.f32 %v1724_v26, %v974_v49 }
 0x164   : > { %v1080_v0 = vmax.f32 %v1048_v51, 0.0  ;;  %v1081_v1 = vmax.f32 %v1049_v52, 0.0  ;;  %v1082_v2 = vmax.f32 %v1050_v53, 0.0  ;;  %1109 = vst [vmem:[%s1691_s7 + $0x88] sm:$0xff] %v1077_v57  ;;  %v1014_v6 = vmul.f32 %v1724_v26, %v975_v54 }
 0x165   : > { %1110 = vst [vmem:[%s1691_s7 + $0x90] sm:$0xff] %v1078_v58  ;;  %1111 = vst [vmem:[%s1691_s7 + $0x98] sm:$0xff] %v1079_v59  ;;  %v1083_v5 = vmax.f32 %v1051_v60, 0.0  ;;  %v1015_v7 = vmul.f32 %v1724_v26, %v976_v55  ;;  %v1016_v8 = vmul.f32 %v1724_v26, %v977_v56  ;;  %v1052_v9 = vadd.f32 %v1729_v27, %v1013_v3 }
 0x166   : > { %1112 = vst [vmem:[%s1691_s7 + $0xa0] sm:$0xff] %v1080_v0  ;;  %1113 = vst [vmem:[%s1691_s7 + $0xa8] sm:$0xff] %v1081_v1  ;;  %v1017_v10 = vmul.f32 %v1724_v26, %v978_v61  ;;  %v1018_v11 = vmul.f32 %v1724_v26, %v979_v62  ;;  %v1019_v12 = vmul.f32 %v1724_v26, %v980_v63 }
 0x167   : > { %1114 = vst [vmem:[%s1691_s7 + $0xb0] sm:$0xff] %v1082_v2  ;;  %1115 = vst [vmem:[%s1691_s7 + $0xb8] sm:$0xff] %v1083_v5  ;;  %v1053_v13 = vadd.f32 %v1729_v27, %v1014_v6  ;;  %v1054_v14 = vadd.f32 %v1729_v27, %v1015_v7  ;;  %v1055_v15 = vadd.f32 %v1729_v27, %v1016_v8  ;;  %v1084_v17 = vmax.f32 %v1052_v9, 0.0 }
 0x168   : > { %v1020_v16 = vmul.f32 %v1724_v26, %v981_v4  ;;  %v1056_v18 = vadd.f32 %v1729_v27, %v1017_v10  ;;  %v1057_v19 = vadd.f32 %v1729_v27, %v1018_v11  ;;  %v1058_v20 = vadd.f32 %v1729_v27, %v1019_v12 }
 0x169   : > { %v1085_v21 = vmax.f32 %v1053_v13, 0.0  ;;  %v1086_v22 = vmax.f32 %v1054_v14, 0.0  ;;  %v1087_v23 = vmax.f32 %v1055_v15, 0.0  ;;  %1116 = vst [vmem:[%s1691_s7 + $0xc0] sm:$0xff] %v1084_v17 }
 0x16a   : > { %v1059_v24 = vadd.f32 %v1729_v27, %v1020_v16  ;;  %v1088_v25 = vmax.f32 %v1056_v18, 0.0  ;;  %v1089_v28 = vmax.f32 %v1057_v19, 0.0  ;;  %v1090_v26 = vmax.f32 %v1058_v20, 0.0 }
 0x16b   : > { %1117 = vst [vmem:[%s1691_s7 + $0xc8] sm:$0xff] %v1085_v21  ;;  %1118 = vst [vmem:[%s1691_s7 + $0xd0] sm:$0xff] %v1086_v22 }
 0x16c   : > { %1119 = vst [vmem:[%s1691_s7 + $0xd8] sm:$0xff] %v1087_v23  ;;  %v1091_v29 = vmax.f32 %v1059_v24, 0.0  ;;  %1120 = vst [vmem:[%s1691_s7 + $0xe0] sm:$0xff] %v1088_v25 }
 0x16d   : > { %1121 = vst [vmem:[%s1691_s7 + $0xe8] sm:$0xff] %v1089_v28  ;;  %1122 = vst [vmem:[%s1691_s7 + $0xf0] sm:$0xff] %v1090_v26 }
 0x16e   : > { %1123 = vst [vmem:[%s1691_s7 + $0xf8] sm:$0xff] %v1091_v29 }
 0x16f PF: > { %s14_s21 = sadd.s32 1, %s1522_s21   ;;  %s1853_s15 = smov %s1502_s16 }
 0x170   : > { %p11_p0 = scmp.ge.s32.totalorder %s14_s21, 18   ;;  %s1854_s16 = smov %s1601_s28 }
 0x171   : > { %s1855_s17 = smov %s1514_s19  ;;  %s1856_s18 = smov %s1518_s20 }
 0x172   : > { %s1857_s19 = smov %s1860_s22  ;;  %s1858_s20 = smov %s1864_s23 }
 0x173   :  { %13 = sbr.rel (!%p11_p0) target bundleno = 4 (0x4), region = 129 }

// kernel: full_mil_model_feats.15
= control target key start
LH: loop header
LB: loop body
LE: loop exit
PB: predicated region body
PF: predicated region fallthrough
CT: control target
= control target key end

     0   :  { %vm498_vm0 = vcmask 1046528   ;;  %vm1511_vm1 = vcmask 130048   ;;  %s3433_s0 = inlined_call_operand.vmem [shape: f32[8,17,17,16], index: 0, kind: input, shape index: {}]   ;;  %s3434_s1 = inlined_call_operand.vmem [shape: f32[2,16,16,16], index: 1, kind: output, shape index: {}]  }
   0x1   :  { %v8_v0 = vld [vmem:[%s3433_s0] sm:$0xff]  ;;  %v9_v1 = vld [vmem:[%s3433_s0 + $0x8] sm:$0xff]  ;;  %v1599_v2 = vld [vmem:[%s3433_s0 + $0x18] sm:$0xff] }
   0x2   :  { %v1604_v3 = vld [vmem:[%s3433_s0 + $0x20] sm:$0xff]  ;;  %v110_v4 = vld [vmem:[%s3433_s0 + $0x330] sm:$0xff]  ;;  %v1612_v5 = vld [vmem:[%s3433_s0 + $0x348] sm:$0xff]  ;;  %v499_v6 = vrot.slane %v8_v0, 1  ;;  %v500_v7 = vrot.slane %v9_v1, 1  ;;  %v504_v8 = vrot.slane %v1599_v2, 1 }
   0x3   :  { %v178_v9 = vld [vmem:[%s3433_s0 + $0x660] sm:$0xff]  ;;  %v179_v10 = vld [vmem:[%s3433_s0 + $0x668] sm:$0xff]  ;;  %v181_v11 = vld [vmem:[%s3433_s0 + $0x678] sm:$0xff]  ;;  %v338_v12 = vmax.f32 %v8_v0, %v110_v4  ;;  %v340_v13 = vmax.f32 %v1599_v2, %v1612_v5  ;;  %v505_v14 = vrot.slane %v1604_v3, 1 }
   0x4   :  { %v501_v15 = vsel %vm498_vm0, %v499_v6, %v500_v7  ;;  %v1011_v16 = vrot.slane %v178_v9, 1  ;;  %v1012_v17 = vrot.slane %v179_v10, 1  ;;  %v111_v18 = vld [vmem:[%s3433_s0 + $0x338] sm:$0xff]  ;;  %v1016_v21 = vrot.slane %v181_v11, 1  ;;  %v10_v22 = vld [vmem:[%s3433_s0 + $0x10] sm:$0x1] }
   0x5   :  { %v1632_v19 = vsel %vm498_vm0, %v504_v8, %v505_v14  ;;  %v723_v20 = vmax.f32 %v338_v12, %v501_v15  ;;  %v13_v23 = vld [vmem:[%s3433_s0 + $0x28] sm:$0x1]  ;;  %v1643_v24 = vld [vmem:[%s3433_s0 + $0x350] sm:$0xff]  ;;  %v339_v25 = vmax.f32 %v9_v1, %v111_v18  ;;  %v182_v30 = vld [vmem:[%s3433_s0 + $0x680] sm:$0xff]  ;;  %v502_v32 = vrot.slane %v10_v22, 1 }
   0x6   :  { %v274_v26 = vld [vmem:[%s3433_s0 + $0x990] sm:$0xff]  ;;  %v725_v27 = vmax.f32 %v340_v13, %v1632_v19  ;;  %v1013_v28 = vsel %vm498_vm0, %v1011_v16, %v1012_v17  ;;  %v341_v31 = vmax.f32 %v1604_v3, %v1643_v24  ;;  %v276_v33 = vld [vmem:[%s3433_s0 + $0x9a8] sm:$0xff]  ;;  %v507_v35 = vrot.slane %v13_v23, 1  ;;  %v15_v39 = vld [vmem:[%s3433_s0 + $0x38] sm:$0xff] }
   0x7   :  { %v180_v29 = vld [vmem:[%s3433_s0 + $0x670] sm:$0x1]  ;;  %v787_v34 = vmax.f32 %v723_v20, %v178_v9  ;;  %v1017_v37 = vrot.slane %v182_v30, 1  ;;  %v503_v41 = vsel %vm498_vm0, %v500_v7, %v502_v32  ;;  %v114_v42 = vld [vmem:[%s3433_s0 + $0x360] sm:$0xff]  ;;  %v510_v45 = vrot.slane %v15_v39, 1  ;;  %v1683_v50 = vld [vmem:[%s3433_s0 + $0x368] sm:$0xff] }
   0x8   :  { %v1014_v36 = vrot.slane %v180_v29, 1  ;;  %v14_v38 = vld [vmem:[%s3433_s0 + $0x30] sm:$0xff]  ;;  %v789_v40 = vmax.f32 %v725_v27, %v181_v11  ;;  %v1677_v47 = vsel %vm498_vm0, %v505_v14, %v507_v35  ;;  %v724_v48 = vmax.f32 %v339_v25, %v503_v41  ;;  %v275_v52 = vld [vmem:[%s3433_s0 + $0x998] sm:$0xff]  ;;  %v16_v56 = vld [vmem:[%s3433_s0 + $0x40] sm:$0x1] }
   0x9   :  { %v1674_v43 = vld [vmem:[%s3433_s0 + $0x690] sm:$0xff]  ;;  %v509_v44 = vrot.slane %v14_v38, 1  ;;  %v851_v46 = vmax.f32 %v787_v34, %v274_v26  ;;  %v726_v53 = vmax.f32 %v341_v31, %v1677_v47  ;;  %v342_v54 = vmax.f32 %v14_v38, %v114_v42  ;;  %v183_v57 = vld [vmem:[%s3433_s0 + $0x688] sm:$0x1]  ;;  %v1704_v63 = vld [vmem:[%s3433_s0 + $0x698] sm:$0xff] }
   0xa   :  { %v1015_v49 = vsel %vm498_vm0, %v1012_v17, %v1014_v36  ;;  %v853_v51 = vmax.f32 %v789_v40, %v276_v33  ;;  %v277_v59 = vld [vmem:[%s3433_s0 + $0x9b0] sm:$0xff]  ;;  %v788_v60 = vmax.f32 %v724_v48, %v179_v10  ;;  %v1018_v61 = vsel %vm498_vm0, %v1016_v21, %v1017_v37  ;;  %v278_v9 = vld [vmem:[%s3433_s0 + $0x9c0] sm:$0xff]  ;;  %v17_v16 = vld [vmem:[%s3433_s0 + $0x48] sm:$0xff] }
   0xb   :  { %v511_v55 = vsel %vm498_vm0, %v509_v44, %v510_v45  ;;  %v1235_v58 = vmax.f32 %v851_v46, %v1013_v28  ;;  %v1021_v62 = vrot.slane %v1674_v43, 1  ;;  %v790_v0 = vmax.f32 %v726_v53, %v182_v30  ;;  %v1727_v22 = vld [vmem:[%s3433_s0 + $0x50] sm:$0xff]  ;;  %v187_v28 = vld [vmem:[%s3433_s0 + $0x6a8] sm:$0xff] }
   0xc   :  { %v727_v1 = vmax.f32 %v342_v54, %v511_v55  ;;  %v1237_v4 = vmax.f32 %v853_v51, %v1018_v61  ;;  %v343_v6 = vmax.f32 %v15_v39, %v1683_v50  ;;  %v852_v8 = vmax.f32 %v788_v60, %v275_v52  ;;  %v279_v31 = vld [vmem:[%s3433_s0 + $0x9c8] sm:$0xff]  ;;  %v188_v41 = vld [vmem:[%s3433_s0 + $0x6b0] sm:$0xff] }
   0xd   :  { %v1299_v7 = vmax.f32 %v1235_v58, %v1599_v2  ;;  %v512_v10 = vrot.slane %v16_v56, 1  ;;  %v1019_v11 = vrot.slane %v183_v57, 1  ;;  %v854_v12 = vmax.f32 %v790_v0, %v277_v59  ;;  %v1719_v2 = vld [vmem:[%s3433_s0 + $0x378] sm:$0xff]  ;;  %v1768_v44 = vld [vmem:[%s3433_s0 + $0x390] sm:$0xff]  ;;  %v21_v54 = vld [vmem:[%s3433_s0 + $0x68] sm:$0xff] }
   0xe   :  { %v791_v13 = vmax.f32 %v727_v1, %v1674_v43  ;;  %v1301_v14 = vmax.f32 %v1237_v4, %v14_v38  ;;  %v1022_v15 = vrot.slane %v1704_v63, 1  ;;  %v1236_v18 = vmax.f32 %v852_v8, %v1015_v49  ;;  %v19_v38 = vld [vmem:[%s3433_s0 + $0x58] sm:$0x1]  ;;  %v20_v43 = vld [vmem:[%s3433_s0 + $0x60] sm:$0xff]  ;;  %v22_v8 = vld [vmem:[%s3433_s0 + $0x70] sm:$0x1] }
   0xf   :  { %v1363_v17 = vmax.f32 %v1299_v7, %v1612_v5  ;;  %v513_v20 = vsel %vm498_vm0, %v510_v45, %v512_v10  ;;  %v1020_v21 = vsel %vm498_vm0, %v1017_v37, %v1019_v11  ;;  %v1735_v5 = vld [vmem:[%s3433_s0 + $0x380] sm:$0xff]  ;;  %v344_v32 = vmax.f32 %v17_v16, %v1719_v2  ;;  %v280_v56 = vld [vmem:[%s3433_s0 + $0x9d8] sm:$0xff] }
  0x10   :  { %v855_v23 = vmax.f32 %v791_v13, %v278_v9  ;;  %v1365_v25 = vmax.f32 %v1301_v14, %v114_v42  ;;  %v728_v26 = vmax.f32 %v343_v6, %v513_v20  ;;  %v1238_v27 = vmax.f32 %v854_v12, %v1020_v21  ;;  %v1790_v59 = vld [vmem:[%s3433_s0 + $0x398] sm:$0xff]  ;;  %v281_v1 = vld [vmem:[%s3433_s0 + $0x9e0] sm:$0xff]  ;;  %v1816_v13 = vld [vmem:[%s3433_s0 + $0x6c8] sm:$0xff] }
  0x11   :  { %v1447_v29 = vmax.f32 %v1363_v17, %v1632_v19  ;;  %v1300_v30 = vmax.f32 %v1236_v18, %v1604_v3  ;;  %v514_v33 = vrot.slane %v17_v16, 1  ;;  %v515_v37 = vrot.slane %v1727_v22, 1  ;;  %v186_v3 = vld [vmem:[%s3433_s0 + $0x6a0] sm:$0x1]  ;;  %v189_v9 = vld [vmem:[%s3433_s0 + $0x6b8] sm:$0x1] }
  0x12   :  { %v1449_v34 = vmax.f32 %v1365_v25, %v511_v55  ;;  %v792_v35 = vmax.f32 %v728_v26, %v1704_v63  ;;  %v1302_v36 = vmax.f32 %v1238_v27, %v15_v39  ;;  %v1023_v40 = vsel %vm498_vm0, %v1021_v62, %v1022_v15 }
  0x13   :  { %1512 = vst.msk [vmem:[%s3434_s1] sm:$0xff] %vm1511_vm1, %v1447_v29  ;;  %v1364_v19 = vmax.f32 %v1300_v30, %v1643_v24  ;;  %v1026_v39 = vrot.slane %v187_v28, 1  ;;  %v345_v42 = vmax.f32 %v1727_v22, %v1735_v5  ;;  %v516_v46 = vsel %vm498_vm0, %v514_v33, %v515_v37  ;;  %v282_v29 = vld [vmem:[%s3433_s0 + $0x9f0] sm:$0xff]  ;;  %v1841_v30 = vld [vmem:[%s3433_s0 + $0x80] sm:$0xff] }
  0x14   :  { %1514 = vst.msk [vmem:[%s3434_s1 + $0x10] sm:$0xff] %vm1511_vm1, %v1449_v34  ;;  %v856_v24 = vmax.f32 %v792_v35, %v279_v31  ;;  %v1366_v45 = vmax.f32 %v1302_v36, %v1683_v50  ;;  %v1239_v48 = vmax.f32 %v855_v23, %v1023_v40  ;;  %v729_v51 = vmax.f32 %v344_v32, %v516_v46  ;;  %v190_v50 = vld [vmem:[%s3433_s0 + $0x6c0] sm:$0xff]  ;;  %v1852_v36 = vld [vmem:[%s3433_s0 + $0x3b0] sm:$0xff]  ;;  %v25_v40 = vld [vmem:[%s3433_s0 + $0x88] sm:$0x1] }
  0x15   :  { %v1448_v49 = vmax.f32 %v1364_v19, %v1677_v47  ;;  %v517_v52 = vrot.slane %v19_v38, 1  ;;  %v1024_v53 = vrot.slane %v186_v3, 1  ;;  %v1027_v58 = vrot.slane %v188_v41, 1 }
  0x16   :  { %v1450_v55 = vmax.f32 %v1366_v45, %v513_v20  ;;  %v1303_v57 = vmax.f32 %v1239_v48, %v17_v16  ;;  %v346_v47 = vmax.f32 %v20_v43, %v1768_v44  ;;  %v793_v60 = vmax.f32 %v729_v51, %v187_v28  ;;  %v1825_v16 = vld [vmem:[%s3433_s0 + $0x3a8] sm:$0xff]  ;;  %v192_v45 = vld [vmem:[%s3433_s0 + $0x6d0] sm:$0x1] }
  0x17   :  { %1513 = vst.msk [vmem:[%s3434_s1 + $0x8] sm:$0xff] %vm1511_vm1, %v1448_v49  ;;  %v518_v61 = vsel %vm498_vm0, %v515_v37, %v517_v52  ;;  %v1025_v62 = vsel %vm498_vm0, %v1022_v15, %v1024_v53  ;;  %v519_v63 = vrot.slane %v20_v43, 1  ;;  %v520_v7 = vrot.slane %v21_v54, 1  ;;  %v23_v15 = vld [vmem:[%s3433_s0 + $0x78] sm:$0xff]  ;;  %v1874_v49 = vld [vmem:[%s3433_s0 + $0x6e0] sm:$0xff]  ;;  %v26_v52 = vld [vmem:[%s3433_s0 + $0x90] sm:$0xff] }
  0x18   :  { %1515 = vst.msk [vmem:[%s3434_s1 + $0x18] sm:$0xff] %vm1511_vm1, %v1450_v55  ;;  %v1367_v0 = vmax.f32 %v1303_v57, %v1719_v2  ;;  %v730_v4 = vmax.f32 %v345_v42, %v518_v61  ;;  %v1240_v6 = vmax.f32 %v856_v24, %v1025_v62  ;;  %v857_v10 = vmax.f32 %v793_v60, %v280_v56  ;;  %v283_v42 = vld [vmem:[%s3433_s0 + $0x9f8] sm:$0xff]  ;;  %v1884_v53 = vld [vmem:[%s3433_s0 + $0x3c0] sm:$0xff]  ;;  %v284_v62 = vld [vmem:[%s3433_s0 + $0xa08] sm:$0xff] }
  0x19   :  { %v1028_v11 = vsel %vm498_vm0, %v1026_v39, %v1027_v58  ;;  %v1031_v12 = vrot.slane %v190_v50, 1  ;;  %v347_v14 = vmax.f32 %v21_v54, %v1790_v59  ;;  %v521_v20 = vsel %vm498_vm0, %v519_v63, %v520_v7 }
  0x1a   :  { %v1451_v2 = vmax.f32 %v1367_v0, %v516_v46  ;;  %v794_v17 = vmax.f32 %v730_v4, %v188_v41  ;;  %v1304_v18 = vmax.f32 %v1240_v6, %v1727_v22  ;;  %v731_v21 = vmax.f32 %v346_v47, %v521_v20 }
  0x1b   :  { %v1241_v23 = vmax.f32 %v857_v10, %v1028_v11  ;;  %v522_v25 = vrot.slane %v22_v8, 1  ;;  %v1029_v26 = vrot.slane %v189_v9, 1  ;;  %v1032_v22 = vrot.slane %v1816_v13, 1  ;;  %v285_v8 = vld [vmem:[%s3433_s0 + $0xa10] sm:$0xff]  ;;  %v1913_v11 = vld [vmem:[%s3433_s0 + $0x3c8] sm:$0xff] }
  0x1c   :  { %1516 = vst.msk [vmem:[%s3434_s1 + $0x20] sm:$0xff] %vm1511_vm1, %v1451_v2  ;;  %v858_v27 = vmax.f32 %v794_v17, %v281_v1  ;;  %v1368_v28 = vmax.f32 %v1304_v18, %v1735_v5  ;;  %v348_v31 = vmax.f32 %v23_v15, %v1825_v16  ;;  %v795_v32 = vmax.f32 %v731_v21, %v190_v50  ;;  %v193_v5 = vld [vmem:[%s3433_s0 + $0x6d8] sm:$0xff]  ;;  %v196_v1 = vld [vmem:[%s3433_s0 + $0x6f0] sm:$0xff]  ;;  %v28_v2 = vld [vmem:[%s3433_s0 + $0xa0] sm:$0x1] }
  0x1d   :  { %v1305_v33 = vmax.f32 %v1241_v23, %v20_v43  ;;  %v523_v34 = vsel %vm498_vm0, %v520_v7, %v522_v25  ;;  %v1030_v35 = vsel %vm498_vm0, %v1027_v58, %v1029_v26  ;;  %v524_v19 = vrot.slane %v23_v15, 1  ;;  %v195_v17 = vld [vmem:[%s3433_s0 + $0x6e8] sm:$0x1]  ;;  %v197_v23 = vld [vmem:[%s3433_s0 + $0x6f8] sm:$0xff] }
  0x1e   :  { %v1452_v37 = vmax.f32 %v1368_v28, %v518_v61  ;;  %v732_v38 = vmax.f32 %v347_v14, %v523_v34  ;;  %v1242_v3 = vmax.f32 %v858_v27, %v1030_v35  ;;  %v859_v39 = vmax.f32 %v795_v32, %v282_v29  ;;  %v1891_v61 = vld [vmem:[%s3433_s0 + $0x98] sm:$0xff]  ;;  %v29_v25 = vld [vmem:[%s3433_s0 + $0xa8] sm:$0xff]  ;;  %v1947_v35 = vld [vmem:[%s3433_s0 + $0xb0] sm:$0xff] }
  0x1f   :  { %v1369_v41 = vmax.f32 %v1305_v33, %v1768_v44  ;;  %v525_v43 = vrot.slane %v1841_v30, 1  ;;  %v1033_v24 = vsel %vm498_vm0, %v1031_v12, %v1032_v22  ;;  %v1036_v48 = vrot.slane %v193_v5, 1  ;;  %v1938_v26 = vld [vmem:[%s3433_s0 + $0x3d8] sm:$0xff] }
  0x20   :  { %1517 = vst.msk [vmem:[%s3434_s1 + $0x28] sm:$0xff] %vm1511_vm1, %v1452_v37  ;;  %v796_v46 = vmax.f32 %v732_v38, %v1816_v13  ;;  %v1306_v44 = vmax.f32 %v1242_v3, %v21_v54  ;;  %v349_v51 = vmax.f32 %v1841_v30, %v1852_v36  ;;  %v1243_v56 = vmax.f32 %v859_v39, %v1033_v24  ;;  %v287_v24 = vld [vmem:[%s3433_s0 + $0xa28] sm:$0xff] }
  0x21   :  { %v1453_v55 = vmax.f32 %v1369_v41, %v521_v20  ;;  %v526_v54 = vsel %vm498_vm0, %v524_v19, %v525_v43  ;;  %v527_v57 = vrot.slane %v25_v40, 1  ;;  %v1034_v60 = vrot.slane %v192_v45, 1  ;;  %v199_v41 = vld [vmem:[%s3433_s0 + $0x708] sm:$0xff] }
  0x22   :  { %v860_v58 = vmax.f32 %v796_v46, %v283_v42  ;;  %v1370_v50 = vmax.f32 %v1306_v44, %v1790_v59  ;;  %v733_v47 = vmax.f32 %v348_v31, %v526_v54  ;;  %v1307_v63 = vmax.f32 %v1243_v56, %v23_v15  ;;  %v1983_v56 = vld [vmem:[%s3433_s0 + $0x710] sm:$0xff] }
  0x23   :  { %1518 = vst.msk [vmem:[%s3434_s1 + $0x30] sm:$0xff] %vm1511_vm1, %v1453_v55  ;;  %v528_v0 = vsel %vm498_vm0, %v525_v43, %v527_v57  ;;  %v1037_v59 = vrot.slane %v1874_v49, 1  ;;  %v350_v4 = vmax.f32 %v26_v52, %v1884_v53  ;;  %v1035_v10 = vsel %vm498_vm0, %v1032_v22, %v1034_v60  ;;  %v31_v55 = vld [vmem:[%s3433_s0 + $0xb8] sm:$0x1]  ;;  %v1998_v60 = vld [vmem:[%s3433_s0 + $0x3f0] sm:$0xff] }
  0x24   :  { %v1454_v6 = vmax.f32 %v1370_v50, %v523_v34  ;;  %v797_v7 = vmax.f32 %v733_v47, %v193_v5  ;;  %v734_v9 = vmax.f32 %v349_v51, %v528_v0  ;;  %v1371_v12 = vmax.f32 %v1307_v63, %v1825_v16  ;;  %v286_v5 = vld [vmem:[%s3433_s0 + $0xa20] sm:$0xff] }
  0x25   :  { %v1244_v13 = vmax.f32 %v860_v58, %v1035_v10  ;;  %v529_v14 = vrot.slane %v26_v52, 1  ;;  %v530_v15 = vrot.slane %v1891_v61, 1  ;;  %v1038_v20 = vsel %vm498_vm0, %v1036_v48, %v1037_v59  ;;  %v32_v47 = vld [vmem:[%s3433_s0 + $0xc0] sm:$0xff] }
  0x26   :  { %1519 = vst.msk [vmem:[%s3434_s1 + $0x38] sm:$0xff] %vm1511_vm1, %v1454_v6  ;;  %v861_v18 = vmax.f32 %v797_v7, %v284_v62  ;;  %v798_v16 = vmax.f32 %v734_v9, %v1874_v49  ;;  %v1041_v21 = vrot.slane %v196_v1, 1  ;;  %v1455_v27 = vmax.f32 %v1371_v12, %v526_v54  ;;  %v198_v54 = vld [vmem:[%s3433_s0 + $0x700] sm:$0x1]  ;;  %v288_v6 = vld [vmem:[%s3433_s0 + $0xa38] sm:$0xff] }
  0x27   :  { %v1308_v28 = vmax.f32 %v1244_v13, %v1841_v30  ;;  %v531_v29 = vsel %vm498_vm0, %v529_v14, %v530_v15  ;;  %v351_v22 = vmax.f32 %v1891_v61, %v1913_v11  ;;  %v532_v34 = vrot.slane %v28_v2, 1  ;;  %v202_v13 = vld [vmem:[%s3433_s0 + $0x720] sm:$0xff] }
  0x28   :  { %v862_v31 = vmax.f32 %v798_v16, %v285_v8  ;;  %v735_v32 = vmax.f32 %v350_v4, %v531_v29  ;;  %v1245_v33 = vmax.f32 %v861_v18, %v1038_v20  ;;  %1520 = vst.msk [vmem:[%s3434_s1 + $0x40] sm:$0xff] %vm1511_vm1, %v1455_v27  ;;  %v1039_v37 = vrot.slane %v195_v17, 1  ;;  %v201_v27 = vld [vmem:[%s3433_s0 + $0x718] sm:$0x1] }
  0x29   :  { %v1372_v30 = vmax.f32 %v1308_v28, %v1852_v36  ;;  %v1042_v38 = vrot.slane %v197_v23, 1  ;;  %v352_v3 = vmax.f32 %v29_v25, %v1938_v26  ;;  %v533_v39 = vsel %vm498_vm0, %v530_v15, %v532_v34  ;;  %v1965_v36 = vld [vmem:[%s3433_s0 + $0x3e0] sm:$0xff] }
  0x2a   :  { %v799_v19 = vmax.f32 %v735_v32, %v196_v1  ;;  %v1309_v40 = vmax.f32 %v1245_v33, %v26_v52  ;;  %v534_v42 = vrot.slane %v29_v25, 1  ;;  %v736_v45 = vmax.f32 %v351_v22, %v533_v39  ;;  %v2004_v1 = vld [vmem:[%s3433_s0 + $0xc8] sm:$0xff]  ;;  %v289_v28 = vld [vmem:[%s3433_s0 + $0xa40] sm:$0xff] }
  0x2b   :  { %v1456_v43 = vmax.f32 %v1372_v30, %v528_v0  ;;  %v1040_v46 = vsel %vm498_vm0, %v1037_v59, %v1039_v37  ;;  %v535_v44 = vrot.slane %v1947_v35, 1  ;;  %v1043_v52 = vsel %vm498_vm0, %v1041_v21, %v1042_v38  ;;  %v2042_v32 = vld [vmem:[%s3433_s0 + $0x728] sm:$0xff]  ;;  %v35_v37 = vld [vmem:[%s3433_s0 + $0xd8] sm:$0xff] }
  0x2c   :  { %v863_v48 = vmax.f32 %v799_v19, %v286_v5  ;;  %v1373_v49 = vmax.f32 %v1309_v40, %v1884_v53  ;;  %v1246_v51 = vmax.f32 %v862_v31, %v1040_v46  ;;  %v800_v53 = vmax.f32 %v736_v45, %v197_v23  ;;  %v34_v23 = vld [vmem:[%s3433_s0 + $0xd0] sm:$0x1] }
  0x2d   :  { %1521 = vst.msk [vmem:[%s3434_s1 + $0x48] sm:$0xff] %vm1511_vm1, %v1456_v43  ;;  %v536_v57 = vsel %vm498_vm0, %v534_v42, %v535_v44  ;;  %v1046_v58 = vrot.slane %v199_v41, 1  ;;  %v353_v50 = vmax.f32 %v1947_v35, %v1965_v36  ;;  %v537_v7 = vrot.slane %v31_v55, 1  ;;  %v290_v19 = vld [vmem:[%s3433_s0 + $0xa50] sm:$0xff] }
  0x2e   :  { %v1457_v62 = vmax.f32 %v1373_v49, %v531_v29  ;;  %v1310_v63 = vmax.f32 %v1246_v51, %v1891_v61  ;;  %v737_v0 = vmax.f32 %v352_v3, %v536_v57  ;;  %v1247_v59 = vmax.f32 %v863_v48, %v1043_v52  ;;  %v205_v49 = vld [vmem:[%s3433_s0 + $0x738] sm:$0xff] }
  0x2f   :  { %v864_v4 = vmax.f32 %v800_v53, %v287_v24  ;;  %v1044_v8 = vrot.slane %v198_v54, 1  ;;  %v1047_v9 = vrot.slane %v1983_v56, 1  ;;  %v354_v14 = vmax.f32 %v32_v47, %v1998_v60  ;;  %v37_v53 = vld [vmem:[%s3433_s0 + $0xe8] sm:$0x1] }
  0x30   :  { %1522 = vst.msk [vmem:[%s3434_s1 + $0x50] sm:$0xff] %vm1511_vm1, %v1457_v62  ;;  %v1374_v61 = vmax.f32 %v1310_v63, %v1913_v11  ;;  %v801_v10 = vmax.f32 %v737_v0, %v199_v41  ;;  %v1311_v12 = vmax.f32 %v1247_v59, %v29_v25  ;;  %v538_v15 = vsel %vm498_vm0, %v535_v44, %v537_v7  ;;  %v2029_v25 = vld [vmem:[%s3433_s0 + $0x3f8] sm:$0xff]  ;;  %v204_v62 = vld [vmem:[%s3433_s0 + $0x730] sm:$0x1] }
  0x31   :  { %v1045_v2 = vsel %vm498_vm0, %v1042_v38, %v1044_v8  ;;  %v539_v17 = vrot.slane %v32_v47, 1  ;;  %v540_v18 = vrot.slane %v2004_v1, 1  ;;  %v738_v11 = vmax.f32 %v353_v50, %v538_v15  ;;  %v2055_v38 = vld [vmem:[%s3433_s0 + $0x408] sm:$0xff]  ;;  %v38_v7 = vld [vmem:[%s3433_s0 + $0xf0] sm:$0xff]  ;;  %v2110_v8 = vld [vmem:[%s3433_s0 + $0x420] sm:$0xff] }
  0x32   :  { %v1458_v16 = vmax.f32 %v1374_v61, %v533_v39  ;;  %v865_v20 = vmax.f32 %v801_v10, %v288_v6  ;;  %v1375_v21 = vmax.f32 %v1311_v12, %v1938_v26  ;;  %v1248_v29 = vmax.f32 %v864_v4, %v1045_v2  ;;  %v2102_v6 = vld [vmem:[%s3433_s0 + $0x740] sm:$0xff]  ;;  %v2127_v2 = vld [vmem:[%s3433_s0 + $0xf8] sm:$0xff] }
  0x33   :  { %v541_v26 = vsel %vm498_vm0, %v539_v17, %v540_v18  ;;  %v1048_v22 = vsel %vm498_vm0, %v1046_v58, %v1047_v9  ;;  %v1051_v31 = vrot.slane %v202_v13, 1  ;;  %v802_v34 = vmax.f32 %v738_v11, %v1983_v56  ;;  %v291_v58 = vld [vmem:[%s3433_s0 + $0xa58] sm:$0xff]  ;;  %v292_v17 = vld [vmem:[%s3433_s0 + $0xa68] sm:$0xff] }
  0x34   :  { %1523 = vst.msk [vmem:[%s3434_s1 + $0x58] sm:$0xff] %vm1511_vm1, %v1458_v16  ;;  %v1459_v33 = vmax.f32 %v1375_v21, %v536_v57  ;;  %v739_v30 = vmax.f32 %v354_v14, %v541_v26  ;;  %v1249_v5 = vmax.f32 %v865_v20, %v1048_v22  ;;  %v1312_v3 = vmax.f32 %v1248_v29, %v1947_v35  ;;  %v2071_v35 = vld [vmem:[%s3433_s0 + $0xe0] sm:$0xff]  ;;  %v208_v21 = vld [vmem:[%s3433_s0 + $0x750] sm:$0xff] }
  0x35   :  { %v355_v40 = vmax.f32 %v2004_v1, %v2029_v25  ;;  %v542_v39 = vrot.slane %v34_v23, 1  ;;  %v1049_v41 = vrot.slane %v201_v27, 1  ;;  %v866_v42 = vmax.f32 %v802_v34, %v289_v28  ;;  %v293_v27 = vld [vmem:[%s3433_s0 + $0xa70] sm:$0xff]  ;;  %v40_v34 = vld [vmem:[%s3433_s0 + $0x100] sm:$0x1] }
  0x36   :  { %1524 = vst.msk [vmem:[%s3434_s1 + $0x60] sm:$0xff] %vm1511_vm1, %v1459_v33  ;;  %v803_v43 = vmax.f32 %v739_v30, %v202_v13  ;;  %v1313_v24 = vmax.f32 %v1249_v5, %v32_v47  ;;  %v1052_v45 = vrot.slane %v2042_v32, 1  ;;  %v1376_v46 = vmax.f32 %v1312_v3, %v1965_v36  ;;  %v2087_v36 = vld [vmem:[%s3433_s0 + $0x410] sm:$0xff]  ;;  %v207_v30 = vld [vmem:[%s3433_s0 + $0x748] sm:$0x1] }
  0x37   :  { %v543_v44 = vsel %vm498_vm0, %v540_v18, %v542_v39  ;;  %v1050_v48 = vsel %vm498_vm0, %v1047_v9, %v1049_v41  ;;  %v356_v51 = vmax.f32 %v35_v37, %v2055_v38  ;;  %v544_v50 = vrot.slane %v35_v37, 1  ;;  %v2170_v39 = vld [vmem:[%s3433_s0 + $0x438] sm:$0xff] }
  0x38   :  { %v867_v52 = vmax.f32 %v803_v43, %v290_v19  ;;  %v1377_v55 = vmax.f32 %v1313_v24, %v1998_v60  ;;  %v740_v54 = vmax.f32 %v355_v40, %v543_v44  ;;  %v1250_v56 = vmax.f32 %v866_v42, %v1050_v48  ;;  %v209_v19 = vld [vmem:[%s3433_s0 + $0x758] sm:$0xff]  ;;  %v41_v40 = vld [vmem:[%s3433_s0 + $0x108] sm:$0xff] }
  0x39   :  { %v1460_v57 = vmax.f32 %v1376_v46, %v538_v15  ;;  %v545_v47 = vrot.slane %v2071_v35, 1  ;;  %v1053_v60 = vsel %vm498_vm0, %v1051_v31, %v1052_v45  ;;  %v1056_v4 = vrot.slane %v205_v49, 1 }
  0x3a   :  { %v1461_v63 = vmax.f32 %v1377_v55, %v541_v26  ;;  %v804_v0 = vmax.f32 %v740_v54, %v2042_v32  ;;  %v1314_v59 = vmax.f32 %v1250_v56, %v2004_v1  ;;  %v1251_v9 = vmax.f32 %v867_v52, %v1053_v60  ;;  %v2145_v26 = vld [vmem:[%s3433_s0 + $0x428] sm:$0xff] }
  0x3b   :  { %1525 = vst.msk [vmem:[%s3434_s1 + $0x68] sm:$0xff] %vm1511_vm1, %v1460_v57  ;;  %v546_v1 = vsel %vm498_vm0, %v544_v50, %v545_v47  ;;  %v357_v61 = vmax.f32 %v2071_v35, %v2087_v36  ;;  %v547_v10 = vrot.slane %v37_v53, 1  ;;  %v1054_v15 = vrot.slane %v204_v62, 1  ;;  %v295_v60 = vld [vmem:[%s3433_s0 + $0xa88] sm:$0xff] }
  0x3c   :  { %1526 = vst.msk [vmem:[%s3434_s1 + $0x70] sm:$0xff] %vm1511_vm1, %v1461_v63  ;;  %v868_v12 = vmax.f32 %v804_v0, %v291_v58  ;;  %v1378_v13 = vmax.f32 %v1314_v59, %v2029_v25  ;;  %v741_v14 = vmax.f32 %v356_v51, %v546_v1  ;;  %v1315_v18 = vmax.f32 %v1251_v9, %v35_v37  ;;  %v294_v51 = vld [vmem:[%s3433_s0 + $0xa80] sm:$0xff]  ;;  %v211_v58 = vld [vmem:[%s3433_s0 + $0x768] sm:$0xff] }
  0x3d   :  { %v548_v16 = vsel %vm498_vm0, %v545_v47, %v547_v10  ;;  %v1057_v20 = vrot.slane %v2102_v6, 1  ;;  %v358_v11 = vmax.f32 %v38_v7, %v2110_v8  ;;  %v1055_v29 = vsel %vm498_vm0, %v1052_v45, %v1054_v15  ;;  %v210_v9 = vld [vmem:[%s3433_s0 + $0x760] sm:$0x1]  ;;  %v2230_v15 = vld [vmem:[%s3433_s0 + $0x450] sm:$0xff] }
  0x3e   :  { %v1462_v23 = vmax.f32 %v1378_v13, %v543_v44  ;;  %v805_v25 = vmax.f32 %v741_v14, %v205_v49  ;;  %v742_v28 = vmax.f32 %v357_v61, %v548_v16  ;;  %v1379_v22 = vmax.f32 %v1315_v18, %v2055_v38  ;;  %v2179_v49 = vld [vmem:[%s3433_s0 + $0x110] sm:$0xff]  ;;  %v44_v14 = vld [vmem:[%s3433_s0 + $0x120] sm:$0xff] }
  0x3f   :  { %v1252_v31 = vmax.f32 %v868_v12, %v1055_v29  ;;  %v549_v32 = vrot.slane %v38_v7, 1  ;;  %v550_v33 = vrot.slane %v2127_v2, 1  ;;  %v1058_v38 = vsel %vm498_vm0, %v1056_v4, %v1057_v20  ;;  %v2215_v61 = vld [vmem:[%s3433_s0 + $0x770] sm:$0xff] }
  0x40   :  { %1527 = vst.msk [vmem:[%s3434_s1 + $0x78] sm:$0xff] %vm1511_vm1, %v1462_v23  ;;  %v869_v5 = vmax.f32 %v805_v25, %v292_v17  ;;  %v806_v37 = vmax.f32 %v742_v28, %v2102_v6  ;;  %v1061_v3 = vrot.slane %v208_v21, 1  ;;  %v1463_v41 = vmax.f32 %v1379_v22, %v546_v1  ;;  %v43_v1 = vld [vmem:[%s3433_s0 + $0x118] sm:$0x1] }
  0x41   :  { %v1316_v42 = vmax.f32 %v1252_v31, %v2071_v35  ;;  %v551_v43 = vsel %vm498_vm0, %v549_v32, %v550_v33  ;;  %v359_v24 = vmax.f32 %v2127_v2, %v2145_v26  ;;  %v552_v48 = vrot.slane %v40_v34, 1  ;;  %v296_v23 = vld [vmem:[%s3433_s0 + $0xa98] sm:$0xff]  ;;  %v214_v31 = vld [vmem:[%s3433_s0 + $0x780] sm:$0xff] }
  0x42   :  { %v870_v45 = vmax.f32 %v806_v37, %v293_v27  ;;  %v743_v46 = vmax.f32 %v358_v11, %v551_v43  ;;  %v1253_v44 = vmax.f32 %v869_v5, %v1058_v38  ;;  %1528 = vst.msk [vmem:[%s3434_s1 + $0x80] sm:$0xff] %vm1511_vm1, %v1463_v41  ;;  %v1059_v52 = vrot.slane %v207_v30, 1  ;;  %v213_v41 = vld [vmem:[%s3433_s0 + $0x778] sm:$0x1] }
  0x43   :  { %v1380_v35 = vmax.f32 %v1316_v42, %v2087_v36  ;;  %v1062_v55 = vrot.slane %v209_v19, 1  ;;  %v360_v54 = vmax.f32 %v41_v40, %v2170_v39  ;;  %v553_v57 = vsel %vm498_vm0, %v550_v33, %v552_v48  ;;  %v2197_v36 = vld [vmem:[%s3433_s0 + $0x440] sm:$0xff] }
  0x44   :  { %v807_v56 = vmax.f32 %v743_v46, %v208_v21  ;;  %v1317_v53 = vmax.f32 %v1253_v44, %v38_v7  ;;  %v554_v50 = vrot.slane %v41_v40, 1  ;;  %v744_v62 = vmax.f32 %v359_v24, %v553_v57  ;;  %v2236_v21 = vld [vmem:[%s3433_s0 + $0x128] sm:$0xff]  ;;  %v297_v42 = vld [vmem:[%s3433_s0 + $0xaa0] sm:$0xff] }
  0x45   :  { %v1464_v47 = vmax.f32 %v1380_v35, %v548_v16  ;;  %v1060_v63 = vsel %vm498_vm0, %v1057_v20, %v1059_v52  ;;  %v555_v0 = vrot.slane %v2179_v49, 1  ;;  %v1063_v7 = vsel %vm498_vm0, %v1061_v3, %v1062_v55  ;;  %v2274_v46 = vld [vmem:[%s3433_s0 + $0x788] sm:$0xff]  ;;  %v47_v52 = vld [vmem:[%s3433_s0 + $0x138] sm:$0xff] }
  0x46   :  { %v871_v59 = vmax.f32 %v807_v56, %v294_v51  ;;  %v1381_v4 = vmax.f32 %v1317_v53, %v2110_v8  ;;  %v1254_v6 = vmax.f32 %v870_v45, %v1060_v63  ;;  %v808_v8 = vmax.f32 %v744_v62, %v209_v19  ;;  %v46_v19 = vld [vmem:[%s3433_s0 + $0x130] sm:$0x1] }
  0x47   :  { %1529 = vst.msk [vmem:[%s3434_s1 + $0x88] sm:$0xff] %vm1511_vm1, %v1464_v47  ;;  %v556_v10 = vsel %vm498_vm0, %v554_v50, %v555_v0  ;;  %v1066_v12 = vrot.slane %v211_v58, 1  ;;  %v361_v13 = vmax.f32 %v2179_v49, %v2197_v36  ;;  %v557_v25 = vrot.slane %v43_v1, 1  ;;  %v298_v56 = vld [vmem:[%s3433_s0 + $0xab0] sm:$0xff] }
  0x48   :  { %v1465_v17 = vmax.f32 %v1381_v4, %v551_v43  ;;  %v1318_v18 = vmax.f32 %v1254_v6, %v2127_v2  ;;  %v745_v16 = vmax.f32 %v360_v54, %v556_v10  ;;  %v1255_v20 = vmax.f32 %v871_v59, %v1063_v7  ;;  %v217_v4 = vld [vmem:[%s3433_s0 + $0x798] sm:$0xff] }
  0x49   :  { %v872_v11 = vmax.f32 %v808_v8, %v295_v60  ;;  %v1064_v27 = vrot.slane %v210_v9, 1  ;;  %v1067_v28 = vrot.slane %v2215_v61, 1  ;;  %v362_v32 = vmax.f32 %v44_v14, %v2230_v15  ;;  %v49_v8 = vld [vmem:[%s3433_s0 + $0x148] sm:$0x1] }
  0x4a   :  { %1530 = vst.msk [vmem:[%s3434_s1 + $0x90] sm:$0xff] %vm1511_vm1, %v1465_v17  ;;  %v1382_v2 = vmax.f32 %v1318_v18, %v2145_v26  ;;  %v809_v29 = vmax.f32 %v745_v16, %v211_v58  ;;  %v1319_v22 = vmax.f32 %v1255_v20, %v41_v40  ;;  %v558_v33 = vsel %vm498_vm0, %v555_v0, %v557_v25  ;;  %v2261_v40 = vld [vmem:[%s3433_s0 + $0x458] sm:$0xff]  ;;  %v216_v17 = vld [vmem:[%s3433_s0 + $0x790] sm:$0x1] }
  0x4b   :  { %v1065_v34 = vsel %vm498_vm0, %v1062_v55, %v1064_v27  ;;  %v559_v30 = vrot.slane %v44_v14, 1  ;;  %v560_v5 = vrot.slane %v2236_v21, 1  ;;  %v746_v26 = vmax.f32 %v361_v13, %v558_v33  ;;  %v2287_v55 = vld [vmem:[%s3433_s0 + $0x468] sm:$0xff]  ;;  %v50_v25 = vld [vmem:[%s3433_s0 + $0x150] sm:$0xff]  ;;  %v2342_v27 = vld [vmem:[%s3433_s0 + $0x480] sm:$0xff] }
  0x4c   :  { %v1466_v37 = vmax.f32 %v1382_v2, %v553_v57  ;;  %v873_v38 = vmax.f32 %v809_v29, %v296_v23  ;;  %v1383_v3 = vmax.f32 %v1319_v22, %v2170_v39  ;;  %v1256_v43 = vmax.f32 %v872_v11, %v1065_v34  ;;  %v2334_v23 = vld [vmem:[%s3433_s0 + $0x7a0] sm:$0xff]  ;;  %v2359_v34 = vld [vmem:[%s3433_s0 + $0x158] sm:$0xff] }
  0x4d   :  { %v561_v39 = vsel %vm498_vm0, %v559_v30, %v560_v5  ;;  %v1068_v24 = vsel %vm498_vm0, %v1066_v12, %v1067_v28  ;;  %v1071_v45 = vrot.slane %v214_v31, 1  ;;  %v810_v48 = vmax.f32 %v746_v26, %v2215_v61  ;;  %v299_v12 = vld [vmem:[%s3433_s0 + $0xab8] sm:$0xff]  ;;  %v300_v30 = vld [vmem:[%s3433_s0 + $0xac8] sm:$0xff] }
  0x4e   :  { %1531 = vst.msk [vmem:[%s3434_s1 + $0x98] sm:$0xff] %vm1511_vm1, %v1466_v37  ;;  %v1467_v44 = vmax.f32 %v1383_v3, %v556_v10  ;;  %v747_v35 = vmax.f32 %v362_v32, %v561_v39  ;;  %v1257_v51 = vmax.f32 %v873_v38, %v1068_v24  ;;  %v1320_v54 = vmax.f32 %v1256_v43, %v2179_v49  ;;  %v2303_v49 = vld [vmem:[%s3433_s0 + $0x140] sm:$0xff]  ;;  %v220_v3 = vld [vmem:[%s3433_s0 + $0x7b0] sm:$0xff]  ;;  %v2374_v43 = vld [vmem:[%s3433_s0 + $0x488] sm:$0xff] }
  0x4f   :  { %v363_v53 = vmax.f32 %v2236_v21, %v2261_v40  ;;  %v562_v57 = vrot.slane %v46_v19, 1  ;;  %v1069_v58 = vrot.slane %v213_v41, 1  ;;  %v874_v50 = vmax.f32 %v810_v48, %v297_v42  ;;  %v301_v24 = vld [vmem:[%s3433_s0 + $0xad0] sm:$0xff]  ;;  %v52_v48 = vld [vmem:[%s3433_s0 + $0x160] sm:$0x1] }
  0x50   :  { %1532 = vst.msk [vmem:[%s3434_s1 + $0xa0] sm:$0xff] %vm1511_vm1, %v1467_v44  ;;  %v811_v47 = vmax.f32 %v747_v35, %v214_v31  ;;  %v1321_v60 = vmax.f32 %v1257_v51, %v44_v14  ;;  %v1072_v62 = vrot.slane %v2274_v46, 1  ;;  %v1384_v63 = vmax.f32 %v1320_v54, %v2197_v36  ;;  %v2319_v36 = vld [vmem:[%s3433_s0 + $0x470] sm:$0xff]  ;;  %v2387_v35 = vld [vmem:[%s3433_s0 + $0x7b8] sm:$0xff] }
  0x51   :  { %v563_v0 = vsel %vm498_vm0, %v560_v5, %v562_v57  ;;  %v1070_v59 = vsel %vm498_vm0, %v1067_v28, %v1069_v58  ;;  %v364_v6 = vmax.f32 %v47_v52, %v2287_v55  ;;  %v564_v13 = vrot.slane %v47_v52, 1  ;;  %v2404_v57 = vld [vmem:[%s3433_s0 + $0x498] sm:$0xff] }
  0x52   :  { %v875_v7 = vmax.f32 %v811_v47, %v298_v56  ;;  %v1385_v1 = vmax.f32 %v1321_v60, %v2230_v15  ;;  %v748_v9 = vmax.f32 %v363_v53, %v563_v0  ;;  %v1258_v61 = vmax.f32 %v874_v50, %v1070_v59  ;;  %v219_v56 = vld [vmem:[%s3433_s0 + $0x7a8] sm:$0x1] }
  0x53   :  { %v1468_v10 = vmax.f32 %v1384_v63, %v558_v33  ;;  %v565_v14 = vrot.slane %v2303_v49, 1  ;;  %v1073_v15 = vsel %vm498_vm0, %v1071_v45, %v1072_v62  ;;  %v1076_v11 = vrot.slane %v217_v4, 1  ;;  %v53_v53 = vld [vmem:[%s3433_s0 + $0x168] sm:$0xff] }
  0x54   :  { %v1469_v18 = vmax.f32 %v1385_v1, %v561_v39  ;;  %v812_v16 = vmax.f32 %v748_v9, %v2274_v46  ;;  %v1322_v20 = vmax.f32 %v1258_v61, %v2236_v21  ;;  %v1259_v28 = vmax.f32 %v875_v7, %v1073_v15  ;;  %v303_v15 = vld [vmem:[%s3433_s0 + $0xae8] sm:$0xff] }
  0x55   :  { %1533 = vst.msk [vmem:[%s3434_s1 + $0xa8] sm:$0xff] %vm1511_vm1, %v1468_v10  ;;  %v566_v21 = vsel %vm498_vm0, %v564_v13, %v565_v14  ;;  %v365_v2 = vmax.f32 %v2303_v49, %v2319_v36  ;;  %v567_v29 = vrot.slane %v49_v8, 1  ;;  %v1074_v33 = vrot.slane %v216_v17, 1 }
  0x56   :  { %1534 = vst.msk [vmem:[%s3434_s1 + $0xb0] sm:$0xff] %vm1511_vm1, %v1469_v18  ;;  %v876_v22 = vmax.f32 %v812_v16, %v299_v12  ;;  %v1386_v31 = vmax.f32 %v1322_v20, %v2261_v40  ;;  %v749_v32 = vmax.f32 %v364_v6, %v566_v21  ;;  %v1323_v5 = vmax.f32 %v1259_v28, %v47_v52  ;;  %v302_v6 = vld [vmem:[%s3433_s0 + $0xae0] sm:$0xff]  ;;  %v223_v12 = vld [vmem:[%s3433_s0 + $0x7c8] sm:$0xff] }
  0x57   :  { %v568_v37 = vsel %vm498_vm0, %v565_v14, %v567_v29  ;;  %v1077_v38 = vrot.slane %v2334_v23, 1  ;;  %v366_v26 = vmax.f32 %v50_v25, %v2342_v27  ;;  %v1075_v42 = vsel %vm498_vm0, %v1072_v62, %v1074_v33  ;;  %v222_v28 = vld [vmem:[%s3433_s0 + $0x7c0] sm:$0x1] }
  0x58   :  { %v1470_v19 = vmax.f32 %v1386_v31, %v563_v0  ;;  %v813_v40 = vmax.f32 %v749_v32, %v217_v4  ;;  %v750_v41 = vmax.f32 %v365_v2, %v568_v37  ;;  %v1387_v39 = vmax.f32 %v1323_v5, %v2287_v55  ;;  %v2413_v4 = vld [vmem:[%s3433_s0 + $0x170] sm:$0xff]  ;;  %v56_v32 = vld [vmem:[%s3433_s0 + $0x180] sm:$0xff] }
  0x59   :  { %v1260_v45 = vmax.f32 %v876_v22, %v1075_v42  ;;  %v569_v46 = vrot.slane %v50_v25, 1  ;;  %v570_v44 = vrot.slane %v2359_v34, 1  ;;  %v1078_v55 = vsel %vm498_vm0, %v1076_v11, %v1077_v38  ;;  %v224_v2 = vld [vmem:[%s3433_s0 + $0x7d0] sm:$0xff] }
  0x5a   :  { %1535 = vst.msk [vmem:[%s3434_s1 + $0xb8] sm:$0xff] %vm1511_vm1, %v1470_v19  ;;  %v877_v51 = vmax.f32 %v813_v40, %v300_v30  ;;  %v814_v52 = vmax.f32 %v750_v41, %v2334_v23  ;;  %v1081_v54 = vrot.slane %v220_v3, 1  ;;  %v1471_v58 = vmax.f32 %v1387_v39, %v566_v21  ;;  %v55_v21 = vld [vmem:[%s3433_s0 + $0x178] sm:$0x1] }
  0x5b   :  { %v1324_v50 = vmax.f32 %v1260_v45, %v2303_v49  ;;  %v571_v47 = vsel %vm498_vm0, %v569_v46, %v570_v44  ;;  %v367_v60 = vmax.f32 %v2359_v34, %v2374_v43  ;;  %v572_v59 = vrot.slane %v52_v48, 1  ;;  %v58_v45 = vld [vmem:[%s3433_s0 + $0x190] sm:$0x1]  ;;  %v225_v46 = vld [vmem:[%s3433_s0 + $0x7d8] sm:$0x1] }
  0x5c   :  { %v878_v62 = vmax.f32 %v814_v52, %v301_v24  ;;  %v751_v63 = vmax.f32 %v366_v26, %v571_v47  ;;  %v1261_v0 = vmax.f32 %v877_v51, %v1078_v55  ;;  %1536 = vst.msk [vmem:[%s3434_s1 + $0xc0] sm:$0xff] %vm1511_vm1, %v1471_v58  ;;  %v1079_v7 = vrot.slane %v219_v56, 1  ;;  %v304_v26 = vld [vmem:[%s3433_s0 + $0xaf8] sm:$0xff]  ;;  %v144_v52 = vld [vmem:[%s3433_s0 + $0x4c8] sm:$0xff]  ;;  %v2495_v58 = vld [vmem:[%s3433_s0 + $0x1b0] sm:$0xff] }
  0x5d   :  { %v1388_v49 = vmax.f32 %v1324_v50, %v2319_v36  ;;  %v1082_v1 = vrot.slane %v2387_v35, 1  ;;  %v368_v9 = vmax.f32 %v53_v53, %v2404_v57  ;;  %v573_v10 = vsel %vm498_vm0, %v570_v44, %v572_v59  ;;  %v2432_v36 = vld [vmem:[%s3433_s0 + $0x4a0] sm:$0xff] }
  0x5e   :  { %v815_v61 = vmax.f32 %v751_v63, %v220_v3  ;;  %v1325_v8 = vmax.f32 %v1261_v0, %v50_v25  ;;  %v574_v13 = vrot.slane %v53_v53, 1  ;;  %v752_v17 = vmax.f32 %v367_v60, %v573_v10  ;;  %v2500_v50 = vld [vmem:[%s3433_s0 + $0x4e0] sm:$0xff] }
  0x5f   :  { %v1472_v14 = vmax.f32 %v1388_v49, %v568_v37  ;;  %v1080_v18 = vsel %vm498_vm0, %v1077_v38, %v1079_v7  ;;  %v575_v16 = vrot.slane %v2413_v4, 1  ;;  %v1083_v25 = vsel %vm498_vm0, %v1081_v54, %v1082_v1  ;;  %v2465_v38 = vld [vmem:[%s3433_s0 + $0x188] sm:$0xff]  ;;  %v2509_v0 = vld [vmem:[%s3433_s0 + $0x1a0] sm:$0xff]  ;;  %v2518_v7 = vld [vmem:[%s3433_s0 + $0x1b8] sm:$0xff] }
  0x60   :  { %v879_v20 = vmax.f32 %v815_v61, %v302_v6  ;;  %v1389_v11 = vmax.f32 %v1325_v8, %v2342_v27  ;;  %v1262_v23 = vmax.f32 %v878_v62, %v1080_v18  ;;  %v816_v27 = vmax.f32 %v752_v17, %v2387_v35  ;;  %v142_v8 = vld [vmem:[%s3433_s0 + $0x4b0] sm:$0xff] }
  0x61   :  { %1537 = vst.msk [vmem:[%s3434_s1 + $0xc8] sm:$0xff] %vm1511_vm1, %v1472_v14  ;;  %v576_v29 = vsel %vm498_vm0, %v574_v13, %v575_v16  ;;  %v1086_v22 = vrot.slane %v223_v12, 1  ;;  %v369_v31 = vmax.f32 %v2413_v4, %v2432_v36  ;;  %v577_v19 = vrot.slane %v55_v21, 1  ;;  %v2532_v13 = vld [vmem:[%s3433_s0 + $0x800] sm:$0xff]  ;;  %v2543_v17 = vld [vmem:[%s3433_s0 + $0x810] sm:$0xff] }
  0x62   :  { %v1473_v33 = vmax.f32 %v1389_v11, %v571_v47  ;;  %v1326_v30 = vmax.f32 %v1262_v23, %v2359_v34  ;;  %v753_v5 = vmax.f32 %v368_v9, %v576_v29  ;;  %v1263_v37 = vmax.f32 %v879_v20, %v1083_v25  ;;  %v305_v47 = vld [vmem:[%s3433_s0 + $0xb00] sm:$0xff]  ;;  %v143_v11 = vld [vmem:[%s3433_s0 + $0x4b8] sm:$0xff] }
  0x63   :  { %v880_v3 = vmax.f32 %v816_v27, %v303_v15  ;;  %v1084_v40 = vrot.slane %v222_v28, 1  ;;  %v1087_v41 = vrot.slane %v224_v2, 1  ;;  %v1433_v24 = vrot.slane %v56_v32, 1 }
  0x64   :  { %1538 = vst.msk [vmem:[%s3434_s1 + $0xd0] sm:$0xff] %vm1511_vm1, %v1473_v33  ;;  %v1390_v34 = vmax.f32 %v1326_v30, %v2374_v43  ;;  %v817_v42 = vmax.f32 %v753_v5, %v223_v12  ;;  %v1327_v39 = vmax.f32 %v1263_v37, %v53_v53  ;;  %v578_v44 = vsel %vm498_vm0, %v575_v16, %v577_v19  ;;  %v59_v43 = vld [vmem:[%s3433_s0 + $0x198] sm:$0xff]  ;;  %v306_v33 = vld [vmem:[%s3433_s0 + $0xb28] sm:$0xff] }
  0x65   :  { %v1085_v48 = vsel %vm498_vm0, %v1082_v1, %v1084_v40  ;;  %v1088_v35 = vsel %vm498_vm0, %v1086_v22, %v1087_v41  ;;  %v1434_v51 = vrot.slane %v2465_v38, 1  ;;  %v754_v53 = vmax.f32 %v369_v31, %v578_v44  ;;  %v226_v1 = vld [vmem:[%s3433_s0 + $0x7f8] sm:$0xff]  ;;  %v61_v22 = vld [vmem:[%s3433_s0 + $0x1a8] sm:$0x1] }
  0x66   :  { %v1474_v55 = vmax.f32 %v1390_v34, %v573_v10  ;;  %v881_v54 = vmax.f32 %v817_v42, %v304_v26  ;;  %v1391_v56 = vmax.f32 %v1327_v39, %v2404_v57  ;;  %v1264_v60 = vmax.f32 %v880_v3, %v1085_v48  ;;  %v2563_v31 = vld [vmem:[%s3433_s0 + $0x4e8] sm:$0xff]  ;;  %v64_v3 = vld [vmem:[%s3433_s0 + $0x1c0] sm:$0x1]  ;;  %v230_v42 = vld [vmem:[%s3433_s0 + $0x818] sm:$0xff] }
  0x67   :  { %v1435_v62 = vsel %vm498_vm0, %v1433_v24, %v1434_v51  ;;  %v1089_v63 = vrot.slane %v225_v46, 1  ;;  %v1436_v57 = vrot.slane %v58_v45, 1  ;;  %v818_v49 = vmax.f32 %v754_v53, %v224_v2  ;;  %v228_v26 = vld [vmem:[%s3433_s0 + $0x808] sm:$0x1]  ;;  %v2590_v24 = vld [vmem:[%s3433_s0 + $0x4f8] sm:$0xff]  ;;  %v66_v53 = vld [vmem:[%s3433_s0 + $0x1d0] sm:$0xff] }
  0x68   :  { %1539 = vst.msk [vmem:[%s3434_s1 + $0xd8] sm:$0xff] %vm1511_vm1, %v1474_v55  ;;  %v1475_v59 = vmax.f32 %v1391_v56, %v576_v29  ;;  %v1265_v6 = vmax.f32 %v881_v54, %v1088_v35  ;;  %v370_v9 = vmax.f32 %v59_v43, %v144_v52  ;;  %v1328_v61 = vmax.f32 %v1264_v60, %v2413_v4  ;;  %v65_v39 = vld [vmem:[%s3433_s0 + $0x1c8] sm:$0xff] }
  0x69   :  { %v1090_v10 = vsel %vm498_vm0, %v1087_v41, %v1089_v63  ;;  %v1437_v12 = vsel %vm498_vm0, %v1434_v51, %v1436_v57  ;;  %v372_v14 = vmax.f32 %v2495_v58, %v2500_v50  ;;  %v882_v4 = vmax.f32 %v818_v49, %v305_v47  ;;  %v2614_v47 = vld [vmem:[%s3433_s0 + $0x828] sm:$0xff] }
  0x6a   :  { %1540 = vst.msk [vmem:[%s3434_s1 + $0xe0] sm:$0xff] %vm1511_vm1, %v1475_v59  ;;  %v1329_v15 = vmax.f32 %v1265_v6, %v56_v32  ;;  %v579_v18 = vrot.slane %v59_v43, 1  ;;  %v580_v16 = vrot.slane %v2509_v0, 1  ;;  %v1392_v20 = vmax.f32 %v1328_v61, %v2432_v36  ;;  %v145_v36 = vld [vmem:[%s3433_s0 + $0x4d0] sm:$0xff]  ;;  %v2623_v59 = vld [vmem:[%s3433_s0 + $0x500] sm:$0xff] }
  0x6b   :  { %v584_v23 = vrot.slane %v2495_v58, 1  ;;  %v585_v25 = vrot.slane %v2518_v7, 1  ;;  %v1091_v21 = vrot.slane %v226_v1, 1  ;;  %v1266_v2 = vmax.f32 %v882_v4, %v1090_v10  ;;  %v307_v6 = vld [vmem:[%s3433_s0 + $0xb30] sm:$0xff]  ;;  %v231_v10 = vld [vmem:[%s3433_s0 + $0x820] sm:$0x1] }
  0x6c   :  { %v1393_v28 = vmax.f32 %v1329_v15, %v142_v8  ;;  %v581_v27 = vsel %vm498_vm0, %v579_v18, %v580_v16  ;;  %v1092_v29 = vrot.slane %v2532_v13, 1  ;;  %v1476_v32 = vmax.f32 %v1392_v20, %v578_v44  ;;  %v67_v8 = vld [vmem:[%s3433_s0 + $0x1d8] sm:$0x1] }
  0x6d   :  { %v2569_v30 = vsel %vm498_vm0, %v584_v23, %v585_v25  ;;  %v755_v5 = vmax.f32 %v370_v9, %v581_v27  ;;  %v1096_v37 = vrot.slane %v2543_v17, 1  ;;  %v1330_v40 = vmax.f32 %v1266_v2, %v2465_v38  ;;  %v308_v38 = vld [vmem:[%s3433_s0 + $0xb40] sm:$0xff] }
  0x6e   :  { %v1477_v19 = vmax.f32 %v1393_v28, %v1435_v62  ;;  %v757_v41 = vmax.f32 %v372_v14, %v2569_v30  ;;  %v1093_v34 = vsel %vm498_vm0, %v1091_v21, %v1092_v29  ;;  %1541 = vst.msk [vmem:[%s3434_s1 + $0xe8] sm:$0xff] %vm1511_vm1, %v1476_v32  ;;  %v371_v46 = vmax.f32 %v2509_v0, %v145_v36  ;;  %v2661_v36 = vld [vmem:[%s3433_s0 + $0x510] sm:$0xff] }
  0x6f   :  { %v819_v45 = vmax.f32 %v755_v5, %v226_v1  ;;  %v373_v44 = vmax.f32 %v2518_v7, %v2563_v31  ;;  %v582_v48 = vrot.slane %v61_v22, 1  ;;  %v1394_v35 = vmax.f32 %v1330_v40, %v143_v11  ;;  %v2650_v11 = vld [vmem:[%s3433_s0 + $0x830] sm:$0xff] }
  0x70   :  { %1542 = vst.msk [vmem:[%s3434_s1 + $0xf0] sm:$0xff] %vm1511_vm1, %v1477_v19  ;;  %v821_v51 = vmax.f32 %v757_v41, %v2543_v17  ;;  %v587_v43 = vrot.slane %v64_v3, 1  ;;  %v1094_v52 = vrot.slane %v228_v26, 1  ;;  %v1097_v56 = vrot.slane %v230_v42, 1  ;;  %v2672_v3 = vld [vmem:[%s3433_s0 + $0x1e8] sm:$0xff] }
  0x71   :  { %v883_v55 = vmax.f32 %v819_v45, %v306_v33  ;;  %v583_v54 = vsel %vm498_vm0, %v580_v16, %v582_v48  ;;  %v374_v60 = vmax.f32 %v65_v39, %v2590_v24  ;;  %v1478_v62 = vmax.f32 %v1394_v35, %v1437_v12  ;;  %v309_v12 = vld [vmem:[%s3433_s0 + $0xb48] sm:$0xff]  ;;  %v310_v33 = vld [vmem:[%s3433_s0 + $0xb58] sm:$0xff]  ;;  %v70_v35 = vld [vmem:[%s3433_s0 + $0x1f0] sm:$0x1] }
  0x72   :  { %v885_v63 = vmax.f32 %v821_v51, %v308_v38  ;;  %v2618_v57 = vsel %vm498_vm0, %v585_v25, %v587_v43  ;;  %v756_v0 = vmax.f32 %v371_v46, %v583_v54  ;;  %v1095_v9 = vsel %vm498_vm0, %v1092_v29, %v1094_v52  ;;  %v234_v51 = vld [vmem:[%s3433_s0 + $0x838] sm:$0x1] }
  0x73   :  { %v1267_v49 = vmax.f32 %v883_v55, %v1093_v34  ;;  %v758_v1 = vmax.f32 %v373_v44, %v2618_v57  ;;  %v589_v61 = vrot.slane %v65_v39, 1  ;;  %1543 = vst.msk [vmem:[%s3434_s1 + $0xf8] sm:$0xff] %vm1511_vm1, %v1478_v62  ;;  %v590_v4 = vrot.slane %v66_v53, 1  ;;  %v235_v34 = vld [vmem:[%s3433_s0 + $0x840] sm:$0xff] }
  0x74   :  { %v820_v14 = vmax.f32 %v756_v0, %v2532_v13  ;;  %v1098_v15 = vsel %vm498_vm0, %v1096_v37, %v1097_v56  ;;  %v1101_v17 = vrot.slane %v2614_v47, 1  ;;  %v375_v23 = vmax.f32 %v66_v53, %v2623_v59 }
  0x75   :  { %v1331_v18 = vmax.f32 %v1267_v49, %v2495_v58  ;;  %v822_v16 = vmax.f32 %v758_v1, %v230_v42  ;;  %v1269_v20 = vmax.f32 %v885_v63, %v1098_v15  ;;  %v591_v21 = vsel %vm498_vm0, %v589_v61, %v590_v4  ;;  %v68_v58 = vld [vmem:[%s3433_s0 + $0x1e0] sm:$0xff]  ;;  %v312_v61 = vld [vmem:[%s3433_s0 + $0xb70] sm:$0xff] }
  0x76   :  { %v884_v25 = vmax.f32 %v820_v14, %v307_v6  ;;  %v592_v13 = vrot.slane %v67_v8, 1  ;;  %v1099_v28 = vrot.slane %v231_v10, 1  ;;  %v759_v29 = vmax.f32 %v374_v60, %v591_v21  ;;  %v2715_v60 = vld [vmem:[%s3433_s0 + $0x528] sm:$0xff] }
  0x77   :  { %v1395_v2 = vmax.f32 %v1331_v18, %v2500_v50  ;;  %v886_v27 = vmax.f32 %v822_v16, %v309_v12  ;;  %v1333_v22 = vmax.f32 %v1269_v20, %v65_v39  ;;  %v1102_v37 = vrot.slane %v2650_v11, 1  ;;  %v311_v39 = vld [vmem:[%s3433_s0 + $0xb60] sm:$0xff]  ;;  %v2747_v18 = vld [vmem:[%s3433_s0 + $0x530] sm:$0xff]  ;;  %v313_v20 = vld [vmem:[%s3433_s0 + $0xb78] sm:$0xff] }
  0x78   :  { %v1268_v32 = vmax.f32 %v884_v25, %v1095_v9  ;;  %v593_v5 = vsel %vm498_vm0, %v590_v4, %v592_v13  ;;  %v1100_v50 = vsel %vm498_vm0, %v1097_v56, %v1099_v28  ;;  %v823_v19 = vmax.f32 %v759_v29, %v2614_v47  ;;  %v2707_v56 = vld [vmem:[%s3433_s0 + $0x848] sm:$0xff]  ;;  %v71_v47 = vld [vmem:[%s3433_s0 + $0x1f8] sm:$0xff]  ;;  %v2729_v9 = vld [vmem:[%s3433_s0 + $0x200] sm:$0xff] }
  0x79   :  { %v1479_v26 = vmax.f32 %v1395_v2, %v2569_v30  ;;  %v1397_v40 = vmax.f32 %v1333_v22, %v2590_v24  ;;  %v760_v41 = vmax.f32 %v375_v23, %v593_v5  ;;  %v1270_v38 = vmax.f32 %v886_v27, %v1100_v50  ;;  %v2688_v30 = vld [vmem:[%s3433_s0 + $0x518] sm:$0xff]  ;;  %v237_v13 = vld [vmem:[%s3433_s0 + $0x850] sm:$0x1]  ;;  %v239_v22 = vld [vmem:[%s3433_s0 + $0x860] sm:$0xff] }
  0x7a   :  { %v1332_v42 = vmax.f32 %v1268_v32, %v2518_v7  ;;  %v376_v45 = vmax.f32 %v68_v58, %v2661_v36  ;;  %v594_v46 = vrot.slane %v68_v58, 1  ;;  %v887_v24 = vmax.f32 %v823_v19, %v310_v33 }
  0x7b   :  { %1544 = vst.msk [vmem:[%s3434_s1 + $0x100] sm:$0xff] %vm1511_vm1, %v1479_v26  ;;  %v1481_v7 = vmax.f32 %v1397_v40, %v591_v21  ;;  %v824_v44 = vmax.f32 %v760_v41, %v2650_v11  ;;  %v595_v48 = vrot.slane %v2672_v3, 1  ;;  %v1334_v52 = vmax.f32 %v1270_v38, %v66_v53  ;;  %v73_v21 = vld [vmem:[%s3433_s0 + $0x208] sm:$0x1]  ;;  %v2785_v41 = vld [vmem:[%s3433_s0 + $0x218] sm:$0xff] }
  0x7c   :  { %v1396_v43 = vmax.f32 %v1332_v42, %v2563_v31  ;;  %v1103_v55 = vsel %vm498_vm0, %v1101_v17, %v1102_v37  ;;  %v1106_v54 = vrot.slane %v235_v34, 1  ;;  %v377_v63 = vmax.f32 %v2672_v3, %v2688_v30  ;;  %v314_v42 = vld [vmem:[%s3433_s0 + $0xb88] sm:$0xff] }
  0x7d   :  { %1546 = vst.msk [vmem:[%s3434_s1 + $0x110] sm:$0xff] %vm1511_vm1, %v1481_v7  ;;  %v888_v31 = vmax.f32 %v824_v44, %v311_v39  ;;  %v596_v53 = vsel %vm498_vm0, %v594_v46, %v595_v48  ;;  %v1271_v62 = vmax.f32 %v887_v24, %v1103_v55  ;;  %v1398_v49 = vmax.f32 %v1334_v52, %v2623_v59  ;;  %v241_v44 = vld [vmem:[%s3433_s0 + $0x870] sm:$0xff] }
  0x7e   :  { %v1480_v0 = vmax.f32 %v1396_v43, %v2618_v57  ;;  %v761_v6 = vmax.f32 %v376_v45, %v596_v53  ;;  %v597_v1 = vrot.slane %v70_v35, 1  ;;  %v1104_v10 = vrot.slane %v234_v51, 1  ;;  %v238_v57 = vld [vmem:[%s3433_s0 + $0x858] sm:$0xff] }
  0x7f   :  { %v1335_v8 = vmax.f32 %v1271_v62, %v68_v58  ;;  %v1107_v12 = vrot.slane %v2707_v56, 1  ;;  %v378_v59 = vmax.f32 %v71_v47, %v2715_v60  ;;  %v1482_v14 = vmax.f32 %v1398_v49, %v593_v5  ;;  %v74_v58 = vld [vmem:[%s3433_s0 + $0x210] sm:$0xff]  ;;  %v242_v49 = vld [vmem:[%s3433_s0 + $0x878] sm:$0xff] }
  0x80   :  { %1545 = vst.msk [vmem:[%s3434_s1 + $0x108] sm:$0xff] %vm1511_vm1, %v1480_v0  ;;  %v825_v4 = vmax.f32 %v761_v6, %v235_v34  ;;  %v598_v15 = vsel %vm498_vm0, %v595_v48, %v597_v1  ;;  %v599_v17 = vrot.slane %v71_v47, 1  ;;  %v1105_v23 = vsel %vm498_vm0, %v1102_v37, %v1104_v10  ;;  %v315_v48 = vld [vmem:[%s3433_s0 + $0xb90] sm:$0xff]  ;;  %v77_v10 = vld [vmem:[%s3433_s0 + $0x228] sm:$0xff] }
  0x81   :  { %v1399_v16 = vmax.f32 %v1335_v8, %v2661_v36  ;;  %v762_v11 = vmax.f32 %v377_v63, %v598_v15  ;;  %v600_v25 = vrot.slane %v2729_v9, 1  ;;  %1547 = vst.msk [vmem:[%s3434_s1 + $0x118] sm:$0xff] %vm1511_vm1, %v1482_v14  ;;  %v1272_v2 = vmax.f32 %v888_v31, %v1105_v23  ;;  %v2775_v36 = vld [vmem:[%s3433_s0 + $0x540] sm:$0xff]  ;;  %v2812_v31 = vld [vmem:[%s3433_s0 + $0x548] sm:$0xff] }
  0x82   :  { %v889_v28 = vmax.f32 %v825_v4, %v312_v61  ;;  %v1108_v27 = vsel %vm498_vm0, %v1106_v54, %v1107_v12  ;;  %v1111_v29 = vrot.slane %v238_v57, 1  ;;  %v379_v50 = vmax.f32 %v2729_v9, %v2747_v18  ;;  %v244_v23 = vld [vmem:[%s3433_s0 + $0x888] sm:$0xff] }
  0x83   :  { %v1483_v32 = vmax.f32 %v1399_v16, %v596_v53  ;;  %v826_v33 = vmax.f32 %v762_v11, %v2707_v56  ;;  %v601_v5 = vsel %vm498_vm0, %v599_v17, %v600_v25  ;;  %v1336_v37 = vmax.f32 %v1272_v2, %v2672_v3  ;;  %v240_v53 = vld [vmem:[%s3433_s0 + $0x868] sm:$0x1]  ;;  %v78_v11 = vld [vmem:[%s3433_s0 + $0x230] sm:$0xff] }
  0x84   :  { %v763_v26 = vmax.f32 %v378_v59, %v601_v5  ;;  %v1273_v19 = vmax.f32 %v889_v28, %v1108_v27  ;;  %v602_v40 = vrot.slane %v73_v21, 1  ;;  %v1109_v39 = vrot.slane %v237_v13, 1  ;;  %v316_v59 = vld [vmem:[%s3433_s0 + $0xba0] sm:$0xff] }
  0x85   :  { %1548 = vst.msk [vmem:[%s3434_s1 + $0x120] sm:$0xff] %vm1511_vm1, %v1483_v32  ;;  %v890_v34 = vmax.f32 %v826_v33, %v313_v20  ;;  %v1112_v3 = vrot.slane %v239_v22, 1  ;;  %v380_v38 = vmax.f32 %v74_v58, %v2775_v36  ;;  %v1400_v45 = vmax.f32 %v1336_v37, %v2688_v30  ;;  %v243_v32 = vld [vmem:[%s3433_s0 + $0x880] sm:$0x1]  ;;  %v317_v33 = vld [vmem:[%s3433_s0 + $0xba8] sm:$0xff] }
  0x86   :  { %v827_v46 = vmax.f32 %v763_v26, %v238_v57  ;;  %v1337_v24 = vmax.f32 %v1273_v19, %v71_v47  ;;  %v603_v7 = vsel %vm498_vm0, %v600_v25, %v602_v40  ;;  %v1110_v51 = vsel %vm498_vm0, %v1107_v12, %v1109_v39  ;;  %v76_v47 = vld [vmem:[%s3433_s0 + $0x220] sm:$0x1]  ;;  %v2833_v12 = vld [vmem:[%s3433_s0 + $0x558] sm:$0xff] }
  0x87   :  { %v764_v35 = vmax.f32 %v379_v50, %v603_v7  ;;  %v604_v43 = vrot.slane %v74_v58, 1  ;;  %v605_v52 = vrot.slane %v2785_v41, 1  ;;  %v1484_v55 = vmax.f32 %v1400_v45, %v598_v15  ;;  %v80_v39 = vld [vmem:[%s3433_s0 + $0x240] sm:$0xff] }
  0x88   :  { %v891_v30 = vmax.f32 %v827_v46, %v314_v42  ;;  %v1401_v54 = vmax.f32 %v1337_v24, %v2715_v60  ;;  %v1274_v56 = vmax.f32 %v890_v34, %v1110_v51  ;;  %v1113_v0 = vsel %vm498_vm0, %v1111_v29, %v1112_v3  ;;  %v2898_v51 = vld [vmem:[%s3433_s0 + $0x248] sm:$0xff] }
  0x89   :  { %v828_v62 = vmax.f32 %v764_v35, %v239_v22  ;;  %v606_v63 = vsel %vm498_vm0, %v604_v43, %v605_v52  ;;  %v1116_v60 = vrot.slane %v241_v44, 1  ;;  %1549 = vst.msk [vmem:[%s3434_s1 + $0x128] sm:$0xff] %vm1511_vm1, %v1484_v55  ;;  %v381_v14 = vmax.f32 %v2785_v41, %v2812_v31  ;;  %v318_v43 = vld [vmem:[%s3433_s0 + $0xbb8] sm:$0xff] }
  0x8a   :  { %v1485_v6 = vmax.f32 %v1401_v54, %v601_v5  ;;  %v1338_v1 = vmax.f32 %v1274_v56, %v2729_v9  ;;  %v765_v61 = vmax.f32 %v380_v38, %v606_v63  ;;  %v1275_v8 = vmax.f32 %v891_v30, %v1113_v0 }
  0x8b   :  { %v892_v57 = vmax.f32 %v828_v62, %v315_v48  ;;  %v607_v9 = vrot.slane %v76_v47, 1  ;;  %v1114_v4 = vrot.slane %v240_v53, 1  ;;  %v1117_v20 = vrot.slane %v242_v49, 1  ;;  %v247_v62 = vld [vmem:[%s3433_s0 + $0x8a0] sm:$0xff] }
  0x8c   :  { %1550 = vst.msk [vmem:[%s3434_s1 + $0x130] sm:$0xff] %vm1511_vm1, %v1485_v6  ;;  %v1402_v15 = vmax.f32 %v1338_v1, %v2747_v18  ;;  %v829_v17 = vmax.f32 %v765_v61, %v241_v44  ;;  %v1339_v16 = vmax.f32 %v1275_v8, %v74_v58  ;;  %v382_v13 = vmax.f32 %v77_v10, %v2833_v12  ;;  %v2857_v18 = vld [vmem:[%s3433_s0 + $0x560] sm:$0xff]  ;;  %v79_v58 = vld [vmem:[%s3433_s0 + $0x238] sm:$0x1] }
  0x8d   :  { %v608_v25 = vsel %vm498_vm0, %v605_v52, %v607_v9  ;;  %v1115_v21 = vsel %vm498_vm0, %v1112_v3, %v1114_v4  ;;  %v609_v28 = vrot.slane %v77_v10, 1  ;;  %v610_v50 = vrot.slane %v78_v11, 1  ;;  %v2886_v3 = vld [vmem:[%s3433_s0 + $0x570] sm:$0xff]  ;;  %v246_v61 = vld [vmem:[%s3433_s0 + $0x898] sm:$0x1]  ;;  %v2939_v9 = vld [vmem:[%s3433_s0 + $0x588] sm:$0xff] }
  0x8e   :  { %v1486_v2 = vmax.f32 %v1402_v15, %v603_v7  ;;  %v893_v27 = vmax.f32 %v829_v17, %v316_v59  ;;  %v1403_v29 = vmax.f32 %v1339_v16, %v2775_v36  ;;  %v766_v22 = vmax.f32 %v381_v14, %v608_v25  ;;  %v2873_v36 = vld [vmem:[%s3433_s0 + $0x890] sm:$0xff]  ;;  %v2931_v59 = vld [vmem:[%s3433_s0 + $0x8a8] sm:$0xff]  ;;  %v83_v14 = vld [vmem:[%s3433_s0 + $0x258] sm:$0xff] }
  0x8f   :  { %v1276_v5 = vmax.f32 %v892_v57, %v1115_v21  ;;  %v1118_v37 = vsel %vm498_vm0, %v1116_v60, %v1117_v20  ;;  %v1121_v26 = vrot.slane %v244_v23, 1  ;;  %v383_v42 = vmax.f32 %v78_v11, %v2857_v18  ;;  %v319_v60 = vld [vmem:[%s3433_s0 + $0xbc0] sm:$0xff] }
  0x90   :  { %1551 = vst.msk [vmem:[%s3434_s1 + $0x138] sm:$0xff] %vm1511_vm1, %v1486_v2  ;;  %v1487_v19 = vmax.f32 %v1403_v29, %v606_v63  ;;  %v830_v40 = vmax.f32 %v766_v22, %v242_v49  ;;  %v1277_v34 = vmax.f32 %v893_v27, %v1118_v37  ;;  %v611_v45 = vsel %vm498_vm0, %v609_v28, %v610_v50  ;;  %v2917_v63 = vld [vmem:[%s3433_s0 + $0x578] sm:$0xff]  ;;  %v2956_v21 = vld [vmem:[%s3433_s0 + $0x260] sm:$0xff] }
  0x91   :  { %v1340_v38 = vmax.f32 %v1276_v5, %v2785_v41  ;;  %v612_v46 = vrot.slane %v79_v58, 1  ;;  %v1119_v24 = vrot.slane %v243_v32, 1  ;;  %v767_v44 = vmax.f32 %v382_v13, %v611_v45  ;;  %v320_v13 = vld [vmem:[%s3433_s0 + $0xbd0] sm:$0xff]  ;;  %v85_v5 = vld [vmem:[%s3433_s0 + $0x268] sm:$0x1]  ;;  %v321_v37 = vld [vmem:[%s3433_s0 + $0xbd8] sm:$0xff] }
  0x92   :  { %1552 = vst.msk [vmem:[%s3434_s1 + $0x140] sm:$0xff] %vm1511_vm1, %v1487_v19  ;;  %v894_v7 = vmax.f32 %v830_v40, %v317_v33  ;;  %v1341_v48 = vmax.f32 %v1277_v34, %v77_v10  ;;  %v1122_v35 = vrot.slane %v2873_v36, 1  ;;  %v384_v30 = vmax.f32 %v80_v39, %v2886_v3  ;;  %v250_v33 = vld [vmem:[%s3433_s0 + $0x8b8] sm:$0xff] }
  0x93   :  { %v1404_v41 = vmax.f32 %v1340_v38, %v2812_v31  ;;  %v613_v52 = vsel %vm498_vm0, %v610_v50, %v612_v46  ;;  %v1120_v55 = vsel %vm498_vm0, %v1117_v20, %v1119_v24  ;;  %v831_v54 = vmax.f32 %v767_v44, %v244_v23  ;;  %v82_v31 = vld [vmem:[%s3433_s0 + $0x250] sm:$0x1]  ;;  %v251_v46 = vld [vmem:[%s3433_s0 + $0x8c0] sm:$0xff] }
  0x94   :  { %v1405_v56 = vmax.f32 %v1341_v48, %v2833_v12  ;;  %v768_v47 = vmax.f32 %v383_v42, %v613_v52  ;;  %v1278_v53 = vmax.f32 %v894_v7, %v1120_v55  ;;  %v614_v49 = vrot.slane %v80_v39, 1  ;;  %v2973_v50 = vld [vmem:[%s3433_s0 + $0x590] sm:$0xff] }
  0x95   :  { %v1488_v0 = vmax.f32 %v1404_v41, %v608_v25  ;;  %v615_v6 = vrot.slane %v2898_v51, 1  ;;  %v1123_v1 = vsel %vm498_vm0, %v1121_v26, %v1122_v35  ;;  %v895_v8 = vmax.f32 %v831_v54, %v318_v43  ;;  %v322_v54 = vld [vmem:[%s3433_s0 + $0xbe8] sm:$0xff] }
  0x96   :  { %v1489_v10 = vmax.f32 %v1405_v56, %v611_v45  ;;  %v832_v12 = vmax.f32 %v768_v47, %v2873_v36  ;;  %v1342_v57 = vmax.f32 %v1278_v53, %v78_v11  ;;  %v1126_v15 = vrot.slane %v247_v62, 1  ;;  %v249_v45 = vld [vmem:[%s3433_s0 + $0x8b0] sm:$0x1] }
  0x97   :  { %1553 = vst.msk [vmem:[%s3434_s1 + $0x148] sm:$0xff] %vm1511_vm1, %v1488_v0  ;;  %v616_v4 = vsel %vm498_vm0, %v614_v49, %v615_v6  ;;  %v385_v17 = vmax.f32 %v2898_v51, %v2917_v63  ;;  %v617_v16 = vrot.slane %v82_v31, 1  ;;  %v1279_v25 = vmax.f32 %v895_v8, %v1123_v1  ;;  %v323_v1 = vld [vmem:[%s3433_s0 + $0xbf0] sm:$0xff] }
  0x98   :  { %1554 = vst.msk [vmem:[%s3434_s1 + $0x150] sm:$0xff] %vm1511_vm1, %v1489_v10  ;;  %v896_v20 = vmax.f32 %v832_v12, %v319_v60  ;;  %v1406_v11 = vmax.f32 %v1342_v57, %v2857_v18  ;;  %v769_v23 = vmax.f32 %v384_v30, %v616_v4  ;;  %v1124_v2 = vrot.slane %v246_v61, 1  ;;  %v3008_v30 = vld [vmem:[%s3433_s0 + $0x278] sm:$0xff]  ;;  %v253_v60 = vld [vmem:[%s3433_s0 + $0x8d0] sm:$0xff] }
  0x99   :  { %v618_v28 = vsel %vm498_vm0, %v615_v6, %v617_v16  ;;  %v1127_v27 = vrot.slane %v2931_v59, 1  ;;  %v386_v29 = vmax.f32 %v83_v14, %v2939_v9  ;;  %v1343_v58 = vmax.f32 %v1279_v25, %v80_v39 }
  0x9a   :  { %v1490_v22 = vmax.f32 %v1406_v11, %v613_v52  ;;  %v833_v18 = vmax.f32 %v769_v23, %v247_v62  ;;  %v770_v32 = vmax.f32 %v385_v17, %v618_v28  ;;  %v1125_v26 = vsel %vm498_vm0, %v1122_v35, %v1124_v2  ;;  %v3002_v35 = vld [vmem:[%s3433_s0 + $0x5a0] sm:$0xff]  ;;  %v254_v23 = vld [vmem:[%s3433_s0 + $0x8d8] sm:$0xff] }
  0x9b   :  { %v619_v36 = vrot.slane %v83_v14, 1  ;;  %v620_v19 = vrot.slane %v2956_v21, 1  ;;  %v1128_v40 = vsel %vm498_vm0, %v1126_v15, %v1127_v27  ;;  %v1407_v42 = vmax.f32 %v1343_v58, %v2886_v3  ;;  %v86_v3 = vld [vmem:[%s3433_s0 + $0x270] sm:$0xff]  ;;  %v252_v15 = vld [vmem:[%s3433_s0 + $0x8c8] sm:$0x1] }
  0x9c   :  { %1555 = vst.msk [vmem:[%s3434_s1 + $0x158] sm:$0xff] %vm1511_vm1, %v1490_v22  ;;  %v897_v34 = vmax.f32 %v833_v18, %v320_v13  ;;  %v834_v39 = vmax.f32 %v770_v32, %v2931_v59  ;;  %v1280_v38 = vmax.f32 %v896_v20, %v1125_v26  ;;  %v1131_v7 = vrot.slane %v250_v33, 1  ;;  %v324_v22 = vld [vmem:[%s3433_s0 + $0xc00] sm:$0xff]  ;;  %v90_v26 = vld [vmem:[%s3433_s0 + $0x290] sm:$0xff] }
  0x9d   :  { %v621_v24 = vsel %vm498_vm0, %v619_v36, %v620_v19  ;;  %v387_v44 = vmax.f32 %v2956_v21, %v2973_v50  ;;  %v622_v48 = vrot.slane %v85_v5, 1  ;;  %v1491_v41 = vmax.f32 %v1407_v42, %v616_v4  ;;  %v88_v4 = vld [vmem:[%s3433_s0 + $0x280] sm:$0x1]  ;;  %v256_v36 = vld [vmem:[%s3433_s0 + $0x8e8] sm:$0xff] }
  0x9e   :  { %v898_v43 = vmax.f32 %v834_v39, %v321_v37  ;;  %v1344_v52 = vmax.f32 %v1280_v38, %v2898_v51  ;;  %v771_v55 = vmax.f32 %v386_v29, %v621_v24  ;;  %v1281_v56 = vmax.f32 %v897_v34, %v1128_v40  ;;  %v3080_v42 = vld [vmem:[%s3433_s0 + $0x5c0] sm:$0xff] }
  0x9f   :  { %v623_v47 = vsel %vm498_vm0, %v620_v19, %v622_v48  ;;  %v1129_v53 = vrot.slane %v249_v45, 1  ;;  %v1132_v62 = vrot.slane %v251_v46, 1  ;;  %1556 = vst.msk [vmem:[%s3434_s1 + $0x160] sm:$0xff] %vm1511_vm1, %v1491_v41  ;;  %v388_v49 = vmax.f32 %v86_v3, %v3002_v35 }
  0xa0   :  { %v1408_v51 = vmax.f32 %v1344_v52, %v2917_v63  ;;  %v835_v31 = vmax.f32 %v771_v55, %v250_v33  ;;  %v772_v0 = vmax.f32 %v387_v44, %v623_v47  ;;  %v1345_v6 = vmax.f32 %v1281_v56, %v83_v14  ;;  %v3034_v14 = vld [vmem:[%s3433_s0 + $0x5a8] sm:$0xff] }
  0xa1   :  { %v1130_v61 = vsel %vm498_vm0, %v1127_v27, %v1129_v53  ;;  %v624_v8 = vrot.slane %v86_v3, 1  ;;  %v625_v10 = vrot.slane %v3008_v30, 1  ;;  %v1133_v20 = vsel %vm498_vm0, %v1131_v7, %v1132_v62  ;;  %v3056_v27 = vld [vmem:[%s3433_s0 + $0x5b8] sm:$0xff]  ;;  %v255_v7 = vld [vmem:[%s3433_s0 + $0x8e0] sm:$0x1]  ;;  %v325_v44 = vld [vmem:[%s3433_s0 + $0xc08] sm:$0xff] }
  0xa2   :  { %v1492_v12 = vmax.f32 %v1408_v51, %v618_v28  ;;  %v899_v63 = vmax.f32 %v835_v31, %v322_v54  ;;  %v836_v57 = vmax.f32 %v772_v0, %v251_v46  ;;  %v1282_v59 = vmax.f32 %v898_v43, %v1130_v61  ;;  %v3109_v53 = vld [vmem:[%s3433_s0 + $0x5d0] sm:$0xff]  ;;  %v3121_v61 = vld [vmem:[%s3433_s0 + $0x2a8] sm:$0xff] }
  0xa3   :  { %v1409_v17 = vmax.f32 %v1345_v6, %v2939_v9  ;;  %v626_v16 = vsel %vm498_vm0, %v624_v8, %v625_v10  ;;  %v1136_v11 = vrot.slane %v253_v60, 1  ;;  %v89_v9 = vld [vmem:[%s3433_s0 + $0x288] sm:$0xff]  ;;  %v389_v18 = vmax.f32 %v3008_v30, %v3034_v14  ;;  %v326_v8 = vld [vmem:[%s3433_s0 + $0xc18] sm:$0xff] }
  0xa4   :  { %1557 = vst.msk [vmem:[%s3434_s1 + $0x168] sm:$0xff] %vm1511_vm1, %v1492_v12  ;;  %v900_v25 = vmax.f32 %v836_v57, %v323_v1  ;;  %v1346_v13 = vmax.f32 %v1282_v59, %v2956_v21  ;;  %v773_v28 = vmax.f32 %v388_v49, %v626_v16  ;;  %v1283_v2 = vmax.f32 %v899_v63, %v1133_v20 }
  0xa5   :  { %v1493_v29 = vmax.f32 %v1409_v17, %v621_v24  ;;  %v627_v21 = vrot.slane %v88_v4, 1  ;;  %v1134_v58 = vrot.slane %v252_v15, 1  ;;  %v1137_v37 = vrot.slane %v254_v23, 1  ;;  %v91_v24 = vld [vmem:[%s3433_s0 + $0x298] sm:$0x1]  ;;  %v259_v17 = vld [vmem:[%s3433_s0 + $0x900] sm:$0xff] }
  0xa6   :  { %v1410_v32 = vmax.f32 %v1346_v13, %v2973_v50  ;;  %v837_v33 = vmax.f32 %v773_v28, %v253_v60  ;;  %v1347_v5 = vmax.f32 %v1283_v2, %v86_v3  ;;  %v390_v40 = vmax.f32 %v89_v9, %v3056_v27  ;;  %v258_v28 = vld [vmem:[%s3433_s0 + $0x8f8] sm:$0x1] }
  0xa7   :  { %1558 = vst.msk [vmem:[%s3434_s1 + $0x170] sm:$0xff] %vm1511_vm1, %v1493_v29  ;;  %v628_v19 = vsel %vm498_vm0, %v625_v10, %v627_v21  ;;  %v1135_v50 = vsel %vm498_vm0, %v1132_v62, %v1134_v58  ;;  %v629_v34 = vrot.slane %v89_v9, 1  ;;  %v630_v3 = vrot.slane %v90_v26, 1  ;;  %v3162_v21 = vld [vmem:[%s3433_s0 + $0x5e8] sm:$0xff] }
  0xa8   :  { %v1494_v39 = vmax.f32 %v1410_v32, %v623_v47  ;;  %v901_v38 = vmax.f32 %v837_v33, %v324_v22  ;;  %v1411_v45 = vmax.f32 %v1347_v5, %v3002_v35  ;;  %v774_v46 = vmax.f32 %v389_v18, %v628_v19  ;;  %v3096_v35 = vld [vmem:[%s3433_s0 + $0x8f0] sm:$0xff]  ;;  %v92_v47 = vld [vmem:[%s3433_s0 + $0x2a0] sm:$0xff]  ;;  %v3154_v22 = vld [vmem:[%s3433_s0 + $0x908] sm:$0xff] }
  0xa9   :  { %v1284_v48 = vmax.f32 %v900_v25, %v1135_v50  ;;  %v1138_v41 = vsel %vm498_vm0, %v1136_v11, %v1137_v37  ;;  %v1141_v43 = vrot.slane %v256_v36, 1  ;;  %v391_v56 = vmax.f32 %v90_v26, %v3080_v42  ;;  %v327_v11 = vld [vmem:[%s3433_s0 + $0xc20] sm:$0xff]  ;;  %v95_v18 = vld [vmem:[%s3433_s0 + $0x2b8] sm:$0xff] }
  0xaa   :  { %1559 = vst.msk [vmem:[%s3434_s1 + $0x178] sm:$0xff] %vm1511_vm1, %v1494_v39  ;;  %v1495_v52 = vmax.f32 %v1411_v45, %v626_v16  ;;  %v838_v55 = vmax.f32 %v774_v46, %v254_v23  ;;  %v1285_v54 = vmax.f32 %v901_v38, %v1138_v41  ;;  %v631_v51 = vsel %vm498_vm0, %v629_v34, %v630_v3  ;;  %v3140_v16 = vld [vmem:[%s3433_s0 + $0x5d8] sm:$0xff]  ;;  %v3179_v50 = vld [vmem:[%s3433_s0 + $0x2c0] sm:$0xff] }
  0xab   :  { %v1348_v62 = vmax.f32 %v1284_v48, %v3008_v30  ;;  %v632_v31 = vrot.slane %v91_v24, 1  ;;  %v1139_v0 = vrot.slane %v255_v7, 1  ;;  %v775_v49 = vmax.f32 %v390_v40, %v631_v51  ;;  %v328_v40 = vld [vmem:[%s3433_s0 + $0xc30] sm:$0xff]  ;;  %v97_v48 = vld [vmem:[%s3433_s0 + $0x2c8] sm:$0x1]  ;;  %v329_v41 = vld [vmem:[%s3433_s0 + $0xc38] sm:$0xff] }
  0xac   :  { %1560 = vst.msk [vmem:[%s3434_s1 + $0x180] sm:$0xff] %vm1511_vm1, %v1495_v52  ;;  %v902_v60 = vmax.f32 %v838_v55, %v325_v44  ;;  %v1349_v6 = vmax.f32 %v1285_v54, %v89_v9  ;;  %v1142_v1 = vrot.slane %v3096_v35, 1  ;;  %v392_v63 = vmax.f32 %v92_v47, %v3109_v53  ;;  %v262_v44 = vld [vmem:[%s3433_s0 + $0x918] sm:$0xff] }
  0xad   :  { %v1412_v30 = vmax.f32 %v1348_v62, %v3034_v14  ;;  %v633_v10 = vsel %vm498_vm0, %v630_v3, %v632_v31  ;;  %v1140_v12 = vsel %vm498_vm0, %v1137_v37, %v1139_v0  ;;  %v839_v57 = vmax.f32 %v775_v49, %v256_v36  ;;  %v94_v14 = vld [vmem:[%s3433_s0 + $0x2b0] sm:$0x1]  ;;  %v263_v31 = vld [vmem:[%s3433_s0 + $0x920] sm:$0xff] }
  0xae   :  { %v1413_v59 = vmax.f32 %v1349_v6, %v3056_v27  ;;  %v776_v4 = vmax.f32 %v391_v56, %v633_v10  ;;  %v1286_v15 = vmax.f32 %v902_v60, %v1140_v12  ;;  %v634_v23 = vrot.slane %v92_v47, 1  ;;  %v3196_v3 = vld [vmem:[%s3433_s0 + $0x5f0] sm:$0xff] }
  0xaf   :  { %v1496_v20 = vmax.f32 %v1412_v30, %v628_v19  ;;  %v635_v25 = vrot.slane %v3121_v61, 1  ;;  %v1143_v13 = vsel %vm498_vm0, %v1141_v43, %v1142_v1  ;;  %v903_v2 = vmax.f32 %v839_v57, %v326_v8  ;;  %v330_v57 = vld [vmem:[%s3433_s0 + $0xc48] sm:$0xff] }
  0xb0   :  { %v1497_v9 = vmax.f32 %v1413_v59, %v631_v51  ;;  %v840_v27 = vmax.f32 %v776_v4, %v3096_v35  ;;  %v1350_v29 = vmax.f32 %v1286_v15, %v90_v26  ;;  %v1146_v32 = vrot.slane %v259_v17, 1  ;;  %v261_v51 = vld [vmem:[%s3433_s0 + $0x910] sm:$0x1] }
  0xb1   :  { %1561 = vst.msk [vmem:[%s3434_s1 + $0x188] sm:$0xff] %vm1511_vm1, %v1496_v20  ;;  %v636_v58 = vsel %vm498_vm0, %v634_v23, %v635_v25  ;;  %v393_v33 = vmax.f32 %v3121_v61, %v3140_v16  ;;  %v637_v5 = vrot.slane %v94_v14, 1  ;;  %v1287_v19 = vmax.f32 %v903_v2, %v1143_v13  ;;  %v331_v13 = vld [vmem:[%s3433_s0 + $0xc50] sm:$0xff] }
  0xb2   :  { %1562 = vst.msk [vmem:[%s3434_s1 + $0x190] sm:$0xff] %vm1511_vm1, %v1497_v9  ;;  %v904_v37 = vmax.f32 %v840_v27, %v327_v11  ;;  %v1414_v26 = vmax.f32 %v1350_v29, %v3080_v42  ;;  %v777_v36 = vmax.f32 %v392_v63, %v636_v58  ;;  %v1144_v39 = vrot.slane %v258_v28, 1  ;;  %v3231_v63 = vld [vmem:[%s3433_s0 + $0x2d8] sm:$0xff]  ;;  %v265_v11 = vld [vmem:[%s3433_s0 + $0x930] sm:$0xff] }
  0xb3   :  { %v638_v34 = vsel %vm498_vm0, %v635_v25, %v637_v5  ;;  %v1147_v38 = vrot.slane %v3154_v22, 1  ;;  %v394_v45 = vmax.f32 %v95_v18, %v3162_v21  ;;  %v1351_v24 = vmax.f32 %v1287_v19, %v92_v47 }
  0xb4   :  { %v1498_v46 = vmax.f32 %v1414_v26, %v633_v10  ;;  %v841_v42 = vmax.f32 %v777_v36, %v259_v17  ;;  %v778_v7 = vmax.f32 %v393_v33, %v638_v34  ;;  %v1145_v43 = vsel %vm498_vm0, %v1142_v1, %v1144_v39  ;;  %v3225_v1 = vld [vmem:[%s3433_s0 + $0x600] sm:$0xff]  ;;  %v266_v36 = vld [vmem:[%s3433_s0 + $0x938] sm:$0xff] }
  0xb5   :  { %v639_v35 = vrot.slane %v95_v18, 1  ;;  %v640_v52 = vrot.slane %v3179_v50, 1  ;;  %v1148_v55 = vsel %vm498_vm0, %v1146_v32, %v1147_v38  ;;  %v1415_v56 = vmax.f32 %v1351_v24, %v3109_v53  ;;  %v98_v53 = vld [vmem:[%s3433_s0 + $0x2d0] sm:$0xff]  ;;  %v264_v32 = vld [vmem:[%s3433_s0 + $0x928] sm:$0x1] }
  0xb6   :  { %1563 = vst.msk [vmem:[%s3434_s1 + $0x198] sm:$0xff] %vm1511_vm1, %v1498_v46  ;;  %v905_v54 = vmax.f32 %v841_v42, %v328_v40  ;;  %v842_v47 = vmax.f32 %v778_v7, %v3154_v22  ;;  %v1288_v62 = vmax.f32 %v904_v37, %v1145_v43  ;;  %v1151_v60 = vrot.slane %v262_v44, 1  ;;  %v332_v46 = vld [vmem:[%s3433_s0 + $0xc60] sm:$0xff]  ;;  %v102_v43 = vld [vmem:[%s3433_s0 + $0x2f0] sm:$0xff] }
  0xb7   :  { %v641_v0 = vsel %vm498_vm0, %v639_v35, %v640_v52  ;;  %v395_v49 = vmax.f32 %v3179_v50, %v3196_v3  ;;  %v642_v6 = vrot.slane %v97_v48, 1  ;;  %v1499_v30 = vmax.f32 %v1415_v56, %v636_v58  ;;  %v100_v58 = vld [vmem:[%s3433_s0 + $0x2e0] sm:$0x1]  ;;  %v268_v35 = vld [vmem:[%s3433_s0 + $0x948] sm:$0xff] }
  0xb8   :  { %v906_v8 = vmax.f32 %v842_v47, %v329_v41  ;;  %v1352_v10 = vmax.f32 %v1288_v62, %v3121_v61  ;;  %v779_v12 = vmax.f32 %v394_v45, %v641_v0  ;;  %v1289_v59 = vmax.f32 %v905_v54, %v1148_v55  ;;  %v3303_v56 = vld [vmem:[%s3433_s0 + $0x620] sm:$0xff] }
  0xb9   :  { %v643_v4 = vsel %vm498_vm0, %v640_v52, %v642_v6  ;;  %v1149_v15 = vrot.slane %v261_v51, 1  ;;  %v1152_v17 = vrot.slane %v263_v31, 1  ;;  %1564 = vst.msk [vmem:[%s3434_s1 + $0x1a0] sm:$0xff] %vm1511_vm1, %v1499_v30  ;;  %v396_v23 = vmax.f32 %v98_v53, %v3225_v1 }
  0xba   :  { %v1416_v61 = vmax.f32 %v1352_v10, %v3140_v16  ;;  %v843_v14 = vmax.f32 %v779_v12, %v262_v44  ;;  %v780_v20 = vmax.f32 %v395_v49, %v643_v4  ;;  %v1353_v25 = vmax.f32 %v1289_v59, %v95_v18  ;;  %v3257_v18 = vld [vmem:[%s3433_s0 + $0x608] sm:$0xff] }
  0xbb   :  { %v1150_v28 = vsel %vm498_vm0, %v1147_v38, %v1149_v15  ;;  %v644_v2 = vrot.slane %v98_v53, 1  ;;  %v645_v9 = vrot.slane %v3231_v63, 1  ;;  %v1153_v37 = vsel %vm498_vm0, %v1151_v60, %v1152_v17  ;;  %v3279_v38 = vld [vmem:[%s3433_s0 + $0x618] sm:$0xff]  ;;  %v267_v60 = vld [vmem:[%s3433_s0 + $0x940] sm:$0x1]  ;;  %v333_v49 = vld [vmem:[%s3433_s0 + $0xc68] sm:$0xff] }
  0xbc   :  { %v1500_v27 = vmax.f32 %v1416_v61, %v638_v34  ;;  %v907_v16 = vmax.f32 %v843_v14, %v330_v57  ;;  %v844_v29 = vmax.f32 %v780_v20, %v263_v31  ;;  %v1290_v22 = vmax.f32 %v906_v8, %v1150_v28  ;;  %v3332_v15 = vld [vmem:[%s3433_s0 + $0x630] sm:$0xff]  ;;  %v105_v28 = vld [vmem:[%s3433_s0 + $0x308] sm:$0xff] }
  0xbd   :  { %v1417_v33 = vmax.f32 %v1353_v25, %v3162_v21  ;;  %v646_v5 = vsel %vm498_vm0, %v644_v2, %v645_v9  ;;  %v1156_v26 = vrot.slane %v265_v11, 1  ;;  %v101_v21 = vld [vmem:[%s3433_s0 + $0x2e8] sm:$0xff]  ;;  %v397_v42 = vmax.f32 %v3231_v63, %v3257_v18  ;;  %v334_v2 = vld [vmem:[%s3433_s0 + $0xc78] sm:$0xff] }
  0xbe   :  { %1565 = vst.msk [vmem:[%s3434_s1 + $0x1a8] sm:$0xff] %vm1511_vm1, %v1500_v27  ;;  %v908_v19 = vmax.f32 %v844_v29, %v331_v13  ;;  %v1354_v40 = vmax.f32 %v1290_v22, %v3179_v50  ;;  %v781_v34 = vmax.f32 %v396_v23, %v646_v5  ;;  %v1291_v39 = vmax.f32 %v907_v16, %v1153_v37 }
  0xbf   :  { %v1501_v45 = vmax.f32 %v1417_v33, %v641_v0  ;;  %v647_v50 = vrot.slane %v100_v58, 1  ;;  %v1154_v24 = vrot.slane %v264_v32, 1  ;;  %v1157_v41 = vrot.slane %v266_v36, 1  ;;  %v103_v0 = vld [vmem:[%s3433_s0 + $0x2f8] sm:$0x1]  ;;  %v271_v33 = vld [vmem:[%s3433_s0 + $0x960] sm:$0xff] }
  0xc0   :  { %v1418_v7 = vmax.f32 %v1354_v40, %v3196_v3  ;;  %v845_v44 = vmax.f32 %v781_v34, %v265_v11  ;;  %v1355_v48 = vmax.f32 %v1291_v39, %v98_v53  ;;  %v398_v55 = vmax.f32 %v101_v21, %v3279_v38 }
  0xc1   :  { %1566 = vst.msk [vmem:[%s3434_s1 + $0x1b0] sm:$0xff] %vm1511_vm1, %v1501_v45  ;;  %v648_v52 = vsel %vm498_vm0, %v645_v9, %v647_v50  ;;  %v1155_v3 = vsel %vm498_vm0, %v1152_v17, %v1154_v24  ;;  %v649_v54 = vrot.slane %v101_v21, 1  ;;  %v650_v53 = vrot.slane %v102_v43, 1  ;;  %v270_v45 = vld [vmem:[%s3433_s0 + $0x958] sm:$0x1] }
  0xc2   :  { %v1502_v47 = vmax.f32 %v1418_v7, %v643_v4  ;;  %v909_v62 = vmax.f32 %v845_v44, %v332_v46  ;;  %v1419_v51 = vmax.f32 %v1355_v48, %v3225_v1  ;;  %v782_v31 = vmax.f32 %v397_v42, %v648_v52  ;;  %v3319_v1 = vld [vmem:[%s3433_s0 + $0x950] sm:$0xff]  ;;  %v104_v4 = vld [vmem:[%s3433_s0 + $0x300] sm:$0xff]  ;;  %v272_v46 = vld [vmem:[%s3433_s0 + $0x968] sm:$0xff] }
  0xc3   :  { %v1292_v6 = vmax.f32 %v908_v19, %v1155_v3  ;;  %v1158_v30 = vsel %vm498_vm0, %v1156_v26, %v1157_v41  ;;  %v1161_v8 = vrot.slane %v268_v35, 1  ;;  %v399_v59 = vmax.f32 %v102_v43, %v3303_v56  ;;  %v335_v26 = vld [vmem:[%s3433_s0 + $0xc80] sm:$0xff] }
  0xc4   :  { %1567 = vst.msk [vmem:[%s3434_s1 + $0x1b8] sm:$0xff] %vm1511_vm1, %v1502_v47  ;;  %v1503_v10 = vmax.f32 %v1419_v51, %v646_v5  ;;  %v846_v12 = vmax.f32 %v782_v31, %v266_v36  ;;  %v1293_v57 = vmax.f32 %v909_v62, %v1158_v30  ;;  %v651_v61 = vsel %vm498_vm0, %v649_v54, %v650_v53  ;;  %v175_v5 = vld [vmem:[%s3433_s0 + $0x638] sm:$0xff] }
  0xc5   :  { %v1356_v17 = vmax.f32 %v1292_v6, %v3231_v63  ;;  %v652_v14 = vrot.slane %v103_v0, 1  ;;  %v1159_v20 = vrot.slane %v267_v60, 1  ;;  %v783_v23 = vmax.f32 %v398_v55, %v651_v61  ;;  %v108_v0 = vld [vmem:[%s3433_s0 + $0x320] sm:$0xff]  ;;  %v337_v60 = vld [vmem:[%s3433_s0 + $0xc98] sm:$0xff] }
  0xc6   :  { %1568 = vst.msk [vmem:[%s3434_s1 + $0x1c0] sm:$0xff] %vm1511_vm1, %v1503_v10  ;;  %v910_v11 = vmax.f32 %v846_v12, %v333_v49  ;;  %v1357_v25 = vmax.f32 %v1293_v57, %v101_v21  ;;  %v1162_v13 = vrot.slane %v3319_v1, 1  ;;  %v400_v16 = vmax.f32 %v104_v4, %v3332_v15  ;;  %v109_v12 = vld [vmem:[%s3433_s0 + $0x328] sm:$0x1] }
  0xc7   :  { %v1420_v63 = vmax.f32 %v1356_v17, %v3257_v18  ;;  %v653_v9 = vsel %vm498_vm0, %v650_v53, %v652_v14  ;;  %v1160_v27 = vsel %vm498_vm0, %v1157_v41, %v1159_v20  ;;  %v847_v29 = vmax.f32 %v783_v23, %v268_v35  ;;  %v106_v18 = vld [vmem:[%s3433_s0 + $0x310] sm:$0x1] }
  0xc8   :  { %v1421_v22 = vmax.f32 %v1357_v25, %v3279_v38  ;;  %v784_v58 = vmax.f32 %v399_v59, %v653_v9  ;;  %v1294_v32 = vmax.f32 %v910_v11, %v1160_v27  ;;  %v654_v36 = vrot.slane %v104_v4, 1  ;;  %v273_v35 = vld [vmem:[%s3433_s0 + $0x970] sm:$0x1]  ;;  %v176_v11 = vld [vmem:[%s3433_s0 + $0x648] sm:$0xff] }
  0xc9   :  { %v1504_v37 = vmax.f32 %v1420_v63, %v648_v52  ;;  %v655_v19 = vrot.slane %v105_v28, 1  ;;  %v1163_v40 = vsel %vm498_vm0, %v1161_v8, %v1162_v13  ;;  %v911_v34 = vmax.f32 %v847_v29, %v334_v2  ;;  %v336_v52 = vld [vmem:[%s3433_s0 + $0xc90] sm:$0xff] }
  0xca   :  { %v1505_v39 = vmax.f32 %v1421_v22, %v651_v61  ;;  %v848_v21 = vmax.f32 %v784_v58, %v3319_v1  ;;  %v1358_v38 = vmax.f32 %v1294_v32, %v102_v43  ;;  %v1166_v50 = vrot.slane %v271_v33, 1 }
  0xcb   :  { %1569 = vst.msk [vmem:[%s3434_s1 + $0x1c8] sm:$0xff] %vm1511_vm1, %v1504_v37  ;;  %v656_v42 = vsel %vm498_vm0, %v654_v36, %v655_v19  ;;  %v401_v24 = vmax.f32 %v105_v28, %v175_v5  ;;  %v657_v7 = vrot.slane %v106_v18, 1  ;;  %v1295_v43 = vmax.f32 %v911_v34, %v1163_v40 }
  0xcc   :  { %1570 = vst.msk [vmem:[%s3434_s1 + $0x1d0] sm:$0xff] %vm1511_vm1, %v1505_v39  ;;  %v912_v44 = vmax.f32 %v848_v21, %v335_v26  ;;  %v1422_v48 = vmax.f32 %v1358_v38, %v3303_v56  ;;  %v785_v41 = vmax.f32 %v400_v16, %v656_v42  ;;  %v1164_v55 = vrot.slane %v270_v45, 1  ;;  %v107_v56 = vld [vmem:[%s3433_s0 + $0x318] sm:$0xff] }
  0xcd   :  { %v658_v3 = vsel %vm498_vm0, %v655_v19, %v657_v7  ;;  %v1167_v54 = vrot.slane %v272_v46, 1  ;;  %v1359_v51 = vmax.f32 %v1295_v43, %v104_v4  ;;  %v1169_v53 = vrot.slane %v273_v35, 1 }
  0xce   :  { %v1506_v47 = vmax.f32 %v1422_v48, %v653_v9  ;;  %v849_v62 = vmax.f32 %v785_v41, %v271_v33  ;;  %v786_v31 = vmax.f32 %v401_v24, %v658_v3  ;;  %v1165_v49 = vsel %vm498_vm0, %v1162_v13, %v1164_v55 }
  0xcf   :  { %v1168_v6 = vsel %vm498_vm0, %v1166_v50, %v1167_v54  ;;  %v1423_v8 = vmax.f32 %v1359_v51, %v3332_v15  ;;  %v1296_v10 = vmax.f32 %v912_v44, %v1165_v49  ;;  %v1438_v57 = vrot.slane %v107_v56, 1 }
  0xd0   :  { %1571 = vst.msk [vmem:[%s3434_s1 + $0x1d8] sm:$0xff] %vm1511_vm1, %v1506_v47  ;;  %v913_v30 = vmax.f32 %v849_v62, %v336_v52  ;;  %v850_v1 = vmax.f32 %v786_v31, %v272_v46  ;;  %v1439_v59 = vrot.slane %v108_v0, 1  ;;  %v1170_v4 = vsel %vm498_vm0, %v1167_v54, %v1169_v53 }
  0xd1   :  { %v1507_v17 = vmax.f32 %v1423_v8, %v656_v42  ;;  %v1360_v14 = vmax.f32 %v1296_v10, %v105_v28  ;;  %v1441_v23 = vrot.slane %v109_v12, 1  ;;  %v177_v28 = vld [vmem:[%s3433_s0 + $0x650] sm:$0xff] }
  0xd2   :  { %v914_v61 = vmax.f32 %v850_v1, %v337_v60  ;;  %v1297_v20 = vmax.f32 %v913_v30, %v1168_v6  ;;  %v1440_v63 = vsel %vm498_vm0, %v1438_v57, %v1439_v59 }
  0xd3   :  { %1572 = vst.msk [vmem:[%s3434_s1 + $0x1e0] sm:$0xff] %vm1511_vm1, %v1507_v17  ;;  %v1424_v15 = vmax.f32 %v1360_v14, %v175_v5  ;;  %v1442_v16 = vsel %vm498_vm0, %v1439_v59, %v1441_v23 }
  0xd4   :  { %v1361_v25 = vmax.f32 %v1297_v20, %v107_v56  ;;  %v1298_v13 = vmax.f32 %v914_v61, %v1170_v4 }
  0xd5   :  { %v1508_v2 = vmax.f32 %v1424_v15, %v658_v3 }
  0xd6   :  { %v1425_v9 = vmax.f32 %v1361_v25, %v176_v11  ;;  %v1362_v27 = vmax.f32 %v1298_v13, %v108_v0 }
  0xd7   :  { %1573 = vst.msk [vmem:[%s3434_s1 + $0x1e8] sm:$0xff] %vm1511_vm1, %v1508_v2 }
  0xd8   :  { %v1509_v29 = vmax.f32 %v1425_v9, %v1440_v63  ;;  %v1426_v22 = vmax.f32 %v1362_v27, %v177_v28 }
  0xda   :  { %1574 = vst.msk [vmem:[%s3434_s1 + $0x1f0] sm:$0xff] %vm1511_vm1, %v1509_v29  ;;  %v1510_v58 = vmax.f32 %v1426_v22, %v1442_v16 }
  0xdc   :  { %1575 = vst.msk [vmem:[%s3434_s1 + $0x1f8] sm:$0xff] %vm1511_vm1, %v1510_v58 }

// kernel: full_mil_model_feats.16
= control target key start
LH: loop header
LB: loop body
LE: loop exit
PB: predicated region body
PF: predicated region fallthrough
CT: control target
= control target key end

     0   :  { %s1550_s15 = smov 0   ;;  %s1552_s16 = smov 0   ;;  %s1848_s0 = inlined_call_operand.vmem [shape: bf16[512,256], index: 0, kind: input, shape index: {}]   ;;  %s1849_s1 = inlined_call_operand.vmem [shape: bf16[256,128], index: 1, kind: input, shape index: {}]   ;;  %s1850_s2 = inlined_call_operand.vmem [shape: f32[1,128], index: 2, kind: input, shape index: {}]   ;;  %s1851_s3 = inlined_call_operand.vmem [shape: f32[1,128], index: 3, kind: input, shape index: {}]   ;;  %s1852_s4 = inlined_call_operand.vmem [shape: f32[512,128], index: 4, kind: output, shape index: {}]  }
   0x1   :  { %s1554_s17 = smov 0   ;;  %s1556_s18 = smov 0  }
   0x2   :  { %s1558_s19 = smov 0   ;;  %s1560_s20 = smov 0  }
   0x3   :  { %s1562_s21 = smov 0  }
   0x4 LB: > { %s26_s22 = sadd.s32 1, %s1514_s19  ;;  %s33_s23 = sadd.s32 1, %s1518_s20  ;;  %s1522_s21 = sphi %s1562_s21, %s14_s21   ;;  %s1518_s20 = sphi %s1560_s20, %s1858_s20   ;;  %s1514_s19 = sphi %s1558_s19, %s1857_s19   ;;  %s1510_s18 = sphi %s1556_s18, %s1856_s18   ;;  %s1506_s17 = sphi %s1554_s17, %s1855_s17   ;;  %s1502_s16 = sphi %s1552_s16, %s1854_s16   ;;  %s1498_s15 = sphi %s1550_s15, %s1853_s15  }
   0x5   : > { %p27_p0 = scmp.ge.s32.totalorder %s26_s22, 2  ;;  %p49_p1 = scmp.ne.s32.totalorder %s1502_s16, %s1498_s15 }
   0x6   : > { %p50_p2 = scmp.eq.s32.totalorder %s1522_s21, 0  ;;  %s42_s27 = sadd.s32 1, %s1502_s16 }
   0x7   : > { %s1860_s22 = smov (%p27_p0, %s26_s22), 0  ;;  %s1862_s23 = smov (!%p27_p0, %s33_s23), %s1518_s20 }
   0x8   : > { %p51_p3 = por %p50_p2, %p49_p1  ;;  %p35_p4 = scmp.ge.s32.totalorder %s1862_s23, 2 }
   0x9   : > { %s38_s24 = ssub.s32 %s1514_s19, %s1860_s22  ;;  %p1257_p6 = scmp.ge.s32.totalorder %s1522_s21, 4 }
   0xa   : > { %s1864_s23 = smov (%p35_p4, %s1862_s23), 0 }
   0xb   : > { %s37_s25 = ssub.s32 %s1518_s20, %s1864_s23  ;;  %195 = sbr.rel (%p1257_p6) target bundleno = 43 (0x2b), region = 24 }
   0xc   : > { %s39_s26 = sor.u32 %s38_s24, %s37_s25 }
   0xd   : > { %p40_p5 = scmp.eq.s32.totalorder %s39_s26, 0 }
   0xf   : > { %s1601_s28 = scalar_select %p40_p5, %s1502_s16, %s42_s27  }
  0x10   : > { %198 = sbr.rel (!%p51_p3) target bundleno = 43 (0x2b), region = 28  ;;  %s200_s29 = sand.u32 (%p51_p3), 1, %s1502_s16  }
  0x11   : > { %s1298_s30 = sshll.u32 (%p51_p3), %s1518_s20, 6  ;;  %s1258_s5 = sshll.u32 (%p51_p3), %s200_s29, 7 }
  0x12   : > { %s205_s6 = sadd.s32 (%p51_p3), %s1514_s19, %s1298_s30  ;;  %s1615_s11 = scalar_lea.vmem (%p51_p3), [#allocation3], %s1258_s5 }
  0x13   : > { %s1261_s7 = sshll.u32 (%p51_p3), %s205_s6, 2 }
  0x14   : > { %s1610_s10 = scalar_lea.vmem (%p51_p3), %s1848_s0, %s1261_s7 }
  0x15   : > { %v224_v0 = vld [vmem:[%s1610_s10] sm:$0xf]  ;;  %v226_v1 = vld [vmem:[%s1610_s10 + $0x8] sm:$0xf]  ;;  %v228_v2 = vld [vmem:[%s1610_s10 + $0x10] sm:$0xf] }
  0x16   : > { %225 = vst [vmem:[%s1615_s11] sm:$0xf] %v224_v0  ;;  %227 = vst [vmem:[%s1615_s11 + $0x4] sm:$0xf] %v226_v1  ;;  %v230_v3 = vld [vmem:[%s1610_s10 + $0x18] sm:$0xf] }
  0x17   : > { %229 = vst [vmem:[%s1615_s11 + $0x8] sm:$0xf] %v228_v2  ;;  %v232_v4 = vld [vmem:[%s1610_s10 + $0x20] sm:$0xf]  ;;  %v234_v5 = vld [vmem:[%s1610_s10 + $0x28] sm:$0xf] }
  0x18   : > { %231 = vst [vmem:[%s1615_s11 + $0xc] sm:$0xf] %v230_v3  ;;  %233 = vst [vmem:[%s1615_s11 + $0x10] sm:$0xf] %v232_v4  ;;  %v236_v6 = vld [vmem:[%s1610_s10 + $0x30] sm:$0xf] }
  0x19   : > { %235 = vst [vmem:[%s1615_s11 + $0x14] sm:$0xf] %v234_v5  ;;  %v238_v7 = vld [vmem:[%s1610_s10 + $0x38] sm:$0xf]  ;;  %v240_v8 = vld [vmem:[%s1610_s10 + $0x40] sm:$0xf] }
  0x1a   : > { %237 = vst [vmem:[%s1615_s11 + $0x18] sm:$0xf] %v236_v6  ;;  %239 = vst [vmem:[%s1615_s11 + $0x1c] sm:$0xf] %v238_v7  ;;  %v242_v9 = vld [vmem:[%s1610_s10 + $0x48] sm:$0xf] }
  0x1b   : > { %241 = vst [vmem:[%s1615_s11 + $0x20] sm:$0xf] %v240_v8  ;;  %v244_v10 = vld [vmem:[%s1610_s10 + $0x50] sm:$0xf]  ;;  %v246_v11 = vld [vmem:[%s1610_s10 + $0x58] sm:$0xf] }
  0x1c   : > { %243 = vst [vmem:[%s1615_s11 + $0x24] sm:$0xf] %v242_v9  ;;  %245 = vst [vmem:[%s1615_s11 + $0x28] sm:$0xf] %v244_v10  ;;  %v248_v12 = vld [vmem:[%s1610_s10 + $0x60] sm:$0xf] }
  0x1d   : > { %247 = vst [vmem:[%s1615_s11 + $0x2c] sm:$0xf] %v246_v11  ;;  %v250_v13 = vld [vmem:[%s1610_s10 + $0x68] sm:$0xf]  ;;  %v252_v14 = vld [vmem:[%s1610_s10 + $0x70] sm:$0xf] }
  0x1e   : > { %249 = vst [vmem:[%s1615_s11 + $0x30] sm:$0xf] %v248_v12  ;;  %251 = vst [vmem:[%s1615_s11 + $0x34] sm:$0xf] %v250_v13  ;;  %v254_v15 = vld [vmem:[%s1610_s10 + $0x78] sm:$0xf] }
  0x1f   : > { %253 = vst [vmem:[%s1615_s11 + $0x38] sm:$0xf] %v252_v14  ;;  %v256_v16 = vld [vmem:[%s1610_s10 + $0x80] sm:$0xf]  ;;  %v258_v17 = vld [vmem:[%s1610_s10 + $0x88] sm:$0xf] }
  0x20   : > { %255 = vst [vmem:[%s1615_s11 + $0x3c] sm:$0xf] %v254_v15  ;;  %257 = vst [vmem:[%s1615_s11 + $0x40] sm:$0xf] %v256_v16  ;;  %v260_v18 = vld [vmem:[%s1610_s10 + $0x90] sm:$0xf] }
  0x21   : > { %259 = vst [vmem:[%s1615_s11 + $0x44] sm:$0xf] %v258_v17  ;;  %v262_v19 = vld [vmem:[%s1610_s10 + $0x98] sm:$0xf]  ;;  %v264_v20 = vld [vmem:[%s1610_s10 + $0xa0] sm:$0xf] }
  0x22   : > { %261 = vst [vmem:[%s1615_s11 + $0x48] sm:$0xf] %v260_v18  ;;  %263 = vst [vmem:[%s1615_s11 + $0x4c] sm:$0xf] %v262_v19  ;;  %v266_v21 = vld [vmem:[%s1610_s10 + $0xa8] sm:$0xf] }
  0x23   : > { %265 = vst [vmem:[%s1615_s11 + $0x50] sm:$0xf] %v264_v20  ;;  %v268_v22 = vld [vmem:[%s1610_s10 + $0xb0] sm:$0xf]  ;;  %v270_v23 = vld [vmem:[%s1610_s10 + $0xb8] sm:$0xf] }
  0x24   : > { %267 = vst [vmem:[%s1615_s11 + $0x54] sm:$0xf] %v266_v21  ;;  %269 = vst [vmem:[%s1615_s11 + $0x58] sm:$0xf] %v268_v22  ;;  %v272_v24 = vld [vmem:[%s1610_s10 + $0xc0] sm:$0xf] }
  0x25   : > { %271 = vst [vmem:[%s1615_s11 + $0x5c] sm:$0xf] %v270_v23  ;;  %v274_v25 = vld [vmem:[%s1610_s10 + $0xc8] sm:$0xf]  ;;  %v276_v26 = vld [vmem:[%s1610_s10 + $0xd0] sm:$0xf] }
  0x26   : > { %273 = vst [vmem:[%s1615_s11 + $0x60] sm:$0xf] %v272_v24  ;;  %275 = vst [vmem:[%s1615_s11 + $0x64] sm:$0xf] %v274_v25  ;;  %v278_v27 = vld [vmem:[%s1610_s10 + $0xd8] sm:$0xf] }
  0x27   : > { %277 = vst [vmem:[%s1615_s11 + $0x68] sm:$0xf] %v276_v26  ;;  %v280_v28 = vld [vmem:[%s1610_s10 + $0xe0] sm:$0xf]  ;;  %v282_v29 = vld [vmem:[%s1610_s10 + $0xe8] sm:$0xf] }
  0x28   : > { %279 = vst [vmem:[%s1615_s11 + $0x6c] sm:$0xf] %v278_v27  ;;  %281 = vst [vmem:[%s1615_s11 + $0x70] sm:$0xf] %v280_v28  ;;  %v284_v30 = vld [vmem:[%s1610_s10 + $0xf0] sm:$0xf] }
  0x29   : > { %283 = vst [vmem:[%s1615_s11 + $0x74] sm:$0xf] %v282_v29  ;;  %v286_v31 = vld [vmem:[%s1610_s10 + $0xf8] sm:$0xf]  ;;  %285 = vst [vmem:[%s1615_s11 + $0x78] sm:$0xf] %v284_v30 }
  0x2a   : > { %287 = vst [vmem:[%s1615_s11 + $0x7c] sm:$0xf] %v286_v31 }
  0x2b PF: > { %p1262_p7 = scmp.ge.s32.totalorder %s1522_s21, 1  ;;  %p386_p8 = scmp.lt.s32.totalorder %s1522_s21, 5 }
  0x2d   : > { %p387_p9 = pnand %p1262_p7, %p386_p8 }
  0x2e   : > { %s393_s12 = sand.u32 (!%p387_p9), 1, %s1498_s15   ;;  %s1264_s13 = sshll.u32 (!%p387_p9), %s1506_s17, 4 }
  0x2f   : > { %390 = sbr.rel (%p387_p9) target bundleno = 367 (0x16f), region = 73  ;;  %s1263_s14 = sshll.u32 (!%p387_p9), %s393_s12, 7 }
  0x30   : > { %p437_p10 = scmp.lt.s32.totalorder (!%p387_p9), %s1264_s13, 31  ;;  %s1266_s24 = sshll.u32 (!%p387_p9), %s1510_s18, 5 }
  0x31   : > { %p452_p11 = scmp.lt.s32.totalorder (!%p387_p9), %s1266_s24, 63  ;;  %s1693_s15 = scalar_lea.vmem (!%p387_p9), [#allocation3], %s1263_s14 }
  0x32   : > { %p1268_p12 = scmp.ne.s32.totalorder (!%p387_p9), %s1506_s17, 0 }
  0x34   : > { %s1866_s13 = smov (!%p437_p10, %s1264_s13), 31  ;;  %s1868_s24 = smov (!%p452_p11, %s1266_s24), 63 }
  0x35   : > { %s1265_s25 = sshll.u32 %s1866_s13, 2  ;;  %s1267_s30 = sshll.u32 %s1868_s24, 3 }
  0x36   : > { %s1686_s29 = scalar_lea.vmem %s1849_s1, %s1265_s25  ;;  %s1691_s7 = scalar_lea.vmem %s1852_s4, %s1267_s30 }
  0x37   : > { %464 = sbr.rel (%p1268_p12) target bundleno = 77 (0x4d), region = 81 }
  0x3c   : > { %v1524_v32 = vmov 0.0  }
  0x3d   : > { %465 = vst [vmem:[#allocation2 + $0xb0] sm:$0xff] %v1524_v32  ;;  %466 = vst [vmem:[#allocation2] sm:$0xff] %v1524_v32 }
  0x3e   : > { %467 = vst [vmem:[#allocation2 + $0xd8] sm:$0xff] %v1524_v32  ;;  %468 = vst [vmem:[#allocation2 + $0x18] sm:$0xff] %v1524_v32 }
  0x3f   : > { %469 = vst [vmem:[#allocation2 + $0x50] sm:$0xff] %v1524_v32  ;;  %470 = vst [vmem:[#allocation2 + $0x68] sm:$0xff] %v1524_v32 }
  0x40   : > { %471 = vst [vmem:[#allocation2 + $0x30] sm:$0xff] %v1524_v32  ;;  %472 = vst [vmem:[#allocation2 + $0x48] sm:$0xff] %v1524_v32 }
  0x41   : > { %473 = vst [vmem:[#allocation2 + $0x80] sm:$0xff] %v1524_v32  ;;  %474 = vst [vmem:[#allocation2 + $0x88] sm:$0xff] %v1524_v32 }
  0x42   : > { %475 = vst [vmem:[#allocation2 + $0xe8] sm:$0xff] %v1524_v32  ;;  %476 = vst [vmem:[#allocation2 + $0xb8] sm:$0xff] %v1524_v32 }
  0x43   : > { %477 = vst [vmem:[#allocation2 + $0x60] sm:$0xff] %v1524_v32  ;;  %478 = vst [vmem:[#allocation2 + $0xf0] sm:$0xff] %v1524_v32 }
  0x44   : > { %479 = vst [vmem:[#allocation2 + $0x8] sm:$0xff] %v1524_v32  ;;  %480 = vst [vmem:[#allocation2 + $0x78] sm:$0xff] %v1524_v32 }
  0x45   : > { %481 = vst [vmem:[#allocation2 + $0x38] sm:$0xff] %v1524_v32  ;;  %482 = vst [vmem:[#allocation2 + $0x58] sm:$0xff] %v1524_v32 }
  0x46   : > { %483 = vst [vmem:[#allocation2 + $0x40] sm:$0xff] %v1524_v32  ;;  %484 = vst [vmem:[#allocation2 + $0xc8] sm:$0xff] %v1524_v32 }
  0x47   : > { %485 = vst [vmem:[#allocation2 + $0xe0] sm:$0xff] %v1524_v32  ;;  %486 = vst [vmem:[#allocation2 + $0x90] sm:$0xff] %v1524_v32 }
  0x48   : > { %487 = vst [vmem:[#allocation2 + $0x70] sm:$0xff] %v1524_v32  ;;  %488 = vst [vmem:[#allocation2 + $0xc0] sm:$0xff] %v1524_v32 }
  0x49   : > { %489 = vst [vmem:[#allocation2 + $0xa8] sm:$0xff] %v1524_v32  ;;  %490 = vst [vmem:[#allocation2 + $0xd0] sm:$0xff] %v1524_v32 }
  0x4a   : > { %491 = vst [vmem:[#allocation2 + $0x10] sm:$0xff] %v1524_v32  ;;  %492 = vst [vmem:[#allocation2 + $0x28] sm:$0xff] %v1524_v32 }
  0x4b   : > { %493 = vst [vmem:[#allocation2 + $0xa0] sm:$0xff] %v1524_v32  ;;  %494 = vst [vmem:[#allocation2 + $0xf8] sm:$0xff] %v1524_v32 }
  0x4c   : > { %495 = vst [vmem:[#allocation2 + $0x20] sm:$0xff] %v1524_v32  ;;  %496 = vst [vmem:[#allocation2 + $0x98] sm:$0xff] %v1524_v32 }
  0x4d PF: > { %v1444_v33 = vld [vmem:[%s1686_s29 + $0x38] sm:$0xff]   ;;  %v1445_v34 = vld [vmem:[%s1686_s29 + $0x30] sm:$0xff]   ;;  %v1446_v35 = vld [vmem:[%s1686_s29 + $0x28] sm:$0xff]   ;;  %p1293_p13 = scmp.ne.s32.totalorder %s1506_s17, 1 }
  0x4e   : > { %1323 = vmatprep.subr.bf16.mxu0 %v1444_v33  ;;  %1371 = vmatprep.subr.bf16.mxu1 %v1444_v33  ;;  %v1447_v36 = vld [vmem:[%s1686_s29 + $0x20] sm:$0xff]   ;;  %v1448_v39 = vld [vmem:[%s1686_s29 + $0x18] sm:$0xff]   ;;  %v1449_v40 = vld [vmem:[%s1686_s29 + $0x10] sm:$0xff]  }
  0x4f   : > { %1324 = vmatpush3.bf16.msra.mxu0 %v1444_v33  ;;  %1379 = vmatpush3.bf16.msra.mxu1 %v1444_v33  ;;  %v1452_v37 = vld [vmem:[%s1693_s15] sm:$0xff]   ;;  %v1450_v41 = vld [vmem:[%s1686_s29 + $0x8] sm:$0xff]   ;;  %v1456_v45 = vld [vmem:[%s1693_s15 + $0x10] sm:$0xff]  }
  0x50   : > { %1325 = vmatprep.subr.bf16.mxu0 %v1445_v34  ;;  %1372 = vmatprep.subr.bf16.mxu1 %v1445_v34  ;;  %v1453_v38 = vld [vmem:[%s1693_s15 + $0x40] sm:$0xff]   ;;  %v1454_v43 = vld [vmem:[%s1693_s15 + $0x8] sm:$0xff]   ;;  %v1457_v46 = vld [vmem:[%s1693_s15 + $0x50] sm:$0xff]  }
  0x51   : > { %1339 = vmatprep.mubr.bf16.mxu0 %v1452_v37  ;;  %1355 = vmatprep.mubr.bf16.mxu1 %v1453_v38  ;;  %v1451_v42 = vld [vmem:[%s1686_s29] sm:$0xff]   ;;  %v1455_v44 = vld [vmem:[%s1693_s15 + $0x48] sm:$0xff]   ;;  %v1458_v47 = vld [vmem:[%s1693_s15 + $0x18] sm:$0xff]  }
  0x52   : > { %v1459_v48 = vld [vmem:[%s1693_s15 + $0x58] sm:$0xff]   ;;  %v1460_v49 = vld [vmem:[%s1693_s15 + $0x20] sm:$0xff]   ;;  %v1462_v51 = vld [vmem:[%s1693_s15 + $0x28] sm:$0xff]  }
  0x53   : > { %1326 = vmatpush3.bf16.msra.mxu0 %v1445_v34  ;;  %1380 = vmatpush3.bf16.msra.mxu1 %v1445_v34  ;;  %v1461_v50 = vld [vmem:[%s1693_s15 + $0x60] sm:$0xff]   ;;  %v1463_v52 = vld [vmem:[%s1693_s15 + $0x68] sm:$0xff]   ;;  %v1464_v53 = vld [vmem:[%s1693_s15 + $0x30] sm:$0xff]  }
  0x54   : > { %1327 = vmatprep.subr.bf16.mxu0 %v1446_v35  ;;  %1373 = vmatprep.subr.bf16.mxu1 %v1446_v35  ;;  %v1465_v54 = vld [vmem:[%s1693_s15 + $0x70] sm:$0xff]   ;;  %v1466_v55 = vld [vmem:[%s1693_s15 + $0x38] sm:$0xff]   ;;  %v515_v58 = vld [vmem:[#allocation2 + $0x40] sm:$0xff] }
  0x55   : > { %v1467_v56 = vld [vmem:[%s1693_s15 + $0x78] sm:$0xff]   ;;  %v497_v61 = vld [vmem:[#allocation2 + $0xb0] sm:$0xff]  ;;  %v516_v4 = vld [vmem:[#allocation2 + $0xc8] sm:$0xff] }
  0x56   : > { %v499_v57 = vld [vmem:[#allocation2 + $0xd8] sm:$0xff]  ;;  %v498_v9 = vld [vmem:[#allocation2] sm:$0xff]  ;;  %v503_v15 = vld [vmem:[#allocation2 + $0x30] sm:$0xff] }
  0x57   : > { %1328 = vmatpush3.bf16.msra.mxu0 %v1446_v35  ;;  %1381 = vmatpush3.bf16.msra.mxu1 %v1446_v35  ;;  %v513_v62 = vld [vmem:[#allocation2 + $0x38] sm:$0xff]  ;;  %v519_v16 = vld [vmem:[#allocation2 + $0x70] sm:$0xff]  ;;  %v517_v22 = vld [vmem:[#allocation2 + $0xe0] sm:$0xff] }
  0x58   : > { %1329 = vmatprep.subr.bf16.mxu0 %v1447_v36  ;;  %1374 = vmatprep.subr.bf16.mxu1 %v1447_v36  ;;  %v500_v3 = vld [vmem:[#allocation2 + $0x18] sm:$0xff]  ;;  %v501_v21 = vld [vmem:[#allocation2 + $0x50] sm:$0xff]  ;;  %v504_v27 = vld [vmem:[#allocation2 + $0x48] sm:$0xff] }
  0x59   : > { %v514_v10 = vld [vmem:[#allocation2 + $0x58] sm:$0xff]  ;;  %v520_v28 = vld [vmem:[#allocation2 + $0xc0] sm:$0xff]  ;;  %v502_v33 = vld [vmem:[#allocation2 + $0x68] sm:$0xff] }
  0x5a   : > { %v518_v34 = vld [vmem:[#allocation2 + $0x90] sm:$0xff] }
  0x5b   : > { %1330 = vmatpush3.bf16.msra.mxu0 %v1447_v36  ;;  %1382 = vmatpush3.bf16.msra.mxu1 %v1447_v36 }
  0x5c   : > { %1331 = vmatprep.subr.bf16.mxu0 %v1448_v39  ;;  %1375 = vmatprep.subr.bf16.mxu1 %v1448_v39 }
  0x5f   : > { %1332 = vmatpush3.bf16.msra.mxu0 %v1448_v39  ;;  %1383 = vmatpush3.bf16.msra.mxu1 %v1448_v39  ;;  %v507_v39 = vld [vmem:[#allocation2 + $0xe8] sm:$0xff] }
  0x60   : > { %1333 = vmatprep.subr.bf16.mxu0 %v1449_v40  ;;  %1376 = vmatprep.subr.bf16.mxu1 %v1449_v40 }
  0x63   : > { %1334 = vmatpush3.bf16.msra.mxu0 %v1449_v40  ;;  %1384 = vmatpush3.bf16.msra.mxu1 %v1449_v40  ;;  %v523_v40 = vld [vmem:[#allocation2 + $0x10] sm:$0xff] }
  0x64   : > { %1335 = vmatprep.subr.bf16.mxu0 %v1450_v41  ;;  %1377 = vmatprep.subr.bf16.mxu1 %v1450_v41 }
  0x67   : > { %1336 = vmatpush3.bf16.msra.mxu0 %v1450_v41  ;;  %1385 = vmatpush3.bf16.msra.mxu1 %v1450_v41 }
  0x68   : > { %1337 = vmatprep.subr.bf16.mxu0 %v1451_v42  ;;  %1378 = vmatprep.subr.bf16.mxu1 %v1451_v42 }
  0x6b   : > { %1338 = vmatpush3.bf16.msra.mxu0 %v1451_v42  ;;  %1386 = vmatpush3.bf16.msra.mxu1 %v1451_v42 }
  0x6e   : > { %1340 = vmatmul.mubr.bf16.vlgmr.msra.gmra.mxu0 %v1454_v43  ;;  %1356 = vmatmul.mubr.bf16.vlgmr.msra.gmra.mxu1 %v1455_v44 }
  0x6f   : > { %1343 = vmatprep.mubr.bf16.mxu0 %v1456_v45  ;;  %1359 = vmatprep.mubr.bf16.mxu1 %v1457_v46  ;;  %v505_v45 = vld [vmem:[#allocation2 + $0x80] sm:$0xff]  ;;  %v521_v46 = vld [vmem:[#allocation2 + $0xa8] sm:$0xff] }
  0x76   : > { %1344 = vmatmul.mubr.bf16.gmra.mxu0 %v1458_v47  ;;  %1360 = vmatmul.mubr.bf16.gmra.mxu1 %v1459_v48 }
  0x77   : > { %1347 = vmatprep.mubr.bf16.mxu0 %v1460_v49  ;;  %1363 = vmatprep.mubr.bf16.mxu1 %v1461_v50 }
  0x7e   : > { %1348 = vmatmul.mubr.bf16.gmra.mxu0 %v1462_v51  ;;  %1364 = vmatmul.mubr.bf16.gmra.mxu1 %v1463_v52  ;;  %v508_v51 = vld [vmem:[#allocation2 + $0xb8] sm:$0xff]  ;;  %v524_v52 = vld [vmem:[#allocation2 + $0x28] sm:$0xff] }
  0x7f   : > { %1351 = vmatprep.mubr.bf16.mxu0 %v1464_v53  ;;  %1367 = vmatprep.mubr.bf16.mxu1 %v1465_v54 }
  0x86   : > { %1352 = vmatmul.mubr.bf16.gmra.mxu0 %v1466_v55  ;;  %1368 = vmatmul.mubr.bf16.gmra.mxu1 %v1467_v56 }
 0x12e   : > { %v1341_v59 = vpop.f32.mrf.mxu0  ;;  %v1357_v60 = vpop.f32.mrf.mxu1 }
 0x12f   : > { %v884_v63 = vadd.f32 %v1341_v59, %v499_v57  ;;  %v900_v0 = vadd.f32 %v1357_v60, %v515_v58  ;;  %v506_v57 = vld [vmem:[#allocation2 + $0x88] sm:$0xff]  ;;  %v522_v58 = vld [vmem:[#allocation2 + $0xd0] sm:$0xff] }
 0x130   : > { %v755_v1 = vpop.f32.mrf.mxu0  ;;  %v819_v2 = vpop.f32.mrf.mxu1 }
 0x131   : > { %916 = vst [vmem:[#allocation2 + $0xd8] sm:$0xff] %v884_v63  ;;  %932 = vst [vmem:[#allocation2 + $0x40] sm:$0xff] %v900_v0  ;;  %v882_v5 = vadd.f32 %v755_v1, %v497_v61  ;;  %v898_v6 = vadd.f32 %v819_v2, %v513_v62  ;;  %v511_v63 = vld [vmem:[#allocation2 + $0x8] sm:$0xff]  ;;  %v527_v0 = vld [vmem:[#allocation2 + $0x20] sm:$0xff] }
 0x132   : > { %v1342_v7 = vpop.f32.mrf.mxu0  ;;  %v1358_v8 = vpop.f32.mrf.mxu1 }
 0x133   : > { %914 = vst [vmem:[#allocation2 + $0xb0] sm:$0xff] %v882_v5  ;;  %930 = vst [vmem:[#allocation2 + $0x38] sm:$0xff] %v898_v6  ;;  %v885_v11 = vadd.f32 %v1342_v7, %v500_v3  ;;  %v901_v12 = vadd.f32 %v1358_v8, %v516_v4  ;;  %v509_v5 = vld [vmem:[#allocation2 + $0x60] sm:$0xff] }
 0x134   : > { %v758_v13 = vpop.f32.mrf.mxu0  ;;  %v822_v14 = vpop.f32.mrf.mxu1  ;;  %v525_v6 = vld [vmem:[#allocation2 + $0xa0] sm:$0xff] }
 0x135   : > { %917 = vst [vmem:[#allocation2 + $0x18] sm:$0xff] %v885_v11  ;;  %933 = vst [vmem:[#allocation2 + $0xc8] sm:$0xff] %v901_v12  ;;  %v883_v17 = vadd.f32 %v758_v13, %v498_v9  ;;  %v899_v18 = vadd.f32 %v822_v14, %v514_v10  ;;  %v512_v11 = vld [vmem:[#allocation2 + $0x78] sm:$0xff] }
 0x136   : > { %v1345_v19 = vpop.f32.mrf.mxu0  ;;  %v1361_v20 = vpop.f32.mrf.mxu1  ;;  %v528_v12 = vld [vmem:[#allocation2 + $0x98] sm:$0xff] }
 0x137   : > { %915 = vst [vmem:[#allocation2] sm:$0xff] %v883_v17  ;;  %931 = vst [vmem:[#allocation2 + $0x58] sm:$0xff] %v899_v18  ;;  %v888_v23 = vadd.f32 %v1345_v19, %v503_v15  ;;  %v904_v24 = vadd.f32 %v1361_v20, %v519_v16  ;;  %v510_v17 = vld [vmem:[#allocation2 + $0xf0] sm:$0xff]  ;;  %v526_v18 = vld [vmem:[#allocation2 + $0xf8] sm:$0xff] }
 0x138   : > { %v771_v25 = vpop.f32.mrf.mxu0  ;;  %v835_v26 = vpop.f32.mrf.mxu1 }
 0x139   : > { %920 = vst [vmem:[#allocation2 + $0x30] sm:$0xff] %v888_v23  ;;  %936 = vst [vmem:[#allocation2 + $0x70] sm:$0xff] %v904_v24  ;;  %v886_v29 = vadd.f32 %v771_v25, %v501_v21  ;;  %v902_v30 = vadd.f32 %v835_v26, %v517_v22 }
 0x13a   : > { %v1346_v31 = vpop.f32.mrf.mxu0  ;;  %v1362_v32 = vpop.f32.mrf.mxu1 }
 0x13b   : > { %918 = vst [vmem:[#allocation2 + $0x50] sm:$0xff] %v886_v29  ;;  %934 = vst [vmem:[#allocation2 + $0xe0] sm:$0xff] %v902_v30  ;;  %v889_v35 = vadd.f32 %v1346_v31, %v504_v27  ;;  %v905_v36 = vadd.f32 %v1362_v32, %v520_v28 }
 0x13c   : > { %v774_v37 = vpop.f32.mrf.mxu0  ;;  %v838_v38 = vpop.f32.mrf.mxu1 }
 0x13d   : > { %921 = vst [vmem:[#allocation2 + $0x48] sm:$0xff] %v889_v35  ;;  %937 = vst [vmem:[#allocation2 + $0xc0] sm:$0xff] %v905_v36  ;;  %v887_v41 = vadd.f32 %v774_v37, %v502_v33  ;;  %v903_v42 = vadd.f32 %v838_v38, %v518_v34 }
 0x13e   : > { %v1349_v43 = vpop.f32.mrf.mxu0  ;;  %v1365_v44 = vpop.f32.mrf.mxu1 }
 0x13f   : > { %919 = vst [vmem:[#allocation2 + $0x68] sm:$0xff] %v887_v41  ;;  %935 = vst [vmem:[#allocation2 + $0x90] sm:$0xff] %v903_v42  ;;  %v892_v47 = vadd.f32 %v1349_v43, %v507_v39  ;;  %v908_v48 = vadd.f32 %v1365_v44, %v523_v40 }
 0x140   : > { %v787_v49 = vpop.f32.mrf.mxu0  ;;  %v851_v50 = vpop.f32.mrf.mxu1 }
 0x141   : > { %924 = vst [vmem:[#allocation2 + $0xe8] sm:$0xff] %v892_v47  ;;  %940 = vst [vmem:[#allocation2 + $0x10] sm:$0xff] %v908_v48  ;;  %v890_v53 = vadd.f32 %v787_v49, %v505_v45  ;;  %v906_v54 = vadd.f32 %v851_v50, %v521_v46 }
 0x142   : > { %v1350_v55 = vpop.f32.mrf.mxu0  ;;  %v1366_v56 = vpop.f32.mrf.mxu1 }
 0x143   : > { %922 = vst [vmem:[#allocation2 + $0x80] sm:$0xff] %v890_v53  ;;  %938 = vst [vmem:[#allocation2 + $0xa8] sm:$0xff] %v906_v54  ;;  %v893_v59 = vadd.f32 %v1350_v55, %v508_v51  ;;  %v909_v60 = vadd.f32 %v1366_v56, %v524_v52 }
 0x144   : > { %v790_v61 = vpop.f32.mrf.mxu0  ;;  %v854_v62 = vpop.f32.mrf.mxu1 }
 0x145   : > { %925 = vst [vmem:[#allocation2 + $0xb8] sm:$0xff] %v893_v59  ;;  %941 = vst [vmem:[#allocation2 + $0x28] sm:$0xff] %v909_v60  ;;  %v891_v1 = vadd.f32 %v790_v61, %v506_v57  ;;  %v907_v2 = vadd.f32 %v854_v62, %v522_v58 }
 0x146   : > { %v1353_v3 = vpop.f32.mrf.mxu0  ;;  %v1369_v4 = vpop.f32.mrf.mxu1 }
 0x147   : > { %923 = vst [vmem:[#allocation2 + $0x88] sm:$0xff] %v891_v1  ;;  %939 = vst [vmem:[#allocation2 + $0xd0] sm:$0xff] %v907_v2  ;;  %v896_v7 = vadd.f32 %v1353_v3, %v511_v63  ;;  %v912_v8 = vadd.f32 %v1369_v4, %v527_v0 }
 0x148   : > { %v803_v9 = vpop.f32.mrf.mxu0  ;;  %v867_v10 = vpop.f32.mrf.mxu1 }
 0x149   : > { %928 = vst [vmem:[#allocation2 + $0x8] sm:$0xff] %v896_v7  ;;  %944 = vst [vmem:[#allocation2 + $0x20] sm:$0xff] %v912_v8  ;;  %v894_v13 = vadd.f32 %v803_v9, %v509_v5  ;;  %v910_v14 = vadd.f32 %v867_v10, %v525_v6 }
 0x14a   : > { %v1354_v15 = vpop.f32.mrf.mxu0  ;;  %v1370_v16 = vpop.f32.mrf.mxu1 }
 0x14b   : > { %926 = vst [vmem:[#allocation2 + $0x60] sm:$0xff] %v894_v13  ;;  %942 = vst [vmem:[#allocation2 + $0xa0] sm:$0xff] %v910_v14  ;;  %v897_v19 = vadd.f32 %v1354_v15, %v512_v11  ;;  %v913_v20 = vadd.f32 %v1370_v16, %v528_v12  ;;  %949 = sbr.rel (%p1293_p13) target bundleno = 367 (0x16f), region = 85 }
 0x14c   : > { %v806_v21 = vpop.f32.mrf.mxu0  ;;  %v870_v22 = vpop.f32.mrf.mxu1 }
 0x14d   : > { %929 = vst [vmem:[#allocation2 + $0x78] sm:$0xff] %v897_v19  ;;  %945 = vst [vmem:[#allocation2 + $0x98] sm:$0xff] %v913_v20  ;;  %v895_v23 = vadd.f32 %v806_v21, %v510_v17  ;;  %v911_v24 = vadd.f32 %v870_v22, %v526_v18 }
 0x14f   : > { %927 = vst [vmem:[#allocation2 + $0xf0] sm:$0xff] %v895_v23  ;;  %943 = vst [vmem:[#allocation2 + $0xf8] sm:$0xff] %v911_v24 }
 0x150   : > { %v950_v25 = vld [vmem:[#allocation2 + $0xb0] sm:$0xff]  ;;  %v1724_v26 = vld [vmem:[%s1850_s2] ss:$0 sm:$0xff]  ;;  %v952_v30 = vld [vmem:[#allocation2 + $0xd8] sm:$0xff] }
 0x151   : > { %v1729_v27 = vld [vmem:[%s1851_s3] ss:$0 sm:$0xff]  ;;  %v989_v28 = vmul.f32 %v1724_v26, %v950_v25  ;;  %v953_v31 = vld [vmem:[#allocation2 + $0x18] sm:$0xff]  ;;  %v991_v33 = vmul.f32 %v1724_v26, %v952_v30  ;;  %v954_v35 = vld [vmem:[#allocation2 + $0x50] sm:$0xff] }
 0x152   : > { %v951_v29 = vld [vmem:[#allocation2] sm:$0xff]  ;;  %v992_v34 = vmul.f32 %v1724_v26, %v953_v31  ;;  %v955_v36 = vld [vmem:[#allocation2 + $0x68] sm:$0xff]  ;;  %v956_v37 = vld [vmem:[#allocation2 + $0x30] sm:$0xff]  ;;  %v993_v39 = vmul.f32 %v1724_v26, %v954_v35 }
 0x153   : > { %v990_v32 = vmul.f32 %v1724_v26, %v951_v29  ;;  %v1028_v38 = vadd.f32 %v1729_v27, %v989_v28  ;;  %v994_v40 = vmul.f32 %v1724_v26, %v955_v36  ;;  %v995_v41 = vmul.f32 %v1724_v26, %v956_v37  ;;  %v957_v42 = vld [vmem:[#allocation2 + $0x48] sm:$0xff]  ;;  %v958_v47 = vld [vmem:[#allocation2 + $0x80] sm:$0xff]  ;;  %v961_v54 = vld [vmem:[#allocation2 + $0xb8] sm:$0xff] }
 0x154   : > { %v1030_v44 = vadd.f32 %v1729_v27, %v991_v33  ;;  %v1031_v45 = vadd.f32 %v1729_v27, %v992_v34  ;;  %v996_v46 = vmul.f32 %v1724_v26, %v957_v42  ;;  %v1032_v49 = vadd.f32 %v1729_v27, %v993_v39  ;;  %v959_v52 = vld [vmem:[#allocation2 + $0x88] sm:$0xff]  ;;  %v962_v59 = vld [vmem:[#allocation2 + $0x60] sm:$0xff]  ;;  %v965_v2 = vld [vmem:[#allocation2 + $0x78] sm:$0xff] }
 0x155   : > { %v1029_v43 = vadd.f32 %v1729_v27, %v990_v32  ;;  %v1060_v48 = vmax.f32 %v1028_v38, 0.0  ;;  %v1033_v50 = vadd.f32 %v1729_v27, %v994_v40  ;;  %v1034_v51 = vadd.f32 %v1729_v27, %v995_v41  ;;  %v960_v53 = vld [vmem:[#allocation2 + $0xe8] sm:$0xff]  ;;  %v966_v15 = vld [vmem:[#allocation2 + $0x38] sm:$0xff]  ;;  %v968_v21 = vld [vmem:[#allocation2 + $0x40] sm:$0xff] }
 0x156   : > { %v1062_v56 = vmax.f32 %v1030_v44, 0.0  ;;  %v1063_v57 = vmax.f32 %v1031_v45, 0.0  ;;  %v1035_v58 = vadd.f32 %v1729_v27, %v996_v46  ;;  %v963_v60 = vld [vmem:[#allocation2 + $0xf0] sm:$0xff]  ;;  %v964_v61 = vld [vmem:[#allocation2 + $0x8] sm:$0xff]  ;;  %v1064_v62 = vmax.f32 %v1032_v49, 0.0  ;;  %v967_v20 = vld [vmem:[#allocation2 + $0x58] sm:$0xff] }
 0x157   : > { %v1061_v55 = vmax.f32 %v1029_v43, 0.0  ;;  %1092 = vst [vmem:[%s1691_s7] sm:$0xff] %v1060_v48  ;;  %v1065_v63 = vmax.f32 %v1033_v50, 0.0  ;;  %v1066_v0 = vmax.f32 %v1034_v51, 0.0  ;;  %v997_v1 = vmul.f32 %v1724_v26, %v958_v47  ;;  %v969_v22 = vld [vmem:[#allocation2 + $0xc8] sm:$0xff]  ;;  %v970_v29 = vld [vmem:[#allocation2 + $0xe0] sm:$0xff]  ;;  %v971_v30 = vld [vmem:[#allocation2 + $0x90] sm:$0xff] }
 0x158   : > { %1094 = vst [vmem:[%s1691_s7 + $0x10] sm:$0xff] %v1062_v56  ;;  %1095 = vst [vmem:[%s1691_s7 + $0x18] sm:$0xff] %v1063_v57  ;;  %v1067_v3 = vmax.f32 %v1035_v58, 0.0  ;;  %v998_v4 = vmul.f32 %v1724_v26, %v959_v52  ;;  %v999_v5 = vmul.f32 %v1724_v26, %v960_v53  ;;  %v1000_v6 = vmul.f32 %v1724_v26, %v961_v54  ;;  %v972_v31 = vld [vmem:[#allocation2 + $0x70] sm:$0xff]  ;;  %v973_v36 = vld [vmem:[#allocation2 + $0xc0] sm:$0xff] }
 0x159   : > { %1093 = vst [vmem:[%s1691_s7 + $0x8] sm:$0xff] %v1061_v55  ;;  %1096 = vst [vmem:[%s1691_s7 + $0x20] sm:$0xff] %v1064_v62  ;;  %v1036_v7 = vadd.f32 %v1729_v27, %v997_v1  ;;  %v1001_v8 = vmul.f32 %v1724_v26, %v962_v59  ;;  %v1002_v9 = vmul.f32 %v1724_v26, %v963_v60  ;;  %v974_v49 = vld [vmem:[#allocation2 + $0xa8] sm:$0xff]  ;;  %v975_v54 = vld [vmem:[#allocation2 + $0xd0] sm:$0xff] }
 0x15a   : > { %1097 = vst [vmem:[%s1691_s7 + $0x28] sm:$0xff] %v1065_v63  ;;  %1098 = vst [vmem:[%s1691_s7 + $0x30] sm:$0xff] %v1066_v0  ;;  %v1003_v10 = vmul.f32 %v1724_v26, %v964_v61  ;;  %v1037_v11 = vadd.f32 %v1729_v27, %v998_v4  ;;  %v1038_v12 = vadd.f32 %v1729_v27, %v999_v5  ;;  %v976_v55 = vld [vmem:[#allocation2 + $0x10] sm:$0xff]  ;;  %v977_v56 = vld [vmem:[#allocation2 + $0x28] sm:$0xff] }
 0x15b   : > { %1099 = vst [vmem:[%s1691_s7 + $0x38] sm:$0xff] %v1067_v3  ;;  %v1039_v13 = vadd.f32 %v1729_v27, %v1000_v6  ;;  %v1004_v14 = vmul.f32 %v1724_v26, %v965_v2  ;;  %v1068_v16 = vmax.f32 %v1036_v7, 0.0  ;;  %v1040_v17 = vadd.f32 %v1729_v27, %v1001_v8  ;;  %v978_v61 = vld [vmem:[#allocation2 + $0xa0] sm:$0xff]  ;;  %v979_v62 = vld [vmem:[#allocation2 + $0xf8] sm:$0xff] }
 0x15c   : > { %v1041_v18 = vadd.f32 %v1729_v27, %v1002_v9  ;;  %v1042_v19 = vadd.f32 %v1729_v27, %v1003_v10  ;;  %v1069_v23 = vmax.f32 %v1037_v11, 0.0  ;;  %v1070_v24 = vmax.f32 %v1038_v12, 0.0  ;;  %v980_v63 = vld [vmem:[#allocation2 + $0x20] sm:$0xff]  ;;  %v981_v4 = vld [vmem:[#allocation2 + $0x98] sm:$0xff] }
 0x15d   : > { %v1071_v25 = vmax.f32 %v1039_v13, 0.0  ;;  %v1043_v28 = vadd.f32 %v1729_v27, %v1004_v14  ;;  %1100 = vst [vmem:[%s1691_s7 + $0x40] sm:$0xff] %v1068_v16  ;;  %v1072_v32 = vmax.f32 %v1040_v17, 0.0  ;;  %v1005_v35 = vmul.f32 %v1724_v26, %v966_v15 }
 0x15e   : > { %v1073_v33 = vmax.f32 %v1041_v18, 0.0  ;;  %v1074_v34 = vmax.f32 %v1042_v19, 0.0  ;;  %1101 = vst [vmem:[%s1691_s7 + $0x48] sm:$0xff] %v1069_v23  ;;  %1102 = vst [vmem:[%s1691_s7 + $0x50] sm:$0xff] %v1070_v24  ;;  %v1006_v38 = vmul.f32 %v1724_v26, %v967_v20  ;;  %v1007_v39 = vmul.f32 %v1724_v26, %v968_v21 }
 0x15f   : > { %1103 = vst [vmem:[%s1691_s7 + $0x58] sm:$0xff] %v1071_v25  ;;  %v1075_v37 = vmax.f32 %v1043_v28, 0.0  ;;  %v1008_v40 = vmul.f32 %v1724_v26, %v969_v22  ;;  %1104 = vst [vmem:[%s1691_s7 + $0x60] sm:$0xff] %v1072_v32  ;;  %v1044_v41 = vadd.f32 %v1729_v27, %v1005_v35  ;;  %v1009_v42 = vmul.f32 %v1724_v26, %v970_v29 }
 0x160   : > { %1105 = vst [vmem:[%s1691_s7 + $0x68] sm:$0xff] %v1073_v33  ;;  %1106 = vst [vmem:[%s1691_s7 + $0x70] sm:$0xff] %v1074_v34  ;;  %v1010_v43 = vmul.f32 %v1724_v26, %v971_v30  ;;  %v1011_v44 = vmul.f32 %v1724_v26, %v972_v31  ;;  %v1045_v45 = vadd.f32 %v1729_v27, %v1006_v38 }
 0x161   : > { %1107 = vst [vmem:[%s1691_s7 + $0x78] sm:$0xff] %v1075_v37  ;;  %v1046_v46 = vadd.f32 %v1729_v27, %v1007_v39  ;;  %v1047_v47 = vadd.f32 %v1729_v27, %v1008_v40  ;;  %v1012_v48 = vmul.f32 %v1724_v26, %v973_v36  ;;  %v1076_v50 = vmax.f32 %v1044_v41, 0.0 }
 0x162   : > { %v1048_v51 = vadd.f32 %v1729_v27, %v1009_v42  ;;  %v1049_v52 = vadd.f32 %v1729_v27, %v1010_v43  ;;  %v1050_v53 = vadd.f32 %v1729_v27, %v1011_v44  ;;  %v1077_v57 = vmax.f32 %v1045_v45, 0.0 }
 0x163   : > { %v1078_v58 = vmax.f32 %v1046_v46, 0.0  ;;  %v1079_v59 = vmax.f32 %v1047_v47, 0.0  ;;  %v1051_v60 = vadd.f32 %v1729_v27, %v1012_v48  ;;  %1108 = vst [vmem:[%s1691_s7 + $0x80] sm:$0xff] %v1076_v50  ;;  %v1013_v3 = vmul.f32 %v1724_v26, %v974_v49 }
 0x164   : > { %v1080_v0 = vmax.f32 %v1048_v51, 0.0  ;;  %v1081_v1 = vmax.f32 %v1049_v52, 0.0  ;;  %v1082_v2 = vmax.f32 %v1050_v53, 0.0  ;;  %1109 = vst [vmem:[%s1691_s7 + $0x88] sm:$0xff] %v1077_v57  ;;  %v1014_v6 = vmul.f32 %v1724_v26, %v975_v54 }
 0x165   : > { %1110 = vst [vmem:[%s1691_s7 + $0x90] sm:$0xff] %v1078_v58  ;;  %1111 = vst [vmem:[%s1691_s7 + $0x98] sm:$0xff] %v1079_v59  ;;  %v1083_v5 = vmax.f32 %v1051_v60, 0.0  ;;  %v1015_v7 = vmul.f32 %v1724_v26, %v976_v55  ;;  %v1016_v8 = vmul.f32 %v1724_v26, %v977_v56  ;;  %v1052_v9 = vadd.f32 %v1729_v27, %v1013_v3 }
 0x166   : > { %1112 = vst [vmem:[%s1691_s7 + $0xa0] sm:$0xff] %v1080_v0  ;;  %1113 = vst [vmem:[%s1691_s7 + $0xa8] sm:$0xff] %v1081_v1  ;;  %v1017_v10 = vmul.f32 %v1724_v26, %v978_v61  ;;  %v1018_v11 = vmul.f32 %v1724_v26, %v979_v62  ;;  %v1019_v12 = vmul.f32 %v1724_v26, %v980_v63 }
 0x167   : > { %1114 = vst [vmem:[%s1691_s7 + $0xb0] sm:$0xff] %v1082_v2  ;;  %1115 = vst [vmem:[%s1691_s7 + $0xb8] sm:$0xff] %v1083_v5  ;;  %v1053_v13 = vadd.f32 %v1729_v27, %v1014_v6  ;;  %v1054_v14 = vadd.f32 %v1729_v27, %v1015_v7  ;;  %v1055_v15 = vadd.f32 %v1729_v27, %v1016_v8  ;;  %v1084_v17 = vmax.f32 %v1052_v9, 0.0 }
 0x168   : > { %v1020_v16 = vmul.f32 %v1724_v26, %v981_v4  ;;  %v1056_v18 = vadd.f32 %v1729_v27, %v1017_v10  ;;  %v1057_v19 = vadd.f32 %v1729_v27, %v1018_v11  ;;  %v1058_v20 = vadd.f32 %v1729_v27, %v1019_v12 }
 0x169   : > { %v1085_v21 = vmax.f32 %v1053_v13, 0.0  ;;  %v1086_v22 = vmax.f32 %v1054_v14, 0.0  ;;  %v1087_v23 = vmax.f32 %v1055_v15, 0.0  ;;  %1116 = vst [vmem:[%s1691_s7 + $0xc0] sm:$0xff] %v1084_v17 }
 0x16a   : > { %v1059_v24 = vadd.f32 %v1729_v27, %v1020_v16  ;;  %v1088_v25 = vmax.f32 %v1056_v18, 0.0  ;;  %v1089_v28 = vmax.f32 %v1057_v19, 0.0  ;;  %v1090_v26 = vmax.f32 %v1058_v20, 0.0 }
 0x16b   : > { %1117 = vst [vmem:[%s1691_s7 + $0xc8] sm:$0xff] %v1085_v21  ;;  %1118 = vst [vmem:[%s1691_s7 + $0xd0] sm:$0xff] %v1086_v22 }
 0x16c   : > { %1119 = vst [vmem:[%s1691_s7 + $0xd8] sm:$0xff] %v1087_v23  ;;  %v1091_v29 = vmax.f32 %v1059_v24, 0.0  ;;  %1120 = vst [vmem:[%s1691_s7 + $0xe0] sm:$0xff] %v1088_v25 }
 0x16d   : > { %1121 = vst [vmem:[%s1691_s7 + $0xe8] sm:$0xff] %v1089_v28  ;;  %1122 = vst [vmem:[%s1691_s7 + $0xf0] sm:$0xff] %v1090_v26 }
 0x16e   : > { %1123 = vst [vmem:[%s1691_s7 + $0xf8] sm:$0xff] %v1091_v29 }
 0x16f PF: > { %s14_s21 = sadd.s32 1, %s1522_s21   ;;  %s1853_s15 = smov %s1502_s16 }
 0x170   : > { %p11_p0 = scmp.ge.s32.totalorder %s14_s21, 6   ;;  %s1854_s16 = smov %s1601_s28 }
 0x171   : > { %s1855_s17 = smov %s1514_s19  ;;  %s1856_s18 = smov %s1518_s20 }
 0x172   : > { %s1857_s19 = smov %s1860_s22  ;;  %s1858_s20 = smov %s1864_s23 }
 0x173   :  { %13 = sbr.rel (!%p11_p0) target bundleno = 4 (0x4), region = 129 }

// kernel: full_mil_model_feats.17
= control target key start
LH: loop header
LB: loop body
LE: loop exit
PB: predicated region body
PF: predicated region fallthrough
CT: control target
= control target key end

     0   :  { %s1696_s18 = smov 0   ;;  %s1698_s19 = smov 0   ;;  %s2031_s0 = inlined_call_operand.vmem [shape: bf16[512,256], index: 0, kind: input, shape index: {}]   ;;  %s2032_s1 = inlined_call_operand.vmem [shape: bf16[256,128], index: 1, kind: input, shape index: {}]   ;;  %s2033_s2 = inlined_call_operand.vmem [shape: f32[1,128], index: 2, kind: input, shape index: {}]   ;;  %s2034_s3 = inlined_call_operand.vmem [shape: f32[1,128], index: 3, kind: input, shape index: {}]   ;;  %s2035_s4 = inlined_call_operand.vmem [shape: f32[512,128], index: 4, kind: input, shape index: {}]   ;;  %s2036_s5 = inlined_call_operand.vmem [shape: f32[512,128], index: 5, kind: output, shape index: {}]  }
   0x1   :  { %s1700_s20 = smov 0   ;;  %s1702_s21 = smov 0  }
   0x2   :  { %s1704_s22 = smov 0   ;;  %s1706_s23 = smov 0  }
   0x3   :  { %s1708_s24 = smov 0  }
   0x4 LB: > { %s27_s25 = sadd.s32 1, %s1655_s22  ;;  %s34_s26 = sadd.s32 1, %s1659_s23  ;;  %s1663_s24 = sphi %s1708_s24, %s15_s24   ;;  %s1659_s23 = sphi %s1706_s23, %s2042_s23   ;;  %s1655_s22 = sphi %s1704_s22, %s2041_s22   ;;  %s1651_s21 = sphi %s1702_s21, %s2040_s21   ;;  %s1647_s20 = sphi %s1700_s20, %s2039_s20   ;;  %s1643_s19 = sphi %s1698_s19, %s2038_s19   ;;  %s1639_s18 = sphi %s1696_s18, %s2037_s18  }
   0x5   : > { %p28_p0 = scmp.ge.s32.totalorder %s27_s25, 2  ;;  %p50_p1 = scmp.ne.s32.totalorder %s1643_s19, %s1639_s18 }
   0x6   : > { %p51_p2 = scmp.eq.s32.totalorder %s1663_s24, 0  ;;  %s43_s30 = sadd.s32 1, %s1643_s19 }
   0x7   : > { %s2044_s25 = smov (%p28_p0, %s27_s25), 0  ;;  %s2046_s26 = smov (!%p28_p0, %s34_s26), %s1659_s23 }
   0x8   : > { %p52_p3 = por %p51_p2, %p50_p1  ;;  %p36_p4 = scmp.ge.s32.totalorder %s2046_s26, 2 }
   0x9   : > { %s39_s27 = ssub.s32 %s1655_s22, %s2044_s25  ;;  %p1396_p6 = scmp.ge.s32.totalorder %s1663_s24, 4 }
   0xa   : > { %s2048_s26 = smov (%p36_p4, %s2046_s26), 0 }
   0xb   : > { %s38_s28 = ssub.s32 %s1659_s23, %s2048_s26  ;;  %224 = sbr.rel (%p1396_p6) target bundleno = 43 (0x2b), region = 24 }
   0xc   : > { %s40_s29 = sor.u32 %s39_s27, %s38_s28 }
   0xd   : > { %p41_p5 = scmp.eq.s32.totalorder %s40_s29, 0 }
   0xf   : > { %s1747_s6 = scalar_select %p41_p5, %s1643_s19, %s43_s30  }
  0x10   : > { %227 = sbr.rel (!%p52_p3) target bundleno = 43 (0x2b), region = 28  ;;  %s229_s7 = sand.u32 (%p52_p3), 1, %s1643_s19  }
  0x11   : > { %s1439_s8 = sshll.u32 (%p52_p3), %s1659_s23, 6  ;;  %s1397_s9 = sshll.u32 (%p52_p3), %s229_s7, 7 }
  0x12   : > { %s234_s10 = sadd.s32 (%p52_p3), %s1655_s22, %s1439_s8  ;;  %s1761_s15 = scalar_lea.vmem (%p52_p3), [#allocation3], %s1397_s9 }
  0x13   : > { %s1400_s11 = sshll.u32 (%p52_p3), %s234_s10, 2 }
  0x14   : > { %s1756_s14 = scalar_lea.vmem (%p52_p3), %s2031_s0, %s1400_s11 }
  0x15   : > { %v253_v0 = vld [vmem:[%s1756_s14] sm:$0xf]  ;;  %v255_v1 = vld [vmem:[%s1756_s14 + $0x8] sm:$0xf]  ;;  %v257_v2 = vld [vmem:[%s1756_s14 + $0x10] sm:$0xf] }
  0x16   : > { %254 = vst [vmem:[%s1761_s15] sm:$0xf] %v253_v0  ;;  %256 = vst [vmem:[%s1761_s15 + $0x4] sm:$0xf] %v255_v1  ;;  %v259_v3 = vld [vmem:[%s1756_s14 + $0x18] sm:$0xf] }
  0x17   : > { %258 = vst [vmem:[%s1761_s15 + $0x8] sm:$0xf] %v257_v2  ;;  %v261_v4 = vld [vmem:[%s1756_s14 + $0x20] sm:$0xf]  ;;  %v263_v5 = vld [vmem:[%s1756_s14 + $0x28] sm:$0xf] }
  0x18   : > { %260 = vst [vmem:[%s1761_s15 + $0xc] sm:$0xf] %v259_v3  ;;  %262 = vst [vmem:[%s1761_s15 + $0x10] sm:$0xf] %v261_v4  ;;  %v265_v6 = vld [vmem:[%s1756_s14 + $0x30] sm:$0xf] }
  0x19   : > { %264 = vst [vmem:[%s1761_s15 + $0x14] sm:$0xf] %v263_v5  ;;  %v267_v7 = vld [vmem:[%s1756_s14 + $0x38] sm:$0xf]  ;;  %v269_v8 = vld [vmem:[%s1756_s14 + $0x40] sm:$0xf] }
  0x1a   : > { %266 = vst [vmem:[%s1761_s15 + $0x18] sm:$0xf] %v265_v6  ;;  %268 = vst [vmem:[%s1761_s15 + $0x1c] sm:$0xf] %v267_v7  ;;  %v271_v9 = vld [vmem:[%s1756_s14 + $0x48] sm:$0xf] }
  0x1b   : > { %270 = vst [vmem:[%s1761_s15 + $0x20] sm:$0xf] %v269_v8  ;;  %v273_v10 = vld [vmem:[%s1756_s14 + $0x50] sm:$0xf]  ;;  %v275_v11 = vld [vmem:[%s1756_s14 + $0x58] sm:$0xf] }
  0x1c   : > { %272 = vst [vmem:[%s1761_s15 + $0x24] sm:$0xf] %v271_v9  ;;  %274 = vst [vmem:[%s1761_s15 + $0x28] sm:$0xf] %v273_v10  ;;  %v277_v12 = vld [vmem:[%s1756_s14 + $0x60] sm:$0xf] }
  0x1d   : > { %276 = vst [vmem:[%s1761_s15 + $0x2c] sm:$0xf] %v275_v11  ;;  %v279_v13 = vld [vmem:[%s1756_s14 + $0x68] sm:$0xf]  ;;  %v281_v14 = vld [vmem:[%s1756_s14 + $0x70] sm:$0xf] }
  0x1e   : > { %278 = vst [vmem:[%s1761_s15 + $0x30] sm:$0xf] %v277_v12  ;;  %280 = vst [vmem:[%s1761_s15 + $0x34] sm:$0xf] %v279_v13  ;;  %v283_v15 = vld [vmem:[%s1756_s14 + $0x78] sm:$0xf] }
  0x1f   : > { %282 = vst [vmem:[%s1761_s15 + $0x38] sm:$0xf] %v281_v14  ;;  %v285_v16 = vld [vmem:[%s1756_s14 + $0x80] sm:$0xf]  ;;  %v287_v17 = vld [vmem:[%s1756_s14 + $0x88] sm:$0xf] }
  0x20   : > { %284 = vst [vmem:[%s1761_s15 + $0x3c] sm:$0xf] %v283_v15  ;;  %286 = vst [vmem:[%s1761_s15 + $0x40] sm:$0xf] %v285_v16  ;;  %v289_v18 = vld [vmem:[%s1756_s14 + $0x90] sm:$0xf] }
  0x21   : > { %288 = vst [vmem:[%s1761_s15 + $0x44] sm:$0xf] %v287_v17  ;;  %v291_v19 = vld [vmem:[%s1756_s14 + $0x98] sm:$0xf]  ;;  %v293_v20 = vld [vmem:[%s1756_s14 + $0xa0] sm:$0xf] }
  0x22   : > { %290 = vst [vmem:[%s1761_s15 + $0x48] sm:$0xf] %v289_v18  ;;  %292 = vst [vmem:[%s1761_s15 + $0x4c] sm:$0xf] %v291_v19  ;;  %v295_v21 = vld [vmem:[%s1756_s14 + $0xa8] sm:$0xf] }
  0x23   : > { %294 = vst [vmem:[%s1761_s15 + $0x50] sm:$0xf] %v293_v20  ;;  %v297_v22 = vld [vmem:[%s1756_s14 + $0xb0] sm:$0xf]  ;;  %v299_v23 = vld [vmem:[%s1756_s14 + $0xb8] sm:$0xf] }
  0x24   : > { %296 = vst [vmem:[%s1761_s15 + $0x54] sm:$0xf] %v295_v21  ;;  %298 = vst [vmem:[%s1761_s15 + $0x58] sm:$0xf] %v297_v22  ;;  %v301_v24 = vld [vmem:[%s1756_s14 + $0xc0] sm:$0xf] }
  0x25   : > { %300 = vst [vmem:[%s1761_s15 + $0x5c] sm:$0xf] %v299_v23  ;;  %v303_v25 = vld [vmem:[%s1756_s14 + $0xc8] sm:$0xf]  ;;  %v305_v26 = vld [vmem:[%s1756_s14 + $0xd0] sm:$0xf] }
  0x26   : > { %302 = vst [vmem:[%s1761_s15 + $0x60] sm:$0xf] %v301_v24  ;;  %304 = vst [vmem:[%s1761_s15 + $0x64] sm:$0xf] %v303_v25  ;;  %v307_v27 = vld [vmem:[%s1756_s14 + $0xd8] sm:$0xf] }
  0x27   : > { %306 = vst [vmem:[%s1761_s15 + $0x68] sm:$0xf] %v305_v26  ;;  %v309_v28 = vld [vmem:[%s1756_s14 + $0xe0] sm:$0xf]  ;;  %v311_v29 = vld [vmem:[%s1756_s14 + $0xe8] sm:$0xf] }
  0x28   : > { %308 = vst [vmem:[%s1761_s15 + $0x6c] sm:$0xf] %v307_v27  ;;  %310 = vst [vmem:[%s1761_s15 + $0x70] sm:$0xf] %v309_v28  ;;  %v313_v30 = vld [vmem:[%s1756_s14 + $0xf0] sm:$0xf] }
  0x29   : > { %312 = vst [vmem:[%s1761_s15 + $0x74] sm:$0xf] %v311_v29  ;;  %v315_v31 = vld [vmem:[%s1756_s14 + $0xf8] sm:$0xf]  ;;  %314 = vst [vmem:[%s1761_s15 + $0x78] sm:$0xf] %v313_v30 }
  0x2a   : > { %316 = vst [vmem:[%s1761_s15 + $0x7c] sm:$0xf] %v315_v31 }
  0x2b PF: > { %p1401_p7 = scmp.ge.s32.totalorder %s1663_s24, 1  ;;  %p427_p8 = scmp.lt.s32.totalorder %s1663_s24, 5 }
  0x2d   : > { %p428_p9 = pnand %p1401_p7, %p427_p8 }
  0x2e   : > { %s434_s16 = sand.u32 (!%p428_p9), 1, %s1639_s18   ;;  %s1403_s17 = sshll.u32 (!%p428_p9), %s1647_s20, 4 }
  0x2f   : > { %431 = sbr.rel (%p428_p9) target bundleno = 376 (0x178), region = 77  ;;  %s1402_s27 = sshll.u32 (!%p428_p9), %s434_s16, 7 }
  0x30   : > { %p488_p10 = scmp.lt.s32.totalorder (!%p428_p9), %s1403_s17, 31  ;;  %s1405_s28 = sshll.u32 (!%p428_p9), %s1651_s21, 5 }
  0x31   : > { %p503_p11 = scmp.lt.s32.totalorder (!%p428_p9), %s1405_s28, 63  ;;  %s1844_s21 = scalar_lea.vmem (!%p428_p9), [#allocation3], %s1402_s27 }
  0x32   : > { %p1409_p12 = scmp.ne.s32.totalorder (!%p428_p9), %s1647_s20, 0 }
  0x34   : > { %s2050_s17 = smov (!%p488_p10, %s1403_s17), 31  ;;  %s2052_s28 = smov (!%p503_p11, %s1405_s28), 63 }
  0x35   : > { %s1404_s29 = sshll.u32 %s2050_s17, 2  ;;  %s1406_s9 = sshll.u32 %s2052_s28, 3 }
  0x36   : > { %s1832_s8 = scalar_lea.vmem %s2032_s1, %s1404_s29  ;;  %s1837_s12 = scalar_lea.vmem %s2035_s4, %s1406_s9 }
  0x37   : > { %s1842_s14 = scalar_lea.vmem %s2036_s5, %s1406_s9  ;;  %524 = sbr.rel (%p1409_p12) target bundleno = 77 (0x4d), region = 85 }
  0x3c   : > { %v1665_v32 = vmov 0.0  }
  0x3d   : > { %525 = vst [vmem:[#allocation2 + $0xb0] sm:$0xff] %v1665_v32  ;;  %526 = vst [vmem:[#allocation2] sm:$0xff] %v1665_v32 }
  0x3e   : > { %527 = vst [vmem:[#allocation2 + $0xd8] sm:$0xff] %v1665_v32  ;;  %528 = vst [vmem:[#allocation2 + $0x18] sm:$0xff] %v1665_v32 }
  0x3f   : > { %529 = vst [vmem:[#allocation2 + $0x50] sm:$0xff] %v1665_v32  ;;  %530 = vst [vmem:[#allocation2 + $0x68] sm:$0xff] %v1665_v32 }
  0x40   : > { %531 = vst [vmem:[#allocation2 + $0x30] sm:$0xff] %v1665_v32  ;;  %532 = vst [vmem:[#allocation2 + $0x48] sm:$0xff] %v1665_v32 }
  0x41   : > { %533 = vst [vmem:[#allocation2 + $0x80] sm:$0xff] %v1665_v32  ;;  %534 = vst [vmem:[#allocation2 + $0x88] sm:$0xff] %v1665_v32 }
  0x42   : > { %535 = vst [vmem:[#allocation2 + $0xe8] sm:$0xff] %v1665_v32  ;;  %536 = vst [vmem:[#allocation2 + $0xb8] sm:$0xff] %v1665_v32 }
  0x43   : > { %537 = vst [vmem:[#allocation2 + $0x60] sm:$0xff] %v1665_v32  ;;  %538 = vst [vmem:[#allocation2 + $0xf0] sm:$0xff] %v1665_v32 }
  0x44   : > { %539 = vst [vmem:[#allocation2 + $0x8] sm:$0xff] %v1665_v32  ;;  %540 = vst [vmem:[#allocation2 + $0x78] sm:$0xff] %v1665_v32 }
  0x45   : > { %541 = vst [vmem:[#allocation2 + $0x38] sm:$0xff] %v1665_v32  ;;  %542 = vst [vmem:[#allocation2 + $0x58] sm:$0xff] %v1665_v32 }
  0x46   : > { %543 = vst [vmem:[#allocation2 + $0x40] sm:$0xff] %v1665_v32  ;;  %544 = vst [vmem:[#allocation2 + $0xc8] sm:$0xff] %v1665_v32 }
  0x47   : > { %545 = vst [vmem:[#allocation2 + $0xe0] sm:$0xff] %v1665_v32  ;;  %546 = vst [vmem:[#allocation2 + $0x90] sm:$0xff] %v1665_v32 }
  0x48   : > { %547 = vst [vmem:[#allocation2 + $0x70] sm:$0xff] %v1665_v32  ;;  %548 = vst [vmem:[#allocation2 + $0xc0] sm:$0xff] %v1665_v32 }
  0x49   : > { %549 = vst [vmem:[#allocation2 + $0xa8] sm:$0xff] %v1665_v32  ;;  %550 = vst [vmem:[#allocation2 + $0xd0] sm:$0xff] %v1665_v32 }
  0x4a   : > { %551 = vst [vmem:[#allocation2 + $0x10] sm:$0xff] %v1665_v32  ;;  %552 = vst [vmem:[#allocation2 + $0x28] sm:$0xff] %v1665_v32 }
  0x4b   : > { %553 = vst [vmem:[#allocation2 + $0xa0] sm:$0xff] %v1665_v32  ;;  %554 = vst [vmem:[#allocation2 + $0xf8] sm:$0xff] %v1665_v32 }
  0x4c   : > { %555 = vst [vmem:[#allocation2 + $0x20] sm:$0xff] %v1665_v32  ;;  %556 = vst [vmem:[#allocation2 + $0x98] sm:$0xff] %v1665_v32 }
  0x4d PF: > { %v1585_v33 = vld [vmem:[%s1832_s8 + $0x38] sm:$0xff]   ;;  %v1586_v34 = vld [vmem:[%s1832_s8 + $0x30] sm:$0xff]   ;;  %v1587_v35 = vld [vmem:[%s1832_s8 + $0x28] sm:$0xff]   ;;  %p1434_p13 = scmp.ne.s32.totalorder %s1647_s20, 1 }
  0x4e   : > { %1464 = vmatprep.subr.bf16.mxu0 %v1585_v33  ;;  %1512 = vmatprep.subr.bf16.mxu1 %v1585_v33  ;;  %v1588_v36 = vld [vmem:[%s1832_s8 + $0x20] sm:$0xff]   ;;  %v1589_v39 = vld [vmem:[%s1832_s8 + $0x18] sm:$0xff]   ;;  %v1590_v40 = vld [vmem:[%s1832_s8 + $0x10] sm:$0xff]  }
  0x4f   : > { %1465 = vmatpush3.bf16.msra.mxu0 %v1585_v33  ;;  %1520 = vmatpush3.bf16.msra.mxu1 %v1585_v33  ;;  %v1593_v37 = vld [vmem:[%s1844_s21] sm:$0xff]   ;;  %v1591_v41 = vld [vmem:[%s1832_s8 + $0x8] sm:$0xff]   ;;  %v1597_v45 = vld [vmem:[%s1844_s21 + $0x10] sm:$0xff]  }
  0x50   : > { %1466 = vmatprep.subr.bf16.mxu0 %v1586_v34  ;;  %1513 = vmatprep.subr.bf16.mxu1 %v1586_v34  ;;  %v1594_v38 = vld [vmem:[%s1844_s21 + $0x40] sm:$0xff]   ;;  %v1595_v43 = vld [vmem:[%s1844_s21 + $0x8] sm:$0xff]   ;;  %v1598_v46 = vld [vmem:[%s1844_s21 + $0x50] sm:$0xff]  }
  0x51   : > { %1480 = vmatprep.mubr.bf16.mxu0 %v1593_v37  ;;  %1496 = vmatprep.mubr.bf16.mxu1 %v1594_v38  ;;  %v1592_v42 = vld [vmem:[%s1832_s8] sm:$0xff]   ;;  %v1596_v44 = vld [vmem:[%s1844_s21 + $0x48] sm:$0xff]   ;;  %v1599_v47 = vld [vmem:[%s1844_s21 + $0x18] sm:$0xff]  }
  0x52   : > { %v1600_v48 = vld [vmem:[%s1844_s21 + $0x58] sm:$0xff]   ;;  %v1601_v49 = vld [vmem:[%s1844_s21 + $0x20] sm:$0xff]   ;;  %v1603_v51 = vld [vmem:[%s1844_s21 + $0x28] sm:$0xff]  }
  0x53   : > { %1467 = vmatpush3.bf16.msra.mxu0 %v1586_v34  ;;  %1521 = vmatpush3.bf16.msra.mxu1 %v1586_v34  ;;  %v1602_v50 = vld [vmem:[%s1844_s21 + $0x60] sm:$0xff]   ;;  %v1604_v52 = vld [vmem:[%s1844_s21 + $0x68] sm:$0xff]   ;;  %v1605_v53 = vld [vmem:[%s1844_s21 + $0x30] sm:$0xff]  }
  0x54   : > { %1468 = vmatprep.subr.bf16.mxu0 %v1587_v35  ;;  %1514 = vmatprep.subr.bf16.mxu1 %v1587_v35  ;;  %v1606_v54 = vld [vmem:[%s1844_s21 + $0x70] sm:$0xff]   ;;  %v1607_v55 = vld [vmem:[%s1844_s21 + $0x38] sm:$0xff]   ;;  %v575_v58 = vld [vmem:[#allocation2 + $0x40] sm:$0xff] }
  0x55   : > { %v1608_v56 = vld [vmem:[%s1844_s21 + $0x78] sm:$0xff]   ;;  %v557_v61 = vld [vmem:[#allocation2 + $0xb0] sm:$0xff]  ;;  %v576_v4 = vld [vmem:[#allocation2 + $0xc8] sm:$0xff] }
  0x56   : > { %v559_v57 = vld [vmem:[#allocation2 + $0xd8] sm:$0xff]  ;;  %v558_v9 = vld [vmem:[#allocation2] sm:$0xff]  ;;  %v563_v15 = vld [vmem:[#allocation2 + $0x30] sm:$0xff] }
  0x57   : > { %1469 = vmatpush3.bf16.msra.mxu0 %v1587_v35  ;;  %1522 = vmatpush3.bf16.msra.mxu1 %v1587_v35  ;;  %v573_v62 = vld [vmem:[#allocation2 + $0x38] sm:$0xff]  ;;  %v579_v16 = vld [vmem:[#allocation2 + $0x70] sm:$0xff]  ;;  %v577_v22 = vld [vmem:[#allocation2 + $0xe0] sm:$0xff] }
  0x58   : > { %1470 = vmatprep.subr.bf16.mxu0 %v1588_v36  ;;  %1515 = vmatprep.subr.bf16.mxu1 %v1588_v36  ;;  %v560_v3 = vld [vmem:[#allocation2 + $0x18] sm:$0xff]  ;;  %v561_v21 = vld [vmem:[#allocation2 + $0x50] sm:$0xff]  ;;  %v564_v27 = vld [vmem:[#allocation2 + $0x48] sm:$0xff] }
  0x59   : > { %v574_v10 = vld [vmem:[#allocation2 + $0x58] sm:$0xff]  ;;  %v580_v28 = vld [vmem:[#allocation2 + $0xc0] sm:$0xff]  ;;  %v562_v33 = vld [vmem:[#allocation2 + $0x68] sm:$0xff] }
  0x5a   : > { %v578_v34 = vld [vmem:[#allocation2 + $0x90] sm:$0xff] }
  0x5b   : > { %1471 = vmatpush3.bf16.msra.mxu0 %v1588_v36  ;;  %1523 = vmatpush3.bf16.msra.mxu1 %v1588_v36 }
  0x5c   : > { %1472 = vmatprep.subr.bf16.mxu0 %v1589_v39  ;;  %1516 = vmatprep.subr.bf16.mxu1 %v1589_v39 }
  0x5f   : > { %1473 = vmatpush3.bf16.msra.mxu0 %v1589_v39  ;;  %1524 = vmatpush3.bf16.msra.mxu1 %v1589_v39  ;;  %v567_v39 = vld [vmem:[#allocation2 + $0xe8] sm:$0xff] }
  0x60   : > { %1474 = vmatprep.subr.bf16.mxu0 %v1590_v40  ;;  %1517 = vmatprep.subr.bf16.mxu1 %v1590_v40 }
  0x63   : > { %1475 = vmatpush3.bf16.msra.mxu0 %v1590_v40  ;;  %1525 = vmatpush3.bf16.msra.mxu1 %v1590_v40  ;;  %v583_v40 = vld [vmem:[#allocation2 + $0x10] sm:$0xff] }
  0x64   : > { %1476 = vmatprep.subr.bf16.mxu0 %v1591_v41  ;;  %1518 = vmatprep.subr.bf16.mxu1 %v1591_v41 }
  0x67   : > { %1477 = vmatpush3.bf16.msra.mxu0 %v1591_v41  ;;  %1526 = vmatpush3.bf16.msra.mxu1 %v1591_v41 }
  0x68   : > { %1478 = vmatprep.subr.bf16.mxu0 %v1592_v42  ;;  %1519 = vmatprep.subr.bf16.mxu1 %v1592_v42 }
  0x6b   : > { %1479 = vmatpush3.bf16.msra.mxu0 %v1592_v42  ;;  %1527 = vmatpush3.bf16.msra.mxu1 %v1592_v42 }
  0x6e   : > { %1481 = vmatmul.mubr.bf16.vlgmr.msra.gmra.mxu0 %v1595_v43  ;;  %1497 = vmatmul.mubr.bf16.vlgmr.msra.gmra.mxu1 %v1596_v44 }
  0x6f   : > { %1484 = vmatprep.mubr.bf16.mxu0 %v1597_v45  ;;  %1500 = vmatprep.mubr.bf16.mxu1 %v1598_v46  ;;  %v565_v45 = vld [vmem:[#allocation2 + $0x80] sm:$0xff]  ;;  %v581_v46 = vld [vmem:[#allocation2 + $0xa8] sm:$0xff] }
  0x76   : > { %1485 = vmatmul.mubr.bf16.gmra.mxu0 %v1599_v47  ;;  %1501 = vmatmul.mubr.bf16.gmra.mxu1 %v1600_v48 }
  0x77   : > { %1488 = vmatprep.mubr.bf16.mxu0 %v1601_v49  ;;  %1504 = vmatprep.mubr.bf16.mxu1 %v1602_v50 }
  0x7e   : > { %1489 = vmatmul.mubr.bf16.gmra.mxu0 %v1603_v51  ;;  %1505 = vmatmul.mubr.bf16.gmra.mxu1 %v1604_v52  ;;  %v568_v51 = vld [vmem:[#allocation2 + $0xb8] sm:$0xff]  ;;  %v584_v52 = vld [vmem:[#allocation2 + $0x28] sm:$0xff] }
  0x7f   : > { %1492 = vmatprep.mubr.bf16.mxu0 %v1605_v53  ;;  %1508 = vmatprep.mubr.bf16.mxu1 %v1606_v54 }
  0x86   : > { %1493 = vmatmul.mubr.bf16.gmra.mxu0 %v1607_v55  ;;  %1509 = vmatmul.mubr.bf16.gmra.mxu1 %v1608_v56 }
 0x12e   : > { %v1482_v59 = vpop.f32.mrf.mxu0  ;;  %v1498_v60 = vpop.f32.mrf.mxu1 }
 0x12f   : > { %v944_v63 = vadd.f32 %v1482_v59, %v559_v57  ;;  %v960_v0 = vadd.f32 %v1498_v60, %v575_v58  ;;  %v566_v57 = vld [vmem:[#allocation2 + $0x88] sm:$0xff]  ;;  %v582_v58 = vld [vmem:[#allocation2 + $0xd0] sm:$0xff] }
 0x130   : > { %v815_v1 = vpop.f32.mrf.mxu0  ;;  %v879_v2 = vpop.f32.mrf.mxu1 }
 0x131   : > { %976 = vst [vmem:[#allocation2 + $0xd8] sm:$0xff] %v944_v63  ;;  %992 = vst [vmem:[#allocation2 + $0x40] sm:$0xff] %v960_v0  ;;  %v942_v5 = vadd.f32 %v815_v1, %v557_v61  ;;  %v958_v6 = vadd.f32 %v879_v2, %v573_v62  ;;  %v571_v63 = vld [vmem:[#allocation2 + $0x8] sm:$0xff]  ;;  %v587_v0 = vld [vmem:[#allocation2 + $0x20] sm:$0xff] }
 0x132   : > { %v1483_v7 = vpop.f32.mrf.mxu0  ;;  %v1499_v8 = vpop.f32.mrf.mxu1 }
 0x133   : > { %974 = vst [vmem:[#allocation2 + $0xb0] sm:$0xff] %v942_v5  ;;  %990 = vst [vmem:[#allocation2 + $0x38] sm:$0xff] %v958_v6  ;;  %v945_v11 = vadd.f32 %v1483_v7, %v560_v3  ;;  %v961_v12 = vadd.f32 %v1499_v8, %v576_v4  ;;  %v569_v5 = vld [vmem:[#allocation2 + $0x60] sm:$0xff] }
 0x134   : > { %v818_v13 = vpop.f32.mrf.mxu0  ;;  %v882_v14 = vpop.f32.mrf.mxu1  ;;  %v585_v6 = vld [vmem:[#allocation2 + $0xa0] sm:$0xff] }
 0x135   : > { %977 = vst [vmem:[#allocation2 + $0x18] sm:$0xff] %v945_v11  ;;  %993 = vst [vmem:[#allocation2 + $0xc8] sm:$0xff] %v961_v12  ;;  %v943_v17 = vadd.f32 %v818_v13, %v558_v9  ;;  %v959_v18 = vadd.f32 %v882_v14, %v574_v10  ;;  %v572_v11 = vld [vmem:[#allocation2 + $0x78] sm:$0xff] }
 0x136   : > { %v1486_v19 = vpop.f32.mrf.mxu0  ;;  %v1502_v20 = vpop.f32.mrf.mxu1  ;;  %v588_v12 = vld [vmem:[#allocation2 + $0x98] sm:$0xff] }
 0x137   : > { %975 = vst [vmem:[#allocation2] sm:$0xff] %v943_v17  ;;  %991 = vst [vmem:[#allocation2 + $0x58] sm:$0xff] %v959_v18  ;;  %v948_v23 = vadd.f32 %v1486_v19, %v563_v15  ;;  %v964_v24 = vadd.f32 %v1502_v20, %v579_v16  ;;  %v570_v17 = vld [vmem:[#allocation2 + $0xf0] sm:$0xff]  ;;  %v586_v18 = vld [vmem:[#allocation2 + $0xf8] sm:$0xff] }
 0x138   : > { %v831_v25 = vpop.f32.mrf.mxu0  ;;  %v895_v26 = vpop.f32.mrf.mxu1 }
 0x139   : > { %980 = vst [vmem:[#allocation2 + $0x30] sm:$0xff] %v948_v23  ;;  %996 = vst [vmem:[#allocation2 + $0x70] sm:$0xff] %v964_v24  ;;  %v946_v29 = vadd.f32 %v831_v25, %v561_v21  ;;  %v962_v30 = vadd.f32 %v895_v26, %v577_v22 }
 0x13a   : > { %v1487_v31 = vpop.f32.mrf.mxu0  ;;  %v1503_v32 = vpop.f32.mrf.mxu1 }
 0x13b   : > { %978 = vst [vmem:[#allocation2 + $0x50] sm:$0xff] %v946_v29  ;;  %994 = vst [vmem:[#allocation2 + $0xe0] sm:$0xff] %v962_v30  ;;  %v949_v35 = vadd.f32 %v1487_v31, %v564_v27  ;;  %v965_v36 = vadd.f32 %v1503_v32, %v580_v28 }
 0x13c   : > { %v834_v37 = vpop.f32.mrf.mxu0  ;;  %v898_v38 = vpop.f32.mrf.mxu1 }
 0x13d   : > { %981 = vst [vmem:[#allocation2 + $0x48] sm:$0xff] %v949_v35  ;;  %997 = vst [vmem:[#allocation2 + $0xc0] sm:$0xff] %v965_v36  ;;  %v947_v41 = vadd.f32 %v834_v37, %v562_v33  ;;  %v963_v42 = vadd.f32 %v898_v38, %v578_v34 }
 0x13e   : > { %v1490_v43 = vpop.f32.mrf.mxu0  ;;  %v1506_v44 = vpop.f32.mrf.mxu1 }
 0x13f   : > { %979 = vst [vmem:[#allocation2 + $0x68] sm:$0xff] %v947_v41  ;;  %995 = vst [vmem:[#allocation2 + $0x90] sm:$0xff] %v963_v42  ;;  %v952_v47 = vadd.f32 %v1490_v43, %v567_v39  ;;  %v968_v48 = vadd.f32 %v1506_v44, %v583_v40 }
 0x140   : > { %v847_v49 = vpop.f32.mrf.mxu0  ;;  %v911_v50 = vpop.f32.mrf.mxu1 }
 0x141   : > { %984 = vst [vmem:[#allocation2 + $0xe8] sm:$0xff] %v952_v47  ;;  %1000 = vst [vmem:[#allocation2 + $0x10] sm:$0xff] %v968_v48  ;;  %v950_v53 = vadd.f32 %v847_v49, %v565_v45  ;;  %v966_v54 = vadd.f32 %v911_v50, %v581_v46 }
 0x142   : > { %v1491_v55 = vpop.f32.mrf.mxu0  ;;  %v1507_v56 = vpop.f32.mrf.mxu1 }
 0x143   : > { %982 = vst [vmem:[#allocation2 + $0x80] sm:$0xff] %v950_v53  ;;  %998 = vst [vmem:[#allocation2 + $0xa8] sm:$0xff] %v966_v54  ;;  %v953_v59 = vadd.f32 %v1491_v55, %v568_v51  ;;  %v969_v60 = vadd.f32 %v1507_v56, %v584_v52 }
 0x144   : > { %v850_v61 = vpop.f32.mrf.mxu0  ;;  %v914_v62 = vpop.f32.mrf.mxu1 }
 0x145   : > { %985 = vst [vmem:[#allocation2 + $0xb8] sm:$0xff] %v953_v59  ;;  %1001 = vst [vmem:[#allocation2 + $0x28] sm:$0xff] %v969_v60  ;;  %v951_v1 = vadd.f32 %v850_v61, %v566_v57  ;;  %v967_v2 = vadd.f32 %v914_v62, %v582_v58 }
 0x146   : > { %v1494_v3 = vpop.f32.mrf.mxu0  ;;  %v1510_v4 = vpop.f32.mrf.mxu1 }
 0x147   : > { %983 = vst [vmem:[#allocation2 + $0x88] sm:$0xff] %v951_v1  ;;  %999 = vst [vmem:[#allocation2 + $0xd0] sm:$0xff] %v967_v2  ;;  %v956_v7 = vadd.f32 %v1494_v3, %v571_v63  ;;  %v972_v8 = vadd.f32 %v1510_v4, %v587_v0 }
 0x148   : > { %v863_v9 = vpop.f32.mrf.mxu0  ;;  %v927_v10 = vpop.f32.mrf.mxu1 }
 0x149   : > { %988 = vst [vmem:[#allocation2 + $0x8] sm:$0xff] %v956_v7  ;;  %1004 = vst [vmem:[#allocation2 + $0x20] sm:$0xff] %v972_v8  ;;  %v954_v13 = vadd.f32 %v863_v9, %v569_v5  ;;  %v970_v14 = vadd.f32 %v927_v10, %v585_v6 }
 0x14a   : > { %v1495_v15 = vpop.f32.mrf.mxu0  ;;  %v1511_v16 = vpop.f32.mrf.mxu1 }
 0x14b   : > { %986 = vst [vmem:[#allocation2 + $0x60] sm:$0xff] %v954_v13  ;;  %1002 = vst [vmem:[#allocation2 + $0xa0] sm:$0xff] %v970_v14  ;;  %v957_v19 = vadd.f32 %v1495_v15, %v572_v11  ;;  %v973_v20 = vadd.f32 %v1511_v16, %v588_v12  ;;  %1009 = sbr.rel (%p1434_p13) target bundleno = 376 (0x178), region = 89 }
 0x14c   : > { %v866_v21 = vpop.f32.mrf.mxu0  ;;  %v930_v22 = vpop.f32.mrf.mxu1 }
 0x14d   : > { %989 = vst [vmem:[#allocation2 + $0x78] sm:$0xff] %v957_v19  ;;  %1005 = vst [vmem:[#allocation2 + $0x98] sm:$0xff] %v973_v20  ;;  %v955_v23 = vadd.f32 %v866_v21, %v570_v17  ;;  %v971_v24 = vadd.f32 %v930_v22, %v586_v18 }
 0x14f   : > { %987 = vst [vmem:[#allocation2 + $0xf0] sm:$0xff] %v955_v23  ;;  %1003 = vst [vmem:[#allocation2 + $0xf8] sm:$0xff] %v971_v24 }
 0x150   : > { %v1010_v25 = vld [vmem:[#allocation2 + $0xb0] sm:$0xff]  ;;  %v1875_v26 = vld [vmem:[%s2033_s2] ss:$0 sm:$0xff]  ;;  %v1012_v32 = vld [vmem:[#allocation2 + $0xd8] sm:$0xff] }
 0x151   : > { %v1880_v27 = vld [vmem:[%s2034_s3] ss:$0 sm:$0xff]  ;;  %v1049_v28 = vmul.f32 %v1875_v26, %v1010_v25  ;;  %v1013_v33 = vld [vmem:[#allocation2 + $0x18] sm:$0xff]  ;;  %v1121_v35 = vld [vmem:[%s1837_s12 + $0x8] sm:$0xff]  ;;  %v1051_v36 = vmul.f32 %v1875_v26, %v1012_v32 }
 0x152   : > { %v1011_v29 = vld [vmem:[#allocation2] sm:$0xff]  ;;  %v1122_v37 = vld [vmem:[%s1837_s12 + $0x10] sm:$0xff]  ;;  %v1052_v38 = vmul.f32 %v1875_v26, %v1013_v33  ;;  %v1123_v41 = vld [vmem:[%s1837_s12 + $0x18] sm:$0xff] }
 0x153   : > { %v1120_v30 = vld [vmem:[%s1837_s12] sm:$0xff]  ;;  %v1050_v31 = vmul.f32 %v1875_v26, %v1011_v29  ;;  %v1088_v34 = vadd.f32 %v1880_v27, %v1049_v28  ;;  %v1014_v39 = vld [vmem:[#allocation2 + $0x50] sm:$0xff]  ;;  %v1015_v43 = vld [vmem:[#allocation2 + $0x68] sm:$0xff]  ;;  %v1090_v46 = vadd.f32 %v1880_v27, %v1051_v36 }
 0x154   : > { %v1053_v42 = vmul.f32 %v1875_v26, %v1014_v39  ;;  %v1016_v44 = vld [vmem:[#allocation2 + $0x30] sm:$0xff]  ;;  %v1091_v47 = vadd.f32 %v1880_v27, %v1052_v38  ;;  %v1124_v48 = vld [vmem:[%s1837_s12 + $0x20] sm:$0xff]  ;;  %v1054_v49 = vmul.f32 %v1875_v26, %v1015_v43  ;;  %v1017_v50 = vld [vmem:[#allocation2 + $0x48] sm:$0xff] }
 0x155   : > { %v1089_v40 = vadd.f32 %v1880_v27, %v1050_v31  ;;  %v1152_v45 = vadd.f32 %v1120_v30, %v1088_v34  ;;  %v1125_v53 = vld [vmem:[%s1837_s12 + $0x28] sm:$0xff]  ;;  %v1055_v54 = vmul.f32 %v1875_v26, %v1016_v44  ;;  %v1056_v55 = vmul.f32 %v1875_v26, %v1017_v50  ;;  %v1018_v56 = vld [vmem:[#allocation2 + $0x80] sm:$0xff]  ;;  %v1126_v61 = vld [vmem:[%s1837_s12 + $0x30] sm:$0xff] }
 0x156   : > { %v1092_v52 = vadd.f32 %v1880_v27, %v1053_v42  ;;  %v1154_v58 = vadd.f32 %v1122_v37, %v1090_v46  ;;  %v1155_v59 = vadd.f32 %v1123_v41, %v1091_v47  ;;  %v1093_v60 = vadd.f32 %v1880_v27, %v1054_v49  ;;  %v1127_v62 = vld [vmem:[%s1837_s12 + $0x38] sm:$0xff]  ;;  %v1019_v63 = vld [vmem:[#allocation2 + $0x88] sm:$0xff]  ;;  %v1022_v10 = vld [vmem:[#allocation2 + $0x60] sm:$0xff] }
 0x157   : > { %v1153_v51 = vadd.f32 %v1121_v35, %v1089_v40  ;;  %v1184_v57 = vmax.f32 %v1152_v45, 0.0  ;;  %v1094_v2 = vadd.f32 %v1880_v27, %v1055_v54  ;;  %v1095_v3 = vadd.f32 %v1880_v27, %v1056_v55  ;;  %v1020_v4 = vld [vmem:[#allocation2 + $0xe8] sm:$0xff]  ;;  %v1021_v5 = vld [vmem:[#allocation2 + $0xb8] sm:$0xff]  ;;  %v1128_v14 = vld [vmem:[%s1837_s12 + $0x40] sm:$0xff] }
 0x158   : > { %v1156_v1 = vadd.f32 %v1124_v48, %v1092_v52  ;;  %v1186_v6 = vmax.f32 %v1154_v58, 0.0  ;;  %v1187_v7 = vmax.f32 %v1155_v59, 0.0  ;;  %v1157_v8 = vadd.f32 %v1125_v53, %v1093_v60  ;;  %v1023_v16 = vld [vmem:[#allocation2 + $0xf0] sm:$0xff]  ;;  %v1129_v19 = vld [vmem:[%s1837_s12 + $0x48] sm:$0xff]  ;;  %v1025_v23 = vld [vmem:[#allocation2 + $0x78] sm:$0xff] }
 0x159   : > { %v1185_v0 = vmax.f32 %v1153_v51, 0.0  ;;  %1216 = vst [vmem:[%s1842_s14] sm:$0xff] %v1184_v57  ;;  %v1057_v9 = vmul.f32 %v1875_v26, %v1018_v56  ;;  %v1158_v12 = vadd.f32 %v1126_v61, %v1094_v2  ;;  %v1159_v13 = vadd.f32 %v1127_v62, %v1095_v3  ;;  %v1024_v22 = vld [vmem:[#allocation2 + $0x8] sm:$0xff]  ;;  %v1130_v29 = vld [vmem:[%s1837_s12 + $0x50] sm:$0xff]  ;;  %v1131_v30 = vld [vmem:[%s1837_s12 + $0x58] sm:$0xff] }
 0x15a   : > { %v1188_v11 = vmax.f32 %v1156_v1, 0.0  ;;  %v1058_v15 = vmul.f32 %v1875_v26, %v1019_v63  ;;  %1218 = vst [vmem:[%s1842_s14 + $0x10] sm:$0xff] %v1186_v6  ;;  %1219 = vst [vmem:[%s1842_s14 + $0x18] sm:$0xff] %v1187_v7  ;;  %v1189_v17 = vmax.f32 %v1157_v8, 0.0  ;;  %v1059_v20 = vmul.f32 %v1875_v26, %v1020_v4  ;;  %v1132_v35 = vld [vmem:[%s1837_s12 + $0x60] sm:$0xff]  ;;  %v1133_v39 = vld [vmem:[%s1837_s12 + $0x68] sm:$0xff] }
 0x15b   : > { %1217 = vst [vmem:[%s1842_s14 + $0x8] sm:$0xff] %v1185_v0  ;;  %v1096_v18 = vadd.f32 %v1880_v27, %v1057_v9  ;;  %v1060_v21 = vmul.f32 %v1875_v26, %v1021_v5  ;;  %v1190_v24 = vmax.f32 %v1158_v12, 0.0  ;;  %v1191_v25 = vmax.f32 %v1159_v13, 0.0  ;;  %v1026_v42 = vld [vmem:[#allocation2 + $0x38] sm:$0xff]  ;;  %v1134_v47 = vld [vmem:[%s1837_s12 + $0x70] sm:$0xff]  ;;  %v1028_v54 = vld [vmem:[#allocation2 + $0x40] sm:$0xff] }
 0x15c   : > { %1220 = vst [vmem:[%s1842_s14 + $0x20] sm:$0xff] %v1188_v11  ;;  %v1097_v28 = vadd.f32 %v1880_v27, %v1058_v15  ;;  %v1061_v31 = vmul.f32 %v1875_v26, %v1022_v10  ;;  %1221 = vst [vmem:[%s1842_s14 + $0x28] sm:$0xff] %v1189_v17  ;;  %v1098_v33 = vadd.f32 %v1880_v27, %v1059_v20  ;;  %v1135_v48 = vld [vmem:[%s1837_s12 + $0x78] sm:$0xff]  ;;  %v1029_v55 = vld [vmem:[#allocation2 + $0xc8] sm:$0xff] }
 0x15d   : > { %v1160_v32 = vadd.f32 %v1128_v14, %v1096_v18  ;;  %v1099_v34 = vadd.f32 %v1880_v27, %v1060_v21  ;;  %v1062_v36 = vmul.f32 %v1875_v26, %v1023_v16  ;;  %1222 = vst [vmem:[%s1842_s14 + $0x30] sm:$0xff] %v1190_v24  ;;  %1223 = vst [vmem:[%s1842_s14 + $0x38] sm:$0xff] %v1191_v25  ;;  %v1027_v49 = vld [vmem:[#allocation2 + $0x58] sm:$0xff]  ;;  %v1030_v60 = vld [vmem:[#allocation2 + $0xe0] sm:$0xff] }
 0x15e   : > { %v1161_v37 = vadd.f32 %v1129_v19, %v1097_v28  ;;  %v1100_v38 = vadd.f32 %v1880_v27, %v1061_v31  ;;  %v1063_v40 = vmul.f32 %v1875_v26, %v1024_v22  ;;  %v1064_v41 = vmul.f32 %v1875_v26, %v1025_v23  ;;  %v1136_v0 = vld [vmem:[%s1837_s12 + $0x80] sm:$0xff]  ;;  %v1031_v2 = vld [vmem:[#allocation2 + $0x90] sm:$0xff]  ;;  %v1137_v5 = vld [vmem:[%s1837_s12 + $0x88] sm:$0xff] }
 0x15f   : > { %v1192_v43 = vmax.f32 %v1160_v32, 0.0  ;;  %v1162_v44 = vadd.f32 %v1130_v29, %v1098_v33  ;;  %v1163_v45 = vadd.f32 %v1131_v30, %v1099_v34  ;;  %v1101_v46 = vadd.f32 %v1880_v27, %v1062_v36  ;;  %v1032_v8 = vld [vmem:[#allocation2 + $0x70] sm:$0xff]  ;;  %v1033_v9 = vld [vmem:[#allocation2 + $0xc0] sm:$0xff]  ;;  %v1139_v14 = vld [vmem:[%s1837_s12 + $0x98] sm:$0xff] }
 0x160   : > { %v1193_v50 = vmax.f32 %v1161_v37, 0.0  ;;  %v1164_v51 = vadd.f32 %v1132_v35, %v1100_v38  ;;  %v1102_v52 = vadd.f32 %v1880_v27, %v1063_v40  ;;  %v1103_v53 = vadd.f32 %v1880_v27, %v1064_v41  ;;  %v1138_v13 = vld [vmem:[%s1837_s12 + $0x90] sm:$0xff]  ;;  %v1140_v19 = vld [vmem:[%s1837_s12 + $0xa0] sm:$0xff]  ;;  %v1141_v23 = vld [vmem:[%s1837_s12 + $0xa8] sm:$0xff] }
 0x161   : > { %1224 = vst [vmem:[%s1842_s14 + $0x40] sm:$0xff] %v1192_v43  ;;  %v1194_v56 = vmax.f32 %v1162_v44, 0.0  ;;  %v1195_v57 = vmax.f32 %v1163_v45, 0.0  ;;  %v1165_v58 = vadd.f32 %v1133_v39, %v1101_v46  ;;  %v1065_v59 = vmul.f32 %v1875_v26, %v1026_v42  ;;  %v1034_v28 = vld [vmem:[#allocation2 + $0xa8] sm:$0xff]  ;;  %v1142_v33 = vld [vmem:[%s1837_s12 + $0xb0] sm:$0xff]  ;;  %v1143_v34 = vld [vmem:[%s1837_s12 + $0xb8] sm:$0xff] }
 0x162   : > { %1225 = vst [vmem:[%s1842_s14 + $0x48] sm:$0xff] %v1193_v50  ;;  %v1196_v61 = vmax.f32 %v1164_v51, 0.0  ;;  %v1166_v62 = vadd.f32 %v1134_v47, %v1102_v52  ;;  %v1167_v63 = vadd.f32 %v1135_v48, %v1103_v53  ;;  %v1066_v1 = vmul.f32 %v1875_v26, %v1027_v49  ;;  %v1035_v35 = vld [vmem:[#allocation2 + $0xd0] sm:$0xff]  ;;  %v1037_v41 = vld [vmem:[#allocation2 + $0x28] sm:$0xff]  ;;  %v1038_v46 = vld [vmem:[#allocation2 + $0xa0] sm:$0xff] }
 0x163   : > { %1226 = vst [vmem:[%s1842_s14 + $0x50] sm:$0xff] %v1194_v56  ;;  %1227 = vst [vmem:[%s1842_s14 + $0x58] sm:$0xff] %v1195_v57  ;;  %v1197_v3 = vmax.f32 %v1165_v58, 0.0  ;;  %v1104_v4 = vadd.f32 %v1880_v27, %v1065_v59  ;;  %v1067_v6 = vmul.f32 %v1875_v26, %v1028_v54  ;;  %v1068_v7 = vmul.f32 %v1875_v26, %v1029_v55  ;;  %v1036_v40 = vld [vmem:[#allocation2 + $0x10] sm:$0xff]  ;;  %v1144_v50 = vld [vmem:[%s1837_s12 + $0xc0] sm:$0xff] }
 0x164   : > { %1228 = vst [vmem:[%s1842_s14 + $0x60] sm:$0xff] %v1196_v61  ;;  %v1198_v10 = vmax.f32 %v1166_v62, 0.0  ;;  %v1199_v11 = vmax.f32 %v1167_v63, 0.0  ;;  %v1105_v12 = vadd.f32 %v1880_v27, %v1066_v1  ;;  %v1069_v15 = vmul.f32 %v1875_v26, %v1030_v60  ;;  %v1039_v52 = vld [vmem:[#allocation2 + $0xf8] sm:$0xff]  ;;  %v1145_v55 = vld [vmem:[%s1837_s12 + $0xc8] sm:$0xff]  ;;  %v1040_v58 = vld [vmem:[#allocation2 + $0x20] sm:$0xff] }
 0x165   : > { %1229 = vst [vmem:[%s1842_s14 + $0x68] sm:$0xff] %v1197_v3  ;;  %v1168_v16 = vadd.f32 %v1136_v0, %v1104_v4  ;;  %v1106_v17 = vadd.f32 %v1880_v27, %v1067_v6  ;;  %v1107_v18 = vadd.f32 %v1880_v27, %v1068_v7  ;;  %v1070_v20 = vmul.f32 %v1875_v26, %v1031_v2  ;;  %v1041_v59 = vld [vmem:[#allocation2 + $0x98] sm:$0xff]  ;;  %v1146_v63 = vld [vmem:[%s1837_s12 + $0xd0] sm:$0xff] }
 0x166   : > { %1230 = vst [vmem:[%s1842_s14 + $0x70] sm:$0xff] %v1198_v10  ;;  %1231 = vst [vmem:[%s1842_s14 + $0x78] sm:$0xff] %v1199_v11  ;;  %v1169_v21 = vadd.f32 %v1137_v5, %v1105_v12  ;;  %v1108_v22 = vadd.f32 %v1880_v27, %v1069_v15  ;;  %v1071_v24 = vmul.f32 %v1875_v26, %v1032_v8  ;;  %v1147_v0 = vld [vmem:[%s1837_s12 + $0xd8] sm:$0xff]  ;;  %v1148_v5 = vld [vmem:[%s1837_s12 + $0xe0] sm:$0xff] }
 0x167   : > { %v1072_v25 = vmul.f32 %v1875_v26, %v1033_v9  ;;  %v1200_v29 = vmax.f32 %v1168_v16, 0.0  ;;  %v1170_v30 = vadd.f32 %v1138_v13, %v1106_v17  ;;  %v1171_v31 = vadd.f32 %v1139_v14, %v1107_v18  ;;  %v1149_v9 = vld [vmem:[%s1837_s12 + $0xe8] sm:$0xff]  ;;  %v1150_v16 = vld [vmem:[%s1837_s12 + $0xf0] sm:$0xff]  ;;  %v1151_v17 = vld [vmem:[%s1837_s12 + $0xf8] sm:$0xff] }
 0x168   : > { %v1109_v32 = vadd.f32 %v1880_v27, %v1070_v20  ;;  %v1201_v36 = vmax.f32 %v1169_v21, 0.0  ;;  %v1172_v37 = vadd.f32 %v1140_v19, %v1108_v22  ;;  %v1110_v38 = vadd.f32 %v1880_v27, %v1071_v24 }
 0x169   : > { %v1111_v39 = vadd.f32 %v1880_v27, %v1072_v25  ;;  %1232 = vst [vmem:[%s1842_s14 + $0x80] sm:$0xff] %v1200_v29  ;;  %v1202_v42 = vmax.f32 %v1170_v30, 0.0  ;;  %v1203_v43 = vmax.f32 %v1171_v31, 0.0  ;;  %v1073_v45 = vmul.f32 %v1875_v26, %v1034_v28 }
 0x16a   : > { %v1173_v44 = vadd.f32 %v1141_v23, %v1109_v32  ;;  %1233 = vst [vmem:[%s1842_s14 + $0x88] sm:$0xff] %v1201_v36  ;;  %v1204_v47 = vmax.f32 %v1172_v37, 0.0  ;;  %v1174_v48 = vadd.f32 %v1142_v33, %v1110_v38  ;;  %v1074_v51 = vmul.f32 %v1875_v26, %v1035_v35 }
 0x16b   : > { %v1175_v49 = vadd.f32 %v1143_v34, %v1111_v39  ;;  %1234 = vst [vmem:[%s1842_s14 + $0x90] sm:$0xff] %v1202_v42  ;;  %1235 = vst [vmem:[%s1842_s14 + $0x98] sm:$0xff] %v1203_v43  ;;  %v1112_v54 = vadd.f32 %v1880_v27, %v1073_v45  ;;  %v1075_v56 = vmul.f32 %v1875_v26, %v1036_v40 }
 0x16c   : > { %v1205_v53 = vmax.f32 %v1173_v44, 0.0  ;;  %v1076_v57 = vmul.f32 %v1875_v26, %v1037_v41  ;;  %1236 = vst [vmem:[%s1842_s14 + $0xa0] sm:$0xff] %v1204_v47  ;;  %v1206_v60 = vmax.f32 %v1174_v48, 0.0  ;;  %v1113_v62 = vadd.f32 %v1880_v27, %v1074_v51 }
 0x16d   : > { %v1207_v61 = vmax.f32 %v1175_v49, 0.0  ;;  %v1077_v1 = vmul.f32 %v1875_v26, %v1038_v46  ;;  %v1176_v2 = vadd.f32 %v1144_v50, %v1112_v54  ;;  %v1114_v3 = vadd.f32 %v1880_v27, %v1075_v56 }
 0x16e   : > { %1237 = vst [vmem:[%s1842_s14 + $0xa8] sm:$0xff] %v1205_v53  ;;  %v1115_v4 = vadd.f32 %v1880_v27, %v1076_v57  ;;  %v1078_v6 = vmul.f32 %v1875_v26, %v1039_v52  ;;  %1238 = vst [vmem:[%s1842_s14 + $0xb0] sm:$0xff] %v1206_v60  ;;  %v1177_v7 = vadd.f32 %v1145_v55, %v1113_v62 }
 0x16f   : > { %1239 = vst [vmem:[%s1842_s14 + $0xb8] sm:$0xff] %v1207_v61  ;;  %v1116_v8 = vadd.f32 %v1880_v27, %v1077_v1  ;;  %v1079_v10 = vmul.f32 %v1875_v26, %v1040_v58  ;;  %v1080_v11 = vmul.f32 %v1875_v26, %v1041_v59  ;;  %v1208_v12 = vmax.f32 %v1176_v2, 0.0 }
 0x170   : > { %v1178_v13 = vadd.f32 %v1146_v63, %v1114_v3  ;;  %v1179_v14 = vadd.f32 %v1147_v0, %v1115_v4  ;;  %v1117_v15 = vadd.f32 %v1880_v27, %v1078_v6  ;;  %v1209_v18 = vmax.f32 %v1177_v7, 0.0 }
 0x171   : > { %v1180_v19 = vadd.f32 %v1148_v5, %v1116_v8  ;;  %v1118_v20 = vadd.f32 %v1880_v27, %v1079_v10  ;;  %v1119_v21 = vadd.f32 %v1880_v27, %v1080_v11  ;;  %1240 = vst [vmem:[%s1842_s14 + $0xc0] sm:$0xff] %v1208_v12 }
 0x172   : > { %v1210_v26 = vmax.f32 %v1178_v13, 0.0  ;;  %v1211_v22 = vmax.f32 %v1179_v14, 0.0  ;;  %v1181_v23 = vadd.f32 %v1149_v9, %v1117_v15  ;;  %1241 = vst [vmem:[%s1842_s14 + $0xc8] sm:$0xff] %v1209_v18 }
 0x173   : > { %v1212_v24 = vmax.f32 %v1180_v19, 0.0  ;;  %v1182_v25 = vadd.f32 %v1150_v16, %v1118_v20  ;;  %v1183_v28 = vadd.f32 %v1151_v17, %v1119_v21 }
 0x174   : > { %1242 = vst [vmem:[%s1842_s14 + $0xd0] sm:$0xff] %v1210_v26  ;;  %1243 = vst [vmem:[%s1842_s14 + $0xd8] sm:$0xff] %v1211_v22  ;;  %v1213_v29 = vmax.f32 %v1181_v23, 0.0 }
 0x175   : > { %1244 = vst [vmem:[%s1842_s14 + $0xe0] sm:$0xff] %v1212_v24  ;;  %v1214_v30 = vmax.f32 %v1182_v25, 0.0  ;;  %v1215_v31 = vmax.f32 %v1183_v28, 0.0 }
 0x176   : > { %1245 = vst [vmem:[%s1842_s14 + $0xe8] sm:$0xff] %v1213_v29 }
 0x177   : > { %1246 = vst [vmem:[%s1842_s14 + $0xf0] sm:$0xff] %v1214_v30  ;;  %1247 = vst [vmem:[%s1842_s14 + $0xf8] sm:$0xff] %v1215_v31 }
 0x178 PF: > { %s15_s24 = sadd.s32 1, %s1663_s24   ;;  %s2037_s18 = smov %s1643_s19 }
 0x179   : > { %p12_p0 = scmp.ge.s32.totalorder %s15_s24, 6   ;;  %s2038_s19 = smov %s1747_s6 }
 0x17a   : > { %s2039_s20 = smov %s1655_s22  ;;  %s2040_s21 = smov %s1659_s23 }
 0x17b   : > { %s2041_s22 = smov %s2044_s25  ;;  %s2042_s23 = smov %s2048_s26 }
 0x17c   :  { %14 = sbr.rel (!%p12_p0) target bundleno = 4 (0x4), region = 136 }

// kernel: full_mil_model_feats.19
= control target key start
LH: loop header
LB: loop body
LE: loop exit
PB: predicated region body
PF: predicated region fallthrough
CT: control target
= control target key end

     0   :  { %s1132_s15 = smov 0   ;;  %s1134_s16 = smov 0   ;;  %s1309_s0 = inlined_call_operand.vmem [shape: bf16[128,256], index: 0, kind: input, shape index: {}]   ;;  %s1310_s1 = inlined_call_operand.vmem [shape: bf16[256,128], index: 1, kind: input, shape index: {}]   ;;  %s1311_s2 = inlined_call_operand.vmem [shape: f32[1,128], index: 2, kind: input, shape index: {}]   ;;  %s1312_s3 = inlined_call_operand.vmem [shape: f32[1,128], index: 3, kind: input, shape index: {}]   ;;  %s1313_s4 = inlined_call_operand.vmem [shape: f32[128,128], index: 4, kind: output, shape index: {}]  }
   0x1   :  { %s1136_s17 = smov 0   ;;  %s1138_s18 = smov 0  }
   0x2   :  { %s1140_s19 = smov 0  }
   0x3 LB: > { %s26_s20 = sadd.s32 1, %s1100_s18  ;;  %p49_p1 = scmp.ne.s32.totalorder %s1092_s16, %s1088_s15  ;;  %s1104_s19 = sphi %s1140_s19, %s14_s19   ;;  %s1100_s18 = sphi %s1138_s18, %s1317_s18   ;;  %s1096_s17 = sphi %s1136_s17, %s1316_s17   ;;  %s1092_s16 = sphi %s1134_s16, %s1315_s16   ;;  %s1088_s15 = sphi %s1132_s15, %s1314_s15  }
   0x4   : > { %p27_p0 = scmp.ge.s32.totalorder %s26_s20, 2  ;;  %p50_p2 = scmp.eq.s32.totalorder %s1104_s19, 0 }
   0x5   : > { %s42_s22 = sadd.s32 1, %s1092_s16  ;;  %p914_p5 = scmp.ge.s32.totalorder %s1104_s19, 2 }
   0x6   : > { %s1319_s20 = smov (%p27_p0, %s26_s20), 0  ;;  %p51_p3 = por %p50_p2, %p49_p1 }
   0x7   : > { %s38_s21 = ssub.s32 %s1100_s18, %s1319_s20  ;;  %195 = sbr.rel (%p914_p5) target bundleno = 26 (0x1a), region = 24 }
   0x8   : > { %p40_p4 = scmp.eq.s32.totalorder %s38_s21, 0 }
   0xa   : > { %s1167_s23 = scalar_select %p40_p4, %s1092_s16, %s42_s22  }
   0xc   : > { %198 = sbr.rel (!%p51_p3) target bundleno = 26 (0x1a), region = 28  ;;  %s200_s24 = sand.u32 (%p51_p3), 1, %s1092_s16  }
   0xd   : > { %s916_s25 = sshll.u32 (%p51_p3), %s1100_s18, 2  ;;  %s915_s26 = sshll.u32 (%p51_p3), %s200_s24, 6 }
   0xe   : > { %s1175_s29 = scalar_lea.vmem (%p51_p3), %s1309_s0, %s916_s25  ;;  %s202_s30 = scalar_lea.vmem (%p51_p3), [#allocation3], %s915_s26 }
   0xf   : > { %v224_v0 = vld [vmem:[%s1175_s29] sm:$0xf] (%p51_p3)  ;;  %v226_v1 = vld [vmem:[%s1175_s29 + $0x8] sm:$0xf] (%p51_p3)  ;;  %v228_v2 = vld [vmem:[%s1175_s29 + $0x10] sm:$0xf] (%p51_p3) }
  0x10   : > { %225 = vst [vmem:[%s202_s30] sm:$0xf] (%p51_p3), %v224_v0  ;;  %227 = vst [vmem:[%s202_s30 + $0x4] sm:$0xf] (%p51_p3), %v226_v1  ;;  %v230_v3 = vld [vmem:[%s1175_s29 + $0x18] sm:$0xf] (%p51_p3) }
  0x11   : > { %v232_v4 = vld [vmem:[%s1175_s29 + $0x20] sm:$0xf]  ;;  %229 = vst [vmem:[%s202_s30 + $0x8] sm:$0xf] %v228_v2  ;;  %231 = vst [vmem:[%s202_s30 + $0xc] sm:$0xf] %v230_v3 }
  0x12   : > { %233 = vst [vmem:[%s202_s30 + $0x10] sm:$0xf] %v232_v4  ;;  %v234_v5 = vld [vmem:[%s1175_s29 + $0x28] sm:$0xf]  ;;  %v236_v6 = vld [vmem:[%s1175_s29 + $0x30] sm:$0xf] }
  0x13   : > { %v238_v7 = vld [vmem:[%s1175_s29 + $0x38] sm:$0xf]  ;;  %235 = vst [vmem:[%s202_s30 + $0x14] sm:$0xf] %v234_v5  ;;  %237 = vst [vmem:[%s202_s30 + $0x18] sm:$0xf] %v236_v6 }
  0x14   : > { %239 = vst [vmem:[%s202_s30 + $0x1c] sm:$0xf] %v238_v7  ;;  %v240_v8 = vld [vmem:[%s1175_s29 + $0x40] sm:$0xf]  ;;  %v242_v9 = vld [vmem:[%s1175_s29 + $0x48] sm:$0xf] }
  0x15   : > { %v244_v10 = vld [vmem:[%s1175_s29 + $0x50] sm:$0xf]  ;;  %241 = vst [vmem:[%s202_s30 + $0x20] sm:$0xf] %v240_v8  ;;  %243 = vst [vmem:[%s202_s30 + $0x24] sm:$0xf] %v242_v9 }
  0x16   : > { %245 = vst [vmem:[%s202_s30 + $0x28] sm:$0xf] %v244_v10  ;;  %v246_v11 = vld [vmem:[%s1175_s29 + $0x58] sm:$0xf]  ;;  %v248_v12 = vld [vmem:[%s1175_s29 + $0x60] sm:$0xf] }
  0x17   : > { %v250_v13 = vld [vmem:[%s1175_s29 + $0x68] sm:$0xf]  ;;  %247 = vst [vmem:[%s202_s30 + $0x2c] sm:$0xf] %v246_v11  ;;  %249 = vst [vmem:[%s202_s30 + $0x30] sm:$0xf] %v248_v12 }
  0x18   : > { %251 = vst [vmem:[%s202_s30 + $0x34] sm:$0xf] %v250_v13  ;;  %v252_v14 = vld [vmem:[%s1175_s29 + $0x70] sm:$0xf]  ;;  %v254_v15 = vld [vmem:[%s1175_s29 + $0x78] sm:$0xf] }
  0x19   : > { %253 = vst [vmem:[%s202_s30 + $0x38] sm:$0xf] %v252_v14  ;;  %255 = vst [vmem:[%s202_s30 + $0x3c] sm:$0xf] %v254_v15 }
  0x1a PF: > { %p917_p6 = scmp.ge.s32.totalorder %s1104_s19, 1  ;;  %p322_p7 = scmp.lt.s32.totalorder %s1104_s19, 3 }
  0x1c   : > { %p323_p8 = pnand %p917_p6, %p322_p7 }
  0x1d   : > { %s329_s5 = sand.u32 (!%p323_p8), 1, %s1088_s15   ;;  %s919_s6 = sshll.u32 (!%p323_p8), %s1096_s17, 4 }
  0x1e   : > { %326 = sbr.rel (%p323_p8) target bundleno = 310 (0x136), region = 73  ;;  %s918_s7 = sshll.u32 (!%p323_p8), %s329_s5, 6 }
  0x1f   : > { %p373_p9 = scmp.lt.s32.totalorder (!%p323_p8), %s919_s6, 31  ;;  %s1202_s12 = scalar_lea.vmem (!%p323_p8), [#allocation3], %s918_s7 }
  0x20   : > { %p921_p10 = scmp.ne.s32.totalorder (!%p323_p8), %s1096_s17, 0 }
  0x23   : > { %s1321_s6 = smov (!%p373_p9, %s919_s6), 31  ;;  %400 = sbr.rel (%p921_p10) target bundleno = 49 (0x31), region = 81 }
  0x24   : > { %s920_s8 = sshll.u32 %s1321_s6, 2 }
  0x25   : > { %s1200_s11 = scalar_lea.vmem %s1310_s1, %s920_s8 }
  0x28   : > { %v1106_v16 = vmov 0.0  }
  0x29   : > { %401 = vst [vmem:[#allocation2 + $0x30] sm:$0xff] %v1106_v16  ;;  %402 = vst [vmem:[#allocation2] sm:$0xff] %v1106_v16 }
  0x2a   : > { %403 = vst [vmem:[#allocation2 + $0x58] sm:$0xff] %v1106_v16  ;;  %404 = vst [vmem:[#allocation2 + $0x18] sm:$0xff] %v1106_v16 }
  0x2b   : > { %405 = vst [vmem:[#allocation2 + $0x50] sm:$0xff] %v1106_v16  ;;  %406 = vst [vmem:[#allocation2 + $0x68] sm:$0xff] %v1106_v16 }
  0x2c   : > { %407 = vst [vmem:[#allocation2 + $0x8] sm:$0xff] %v1106_v16  ;;  %408 = vst [vmem:[#allocation2 + $0x48] sm:$0xff] %v1106_v16 }
  0x2d   : > { %409 = vst [vmem:[#allocation2 + $0x40] sm:$0xff] %v1106_v16  ;;  %410 = vst [vmem:[#allocation2 + $0x20] sm:$0xff] %v1106_v16 }
  0x2e   : > { %411 = vst [vmem:[#allocation2 + $0x10] sm:$0xff] %v1106_v16  ;;  %412 = vst [vmem:[#allocation2 + $0x38] sm:$0xff] %v1106_v16 }
  0x2f   : > { %413 = vst [vmem:[#allocation2 + $0x60] sm:$0xff] %v1106_v16  ;;  %414 = vst [vmem:[#allocation2 + $0x70] sm:$0xff] %v1106_v16 }
  0x30   : > { %415 = vst [vmem:[#allocation2 + $0x78] sm:$0xff] %v1106_v16  ;;  %416 = vst [vmem:[#allocation2 + $0x28] sm:$0xff] %v1106_v16 }
  0x31 PF: > { %v1050_v17 = vld [vmem:[%s1200_s11 + $0x38] sm:$0xff]   ;;  %v1051_v18 = vld [vmem:[%s1200_s11 + $0x30] sm:$0xff]   ;;  %v1052_v19 = vld [vmem:[%s1200_s11 + $0x28] sm:$0xff]   ;;  %p938_p11 = scmp.ne.s32.totalorder %s1096_s17, 1 }
  0x32   : > { %961 = vmatprep.subr.bf16.mxu0 %v1050_v17  ;;  %993 = vmatprep.subr.bf16.mxu1 %v1050_v17  ;;  %v1053_v20 = vld [vmem:[%s1200_s11 + $0x20] sm:$0xff]   ;;  %v1054_v23 = vld [vmem:[%s1200_s11 + $0x18] sm:$0xff]   ;;  %v1055_v24 = vld [vmem:[%s1200_s11 + $0x10] sm:$0xff]  }
  0x33   : > { %962 = vmatpush3.bf16.msra.mxu0 %v1050_v17  ;;  %1001 = vmatpush3.bf16.msra.mxu1 %v1050_v17  ;;  %v1058_v21 = vld [vmem:[%s1202_s12] sm:$0xff]   ;;  %v1056_v25 = vld [vmem:[%s1200_s11 + $0x8] sm:$0xff]   ;;  %v1062_v29 = vld [vmem:[%s1202_s12 + $0x10] sm:$0xff]  }
  0x34   : > { %963 = vmatprep.subr.bf16.mxu0 %v1051_v18  ;;  %994 = vmatprep.subr.bf16.mxu1 %v1051_v18  ;;  %v1059_v22 = vld [vmem:[%s1202_s12 + $0x20] sm:$0xff]   ;;  %v1060_v27 = vld [vmem:[%s1202_s12 + $0x8] sm:$0xff]   ;;  %v1063_v30 = vld [vmem:[%s1202_s12 + $0x30] sm:$0xff]  }
  0x35   : > { %977 = vmatprep.mubr.bf16.mxu0 %v1058_v21  ;;  %985 = vmatprep.mubr.bf16.mxu1 %v1059_v22  ;;  %v1057_v26 = vld [vmem:[%s1200_s11] sm:$0xff]   ;;  %v1061_v28 = vld [vmem:[%s1202_s12 + $0x28] sm:$0xff]   ;;  %v1064_v31 = vld [vmem:[%s1202_s12 + $0x18] sm:$0xff]  }
  0x36   : > { %v1065_v32 = vld [vmem:[%s1202_s12 + $0x38] sm:$0xff]   ;;  %v427_v34 = vld [vmem:[#allocation2 + $0x10] sm:$0xff]  ;;  %v425_v38 = vld [vmem:[#allocation2 + $0x40] sm:$0xff] }
  0x37   : > { %964 = vmatpush3.bf16.msra.mxu0 %v1051_v18  ;;  %1002 = vmatpush3.bf16.msra.mxu1 %v1051_v18  ;;  %v419_v33 = vld [vmem:[#allocation2 + $0x58] sm:$0xff]  ;;  %v417_v37 = vld [vmem:[#allocation2 + $0x30] sm:$0xff]  ;;  %v418_v49 = vld [vmem:[#allocation2] sm:$0xff] }
  0x38   : > { %965 = vmatprep.subr.bf16.mxu0 %v1052_v19  ;;  %995 = vmatprep.subr.bf16.mxu1 %v1052_v19  ;;  %v420_v43 = vld [vmem:[#allocation2 + $0x18] sm:$0xff]  ;;  %v426_v50 = vld [vmem:[#allocation2 + $0x20] sm:$0xff]  ;;  %v423_v55 = vld [vmem:[#allocation2 + $0x8] sm:$0xff] }
  0x39   : > { %v428_v44 = vld [vmem:[#allocation2 + $0x38] sm:$0xff]  ;;  %v421_v61 = vld [vmem:[#allocation2 + $0x50] sm:$0xff]  ;;  %v429_v62 = vld [vmem:[#allocation2 + $0x60] sm:$0xff] }
  0x3a   : > { %v431_v56 = vld [vmem:[#allocation2 + $0x78] sm:$0xff]  ;;  %v424_v3 = vld [vmem:[#allocation2 + $0x48] sm:$0xff]  ;;  %v430_v10 = vld [vmem:[#allocation2 + $0x70] sm:$0xff] }
  0x3b   : > { %966 = vmatpush3.bf16.msra.mxu0 %v1052_v19  ;;  %1003 = vmatpush3.bf16.msra.mxu1 %v1052_v19  ;;  %v432_v4 = vld [vmem:[#allocation2 + $0x28] sm:$0xff] }
  0x3c   : > { %967 = vmatprep.subr.bf16.mxu0 %v1053_v20  ;;  %996 = vmatprep.subr.bf16.mxu1 %v1053_v20  ;;  %v422_v9 = vld [vmem:[#allocation2 + $0x68] sm:$0xff] }
  0x3f   : > { %968 = vmatpush3.bf16.msra.mxu0 %v1053_v20  ;;  %1004 = vmatpush3.bf16.msra.mxu1 %v1053_v20 }
  0x40   : > { %969 = vmatprep.subr.bf16.mxu0 %v1054_v23  ;;  %997 = vmatprep.subr.bf16.mxu1 %v1054_v23 }
  0x43   : > { %970 = vmatpush3.bf16.msra.mxu0 %v1054_v23  ;;  %1005 = vmatpush3.bf16.msra.mxu1 %v1054_v23 }
  0x44   : > { %971 = vmatprep.subr.bf16.mxu0 %v1055_v24  ;;  %998 = vmatprep.subr.bf16.mxu1 %v1055_v24 }
  0x47   : > { %972 = vmatpush3.bf16.msra.mxu0 %v1055_v24  ;;  %1006 = vmatpush3.bf16.msra.mxu1 %v1055_v24 }
  0x48   : > { %973 = vmatprep.subr.bf16.mxu0 %v1056_v25  ;;  %999 = vmatprep.subr.bf16.mxu1 %v1056_v25 }
  0x4b   : > { %974 = vmatpush3.bf16.msra.mxu0 %v1056_v25  ;;  %1007 = vmatpush3.bf16.msra.mxu1 %v1056_v25 }
  0x4c   : > { %975 = vmatprep.subr.bf16.mxu0 %v1057_v26  ;;  %1000 = vmatprep.subr.bf16.mxu1 %v1057_v26 }
  0x4f   : > { %976 = vmatpush3.bf16.msra.mxu0 %v1057_v26  ;;  %1008 = vmatpush3.bf16.msra.mxu1 %v1057_v26 }
  0x52   : > { %978 = vmatmul.mubr.bf16.vlgmr.msra.gmra.mxu0 %v1060_v27  ;;  %986 = vmatmul.mubr.bf16.vlgmr.msra.gmra.mxu1 %v1061_v28 }
  0x53   : > { %981 = vmatprep.mubr.bf16.mxu0 %v1062_v29  ;;  %989 = vmatprep.mubr.bf16.mxu1 %v1063_v30 }
  0x5a   : > { %982 = vmatmul.mubr.bf16.gmra.mxu0 %v1064_v31  ;;  %990 = vmatmul.mubr.bf16.gmra.mxu1 %v1065_v32 }
 0x112   : > { %v979_v35 = vpop.f32.mrf.mxu0  ;;  %v987_v36 = vpop.f32.mrf.mxu1 }
 0x113   : > { %v660_v39 = vadd.f32 %v979_v35, %v419_v33  ;;  %v668_v40 = vadd.f32 %v987_v36, %v427_v34 }
 0x114   : > { %v595_v41 = vpop.f32.mrf.mxu0  ;;  %v627_v42 = vpop.f32.mrf.mxu1 }
 0x115   : > { %676 = vst [vmem:[#allocation2 + $0x58] sm:$0xff] %v660_v39  ;;  %684 = vst [vmem:[#allocation2 + $0x10] sm:$0xff] %v668_v40  ;;  %v658_v45 = vadd.f32 %v595_v41, %v417_v37  ;;  %v666_v46 = vadd.f32 %v627_v42, %v425_v38 }
 0x116   : > { %v980_v47 = vpop.f32.mrf.mxu0  ;;  %v988_v48 = vpop.f32.mrf.mxu1 }
 0x117   : > { %674 = vst [vmem:[#allocation2 + $0x30] sm:$0xff] %v658_v45  ;;  %682 = vst [vmem:[#allocation2 + $0x40] sm:$0xff] %v666_v46  ;;  %v661_v51 = vadd.f32 %v980_v47, %v420_v43  ;;  %v669_v52 = vadd.f32 %v988_v48, %v428_v44 }
 0x118   : > { %v598_v53 = vpop.f32.mrf.mxu0  ;;  %v630_v54 = vpop.f32.mrf.mxu1 }
 0x119   : > { %677 = vst [vmem:[#allocation2 + $0x18] sm:$0xff] %v661_v51  ;;  %685 = vst [vmem:[#allocation2 + $0x38] sm:$0xff] %v669_v52  ;;  %v659_v57 = vadd.f32 %v598_v53, %v418_v49  ;;  %v667_v58 = vadd.f32 %v630_v54, %v426_v50 }
 0x11a   : > { %v983_v59 = vpop.f32.mrf.mxu0  ;;  %v991_v60 = vpop.f32.mrf.mxu1 }
 0x11b   : > { %675 = vst [vmem:[#allocation2] sm:$0xff] %v659_v57  ;;  %683 = vst [vmem:[#allocation2 + $0x20] sm:$0xff] %v667_v58  ;;  %v664_v63 = vadd.f32 %v983_v59, %v423_v55  ;;  %v672_v0 = vadd.f32 %v991_v60, %v431_v56 }
 0x11c   : > { %v611_v1 = vpop.f32.mrf.mxu0  ;;  %v643_v2 = vpop.f32.mrf.mxu1 }
 0x11d   : > { %680 = vst [vmem:[#allocation2 + $0x8] sm:$0xff] %v664_v63  ;;  %688 = vst [vmem:[#allocation2 + $0x78] sm:$0xff] %v672_v0  ;;  %v662_v5 = vadd.f32 %v611_v1, %v421_v61  ;;  %v670_v6 = vadd.f32 %v643_v2, %v429_v62 }
 0x11e   : > { %v984_v7 = vpop.f32.mrf.mxu0  ;;  %v992_v8 = vpop.f32.mrf.mxu1 }
 0x11f   : > { %678 = vst [vmem:[#allocation2 + $0x50] sm:$0xff] %v662_v5  ;;  %686 = vst [vmem:[#allocation2 + $0x60] sm:$0xff] %v670_v6  ;;  %v665_v11 = vadd.f32 %v984_v7, %v424_v3  ;;  %v673_v12 = vadd.f32 %v992_v8, %v432_v4  ;;  %693 = sbr.rel (%p938_p11) target bundleno = 310 (0x136), region = 85 }
 0x120   : > { %v614_v13 = vpop.f32.mrf.mxu0  ;;  %v646_v14 = vpop.f32.mrf.mxu1 }
 0x121   : > { %681 = vst [vmem:[#allocation2 + $0x48] sm:$0xff] %v665_v11  ;;  %689 = vst [vmem:[#allocation2 + $0x28] sm:$0xff] %v673_v12  ;;  %v663_v15 = vadd.f32 %v614_v13, %v422_v9  ;;  %v671_v16 = vadd.f32 %v646_v14, %v430_v10 }
 0x123   : > { %679 = vst [vmem:[#allocation2 + $0x68] sm:$0xff] %v663_v15  ;;  %687 = vst [vmem:[#allocation2 + $0x70] sm:$0xff] %v671_v16 }
 0x124   : > { %v694_v17 = vld [vmem:[#allocation2 + $0x30] sm:$0xff]  ;;  %v939_v18 = vld [vmem:[%s1311_s2] ss:$0 sm:$0xff]  ;;  %v696_v22 = vld [vmem:[#allocation2 + $0x58] sm:$0xff] }
 0x125   : > { %v1228_v19 = vld [vmem:[%s1312_s3] ss:$0 sm:$0xff]  ;;  %v717_v20 = vmul.f32 %v939_v18, %v694_v17  ;;  %v697_v23 = vld [vmem:[#allocation2 + $0x18] sm:$0xff]  ;;  %v719_v25 = vmul.f32 %v939_v18, %v696_v22  ;;  %v700_v29 = vld [vmem:[#allocation2 + $0x8] sm:$0xff] }
 0x126   : > { %v695_v21 = vld [vmem:[#allocation2] sm:$0xff]  ;;  %v720_v26 = vmul.f32 %v939_v18, %v697_v23  ;;  %v698_v27 = vld [vmem:[#allocation2 + $0x50] sm:$0xff]  ;;  %v723_v33 = vmul.f32 %v939_v18, %v700_v29  ;;  %v705_v46 = vld [vmem:[#allocation2 + $0x38] sm:$0xff] }
 0x127   : > { %v718_v24 = vmul.f32 %v939_v18, %v695_v21  ;;  %v740_v30 = vadd.f32 %v1228_v19, %v717_v20  ;;  %v721_v31 = vmul.f32 %v939_v18, %v698_v27  ;;  %v742_v36 = vadd.f32 %v1228_v19, %v719_v25  ;;  %v702_v39 = vld [vmem:[#allocation2 + $0x40] sm:$0xff]  ;;  %v704_v45 = vld [vmem:[#allocation2 + $0x10] sm:$0xff]  ;;  %v708_v53 = vld [vmem:[#allocation2 + $0x78] sm:$0xff] }
 0x128   : > { %v701_v34 = vld [vmem:[#allocation2 + $0x48] sm:$0xff]  ;;  %v743_v37 = vadd.f32 %v1228_v19, %v720_v26  ;;  %v746_v43 = vadd.f32 %v1228_v19, %v723_v33  ;;  %v703_v44 = vld [vmem:[#allocation2 + $0x20] sm:$0xff]  ;;  %v725_v57 = vmul.f32 %v939_v18, %v702_v39  ;;  %v727_v61 = vmul.f32 %v939_v18, %v704_v45 }
 0x129   : > { %v741_v35 = vadd.f32 %v1228_v19, %v718_v24  ;;  %v724_v38 = vmul.f32 %v939_v18, %v701_v34  ;;  %v756_v40 = vmax.f32 %v740_v30, 0.0  ;;  %v744_v41 = vadd.f32 %v1228_v19, %v721_v31  ;;  %v706_v51 = vld [vmem:[#allocation2 + $0x60] sm:$0xff]  ;;  %v709_v58 = vld [vmem:[#allocation2 + $0x28] sm:$0xff] }
 0x12a   : > { %v699_v28 = vld [vmem:[#allocation2 + $0x68] sm:$0xff]  ;;  %v758_v48 = vmax.f32 %v742_v36, 0.0  ;;  %v759_v49 = vmax.f32 %v743_v37, 0.0  ;;  %v707_v52 = vld [vmem:[#allocation2 + $0x70] sm:$0xff]  ;;  %v762_v56 = vmax.f32 %v746_v43, 0.0  ;;  %v726_v60 = vmul.f32 %v939_v18, %v703_v44 }
 0x12b   : > { %v722_v32 = vmul.f32 %v939_v18, %v699_v28  ;;  %v757_v47 = vmax.f32 %v741_v35, 0.0  ;;  %v747_v50 = vadd.f32 %v1228_v19, %v724_v38  ;;  %772 = vst [vmem:[%s1313_s4] sm:$0xff] %v756_v40  ;;  %v760_v54 = vmax.f32 %v744_v41, 0.0 }
 0x12c   : > { %774 = vst [vmem:[%s1313_s4 + $0x10] sm:$0xff] %v758_v48  ;;  %775 = vst [vmem:[%s1313_s4 + $0x18] sm:$0xff] %v759_v49  ;;  %v728_v62 = vmul.f32 %v939_v18, %v705_v46  ;;  %v748_v63 = vadd.f32 %v1228_v19, %v725_v57  ;;  %v729_v0 = vmul.f32 %v939_v18, %v706_v51 }
 0x12d   : > { %v745_v42 = vadd.f32 %v1228_v19, %v722_v32  ;;  %773 = vst [vmem:[%s1313_s4 + $0x8] sm:$0xff] %v757_v47  ;;  %v763_v59 = vmax.f32 %v747_v50, 0.0  ;;  %776 = vst [vmem:[%s1313_s4 + $0x20] sm:$0xff] %v760_v54  ;;  %v730_v1 = vmul.f32 %v939_v18, %v707_v52  ;;  %v731_v2 = vmul.f32 %v939_v18, %v708_v53 }
 0x12e   : > { %778 = vst [vmem:[%s1313_s4 + $0x30] sm:$0xff] %v762_v56  ;;  %v749_v3 = vadd.f32 %v1228_v19, %v726_v60  ;;  %v750_v4 = vadd.f32 %v1228_v19, %v727_v61  ;;  %v751_v5 = vadd.f32 %v1228_v19, %v728_v62  ;;  %v732_v6 = vmul.f32 %v939_v18, %v709_v58 }
 0x12f   : > { %v761_v55 = vmax.f32 %v745_v42, 0.0  ;;  %779 = vst [vmem:[%s1313_s4 + $0x38] sm:$0xff] %v763_v59  ;;  %v764_v7 = vmax.f32 %v748_v63, 0.0  ;;  %v752_v8 = vadd.f32 %v1228_v19, %v729_v0  ;;  %v753_v9 = vadd.f32 %v1228_v19, %v730_v1 }
 0x130   : > { %v754_v10 = vadd.f32 %v1228_v19, %v731_v2  ;;  %v765_v11 = vmax.f32 %v749_v3, 0.0  ;;  %v766_v12 = vmax.f32 %v750_v4, 0.0  ;;  %v767_v13 = vmax.f32 %v751_v5, 0.0 }
 0x131   : > { %777 = vst [vmem:[%s1313_s4 + $0x28] sm:$0xff] %v761_v55  ;;  %v755_v14 = vadd.f32 %v1228_v19, %v732_v6  ;;  %780 = vst [vmem:[%s1313_s4 + $0x40] sm:$0xff] %v764_v7  ;;  %v768_v15 = vmax.f32 %v752_v8, 0.0  ;;  %v769_v16 = vmax.f32 %v753_v9, 0.0 }
 0x132   : > { %v770_v17 = vmax.f32 %v754_v10, 0.0  ;;  %781 = vst [vmem:[%s1313_s4 + $0x48] sm:$0xff] %v765_v11  ;;  %782 = vst [vmem:[%s1313_s4 + $0x50] sm:$0xff] %v766_v12 }
 0x133   : > { %783 = vst [vmem:[%s1313_s4 + $0x58] sm:$0xff] %v767_v13  ;;  %v771_v18 = vmax.f32 %v755_v14, 0.0  ;;  %784 = vst [vmem:[%s1313_s4 + $0x60] sm:$0xff] %v768_v15 }
 0x134   : > { %785 = vst [vmem:[%s1313_s4 + $0x68] sm:$0xff] %v769_v16  ;;  %786 = vst [vmem:[%s1313_s4 + $0x70] sm:$0xff] %v770_v17 }
 0x135   : > { %787 = vst [vmem:[%s1313_s4 + $0x78] sm:$0xff] %v771_v18 }
 0x136 PF: > { %s14_s19 = sadd.s32 1, %s1104_s19   ;;  %s1314_s15 = smov %s1092_s16 }
 0x137   : > { %p11_p12 = scmp.ge.s32.totalorder %s14_s19, 4   ;;  %s1315_s16 = smov %s1167_s23 }
 0x138   : > { %s1316_s17 = smov %s1100_s18  ;;  %s1317_s18 = smov %s1319_s20 }
 0x139   :  { %13 = sbr.rel (!%p11_p12) target bundleno = 3 (0x3), region = 129 }

// kernel: full_mil_model_feats.18
= control target key start
LH: loop header
LB: loop body
LE: loop exit
PB: predicated region body
PF: predicated region fallthrough
CT: control target
= control target key end

     0   :  { %s621_s1 = inlined_call_operand.vmem [shape: bf16[128,128], index: 1, kind: input, shape index: {}]   ;;  %s622_s0 = inlined_call_operand.vmem [shape: bf16[128,128], index: 0, kind: input, shape index: {}]   ;;  %s623_s2 = inlined_call_operand.vmem [shape: f32[1,128], index: 2, kind: input, shape index: {}]   ;;  %s624_s3 = inlined_call_operand.vmem [shape: f32[1,128], index: 3, kind: input, shape index: {}]   ;;  %s625_s4 = inlined_call_operand.vmem [shape: f32[128,128], index: 4, kind: output, shape index: {}]  }
   0x1   :  { %v478_v0 = vld [vmem:[%s621_s1 + $0x38] sm:$0xff]   ;;  %v479_v1 = vld [vmem:[%s621_s1 + $0x30] sm:$0xff]   ;;  %v480_v2 = vld [vmem:[%s621_s1 + $0x28] sm:$0xff]  }
   0x2   :  { %430 = vmatprep.subr.bf16.mxu0 %v478_v0  ;;  %462 = vmatprep.subr.bf16.mxu1 %v478_v0  ;;  %v481_v3 = vld [vmem:[%s621_s1 + $0x20] sm:$0xff]   ;;  %v482_v6 = vld [vmem:[%s621_s1 + $0x18] sm:$0xff]   ;;  %v483_v7 = vld [vmem:[%s621_s1 + $0x10] sm:$0xff]  }
   0x3   :  { %431 = vmatpush3.bf16.msra.mxu0 %v478_v0  ;;  %470 = vmatpush3.bf16.msra.mxu1 %v478_v0  ;;  %v486_v4 = vld [vmem:[%s622_s0] sm:$0xff]   ;;  %v484_v8 = vld [vmem:[%s621_s1 + $0x8] sm:$0xff]   ;;  %v490_v12 = vld [vmem:[%s622_s0 + $0x10] sm:$0xff]  }
   0x4   :  { %432 = vmatprep.subr.bf16.mxu0 %v479_v1  ;;  %463 = vmatprep.subr.bf16.mxu1 %v479_v1  ;;  %v487_v5 = vld [vmem:[%s622_s0 + $0x20] sm:$0xff]   ;;  %v488_v10 = vld [vmem:[%s622_s0 + $0x8] sm:$0xff]   ;;  %v491_v13 = vld [vmem:[%s622_s0 + $0x30] sm:$0xff]  }
   0x5   :  { %446 = vmatprep.mubr.bf16.mxu0 %v486_v4  ;;  %454 = vmatprep.mubr.bf16.mxu1 %v487_v5  ;;  %v485_v9 = vld [vmem:[%s621_s1] sm:$0xff]   ;;  %v489_v11 = vld [vmem:[%s622_s0 + $0x28] sm:$0xff]   ;;  %v492_v14 = vld [vmem:[%s622_s0 + $0x18] sm:$0xff]  }
   0x6   :  { %v493_v15 = vld [vmem:[%s622_s0 + $0x38] sm:$0xff]   ;;  %v412_v16 = vld [vmem:[%s623_s2] ss:$0 sm:$0xff] }
   0x7   :  { %433 = vmatpush3.bf16.msra.mxu0 %v479_v1  ;;  %471 = vmatpush3.bf16.msra.mxu1 %v479_v1  ;;  %v413_v18 = vld [vmem:[%s624_s3] ss:$0 sm:$0xff] }
   0x8   :  { %434 = vmatprep.subr.bf16.mxu0 %v480_v2  ;;  %464 = vmatprep.subr.bf16.mxu1 %v480_v2 }
   0xb   :  { %435 = vmatpush3.bf16.msra.mxu0 %v480_v2  ;;  %472 = vmatpush3.bf16.msra.mxu1 %v480_v2 }
   0xc   :  { %436 = vmatprep.subr.bf16.mxu0 %v481_v3  ;;  %465 = vmatprep.subr.bf16.mxu1 %v481_v3 }
   0xf   :  { %437 = vmatpush3.bf16.msra.mxu0 %v481_v3  ;;  %473 = vmatpush3.bf16.msra.mxu1 %v481_v3 }
  0x10   :  { %438 = vmatprep.subr.bf16.mxu0 %v482_v6  ;;  %466 = vmatprep.subr.bf16.mxu1 %v482_v6 }
  0x13   :  { %439 = vmatpush3.bf16.msra.mxu0 %v482_v6  ;;  %474 = vmatpush3.bf16.msra.mxu1 %v482_v6 }
  0x14   :  { %440 = vmatprep.subr.bf16.mxu0 %v483_v7  ;;  %467 = vmatprep.subr.bf16.mxu1 %v483_v7 }
  0x17   :  { %441 = vmatpush3.bf16.msra.mxu0 %v483_v7  ;;  %475 = vmatpush3.bf16.msra.mxu1 %v483_v7 }
  0x18   :  { %442 = vmatprep.subr.bf16.mxu0 %v484_v8  ;;  %468 = vmatprep.subr.bf16.mxu1 %v484_v8 }
  0x1b   :  { %443 = vmatpush3.bf16.msra.mxu0 %v484_v8  ;;  %476 = vmatpush3.bf16.msra.mxu1 %v484_v8 }
  0x1c   :  { %444 = vmatprep.subr.bf16.mxu0 %v485_v9  ;;  %469 = vmatprep.subr.bf16.mxu1 %v485_v9 }
  0x1f   :  { %445 = vmatpush3.bf16.msra.mxu0 %v485_v9  ;;  %477 = vmatpush3.bf16.msra.mxu1 %v485_v9 }
  0x22   :  { %447 = vmatmul.mubr.bf16.vlgmr.msra.gmra.mxu0 %v488_v10  ;;  %455 = vmatmul.mubr.bf16.vlgmr.msra.gmra.mxu1 %v489_v11 }
  0x23   :  { %450 = vmatprep.mubr.bf16.mxu0 %v490_v12  ;;  %458 = vmatprep.mubr.bf16.mxu1 %v491_v13 }
  0x2a   :  { %451 = vmatmul.mubr.bf16.gmra.mxu0 %v492_v14  ;;  %459 = vmatmul.mubr.bf16.gmra.mxu1 %v493_v15 }
  0xe2   :  { %v448_v17 = vpop.f32.mrf.mxu0  ;;  %v456_v19 = vpop.f32.mrf.mxu1 }
  0xe3   :  { %v339_v20 = vmul.f32 %v448_v17, %v412_v16  ;;  %v347_v21 = vmul.f32 %v456_v19, %v412_v16 }
  0xe4   :  { %v216_v22 = vpop.f32.mrf.mxu0  ;;  %v248_v23 = vpop.f32.mrf.mxu1 }
  0xe5   :  { %v362_v24 = vadd.f32 %v413_v18, %v339_v20  ;;  %v370_v25 = vadd.f32 %v413_v18, %v347_v21  ;;  %v337_v26 = vmul.f32 %v412_v16, %v216_v22  ;;  %v345_v27 = vmul.f32 %v412_v16, %v248_v23 }
  0xe6   :  { %v449_v28 = vpop.f32.mrf.mxu0  ;;  %v457_v29 = vpop.f32.mrf.mxu1 }
  0xe7   :  { %378 = vst [vmem:[%s625_s4 + $0x10] sm:$0xff] %v362_v24  ;;  %386 = vst [vmem:[%s625_s4 + $0x50] sm:$0xff] %v370_v25  ;;  %v360_v30 = vadd.f32 %v413_v18, %v337_v26  ;;  %v368_v31 = vadd.f32 %v413_v18, %v345_v27  ;;  %v340_v32 = vmul.f32 %v449_v28, %v412_v16 }
  0xe8   :  { %v348_v33 = vmul.f32 %v457_v29, %v412_v16  ;;  %v219_v34 = vpop.f32.mrf.mxu0  ;;  %v251_v35 = vpop.f32.mrf.mxu1 }
  0xe9   :  { %376 = vst [vmem:[%s625_s4] sm:$0xff] %v360_v30  ;;  %384 = vst [vmem:[%s625_s4 + $0x40] sm:$0xff] %v368_v31  ;;  %v363_v36 = vadd.f32 %v413_v18, %v340_v32  ;;  %v338_v38 = vmul.f32 %v412_v16, %v219_v34  ;;  %v346_v39 = vmul.f32 %v412_v16, %v251_v35 }
  0xea   :  { %v371_v37 = vadd.f32 %v413_v18, %v348_v33  ;;  %v452_v40 = vpop.f32.mrf.mxu0  ;;  %v460_v41 = vpop.f32.mrf.mxu1 }
  0xeb   :  { %379 = vst [vmem:[%s625_s4 + $0x18] sm:$0xff] %v363_v36  ;;  %v361_v42 = vadd.f32 %v413_v18, %v338_v38  ;;  %v369_v43 = vadd.f32 %v413_v18, %v346_v39  ;;  %v343_v44 = vmul.f32 %v452_v40, %v412_v16  ;;  %v351_v45 = vmul.f32 %v460_v41, %v412_v16 }
  0xec   :  { %387 = vst [vmem:[%s625_s4 + $0x58] sm:$0xff] %v371_v37  ;;  %v232_v46 = vpop.f32.mrf.mxu0  ;;  %v264_v47 = vpop.f32.mrf.mxu1 }
  0xed   :  { %377 = vst [vmem:[%s625_s4 + $0x8] sm:$0xff] %v361_v42  ;;  %385 = vst [vmem:[%s625_s4 + $0x48] sm:$0xff] %v369_v43  ;;  %v366_v48 = vadd.f32 %v413_v18, %v343_v44  ;;  %v374_v49 = vadd.f32 %v413_v18, %v351_v45  ;;  %v341_v50 = vmul.f32 %v412_v16, %v232_v46 }
  0xee   :  { %v349_v51 = vmul.f32 %v412_v16, %v264_v47  ;;  %v453_v52 = vpop.f32.mrf.mxu0  ;;  %v461_v53 = vpop.f32.mrf.mxu1 }
  0xef   :  { %382 = vst [vmem:[%s625_s4 + $0x30] sm:$0xff] %v366_v48  ;;  %390 = vst [vmem:[%s625_s4 + $0x70] sm:$0xff] %v374_v49  ;;  %v364_v54 = vadd.f32 %v413_v18, %v341_v50  ;;  %v344_v56 = vmul.f32 %v453_v52, %v412_v16  ;;  %v352_v57 = vmul.f32 %v461_v53, %v412_v16 }
  0xf0   :  { %v372_v55 = vadd.f32 %v413_v18, %v349_v51  ;;  %v235_v58 = vpop.f32.mrf.mxu0  ;;  %v267_v59 = vpop.f32.mrf.mxu1 }
  0xf1   :  { %380 = vst [vmem:[%s625_s4 + $0x20] sm:$0xff] %v364_v54  ;;  %v367_v60 = vadd.f32 %v413_v18, %v344_v56  ;;  %v375_v61 = vadd.f32 %v413_v18, %v352_v57  ;;  %v342_v62 = vmul.f32 %v412_v16, %v235_v58  ;;  %v350_v63 = vmul.f32 %v412_v16, %v267_v59 }
  0xf2   :  { %388 = vst [vmem:[%s625_s4 + $0x60] sm:$0xff] %v372_v55 }
  0xf3   :  { %383 = vst [vmem:[%s625_s4 + $0x38] sm:$0xff] %v367_v60  ;;  %391 = vst [vmem:[%s625_s4 + $0x78] sm:$0xff] %v375_v61  ;;  %v365_v0 = vadd.f32 %v413_v18, %v342_v62  ;;  %v373_v1 = vadd.f32 %v413_v18, %v350_v63 }
  0xf5   :  { %381 = vst [vmem:[%s625_s4 + $0x28] sm:$0xff] %v365_v0  ;;  %389 = vst [vmem:[%s625_s4 + $0x68] sm:$0xff] %v373_v1 }

// kernel: full_mil_model_feats.20
= control target key start
LH: loop header
LB: loop body
LE: loop exit
PB: predicated region body
PF: predicated region fallthrough
CT: control target
= control target key end

     0   :  { %s1248_s18 = smov 0   ;;  %s1250_s19 = smov 0   ;;  %s1491_s0 = inlined_call_operand.vmem [shape: bf16[128,384], index: 0, kind: input, shape index: {}]   ;;  %s1492_s1 = inlined_call_operand.vmem [shape: bf16[384,128], index: 1, kind: input, shape index: {}]   ;;  %s1493_s2 = inlined_call_operand.vmem [shape: f32[1,128], index: 2, kind: input, shape index: {}]   ;;  %s1494_s3 = inlined_call_operand.vmem [shape: f32[1,128], index: 3, kind: input, shape index: {}]   ;;  %s1495_s4 = inlined_call_operand.vmem [shape: f32[128,128], index: 4, kind: input, shape index: {}]   ;;  %s1496_s5 = inlined_call_operand.vmem [shape: f32[128,128], index: 5, kind: output, shape index: {}]  }
   0x1   :  { %s1252_s20 = smov 0   ;;  %s1254_s21 = smov 0  }
   0x2   :  { %s1256_s22 = smov 0  }
   0x3 LB: > { %s27_s23 = sadd.s32 1, %s1211_s21  ;;  %p50_p1 = scmp.ne.s32.totalorder %s1203_s19, %s1199_s18  ;;  %s1215_s22 = sphi %s1256_s22, %s15_s22   ;;  %s1211_s21 = sphi %s1254_s21, %s1500_s21   ;;  %s1207_s20 = sphi %s1252_s20, %s1499_s20   ;;  %s1203_s19 = sphi %s1250_s19, %s1498_s19   ;;  %s1199_s18 = sphi %s1248_s18, %s1497_s18  }
   0x4   : > { %p28_p0 = scmp.ge.s32.totalorder %s27_s23, 3  ;;  %p51_p2 = scmp.eq.s32.totalorder %s1215_s22, 0 }
   0x5   : > { %s43_s25 = sadd.s32 1, %s1203_s19  ;;  %p1025_p5 = scmp.ge.s32.totalorder %s1215_s22, 3 }
   0x6   : > { %s1502_s23 = smov (%p28_p0, %s27_s23), 0  ;;  %p52_p3 = por %p51_p2, %p50_p1 }
   0x7   : > { %s39_s24 = ssub.s32 %s1211_s21, %s1502_s23  ;;  %236 = sbr.rel (%p1025_p5) target bundleno = 26 (0x1a), region = 28 }
   0x8   : > { %p41_p4 = scmp.eq.s32.totalorder %s39_s24, 0 }
   0xa   : > { %s1283_s26 = scalar_select %p41_p4, %s1203_s19, %s43_s25  }
   0xc   : > { %239 = sbr.rel (!%p52_p3) target bundleno = 26 (0x1a), region = 32  ;;  %s241_s27 = sand.u32 (%p52_p3), 1, %s1203_s19  }
   0xd   : > { %s1027_s28 = sshll.u32 (%p52_p3), %s1211_s21, 2  ;;  %s1026_s29 = sshll.u32 (%p52_p3), %s241_s27, 6 }
   0xe   : > { %s1291_s7 = scalar_lea.vmem (%p52_p3), %s1491_s0, %s1027_s28  ;;  %s243_s8 = scalar_lea.vmem (%p52_p3), [#allocation3], %s1026_s29 }
   0xf   : > { %v265_v0 = vld [vmem:[%s1291_s7] sm:$0xf] (%p52_p3)  ;;  %v267_v1 = vld [vmem:[%s1291_s7 + $0xc] sm:$0xf] (%p52_p3)  ;;  %v269_v2 = vld [vmem:[%s1291_s7 + $0x18] sm:$0xf] (%p52_p3) }
  0x10   : > { %266 = vst [vmem:[%s243_s8] sm:$0xf] (%p52_p3), %v265_v0  ;;  %268 = vst [vmem:[%s243_s8 + $0x4] sm:$0xf] (%p52_p3), %v267_v1  ;;  %v271_v3 = vld [vmem:[%s1291_s7 + $0x24] sm:$0xf] (%p52_p3) }
  0x11   : > { %v273_v4 = vld [vmem:[%s1291_s7 + $0x30] sm:$0xf]  ;;  %270 = vst [vmem:[%s243_s8 + $0x8] sm:$0xf] %v269_v2  ;;  %272 = vst [vmem:[%s243_s8 + $0xc] sm:$0xf] %v271_v3 }
  0x12   : > { %274 = vst [vmem:[%s243_s8 + $0x10] sm:$0xf] %v273_v4  ;;  %v275_v5 = vld [vmem:[%s1291_s7 + $0x3c] sm:$0xf]  ;;  %v277_v6 = vld [vmem:[%s1291_s7 + $0x48] sm:$0xf] }
  0x13   : > { %v279_v7 = vld [vmem:[%s1291_s7 + $0x54] sm:$0xf]  ;;  %276 = vst [vmem:[%s243_s8 + $0x14] sm:$0xf] %v275_v5  ;;  %278 = vst [vmem:[%s243_s8 + $0x18] sm:$0xf] %v277_v6 }
  0x14   : > { %280 = vst [vmem:[%s243_s8 + $0x1c] sm:$0xf] %v279_v7  ;;  %v281_v8 = vld [vmem:[%s1291_s7 + $0x60] sm:$0xf]  ;;  %v283_v9 = vld [vmem:[%s1291_s7 + $0x6c] sm:$0xf] }
  0x15   : > { %v285_v10 = vld [vmem:[%s1291_s7 + $0x78] sm:$0xf]  ;;  %282 = vst [vmem:[%s243_s8 + $0x20] sm:$0xf] %v281_v8  ;;  %284 = vst [vmem:[%s243_s8 + $0x24] sm:$0xf] %v283_v9 }
  0x16   : > { %286 = vst [vmem:[%s243_s8 + $0x28] sm:$0xf] %v285_v10  ;;  %v287_v11 = vld [vmem:[%s1291_s7 + $0x84] sm:$0xf]  ;;  %v289_v12 = vld [vmem:[%s1291_s7 + $0x90] sm:$0xf] }
  0x17   : > { %v291_v13 = vld [vmem:[%s1291_s7 + $0x9c] sm:$0xf]  ;;  %288 = vst [vmem:[%s243_s8 + $0x2c] sm:$0xf] %v287_v11  ;;  %290 = vst [vmem:[%s243_s8 + $0x30] sm:$0xf] %v289_v12 }
  0x18   : > { %292 = vst [vmem:[%s243_s8 + $0x34] sm:$0xf] %v291_v13  ;;  %v293_v14 = vld [vmem:[%s1291_s7 + $0xa8] sm:$0xf]  ;;  %v295_v15 = vld [vmem:[%s1291_s7 + $0xb4] sm:$0xf] }
  0x19   : > { %294 = vst [vmem:[%s243_s8 + $0x38] sm:$0xf] %v293_v14  ;;  %296 = vst [vmem:[%s243_s8 + $0x3c] sm:$0xf] %v295_v15 }
  0x1a PF: > { %p1028_p6 = scmp.ge.s32.totalorder %s1215_s22, 1  ;;  %p363_p7 = scmp.lt.s32.totalorder %s1215_s22, 4 }
  0x1c   : > { %p364_p8 = pnand %p1028_p6, %p363_p7 }
  0x1d   : > { %s370_s9 = sand.u32 (!%p364_p8), 1, %s1199_s18   ;;  %s1030_s10 = sshll.u32 (!%p364_p8), %s1207_s20, 4 }
  0x1e   : > { %367 = sbr.rel (%p364_p8) target bundleno = 315 (0x13b), region = 77  ;;  %s1029_s11 = sshll.u32 (!%p364_p8), %s370_s9, 6 }
  0x1f   : > { %p424_p9 = scmp.lt.s32.totalorder (!%p364_p8), %s1030_s10, 47  ;;  %s1318_s16 = scalar_lea.vmem (!%p364_p8), [#allocation3], %s1029_s11 }
  0x20   : > { %p1032_p10 = scmp.ne.s32.totalorder (!%p364_p8), %s1207_s20, 0 }
  0x23   : > { %s1504_s10 = smov (!%p424_p9, %s1030_s10), 47  ;;  %460 = sbr.rel (%p1032_p10) target bundleno = 49 (0x31), region = 85 }
  0x24   : > { %s1031_s12 = sshll.u32 %s1504_s10, 2 }
  0x25   : > { %s1316_s15 = scalar_lea.vmem %s1492_s1, %s1031_s12 }
  0x28   : > { %v1217_v16 = vmov 0.0  }
  0x29   : > { %461 = vst [vmem:[#allocation2 + $0x30] sm:$0xff] %v1217_v16  ;;  %462 = vst [vmem:[#allocation2] sm:$0xff] %v1217_v16 }
  0x2a   : > { %463 = vst [vmem:[#allocation2 + $0x58] sm:$0xff] %v1217_v16  ;;  %464 = vst [vmem:[#allocation2 + $0x18] sm:$0xff] %v1217_v16 }
  0x2b   : > { %465 = vst [vmem:[#allocation2 + $0x50] sm:$0xff] %v1217_v16  ;;  %466 = vst [vmem:[#allocation2 + $0x68] sm:$0xff] %v1217_v16 }
  0x2c   : > { %467 = vst [vmem:[#allocation2 + $0x8] sm:$0xff] %v1217_v16  ;;  %468 = vst [vmem:[#allocation2 + $0x48] sm:$0xff] %v1217_v16 }
  0x2d   : > { %469 = vst [vmem:[#allocation2 + $0x40] sm:$0xff] %v1217_v16  ;;  %470 = vst [vmem:[#allocation2 + $0x20] sm:$0xff] %v1217_v16 }
  0x2e   : > { %471 = vst [vmem:[#allocation2 + $0x10] sm:$0xff] %v1217_v16  ;;  %472 = vst [vmem:[#allocation2 + $0x38] sm:$0xff] %v1217_v16 }
  0x2f   : > { %473 = vst [vmem:[#allocation2 + $0x60] sm:$0xff] %v1217_v16  ;;  %474 = vst [vmem:[#allocation2 + $0x70] sm:$0xff] %v1217_v16 }
  0x30   : > { %475 = vst [vmem:[#allocation2 + $0x78] sm:$0xff] %v1217_v16  ;;  %476 = vst [vmem:[#allocation2 + $0x28] sm:$0xff] %v1217_v16 }
  0x31 PF: > { %v1161_v17 = vld [vmem:[%s1316_s15 + $0x38] sm:$0xff]   ;;  %v1162_v18 = vld [vmem:[%s1316_s15 + $0x30] sm:$0xff]   ;;  %v1163_v19 = vld [vmem:[%s1316_s15 + $0x28] sm:$0xff]   ;;  %p1049_p11 = scmp.ne.s32.totalorder %s1207_s20, 2 }
  0x32   : > { %1072 = vmatprep.subr.bf16.mxu0 %v1161_v17  ;;  %1104 = vmatprep.subr.bf16.mxu1 %v1161_v17  ;;  %v1164_v20 = vld [vmem:[%s1316_s15 + $0x20] sm:$0xff]   ;;  %v1165_v23 = vld [vmem:[%s1316_s15 + $0x18] sm:$0xff]   ;;  %v1166_v24 = vld [vmem:[%s1316_s15 + $0x10] sm:$0xff]  }
  0x33   : > { %1073 = vmatpush3.bf16.msra.mxu0 %v1161_v17  ;;  %1112 = vmatpush3.bf16.msra.mxu1 %v1161_v17  ;;  %v1169_v21 = vld [vmem:[%s1318_s16] sm:$0xff]   ;;  %v1167_v25 = vld [vmem:[%s1316_s15 + $0x8] sm:$0xff]   ;;  %v1173_v29 = vld [vmem:[%s1318_s16 + $0x10] sm:$0xff]  }
  0x34   : > { %1074 = vmatprep.subr.bf16.mxu0 %v1162_v18  ;;  %1105 = vmatprep.subr.bf16.mxu1 %v1162_v18  ;;  %v1170_v22 = vld [vmem:[%s1318_s16 + $0x20] sm:$0xff]   ;;  %v1171_v27 = vld [vmem:[%s1318_s16 + $0x8] sm:$0xff]   ;;  %v1174_v30 = vld [vmem:[%s1318_s16 + $0x30] sm:$0xff]  }
  0x35   : > { %1088 = vmatprep.mubr.bf16.mxu0 %v1169_v21  ;;  %1096 = vmatprep.mubr.bf16.mxu1 %v1170_v22  ;;  %v1168_v26 = vld [vmem:[%s1316_s15] sm:$0xff]   ;;  %v1172_v28 = vld [vmem:[%s1318_s16 + $0x28] sm:$0xff]   ;;  %v1175_v31 = vld [vmem:[%s1318_s16 + $0x18] sm:$0xff]  }
  0x36   : > { %v1176_v32 = vld [vmem:[%s1318_s16 + $0x38] sm:$0xff]   ;;  %v487_v34 = vld [vmem:[#allocation2 + $0x10] sm:$0xff]  ;;  %v485_v38 = vld [vmem:[#allocation2 + $0x40] sm:$0xff] }
  0x37   : > { %1075 = vmatpush3.bf16.msra.mxu0 %v1162_v18  ;;  %1113 = vmatpush3.bf16.msra.mxu1 %v1162_v18  ;;  %v479_v33 = vld [vmem:[#allocation2 + $0x58] sm:$0xff]  ;;  %v477_v37 = vld [vmem:[#allocation2 + $0x30] sm:$0xff]  ;;  %v478_v49 = vld [vmem:[#allocation2] sm:$0xff] }
  0x38   : > { %1076 = vmatprep.subr.bf16.mxu0 %v1163_v19  ;;  %1106 = vmatprep.subr.bf16.mxu1 %v1163_v19  ;;  %v480_v43 = vld [vmem:[#allocation2 + $0x18] sm:$0xff]  ;;  %v486_v50 = vld [vmem:[#allocation2 + $0x20] sm:$0xff]  ;;  %v483_v55 = vld [vmem:[#allocation2 + $0x8] sm:$0xff] }
  0x39   : > { %v488_v44 = vld [vmem:[#allocation2 + $0x38] sm:$0xff]  ;;  %v481_v61 = vld [vmem:[#allocation2 + $0x50] sm:$0xff]  ;;  %v489_v62 = vld [vmem:[#allocation2 + $0x60] sm:$0xff] }
  0x3a   : > { %v491_v56 = vld [vmem:[#allocation2 + $0x78] sm:$0xff]  ;;  %v484_v3 = vld [vmem:[#allocation2 + $0x48] sm:$0xff]  ;;  %v490_v10 = vld [vmem:[#allocation2 + $0x70] sm:$0xff] }
  0x3b   : > { %1077 = vmatpush3.bf16.msra.mxu0 %v1163_v19  ;;  %1114 = vmatpush3.bf16.msra.mxu1 %v1163_v19  ;;  %v492_v4 = vld [vmem:[#allocation2 + $0x28] sm:$0xff] }
  0x3c   : > { %1078 = vmatprep.subr.bf16.mxu0 %v1164_v20  ;;  %1107 = vmatprep.subr.bf16.mxu1 %v1164_v20  ;;  %v482_v9 = vld [vmem:[#allocation2 + $0x68] sm:$0xff] }
  0x3f   : > { %1079 = vmatpush3.bf16.msra.mxu0 %v1164_v20  ;;  %1115 = vmatpush3.bf16.msra.mxu1 %v1164_v20 }
  0x40   : > { %1080 = vmatprep.subr.bf16.mxu0 %v1165_v23  ;;  %1108 = vmatprep.subr.bf16.mxu1 %v1165_v23 }
  0x43   : > { %1081 = vmatpush3.bf16.msra.mxu0 %v1165_v23  ;;  %1116 = vmatpush3.bf16.msra.mxu1 %v1165_v23 }
  0x44   : > { %1082 = vmatprep.subr.bf16.mxu0 %v1166_v24  ;;  %1109 = vmatprep.subr.bf16.mxu1 %v1166_v24 }
  0x47   : > { %1083 = vmatpush3.bf16.msra.mxu0 %v1166_v24  ;;  %1117 = vmatpush3.bf16.msra.mxu1 %v1166_v24 }
  0x48   : > { %1084 = vmatprep.subr.bf16.mxu0 %v1167_v25  ;;  %1110 = vmatprep.subr.bf16.mxu1 %v1167_v25 }
  0x4b   : > { %1085 = vmatpush3.bf16.msra.mxu0 %v1167_v25  ;;  %1118 = vmatpush3.bf16.msra.mxu1 %v1167_v25 }
  0x4c   : > { %1086 = vmatprep.subr.bf16.mxu0 %v1168_v26  ;;  %1111 = vmatprep.subr.bf16.mxu1 %v1168_v26 }
  0x4f   : > { %1087 = vmatpush3.bf16.msra.mxu0 %v1168_v26  ;;  %1119 = vmatpush3.bf16.msra.mxu1 %v1168_v26 }
  0x52   : > { %1089 = vmatmul.mubr.bf16.vlgmr.msra.gmra.mxu0 %v1171_v27  ;;  %1097 = vmatmul.mubr.bf16.vlgmr.msra.gmra.mxu1 %v1172_v28 }
  0x53   : > { %1092 = vmatprep.mubr.bf16.mxu0 %v1173_v29  ;;  %1100 = vmatprep.mubr.bf16.mxu1 %v1174_v30 }
  0x5a   : > { %1093 = vmatmul.mubr.bf16.gmra.mxu0 %v1175_v31  ;;  %1101 = vmatmul.mubr.bf16.gmra.mxu1 %v1176_v32 }
 0x112   : > { %v1090_v35 = vpop.f32.mrf.mxu0  ;;  %v1098_v36 = vpop.f32.mrf.mxu1 }
 0x113   : > { %v720_v39 = vadd.f32 %v1090_v35, %v479_v33  ;;  %v728_v40 = vadd.f32 %v1098_v36, %v487_v34 }
 0x114   : > { %v655_v41 = vpop.f32.mrf.mxu0  ;;  %v687_v42 = vpop.f32.mrf.mxu1 }
 0x115   : > { %736 = vst [vmem:[#allocation2 + $0x58] sm:$0xff] %v720_v39  ;;  %744 = vst [vmem:[#allocation2 + $0x10] sm:$0xff] %v728_v40  ;;  %v718_v45 = vadd.f32 %v655_v41, %v477_v37  ;;  %v726_v46 = vadd.f32 %v687_v42, %v485_v38 }
 0x116   : > { %v1091_v47 = vpop.f32.mrf.mxu0  ;;  %v1099_v48 = vpop.f32.mrf.mxu1 }
 0x117   : > { %734 = vst [vmem:[#allocation2 + $0x30] sm:$0xff] %v718_v45  ;;  %742 = vst [vmem:[#allocation2 + $0x40] sm:$0xff] %v726_v46  ;;  %v721_v51 = vadd.f32 %v1091_v47, %v480_v43  ;;  %v729_v52 = vadd.f32 %v1099_v48, %v488_v44 }
 0x118   : > { %v658_v53 = vpop.f32.mrf.mxu0  ;;  %v690_v54 = vpop.f32.mrf.mxu1 }
 0x119   : > { %737 = vst [vmem:[#allocation2 + $0x18] sm:$0xff] %v721_v51  ;;  %745 = vst [vmem:[#allocation2 + $0x38] sm:$0xff] %v729_v52  ;;  %v719_v57 = vadd.f32 %v658_v53, %v478_v49  ;;  %v727_v58 = vadd.f32 %v690_v54, %v486_v50 }
 0x11a   : > { %v1094_v59 = vpop.f32.mrf.mxu0  ;;  %v1102_v60 = vpop.f32.mrf.mxu1 }
 0x11b   : > { %735 = vst [vmem:[#allocation2] sm:$0xff] %v719_v57  ;;  %743 = vst [vmem:[#allocation2 + $0x20] sm:$0xff] %v727_v58  ;;  %v724_v63 = vadd.f32 %v1094_v59, %v483_v55  ;;  %v732_v0 = vadd.f32 %v1102_v60, %v491_v56 }
 0x11c   : > { %v671_v1 = vpop.f32.mrf.mxu0  ;;  %v703_v2 = vpop.f32.mrf.mxu1 }
 0x11d   : > { %740 = vst [vmem:[#allocation2 + $0x8] sm:$0xff] %v724_v63  ;;  %748 = vst [vmem:[#allocation2 + $0x78] sm:$0xff] %v732_v0  ;;  %v722_v5 = vadd.f32 %v671_v1, %v481_v61  ;;  %v730_v6 = vadd.f32 %v703_v2, %v489_v62 }
 0x11e   : > { %v1095_v7 = vpop.f32.mrf.mxu0  ;;  %v1103_v8 = vpop.f32.mrf.mxu1 }
 0x11f   : > { %738 = vst [vmem:[#allocation2 + $0x50] sm:$0xff] %v722_v5  ;;  %746 = vst [vmem:[#allocation2 + $0x60] sm:$0xff] %v730_v6  ;;  %v725_v11 = vadd.f32 %v1095_v7, %v484_v3  ;;  %v733_v12 = vadd.f32 %v1103_v8, %v492_v4  ;;  %753 = sbr.rel (%p1049_p11) target bundleno = 315 (0x13b), region = 89 }
 0x120   : > { %v674_v13 = vpop.f32.mrf.mxu0  ;;  %v706_v14 = vpop.f32.mrf.mxu1 }
 0x121   : > { %741 = vst [vmem:[#allocation2 + $0x48] sm:$0xff] %v725_v11  ;;  %749 = vst [vmem:[#allocation2 + $0x28] sm:$0xff] %v733_v12  ;;  %v723_v15 = vadd.f32 %v674_v13, %v482_v9  ;;  %v731_v16 = vadd.f32 %v706_v14, %v490_v10 }
 0x123   : > { %739 = vst [vmem:[#allocation2 + $0x68] sm:$0xff] %v723_v15  ;;  %747 = vst [vmem:[#allocation2 + $0x70] sm:$0xff] %v731_v16 }
 0x124   : > { %v754_v17 = vld [vmem:[#allocation2 + $0x30] sm:$0xff]  ;;  %v1341_v18 = vld [vmem:[%s1493_s2] ss:$0 sm:$0xff]  ;;  %v756_v24 = vld [vmem:[#allocation2 + $0x58] sm:$0xff] }
 0x125   : > { %v1346_v19 = vld [vmem:[%s1494_s3] ss:$0 sm:$0xff]  ;;  %v777_v20 = vmul.f32 %v1341_v18, %v754_v17  ;;  %v757_v25 = vld [vmem:[#allocation2 + $0x18] sm:$0xff]  ;;  %v817_v27 = vld [vmem:[%s1495_s4 + $0x8] sm:$0xff]  ;;  %v779_v28 = vmul.f32 %v1341_v18, %v756_v24 }
 0x126   : > { %v755_v21 = vld [vmem:[#allocation2] sm:$0xff]  ;;  %v818_v29 = vld [vmem:[%s1495_s4 + $0x10] sm:$0xff]  ;;  %v780_v30 = vmul.f32 %v1341_v18, %v757_v25  ;;  %v819_v33 = vld [vmem:[%s1495_s4 + $0x18] sm:$0xff] }
 0x127   : > { %v816_v22 = vld [vmem:[%s1495_s4] sm:$0xff]  ;;  %v778_v23 = vmul.f32 %v1341_v18, %v755_v21  ;;  %v800_v26 = vadd.f32 %v1346_v19, %v777_v20  ;;  %v758_v31 = vld [vmem:[#allocation2 + $0x50] sm:$0xff]  ;;  %v760_v36 = vld [vmem:[#allocation2 + $0x8] sm:$0xff]  ;;  %v802_v38 = vadd.f32 %v1346_v19, %v779_v28 }
 0x128   : > { %v781_v34 = vmul.f32 %v1341_v18, %v758_v31  ;;  %v803_v39 = vadd.f32 %v1346_v19, %v780_v30  ;;  %v820_v40 = vld [vmem:[%s1495_s4 + $0x20] sm:$0xff]  ;;  %v761_v42 = vld [vmem:[#allocation2 + $0x48] sm:$0xff]  ;;  %v783_v46 = vmul.f32 %v1341_v18, %v760_v36  ;;  %v822_v53 = vld [vmem:[%s1495_s4 + $0x30] sm:$0xff] }
 0x129   : > { %v801_v32 = vadd.f32 %v1346_v19, %v778_v23  ;;  %v832_v37 = vadd.f32 %v816_v22, %v800_v26  ;;  %v821_v45 = vld [vmem:[%s1495_s4 + $0x28] sm:$0xff]  ;;  %v784_v47 = vmul.f32 %v1341_v18, %v761_v42  ;;  %v762_v48 = vld [vmem:[#allocation2 + $0x40] sm:$0xff]  ;;  %v834_v50 = vadd.f32 %v818_v29, %v802_v38  ;;  %v823_v54 = vld [vmem:[%s1495_s4 + $0x38] sm:$0xff] }
 0x12a   : > { %v759_v35 = vld [vmem:[#allocation2 + $0x68] sm:$0xff]  ;;  %v804_v44 = vadd.f32 %v1346_v19, %v781_v34  ;;  %v835_v51 = vadd.f32 %v819_v33, %v803_v39  ;;  %v763_v55 = vld [vmem:[#allocation2 + $0x20] sm:$0xff]  ;;  %v806_v58 = vadd.f32 %v1346_v19, %v783_v46  ;;  %v764_v60 = vld [vmem:[#allocation2 + $0x10] sm:$0xff]  ;;  %v785_v1 = vmul.f32 %v1341_v18, %v762_v48 }
 0x12b   : > { %v782_v41 = vmul.f32 %v1341_v18, %v759_v35  ;;  %v833_v43 = vadd.f32 %v817_v27, %v801_v32  ;;  %v848_v49 = vmax.f32 %v832_v37, 0.0  ;;  %v807_v59 = vadd.f32 %v1346_v19, %v784_v47  ;;  %v765_v61 = vld [vmem:[#allocation2 + $0x38] sm:$0xff]  ;;  %v766_v2 = vld [vmem:[#allocation2 + $0x60] sm:$0xff]  ;;  %v767_v8 = vld [vmem:[#allocation2 + $0x70] sm:$0xff] }
 0x12c   : > { %v836_v57 = vadd.f32 %v820_v40, %v804_v44  ;;  %v850_v62 = vmax.f32 %v834_v50, 0.0  ;;  %v851_v63 = vmax.f32 %v835_v51, 0.0  ;;  %v838_v4 = vadd.f32 %v822_v53, %v806_v58  ;;  %v824_v6 = vld [vmem:[%s1495_s4 + $0x40] sm:$0xff]  ;;  %v825_v11 = vld [vmem:[%s1495_s4 + $0x48] sm:$0xff]  ;;  %v768_v14 = vld [vmem:[#allocation2 + $0x78] sm:$0xff] }
 0x12d   : > { %v805_v52 = vadd.f32 %v1346_v19, %v782_v41  ;;  %v849_v56 = vmax.f32 %v833_v43, 0.0  ;;  %864 = vst [vmem:[%s1496_s5] sm:$0xff] %v848_v49  ;;  %v839_v5 = vadd.f32 %v823_v54, %v807_v59  ;;  %v786_v7 = vmul.f32 %v1341_v18, %v763_v55  ;;  %v769_v15 = vld [vmem:[#allocation2 + $0x28] sm:$0xff]  ;;  %v826_v21 = vld [vmem:[%s1495_s4 + $0x50] sm:$0xff]  ;;  %v827_v22 = vld [vmem:[%s1495_s4 + $0x58] sm:$0xff] }
 0x12e   : > { %v852_v3 = vmax.f32 %v836_v57, 0.0  ;;  %866 = vst [vmem:[%s1496_s5 + $0x10] sm:$0xff] %v850_v62  ;;  %867 = vst [vmem:[%s1496_s5 + $0x18] sm:$0xff] %v851_v63  ;;  %v808_v10 = vadd.f32 %v1346_v19, %v785_v1  ;;  %v787_v12 = vmul.f32 %v1341_v18, %v764_v60  ;;  %v788_v13 = vmul.f32 %v1341_v18, %v765_v61  ;;  %v828_v27 = vld [vmem:[%s1495_s4 + $0x60] sm:$0xff]  ;;  %v829_v31 = vld [vmem:[%s1495_s4 + $0x68] sm:$0xff] }
 0x12f   : > { %v837_v0 = vadd.f32 %v821_v45, %v805_v52  ;;  %865 = vst [vmem:[%s1496_s5 + $0x8] sm:$0xff] %v849_v56  ;;  %v854_v16 = vmax.f32 %v838_v4, 0.0  ;;  %v855_v17 = vmax.f32 %v839_v5, 0.0  ;;  %v809_v20 = vadd.f32 %v1346_v19, %v786_v7  ;;  %v830_v38 = vld [vmem:[%s1495_s4 + $0x70] sm:$0xff]  ;;  %v831_v39 = vld [vmem:[%s1495_s4 + $0x78] sm:$0xff] }
 0x130   : > { %868 = vst [vmem:[%s1496_s5 + $0x20] sm:$0xff] %v852_v3  ;;  %v789_v23 = vmul.f32 %v1341_v18, %v766_v2  ;;  %v840_v24 = vadd.f32 %v824_v6, %v808_v10  ;;  %v810_v25 = vadd.f32 %v1346_v19, %v787_v12  ;;  %v811_v26 = vadd.f32 %v1346_v19, %v788_v13 }
 0x131   : > { %v853_v9 = vmax.f32 %v837_v0, 0.0  ;;  %v790_v28 = vmul.f32 %v1341_v18, %v767_v8  ;;  %870 = vst [vmem:[%s1496_s5 + $0x30] sm:$0xff] %v854_v16  ;;  %871 = vst [vmem:[%s1496_s5 + $0x38] sm:$0xff] %v855_v17  ;;  %v841_v29 = vadd.f32 %v825_v11, %v809_v20  ;;  %v791_v32 = vmul.f32 %v1341_v18, %v768_v14 }
 0x132   : > { %v812_v30 = vadd.f32 %v1346_v19, %v789_v23  ;;  %v792_v33 = vmul.f32 %v1341_v18, %v769_v15  ;;  %v856_v34 = vmax.f32 %v840_v24, 0.0  ;;  %v842_v35 = vadd.f32 %v826_v21, %v810_v25 }
 0x133   : > { %869 = vst [vmem:[%s1496_s5 + $0x28] sm:$0xff] %v853_v9  ;;  %v843_v36 = vadd.f32 %v827_v22, %v811_v26  ;;  %v813_v37 = vadd.f32 %v1346_v19, %v790_v28  ;;  %v857_v40 = vmax.f32 %v841_v29, 0.0  ;;  %v814_v42 = vadd.f32 %v1346_v19, %v791_v32 }
 0x134   : > { %v844_v41 = vadd.f32 %v828_v27, %v812_v30  ;;  %v815_v43 = vadd.f32 %v1346_v19, %v792_v33  ;;  %872 = vst [vmem:[%s1496_s5 + $0x40] sm:$0xff] %v856_v34  ;;  %v858_v18 = vmax.f32 %v842_v35, 0.0 }
 0x135   : > { %v859_v44 = vmax.f32 %v843_v36, 0.0  ;;  %v845_v45 = vadd.f32 %v829_v31, %v813_v37  ;;  %873 = vst [vmem:[%s1496_s5 + $0x48] sm:$0xff] %v857_v40  ;;  %v846_v47 = vadd.f32 %v830_v38, %v814_v42 }
 0x136   : > { %v860_v46 = vmax.f32 %v844_v41, 0.0  ;;  %v847_v48 = vadd.f32 %v831_v39, %v815_v43  ;;  %874 = vst [vmem:[%s1496_s5 + $0x50] sm:$0xff] %v858_v18 }
 0x137   : > { %875 = vst [vmem:[%s1496_s5 + $0x58] sm:$0xff] %v859_v44  ;;  %v861_v19 = vmax.f32 %v845_v45, 0.0  ;;  %v862_v49 = vmax.f32 %v846_v47, 0.0 }
 0x138   : > { %876 = vst [vmem:[%s1496_s5 + $0x60] sm:$0xff] %v860_v46  ;;  %v863_v50 = vmax.f32 %v847_v48, 0.0 }
 0x139   : > { %877 = vst [vmem:[%s1496_s5 + $0x68] sm:$0xff] %v861_v19  ;;  %878 = vst [vmem:[%s1496_s5 + $0x70] sm:$0xff] %v862_v49 }
 0x13a   : > { %879 = vst [vmem:[%s1496_s5 + $0x78] sm:$0xff] %v863_v50 }
 0x13b PF: > { %s15_s22 = sadd.s32 1, %s1215_s22   ;;  %s1497_s18 = smov %s1203_s19 }
 0x13c   : > { %p12_p12 = scmp.ge.s32.totalorder %s15_s22, 5   ;;  %s1498_s19 = smov %s1283_s26 }
 0x13d   : > { %s1499_s20 = smov %s1211_s21  ;;  %s1500_s21 = smov %s1502_s23 }
 0x13e   :  { %14 = sbr.rel (!%p12_p12) target bundleno = 3 (0x3), region = 136 }

// kernel: full_mil_model_feats.22
= control target key start
LH: loop header
LB: loop body
LE: loop exit
PB: predicated region body
PF: predicated region fallthrough
CT: control target
= control target key end

     0   :  { %s834_s15 = smov 0   ;;  %s836_s16 = smov 0   ;;  %s936_s0 = inlined_call_operand.vmem [shape: bf16[32,384], index: 0, kind: input, shape index: {}]   ;;  %s937_s1 = inlined_call_operand.vmem [shape: bf16[384,128], index: 1, kind: input, shape index: {}]   ;;  %s938_s2 = inlined_call_operand.vmem [shape: f32[1,128], index: 2, kind: input, shape index: {}]   ;;  %s939_s3 = inlined_call_operand.vmem [shape: f32[1,128], index: 3, kind: input, shape index: {}]   ;;  %s940_s4 = inlined_call_operand.vmem [shape: f32[32,128], index: 4, kind: output, shape index: {}]  }
   0x1   :  { %s838_s17 = smov 0   ;;  %s840_s18 = smov 0  }
   0x2   :  { %s842_s19 = smov 0  }
   0x3 LB: > { %s26_s20 = sadd.s32 1, %s802_s18  ;;  %p49_p1 = scmp.ne.s32.totalorder %s794_s16, %s790_s15  ;;  %s806_s19 = sphi %s842_s19, %s14_s19   ;;  %s802_s18 = sphi %s840_s18, %s944_s18   ;;  %s798_s17 = sphi %s838_s17, %s943_s17   ;;  %s794_s16 = sphi %s836_s16, %s942_s16   ;;  %s790_s15 = sphi %s834_s15, %s941_s15  }
   0x4   : > { %p27_p0 = scmp.ge.s32.totalorder %s26_s20, 3  ;;  %p50_p2 = scmp.eq.s32.totalorder %s806_s19, 0 }
   0x5   : > { %s42_s22 = sadd.s32 1, %s794_s16  ;;  %p662_p5 = scmp.ge.s32.totalorder %s806_s19, 3 }
   0x6   : > { %s946_s20 = smov (%p27_p0, %s26_s20), 0  ;;  %p51_p3 = por %p50_p2, %p49_p1 }
   0x7   : > { %s38_s21 = ssub.s32 %s802_s18, %s946_s20  ;;  %195 = sbr.rel (%p662_p5) target bundleno = 18 (0x12), region = 24 }
   0x8   : > { %p40_p4 = scmp.eq.s32.totalorder %s38_s21, 0 }
   0xa   : > { %s869_s23 = scalar_select %p40_p4, %s794_s16, %s42_s22  }
   0xc   : > { %198 = sbr.rel (!%p51_p3) target bundleno = 18 (0x12), region = 28  ;;  %s200_s24 = sand.u32 (%p51_p3), 1, %s794_s16  }
   0xd   : > { %s664_s25 = sshll.u32 (%p51_p3), %s802_s18, 2  ;;  %s663_s26 = sshll.u32 (%p51_p3), %s200_s24, 4 }
   0xe   : > { %s207_s29 = scalar_lea.vmem (%p51_p3), %s936_s0, %s664_s25  ;;  %s202_s30 = scalar_lea.vmem (%p51_p3), [#allocation3], %s663_s26 }
   0xf   : > { %v224_v0 = vld [vmem:[%s207_s29] sm:$0xf] (%p51_p3)  ;;  %v226_v1 = vld [vmem:[%s207_s29 + $0xc] sm:$0xf] (%p51_p3)  ;;  %v228_v2 = vld [vmem:[%s207_s29 + $0x18] sm:$0xf] (%p51_p3) }
  0x10   : > { %225 = vst [vmem:[%s202_s30] sm:$0xf] (%p51_p3), %v224_v0  ;;  %227 = vst [vmem:[%s202_s30 + $0x4] sm:$0xf] (%p51_p3), %v226_v1  ;;  %v230_v3 = vld [vmem:[%s207_s29 + $0x24] sm:$0xf] (%p51_p3) }
  0x11   : > { %229 = vst [vmem:[%s202_s30 + $0x8] sm:$0xf] %v228_v2  ;;  %231 = vst [vmem:[%s202_s30 + $0xc] sm:$0xf] %v230_v3 }
  0x12 PF: > { %p665_p6 = scmp.ge.s32.totalorder %s806_s19, 1  ;;  %p274_p7 = scmp.lt.s32.totalorder %s806_s19, 4 }
  0x14   : > { %p275_p8 = pnand %p665_p6, %p274_p7 }
  0x15   : > { %s281_s5 = sand.u32 (!%p275_p8), 1, %s790_s15   ;;  %s667_s6 = sshll.u32 (!%p275_p8), %s798_s17, 4 }
  0x16   : > { %278 = sbr.rel (%p275_p8) target bundleno = 284 (0x11c), region = 73  ;;  %s881_s7 = sshll.u32 (!%p275_p8), %s281_s5, 4 }
  0x17   : > { %p325_p9 = scmp.lt.s32.totalorder (!%p275_p8), %s667_s6, 47  ;;  %s283_s12 = scalar_lea.vmem (!%p275_p8), [#allocation3], %s881_s7 }
  0x18   : > { %p669_p10 = scmp.ne.s32.totalorder (!%p275_p8), %s798_s17, 0 }
  0x1b   : > { %s948_s6 = smov (!%p325_p9, %s667_s6), 47  ;;  %352 = sbr.rel (%p669_p10) target bundleno = 35 (0x23), region = 81 }
  0x1c   : > { %s668_s8 = sshll.u32 %s948_s6, 2 }
  0x1d   : > { %s886_s11 = scalar_lea.vmem %s937_s1, %s668_s8 }
  0x20   : > { %v808_v4 = vmov 0.0  }
  0x21   : > { %353 = vst [vmem:[#allocation2 + $0x10] sm:$0xff] %v808_v4  ;;  %354 = vst [vmem:[#allocation2] sm:$0xff] %v808_v4 }
  0x22   : > { %355 = vst [vmem:[#allocation2 + $0x18] sm:$0xff] %v808_v4  ;;  %356 = vst [vmem:[#allocation2 + $0x8] sm:$0xff] %v808_v4 }
  0x23 PF: > { %v758_v5 = vld [vmem:[%s886_s11 + $0x38] sm:$0xff]   ;;  %v759_v6 = vld [vmem:[%s886_s11 + $0x30] sm:$0xff]   ;;  %v760_v7 = vld [vmem:[%s886_s11 + $0x28] sm:$0xff]   ;;  %p680_p11 = scmp.ne.s32.totalorder %s798_s17, 2 }
  0x24   : > { %697 = vmatprep.subr.bf16.mxu0 %v758_v5  ;;  %v761_v8 = vld [vmem:[%s886_s11 + $0x20] sm:$0xff]   ;;  %v762_v10 = vld [vmem:[%s886_s11 + $0x18] sm:$0xff]   ;;  %v763_v11 = vld [vmem:[%s886_s11 + $0x10] sm:$0xff]  }
  0x25   : > { %698 = vmatpush3.bf16.msra.mxu0 %v758_v5  ;;  %v766_v9 = vld [vmem:[%s283_s12] sm:$0xff]   ;;  %v764_v12 = vld [vmem:[%s886_s11 + $0x8] sm:$0xff]  }
  0x26   : > { %699 = vmatprep.subr.bf16.mxu0 %v759_v6  ;;  %713 = vmatprep.mubr.bf16.mxu0 %v766_v9  ;;  %v765_v13 = vld [vmem:[%s886_s11] sm:$0xff]   ;;  %v767_v14 = vld [vmem:[%s283_s12 + $0x8] sm:$0xff]  }
  0x28   : > { %v357_v17 = vld [vmem:[#allocation2 + $0x10] sm:$0xff]  ;;  %v358_v23 = vld [vmem:[#allocation2] sm:$0xff] }
  0x29   : > { %700 = vmatpush3.bf16.msra.mxu0 %v759_v6  ;;  %v359_v15 = vld [vmem:[#allocation2 + $0x18] sm:$0xff]  ;;  %v360_v20 = vld [vmem:[#allocation2 + $0x8] sm:$0xff] }
  0x2a   : > { %701 = vmatprep.subr.bf16.mxu0 %v760_v7 }
  0x2d   : > { %702 = vmatpush3.bf16.msra.mxu0 %v760_v7 }
  0x2e   : > { %703 = vmatprep.subr.bf16.mxu0 %v761_v8 }
  0x31   : > { %704 = vmatpush3.bf16.msra.mxu0 %v761_v8 }
  0x32   : > { %705 = vmatprep.subr.bf16.mxu0 %v762_v10 }
  0x35   : > { %706 = vmatpush3.bf16.msra.mxu0 %v762_v10 }
  0x36   : > { %707 = vmatprep.subr.bf16.mxu0 %v763_v11 }
  0x39   : > { %708 = vmatpush3.bf16.msra.mxu0 %v763_v11 }
  0x3a   : > { %709 = vmatprep.subr.bf16.mxu0 %v764_v12 }
  0x3d   : > { %710 = vmatpush3.bf16.msra.mxu0 %v764_v12 }
  0x3e   : > { %711 = vmatprep.subr.bf16.mxu0 %v765_v13 }
  0x41   : > { %712 = vmatpush3.bf16.msra.mxu0 %v765_v13 }
  0x44   : > { %714 = vmatmul.mubr.bf16.vlgmr.msra.gmra.mxu0 %v767_v14 }
 0x104   : > { %v715_v16 = vpop.f32.mrf.mxu0 }
 0x105   : > { %v492_v18 = vadd.f32 %v715_v16, %v359_v15 }
 0x106   : > { %v475_v19 = vpop.f32.mrf.mxu0 }
 0x107   : > { %496 = vst [vmem:[#allocation2 + $0x18] sm:$0xff] %v492_v18  ;;  %v490_v21 = vadd.f32 %v475_v19, %v357_v17 }
 0x108   : > { %v716_v22 = vpop.f32.mrf.mxu0 }
 0x109   : > { %494 = vst [vmem:[#allocation2 + $0x10] sm:$0xff] %v490_v21  ;;  %v493_v24 = vadd.f32 %v716_v22, %v360_v20  ;;  %501 = sbr.rel (%p680_p11) target bundleno = 284 (0x11c), region = 85 }
 0x10a   : > { %v478_v25 = vpop.f32.mrf.mxu0 }
 0x10b   : > { %497 = vst [vmem:[#allocation2 + $0x8] sm:$0xff] %v493_v24  ;;  %v491_v26 = vadd.f32 %v478_v25, %v358_v23 }
 0x10d   : > { %495 = vst [vmem:[#allocation2] sm:$0xff] %v491_v26 }
 0x10e   : > { %v681_v28 = vld [vmem:[%s938_s2] ss:$0 sm:$0xff]  ;;  %v504_v32 = vld [vmem:[#allocation2 + $0x18] sm:$0xff] }
 0x10f   : > { %v682_v29 = vld [vmem:[%s939_s3] ss:$0 sm:$0xff]  ;;  %v515_v35 = vmul.f32 %v681_v28, %v504_v32 }
 0x110   : > { %v502_v27 = vld [vmem:[#allocation2 + $0x10] sm:$0xff] }
 0x111   : > { %v513_v30 = vmul.f32 %v681_v28, %v502_v27  ;;  %v526_v39 = vadd.f32 %v682_v29, %v515_v35 }
 0x112   : > { %v505_v33 = vld [vmem:[#allocation2 + $0x8] sm:$0xff] }
 0x113   : > { %v516_v36 = vmul.f32 %v681_v28, %v505_v33  ;;  %v524_v37 = vadd.f32 %v682_v29, %v513_v30  ;;  %v530_v43 = vmax.f32 %v526_v39, 0.0 }
 0x114   : > { %v503_v31 = vld [vmem:[#allocation2] sm:$0xff] }
 0x115   : > { %v514_v34 = vmul.f32 %v681_v28, %v503_v31  ;;  %v527_v40 = vadd.f32 %v682_v29, %v516_v36  ;;  %v528_v41 = vmax.f32 %v524_v37, 0.0  ;;  %534 = vst [vmem:[%s940_s4 + $0x10] sm:$0xff] %v530_v43 }
 0x117   : > { %v525_v38 = vadd.f32 %v682_v29, %v514_v34  ;;  %v531_v44 = vmax.f32 %v527_v40, 0.0  ;;  %532 = vst [vmem:[%s940_s4] sm:$0xff] %v528_v41 }
 0x119   : > { %v529_v42 = vmax.f32 %v525_v38, 0.0  ;;  %535 = vst [vmem:[%s940_s4 + $0x18] sm:$0xff] %v531_v44 }
 0x11b   : > { %533 = vst [vmem:[%s940_s4 + $0x8] sm:$0xff] %v529_v42 }
 0x11c PF: > { %s14_s19 = sadd.s32 1, %s806_s19   ;;  %s941_s15 = smov %s794_s16 }
 0x11d   : > { %p11_p12 = scmp.ge.s32.totalorder %s14_s19, 5   ;;  %s942_s16 = smov %s869_s23 }
 0x11e   : > { %s943_s17 = smov %s802_s18  ;;  %s944_s18 = smov %s946_s20 }
 0x11f   :  { %13 = sbr.rel (!%p11_p12) target bundleno = 3 (0x3), region = 129 }

// kernel: full_mil_model_feats.21
= control target key start
LH: loop header
LB: loop body
LE: loop exit
PB: predicated region body
PF: predicated region fallthrough
CT: control target
= control target key end

     0   :  { %s329_s1 = inlined_call_operand.vmem [shape: bf16[128,128], index: 1, kind: input, shape index: {}]   ;;  %s330_s0 = inlined_call_operand.vmem [shape: bf16[32,128], index: 0, kind: input, shape index: {}]   ;;  %s331_s2 = inlined_call_operand.vmem [shape: f32[1,128], index: 2, kind: input, shape index: {}]   ;;  %s332_s3 = inlined_call_operand.vmem [shape: f32[1,128], index: 3, kind: input, shape index: {}]   ;;  %s333_s4 = inlined_call_operand.vmem [shape: f32[32,128], index: 4, kind: output, shape index: {}]  }
   0x1   :  { %v246_v0 = vld [vmem:[%s329_s1 + $0x38] sm:$0xff]   ;;  %v247_v1 = vld [vmem:[%s329_s1 + $0x30] sm:$0xff]   ;;  %v248_v2 = vld [vmem:[%s329_s1 + $0x28] sm:$0xff]  }
   0x2   :  { %226 = vmatprep.subr.bf16.mxu0 %v246_v0  ;;  %v249_v3 = vld [vmem:[%s329_s1 + $0x20] sm:$0xff]   ;;  %v250_v5 = vld [vmem:[%s329_s1 + $0x18] sm:$0xff]   ;;  %v251_v6 = vld [vmem:[%s329_s1 + $0x10] sm:$0xff]  }
   0x3   :  { %227 = vmatpush3.bf16.msra.mxu0 %v246_v0  ;;  %v254_v4 = vld [vmem:[%s330_s0] sm:$0xff]   ;;  %v252_v7 = vld [vmem:[%s329_s1 + $0x8] sm:$0xff]  }
   0x4   :  { %228 = vmatprep.subr.bf16.mxu0 %v247_v1  ;;  %242 = vmatprep.mubr.bf16.mxu0 %v254_v4  ;;  %v253_v8 = vld [vmem:[%s329_s1] sm:$0xff]   ;;  %v255_v9 = vld [vmem:[%s330_s0 + $0x8] sm:$0xff]  }
   0x5   :  { %v214_v10 = vld [vmem:[%s331_s2] ss:$0 sm:$0xff] }
   0x6   :  { %v215_v12 = vld [vmem:[%s332_s3] ss:$0 sm:$0xff] }
   0x7   :  { %229 = vmatpush3.bf16.msra.mxu0 %v247_v1 }
   0x8   :  { %230 = vmatprep.subr.bf16.mxu0 %v248_v2 }
   0xb   :  { %231 = vmatpush3.bf16.msra.mxu0 %v248_v2 }
   0xc   :  { %232 = vmatprep.subr.bf16.mxu0 %v249_v3 }
   0xf   :  { %233 = vmatpush3.bf16.msra.mxu0 %v249_v3 }
  0x10   :  { %234 = vmatprep.subr.bf16.mxu0 %v250_v5 }
  0x13   :  { %235 = vmatpush3.bf16.msra.mxu0 %v250_v5 }
  0x14   :  { %236 = vmatprep.subr.bf16.mxu0 %v251_v6 }
  0x17   :  { %237 = vmatpush3.bf16.msra.mxu0 %v251_v6 }
  0x18   :  { %238 = vmatprep.subr.bf16.mxu0 %v252_v7 }
  0x1b   :  { %239 = vmatpush3.bf16.msra.mxu0 %v252_v7 }
  0x1c   :  { %240 = vmatprep.subr.bf16.mxu0 %v253_v8 }
  0x1f   :  { %241 = vmatpush3.bf16.msra.mxu0 %v253_v8 }
  0x22   :  { %243 = vmatmul.mubr.bf16.vlgmr.msra.gmra.mxu0 %v255_v9 }
  0xe2   :  { %v244_v11 = vpop.f32.mrf.mxu0 }
  0xe3   :  { %v183_v13 = vmul.f32 %v244_v11, %v214_v10 }
  0xe4   :  { %v144_v14 = vpop.f32.mrf.mxu0 }
  0xe5   :  { %v194_v15 = vadd.f32 %v215_v12, %v183_v13  ;;  %v181_v16 = vmul.f32 %v214_v10, %v144_v14 }
  0xe6   :  { %v245_v17 = vpop.f32.mrf.mxu0 }
  0xe7   :  { %198 = vst [vmem:[%s333_s4 + $0x10] sm:$0xff] %v194_v15  ;;  %v192_v18 = vadd.f32 %v215_v12, %v181_v16  ;;  %v184_v19 = vmul.f32 %v245_v17, %v214_v10 }
  0xe8   :  { %v147_v20 = vpop.f32.mrf.mxu0 }
  0xe9   :  { %196 = vst [vmem:[%s333_s4] sm:$0xff] %v192_v18  ;;  %v195_v21 = vadd.f32 %v215_v12, %v184_v19  ;;  %v182_v22 = vmul.f32 %v214_v10, %v147_v20 }
  0xeb   :  { %199 = vst [vmem:[%s333_s4 + $0x18] sm:$0xff] %v195_v21  ;;  %v193_v23 = vadd.f32 %v215_v12, %v182_v22 }
  0xed   :  { %197 = vst [vmem:[%s333_s4 + $0x8] sm:$0xff] %v193_v23 }

// kernel: full_mil_model_feats.23
= control target key start
LH: loop header
LB: loop body
LE: loop exit
PB: predicated region body
PF: predicated region fallthrough
CT: control target
= control target key end

     0   :  { %s926_s18 = smov 0   ;;  %s928_s19 = smov 0   ;;  %s1040_s0 = inlined_call_operand.vmem [shape: bf16[32,640], index: 0, kind: input, shape index: {}]   ;;  %s1041_s1 = inlined_call_operand.vmem [shape: bf16[640,128], index: 1, kind: input, shape index: {}]   ;;  %s1042_s2 = inlined_call_operand.vmem [shape: f32[1,128], index: 2, kind: input, shape index: {}]   ;;  %s1043_s3 = inlined_call_operand.vmem [shape: f32[1,128], index: 3, kind: input, shape index: {}]   ;;  %s1044_s4 = inlined_call_operand.vmem [shape: f32[32,128], index: 4, kind: input, shape index: {}]   ;;  %s1045_s5 = inlined_call_operand.vmem [shape: f32[32,128], index: 5, kind: output, shape index: {}]  }
   0x1   :  { %s930_s20 = smov 0   ;;  %s932_s21 = smov 0  }
   0x2   :  { %s934_s22 = smov 0  }
   0x3 LB: > { %s27_s23 = sadd.s32 1, %s889_s21  ;;  %p50_p1 = scmp.ne.s32.totalorder %s881_s19, %s877_s18  ;;  %s893_s22 = sphi %s934_s22, %s15_s22   ;;  %s889_s21 = sphi %s932_s21, %s1049_s21   ;;  %s885_s20 = sphi %s930_s20, %s1048_s20   ;;  %s881_s19 = sphi %s928_s19, %s1047_s19   ;;  %s877_s18 = sphi %s926_s18, %s1046_s18  }
   0x4   : > { %p28_p0 = scmp.ge.s32.totalorder %s27_s23, 5  ;;  %p51_p2 = scmp.eq.s32.totalorder %s893_s22, 0 }
   0x5   : > { %s43_s25 = sadd.s32 1, %s881_s19  ;;  %p749_p5 = scmp.ge.s32.totalorder %s893_s22, 5 }
   0x6   : > { %s1051_s23 = smov (%p28_p0, %s27_s23), 0  ;;  %p52_p3 = por %p51_p2, %p50_p1 }
   0x7   : > { %s39_s24 = ssub.s32 %s889_s21, %s1051_s23  ;;  %236 = sbr.rel (%p749_p5) target bundleno = 18 (0x12), region = 28 }
   0x8   : > { %p41_p4 = scmp.eq.s32.totalorder %s39_s24, 0 }
   0xa   : > { %s961_s26 = scalar_select %p41_p4, %s881_s19, %s43_s25  }
   0xc   : > { %239 = sbr.rel (!%p52_p3) target bundleno = 18 (0x12), region = 32  ;;  %s241_s27 = sand.u32 (%p52_p3), 1, %s881_s19  }
   0xd   : > { %s751_s28 = sshll.u32 (%p52_p3), %s889_s21, 2  ;;  %s750_s29 = sshll.u32 (%p52_p3), %s241_s27, 4 }
   0xe   : > { %s248_s7 = scalar_lea.vmem (%p52_p3), %s1040_s0, %s751_s28  ;;  %s243_s8 = scalar_lea.vmem (%p52_p3), [#allocation3], %s750_s29 }
   0xf   : > { %v265_v0 = vld [vmem:[%s248_s7] sm:$0xf] (%p52_p3)  ;;  %v267_v1 = vld [vmem:[%s248_s7 + $0x14] sm:$0xf] (%p52_p3)  ;;  %v269_v2 = vld [vmem:[%s248_s7 + $0x28] sm:$0xf] (%p52_p3) }
  0x10   : > { %266 = vst [vmem:[%s243_s8] sm:$0xf] (%p52_p3), %v265_v0  ;;  %268 = vst [vmem:[%s243_s8 + $0x4] sm:$0xf] (%p52_p3), %v267_v1  ;;  %v271_v3 = vld [vmem:[%s248_s7 + $0x3c] sm:$0xf] (%p52_p3) }
  0x11   : > { %270 = vst [vmem:[%s243_s8 + $0x8] sm:$0xf] %v269_v2  ;;  %272 = vst [vmem:[%s243_s8 + $0xc] sm:$0xf] %v271_v3 }
  0x12 PF: > { %p752_p6 = scmp.ge.s32.totalorder %s893_s22, 1  ;;  %p315_p7 = scmp.lt.s32.totalorder %s893_s22, 6 }
  0x14   : > { %p316_p8 = pnand %p752_p6, %p315_p7 }
  0x15   : > { %s322_s9 = sand.u32 (!%p316_p8), 1, %s877_s18   ;;  %s754_s10 = sshll.u32 (!%p316_p8), %s885_s20, 4 }
  0x16   : > { %319 = sbr.rel (%p316_p8) target bundleno = 286 (0x11e), region = 77  ;;  %s973_s11 = sshll.u32 (!%p316_p8), %s322_s9, 4 }
  0x17   : > { %p376_p9 = scmp.lt.s32.totalorder (!%p316_p8), %s754_s10, 79  ;;  %s324_s16 = scalar_lea.vmem (!%p316_p8), [#allocation3], %s973_s11 }
  0x18   : > { %p756_p10 = scmp.ne.s32.totalorder (!%p316_p8), %s885_s20, 0 }
  0x1b   : > { %s1053_s10 = smov (!%p376_p9, %s754_s10), 79  ;;  %412 = sbr.rel (%p756_p10) target bundleno = 35 (0x23), region = 85 }
  0x1c   : > { %s755_s12 = sshll.u32 %s1053_s10, 2 }
  0x1d   : > { %s978_s15 = scalar_lea.vmem %s1041_s1, %s755_s12 }
  0x20   : > { %v895_v4 = vmov 0.0  }
  0x21   : > { %413 = vst [vmem:[#allocation2 + $0x10] sm:$0xff] %v895_v4  ;;  %414 = vst [vmem:[#allocation2] sm:$0xff] %v895_v4 }
  0x22   : > { %415 = vst [vmem:[#allocation2 + $0x18] sm:$0xff] %v895_v4  ;;  %416 = vst [vmem:[#allocation2 + $0x8] sm:$0xff] %v895_v4 }
  0x23 PF: > { %v845_v5 = vld [vmem:[%s978_s15 + $0x38] sm:$0xff]   ;;  %v846_v6 = vld [vmem:[%s978_s15 + $0x30] sm:$0xff]   ;;  %v847_v7 = vld [vmem:[%s978_s15 + $0x28] sm:$0xff]   ;;  %p767_p11 = scmp.ne.s32.totalorder %s885_s20, 4 }
  0x24   : > { %784 = vmatprep.subr.bf16.mxu0 %v845_v5  ;;  %v848_v8 = vld [vmem:[%s978_s15 + $0x20] sm:$0xff]   ;;  %v849_v10 = vld [vmem:[%s978_s15 + $0x18] sm:$0xff]   ;;  %v850_v11 = vld [vmem:[%s978_s15 + $0x10] sm:$0xff]  }
  0x25   : > { %785 = vmatpush3.bf16.msra.mxu0 %v845_v5  ;;  %v853_v9 = vld [vmem:[%s324_s16] sm:$0xff]   ;;  %v851_v12 = vld [vmem:[%s978_s15 + $0x8] sm:$0xff]  }
  0x26   : > { %786 = vmatprep.subr.bf16.mxu0 %v846_v6  ;;  %800 = vmatprep.mubr.bf16.mxu0 %v853_v9  ;;  %v852_v13 = vld [vmem:[%s978_s15] sm:$0xff]   ;;  %v854_v14 = vld [vmem:[%s324_s16 + $0x8] sm:$0xff]  }
  0x28   : > { %v417_v17 = vld [vmem:[#allocation2 + $0x10] sm:$0xff]  ;;  %v418_v23 = vld [vmem:[#allocation2] sm:$0xff] }
  0x29   : > { %787 = vmatpush3.bf16.msra.mxu0 %v846_v6  ;;  %v419_v15 = vld [vmem:[#allocation2 + $0x18] sm:$0xff]  ;;  %v420_v20 = vld [vmem:[#allocation2 + $0x8] sm:$0xff] }
  0x2a   : > { %788 = vmatprep.subr.bf16.mxu0 %v847_v7 }
  0x2d   : > { %789 = vmatpush3.bf16.msra.mxu0 %v847_v7 }
  0x2e   : > { %790 = vmatprep.subr.bf16.mxu0 %v848_v8 }
  0x31   : > { %791 = vmatpush3.bf16.msra.mxu0 %v848_v8 }
  0x32   : > { %792 = vmatprep.subr.bf16.mxu0 %v849_v10 }
  0x35   : > { %793 = vmatpush3.bf16.msra.mxu0 %v849_v10 }
  0x36   : > { %794 = vmatprep.subr.bf16.mxu0 %v850_v11 }
  0x39   : > { %795 = vmatpush3.bf16.msra.mxu0 %v850_v11 }
  0x3a   : > { %796 = vmatprep.subr.bf16.mxu0 %v851_v12 }
  0x3d   : > { %797 = vmatpush3.bf16.msra.mxu0 %v851_v12 }
  0x3e   : > { %798 = vmatprep.subr.bf16.mxu0 %v852_v13 }
  0x41   : > { %799 = vmatpush3.bf16.msra.mxu0 %v852_v13 }
  0x44   : > { %801 = vmatmul.mubr.bf16.vlgmr.msra.gmra.mxu0 %v854_v14 }
 0x104   : > { %v802_v16 = vpop.f32.mrf.mxu0 }
 0x105   : > { %v552_v18 = vadd.f32 %v802_v16, %v419_v15 }
 0x106   : > { %v535_v19 = vpop.f32.mrf.mxu0 }
 0x107   : > { %556 = vst [vmem:[#allocation2 + $0x18] sm:$0xff] %v552_v18  ;;  %v550_v21 = vadd.f32 %v535_v19, %v417_v17 }
 0x108   : > { %v803_v22 = vpop.f32.mrf.mxu0 }
 0x109   : > { %554 = vst [vmem:[#allocation2 + $0x10] sm:$0xff] %v550_v21  ;;  %v553_v24 = vadd.f32 %v803_v22, %v420_v20  ;;  %561 = sbr.rel (%p767_p11) target bundleno = 286 (0x11e), region = 89 }
 0x10a   : > { %v538_v25 = vpop.f32.mrf.mxu0 }
 0x10b   : > { %557 = vst [vmem:[#allocation2 + $0x8] sm:$0xff] %v553_v24  ;;  %v551_v26 = vadd.f32 %v538_v25, %v418_v23 }
 0x10d   : > { %555 = vst [vmem:[#allocation2] sm:$0xff] %v551_v26 }
 0x10e   : > { %v768_v28 = vld [vmem:[%s1042_s2] ss:$0 sm:$0xff]  ;;  %v564_v34 = vld [vmem:[#allocation2 + $0x18] sm:$0xff]  ;;  %v589_v37 = vld [vmem:[%s1044_s4 + $0x8] sm:$0xff] }
 0x10f   : > { %v769_v29 = vld [vmem:[%s1043_s3] ss:$0 sm:$0xff]  ;;  %v575_v38 = vmul.f32 %v768_v28, %v564_v34  ;;  %v590_v41 = vld [vmem:[%s1044_s4 + $0x10] sm:$0xff]  ;;  %v591_v42 = vld [vmem:[%s1044_s4 + $0x18] sm:$0xff] }
 0x110   : > { %v562_v27 = vld [vmem:[#allocation2 + $0x10] sm:$0xff]  ;;  %v588_v32 = vld [vmem:[%s1044_s4] sm:$0xff] }
 0x111   : > { %v573_v30 = vmul.f32 %v768_v28, %v562_v27  ;;  %v586_v44 = vadd.f32 %v769_v29, %v575_v38 }
 0x112   : > { %v565_v35 = vld [vmem:[#allocation2 + $0x8] sm:$0xff] }
 0x113   : > { %v584_v36 = vadd.f32 %v769_v29, %v573_v30  ;;  %v576_v39 = vmul.f32 %v768_v28, %v565_v35  ;;  %v594_v48 = vadd.f32 %v590_v41, %v586_v44 }
 0x114   : > { %v563_v31 = vld [vmem:[#allocation2] sm:$0xff] }
 0x115   : > { %v574_v33 = vmul.f32 %v768_v28, %v563_v31  ;;  %v592_v43 = vadd.f32 %v588_v32, %v584_v36  ;;  %v587_v45 = vadd.f32 %v769_v29, %v576_v39  ;;  %v598_v51 = vmax.f32 %v594_v48, 0.0 }
 0x117   : > { %v585_v40 = vadd.f32 %v769_v29, %v574_v33  ;;  %v596_v47 = vmax.f32 %v592_v43, 0.0  ;;  %v595_v49 = vadd.f32 %v591_v42, %v587_v45  ;;  %602 = vst [vmem:[%s1045_s5 + $0x10] sm:$0xff] %v598_v51 }
 0x119   : > { %v593_v46 = vadd.f32 %v589_v37, %v585_v40  ;;  %600 = vst [vmem:[%s1045_s5] sm:$0xff] %v596_v47  ;;  %v599_v52 = vmax.f32 %v595_v49, 0.0 }
 0x11b   : > { %v597_v50 = vmax.f32 %v593_v46, 0.0  ;;  %603 = vst [vmem:[%s1045_s5 + $0x18] sm:$0xff] %v599_v52 }
 0x11d   : > { %601 = vst [vmem:[%s1045_s5 + $0x8] sm:$0xff] %v597_v50 }
 0x11e PF: > { %s15_s22 = sadd.s32 1, %s893_s22   ;;  %s1046_s18 = smov %s881_s19 }
 0x11f   : > { %p12_p12 = scmp.ge.s32.totalorder %s15_s22, 7   ;;  %s1047_s19 = smov %s961_s26 }
 0x120   : > { %s1048_s20 = smov %s889_s21  ;;  %s1049_s21 = smov %s1051_s23 }
 0x121   :  { %14 = sbr.rel (!%p12_p12) target bundleno = 3 (0x3), region = 136 }

// kernel: full_mil_model_feats.25
= control target key start
LH: loop header
LB: loop body
LE: loop exit
PB: predicated region body
PF: predicated region fallthrough
CT: control target
= control target key end

     0   :  { %s793_s15 = smov 0   ;;  %s795_s16 = smov 0   ;;  %s887_s0 = inlined_call_operand.vmem [shape: bf16[16,640], index: 0, kind: input, shape index: {}]   ;;  %s888_s1 = inlined_call_operand.vmem [shape: bf16[640,128], index: 1, kind: input, shape index: {}]   ;;  %s889_s2 = inlined_call_operand.vmem [shape: f32[1,128], index: 2, kind: input, shape index: {}]   ;;  %s890_s3 = inlined_call_operand.vmem [shape: f32[1,128], index: 3, kind: input, shape index: {}]   ;;  %s891_s4 = inlined_call_operand.vmem [shape: f32[16,128], index: 4, kind: output, shape index: {}]  }
   0x1   :  { %s797_s17 = smov 0   ;;  %s799_s18 = smov 0  }
   0x2   :  { %s801_s19 = smov 0  }
   0x3 LB: > { %s26_s20 = sadd.s32 1, %s759_s18  ;;  %p49_p1 = scmp.ne.s32.totalorder %s751_s16, %s747_s15  ;;  %s763_s19 = sphi %s801_s19, %s14_s19   ;;  %s759_s18 = sphi %s799_s18, %s895_s18   ;;  %s755_s17 = sphi %s797_s17, %s894_s17   ;;  %s751_s16 = sphi %s795_s16, %s893_s16   ;;  %s747_s15 = sphi %s793_s15, %s892_s15  }
   0x4   : > { %p27_p0 = scmp.ge.s32.totalorder %s26_s20, 5  ;;  %p50_p2 = scmp.eq.s32.totalorder %s763_s19, 0 }
   0x5   : > { %s42_s22 = sadd.s32 1, %s751_s16  ;;  %p620_p5 = scmp.ge.s32.totalorder %s763_s19, 5 }
   0x6   : > { %s897_s20 = smov (%p27_p0, %s26_s20), 0  ;;  %p51_p3 = por %p50_p2, %p49_p1 }
   0x7   : > { %s38_s21 = ssub.s32 %s759_s18, %s897_s20  ;;  %195 = sbr.rel (%p620_p5) target bundleno = 17 (0x11), region = 24 }
   0x8   : > { %p40_p4 = scmp.eq.s32.totalorder %s38_s21, 0 }
   0xa   : > { %s828_s23 = scalar_select %p40_p4, %s751_s16, %s42_s22  }
   0xc   : > { %198 = sbr.rel (!%p51_p3) target bundleno = 17 (0x11), region = 28  ;;  %s200_s24 = sand.u32 (%p51_p3), 1, %s751_s16  }
   0xd   : > { %s622_s25 = sshll.u32 (%p51_p3), %s759_s18, 2  ;;  %s621_s26 = sshll.u32 (%p51_p3), %s200_s24, 3 }
   0xe   : > { %s207_s29 = scalar_lea.vmem (%p51_p3), %s887_s0, %s622_s25  ;;  %s202_s30 = scalar_lea.vmem (%p51_p3), [#allocation3], %s621_s26 }
   0xf   : > { %v224_v0 = vld [vmem:[%s207_s29] sm:$0xf] (%p51_p3)  ;;  %v226_v1 = vld [vmem:[%s207_s29 + $0x14] sm:$0xf] (%p51_p3) }
  0x10   : > { %225 = vst [vmem:[%s202_s30] sm:$0xf] (%p51_p3), %v224_v0  ;;  %227 = vst [vmem:[%s202_s30 + $0x4] sm:$0xf] (%p51_p3), %v226_v1 }
  0x11 PF: > { %p623_p6 = scmp.ge.s32.totalorder %s763_s19, 1  ;;  %p266_p7 = scmp.lt.s32.totalorder %s763_s19, 6 }
  0x13   : > { %p267_p8 = pnand %p623_p6, %p266_p7 }
  0x14   : > { %s273_s5 = sand.u32 (!%p267_p8), 1, %s747_s15   ;;  %s625_s6 = sshll.u32 (!%p267_p8), %s755_s17, 4 }
  0x15   : > { %270 = sbr.rel (%p267_p8) target bundleno = 280 (0x118), region = 73  ;;  %s840_s7 = sshll.u32 (!%p267_p8), %s273_s5, 3 }
  0x16   : > { %p317_p9 = scmp.lt.s32.totalorder (!%p267_p8), %s625_s6, 79  ;;  %s275_s12 = scalar_lea.vmem (!%p267_p8), [#allocation3], %s840_s7 }
  0x17   : > { %p627_p10 = scmp.ne.s32.totalorder (!%p267_p8), %s755_s17, 0 }
  0x1a   : > { %s899_s6 = smov (!%p317_p9, %s625_s6), 79  ;;  %344 = sbr.rel (%p627_p10) target bundleno = 33 (0x21), region = 81 }
  0x1b   : > { %s626_s8 = sshll.u32 %s899_s6, 2 }
  0x1c   : > { %s845_s11 = scalar_lea.vmem %s888_s1, %s626_s8 }
  0x1f   : > { %v765_v2 = vmov 0.0  }
  0x20   : > { %345 = vst [vmem:[#allocation2] sm:$0xff] %v765_v2  ;;  %346 = vst [vmem:[#allocation2 + $0x8] sm:$0xff] %v765_v2 }
  0x21 PF: > { %v716_v3 = vld [vmem:[%s845_s11 + $0x38] sm:$0xff]   ;;  %v766_v4 = vmov 0.0   ;;  %v717_v5 = vld [vmem:[%s845_s11 + $0x30] sm:$0xff]   ;;  %vm767_vm0 = vmmov 0   ;;  %v718_v6 = vld [vmem:[%s845_s11 + $0x28] sm:$0xff]   ;;  %p637_p11 = scmp.ne.s32.totalorder %s755_s17, 4 }
  0x22   : > { %653 = vmatprep.subr.bf16.mxu0 %v766_v4  ;;  %669 = vmatprep.mubr.msk.bf16.mxu0 %vm767_vm0, %v766_v4  ;;  %v719_v7 = vld [vmem:[%s845_s11 + $0x20] sm:$0xff]   ;;  %v720_v8 = vld [vmem:[%s845_s11 + $0x18] sm:$0xff]   ;;  %v721_v9 = vld [vmem:[%s845_s11 + $0x10] sm:$0xff]  }
  0x23   : > { %654 = vmatpush3.bf16.msra.mxu0 %v716_v3  ;;  %v722_v10 = vld [vmem:[%s845_s11 + $0x8] sm:$0xff]   ;;  %v723_v11 = vld [vmem:[%s845_s11] sm:$0xff]   ;;  %v724_v12 = vld [vmem:[%s275_s12] sm:$0xff]  }
  0x24   : > { %655 = vmatprep.subr.bf16.mxu0 %v766_v4 }
  0x27   : > { %656 = vmatpush3.bf16.msra.mxu0 %v717_v5  ;;  %v347_v13 = vld [vmem:[#allocation2] sm:$0xff]  ;;  %v348_v17 = vld [vmem:[#allocation2 + $0x8] sm:$0xff] }
  0x28   : > { %657 = vmatprep.subr.bf16.mxu0 %v766_v4 }
  0x2b   : > { %658 = vmatpush3.bf16.msra.mxu0 %v718_v6 }
  0x2c   : > { %659 = vmatprep.subr.bf16.mxu0 %v766_v4 }
  0x2f   : > { %660 = vmatpush3.bf16.msra.mxu0 %v719_v7 }
  0x30   : > { %661 = vmatprep.subr.bf16.mxu0 %v766_v4 }
  0x33   : > { %662 = vmatpush3.bf16.msra.mxu0 %v720_v8 }
  0x34   : > { %663 = vmatprep.subr.bf16.mxu0 %v766_v4 }
  0x37   : > { %664 = vmatpush3.bf16.msra.mxu0 %v721_v9 }
  0x38   : > { %665 = vmatprep.subr.bf16.mxu0 %v766_v4 }
  0x3b   : > { %666 = vmatpush3.bf16.msra.mxu0 %v722_v10 }
  0x3c   : > { %667 = vmatprep.subr.bf16.mxu0 %v766_v4 }
  0x3f   : > { %668 = vmatpush3.bf16.msra.mxu0 %v723_v11 }
  0x42   : > { %670 = vmatmul.mubr.bf16.vlgmr.msra.gmra.mxu0 %v724_v12 }
 0x102   : > { %v455_v14 = vpop.f32.mrf.mxu0 }
 0x103   : > { %v462_v15 = vadd.f32 %v455_v14, %v347_v13 }
 0x104   : > { %v671_v16 = vpop.f32.mrf.mxu0 }
 0x105   : > { %464 = vst [vmem:[#allocation2] sm:$0xff] %v462_v15  ;;  %469 = sbr.rel (%p637_p11) target bundleno = 280 (0x118), region = 85 }
 0x106   : > { %v458_v18 = vpop.f32.mrf.mxu0 }
 0x107   : > { %v463_v19 = vadd.f32 %v458_v18, %v348_v17 }
 0x108   : > { %v672_v20 = vpop.f32.mrf.mxu0 }
 0x109   : > { %465 = vst [vmem:[#allocation2 + $0x8] sm:$0xff] %v463_v19 }
 0x10a   : > { %v638_v22 = vld [vmem:[%s889_s2] ss:$0 sm:$0xff] }
 0x10b   : > { %v639_v23 = vld [vmem:[%s890_s3] ss:$0 sm:$0xff] }
 0x10c   : > { %v470_v21 = vld [vmem:[#allocation2] sm:$0xff] }
 0x10d   : > { %v479_v24 = vmul.f32 %v638_v22, %v470_v21 }
 0x10f   : > { %v488_v27 = vadd.f32 %v639_v23, %v479_v24 }
 0x110   : > { %v471_v25 = vld [vmem:[#allocation2 + $0x8] sm:$0xff] }
 0x111   : > { %v480_v26 = vmul.f32 %v638_v22, %v471_v25  ;;  %v490_v29 = vmax.f32 %v488_v27, 0.0 }
 0x113   : > { %v489_v28 = vadd.f32 %v639_v23, %v480_v26  ;;  %492 = vst [vmem:[%s891_s4] sm:$0xff] %v490_v29 }
 0x115   : > { %v491_v30 = vmax.f32 %v489_v28, 0.0 }
 0x117   : > { %493 = vst [vmem:[%s891_s4 + $0x8] sm:$0xff] %v491_v30 }
 0x118 PF: > { %s14_s19 = sadd.s32 1, %s763_s19   ;;  %s892_s15 = smov %s751_s16 }
 0x119   : > { %p11_p12 = scmp.ge.s32.totalorder %s14_s19, 7   ;;  %s893_s16 = smov %s828_s23 }
 0x11a   : > { %s894_s17 = smov %s759_s18  ;;  %s895_s18 = smov %s897_s20 }
 0x11b   :  { %13 = sbr.rel (!%p11_p12) target bundleno = 3 (0x3), region = 129 }

// kernel: full_mil_model_feats.24
= control target key start
LH: loop header
LB: loop body
LE: loop exit
PB: predicated region body
PF: predicated region fallthrough
CT: control target
= control target key end

     0   :  { %v223_v0 = vmov 0.0   ;;  %vm224_vm0 = vmmov 0   ;;  %s289_s1 = inlined_call_operand.vmem [shape: bf16[128,128], index: 1, kind: input, shape index: {}]   ;;  %s290_s0 = inlined_call_operand.vmem [shape: bf16[16,128], index: 0, kind: input, shape index: {}]   ;;  %s291_s2 = inlined_call_operand.vmem [shape: f32[1,128], index: 2, kind: input, shape index: {}]   ;;  %s292_s3 = inlined_call_operand.vmem [shape: f32[1,128], index: 3, kind: input, shape index: {}]   ;;  %s293_s4 = inlined_call_operand.vmem [shape: f32[16,128], index: 4, kind: output, shape index: {}]  }
   0x1   :  { %192 = vmatprep.subr.bf16.mxu0 %v223_v0  ;;  %v214_v1 = vld [vmem:[%s289_s1 + $0x38] sm:$0xff]   ;;  %208 = vmatprep.mubr.msk.bf16.mxu0 %vm224_vm0, %v223_v0  ;;  %v215_v2 = vld [vmem:[%s289_s1 + $0x30] sm:$0xff]   ;;  %v216_v3 = vld [vmem:[%s289_s1 + $0x28] sm:$0xff]  }
   0x2   :  { %193 = vmatpush3.bf16.msra.mxu0 %v214_v1  ;;  %v217_v4 = vld [vmem:[%s289_s1 + $0x20] sm:$0xff]   ;;  %v218_v5 = vld [vmem:[%s289_s1 + $0x18] sm:$0xff]   ;;  %v219_v6 = vld [vmem:[%s289_s1 + $0x10] sm:$0xff]  }
   0x3   :  { %194 = vmatprep.subr.bf16.mxu0 %v223_v0  ;;  %v220_v7 = vld [vmem:[%s289_s1 + $0x8] sm:$0xff]   ;;  %v221_v8 = vld [vmem:[%s289_s1] sm:$0xff]  }
   0x4   :  { %v222_v9 = vld [vmem:[%s290_s0] sm:$0xff]  }
   0x5   :  { %v181_v10 = vld [vmem:[%s291_s2] ss:$0 sm:$0xff] }
   0x6   :  { %195 = vmatpush3.bf16.msra.mxu0 %v215_v2  ;;  %v182_v12 = vld [vmem:[%s292_s3] ss:$0 sm:$0xff] }
   0x7   :  { %196 = vmatprep.subr.bf16.mxu0 %v223_v0 }
   0xa   :  { %197 = vmatpush3.bf16.msra.mxu0 %v216_v3 }
   0xb   :  { %198 = vmatprep.subr.bf16.mxu0 %v223_v0 }
   0xe   :  { %199 = vmatpush3.bf16.msra.mxu0 %v217_v4 }
   0xf   :  { %200 = vmatprep.subr.bf16.mxu0 %v223_v0 }
  0x12   :  { %201 = vmatpush3.bf16.msra.mxu0 %v218_v5 }
  0x13   :  { %202 = vmatprep.subr.bf16.mxu0 %v223_v0 }
  0x16   :  { %203 = vmatpush3.bf16.msra.mxu0 %v219_v6 }
  0x17   :  { %204 = vmatprep.subr.bf16.mxu0 %v223_v0 }
  0x1a   :  { %205 = vmatpush3.bf16.msra.mxu0 %v220_v7 }
  0x1b   :  { %206 = vmatprep.subr.bf16.mxu0 %v223_v0 }
  0x1e   :  { %207 = vmatpush3.bf16.msra.mxu0 %v221_v8 }
  0x21   :  { %209 = vmatmul.mubr.bf16.vlgmr.msra.gmra.mxu0 %v222_v9 }
  0xe1   :  { %v132_v11 = vpop.f32.mrf.mxu0 }
  0xe2   :  { %v155_v13 = vmul.f32 %v181_v10, %v132_v11 }
  0xe3   :  { %v210_v14 = vpop.f32.mrf.mxu0 }
  0xe4   :  { %v164_v15 = vadd.f32 %v182_v12, %v155_v13 }
  0xe5   :  { %v135_v16 = vpop.f32.mrf.mxu0 }
  0xe6   :  { %166 = vst [vmem:[%s293_s4] sm:$0xff] %v164_v15  ;;  %v156_v17 = vmul.f32 %v181_v10, %v135_v16 }
  0xe7   :  { %v211_v18 = vpop.f32.mrf.mxu0 }
  0xe8   :  { %v165_v19 = vadd.f32 %v182_v12, %v156_v17 }
  0xea   :  { %167 = vst [vmem:[%s293_s4 + $0x8] sm:$0xff] %v165_v19 }

// kernel: full_mil_model_feats.26
= control target key start
LH: loop header
LB: loop body
LE: loop exit
PB: predicated region body
PF: predicated region fallthrough
CT: control target
= control target key end

     0   :  { %s881_s18 = smov 0   ;;  %s883_s19 = smov 0   ;;  %s981_s0 = inlined_call_operand.vmem [shape: bf16[16,1152], index: 0, kind: input, shape index: {}]   ;;  %s982_s1 = inlined_call_operand.vmem [shape: bf16[1152,128], index: 1, kind: input, shape index: {}]   ;;  %s983_s2 = inlined_call_operand.vmem [shape: f32[1,128], index: 2, kind: input, shape index: {}]   ;;  %s984_s3 = inlined_call_operand.vmem [shape: f32[1,128], index: 3, kind: input, shape index: {}]   ;;  %s985_s4 = inlined_call_operand.vmem [shape: f32[16,128], index: 4, kind: input, shape index: {}]   ;;  %s986_s5 = inlined_call_operand.vmem [shape: f32[16,128], index: 5, kind: output, shape index: {}]  }
   0x1   :  { %s885_s20 = smov 0   ;;  %s887_s21 = smov 0  }
   0x2   :  { %s889_s22 = smov 0  }
   0x3 LB: > { %s27_s23 = sadd.s32 1, %s842_s21  ;;  %p50_p1 = scmp.ne.s32.totalorder %s834_s19, %s830_s18  ;;  %s846_s22 = sphi %s889_s22, %s15_s22   ;;  %s842_s21 = sphi %s887_s21, %s990_s21   ;;  %s838_s20 = sphi %s885_s20, %s989_s20   ;;  %s834_s19 = sphi %s883_s19, %s988_s19   ;;  %s830_s18 = sphi %s881_s18, %s987_s18  }
   0x4   : > { %p28_p0 = scmp.ge.s32.totalorder %s27_s23, 9  ;;  %p51_p2 = scmp.eq.s32.totalorder %s846_s22, 0 }
   0x5   : > { %s43_s25 = sadd.s32 1, %s834_s19  ;;  %p703_p5 = scmp.ge.s32.totalorder %s846_s22, 9 }
   0x6   : > { %s992_s23 = smov (%p28_p0, %s27_s23), 0  ;;  %p52_p3 = por %p51_p2, %p50_p1 }
   0x7   : > { %s39_s24 = ssub.s32 %s842_s21, %s992_s23  ;;  %236 = sbr.rel (%p703_p5) target bundleno = 17 (0x11), region = 28 }
   0x8   : > { %p41_p4 = scmp.eq.s32.totalorder %s39_s24, 0 }
   0xa   : > { %s916_s26 = scalar_select %p41_p4, %s834_s19, %s43_s25  }
   0xc   : > { %239 = sbr.rel (!%p52_p3) target bundleno = 17 (0x11), region = 32  ;;  %s241_s27 = sand.u32 (%p52_p3), 1, %s834_s19  }
   0xd   : > { %s705_s28 = sshll.u32 (%p52_p3), %s842_s21, 2  ;;  %s704_s29 = sshll.u32 (%p52_p3), %s241_s27, 3 }
   0xe   : > { %s248_s7 = scalar_lea.vmem (%p52_p3), %s981_s0, %s705_s28  ;;  %s243_s8 = scalar_lea.vmem (%p52_p3), [#allocation3], %s704_s29 }
   0xf   : > { %v265_v0 = vld [vmem:[%s248_s7] sm:$0xf] (%p52_p3)  ;;  %v267_v1 = vld [vmem:[%s248_s7 + $0x24] sm:$0xf] (%p52_p3) }
  0x10   : > { %266 = vst [vmem:[%s243_s8] sm:$0xf] (%p52_p3), %v265_v0  ;;  %268 = vst [vmem:[%s243_s8 + $0x4] sm:$0xf] (%p52_p3), %v267_v1 }
  0x11 PF: > { %p706_p6 = scmp.ge.s32.totalorder %s846_s22, 1  ;;  %p307_p7 = scmp.lt.s32.totalorder %s846_s22, 10 }
  0x13   : > { %p308_p8 = pnand %p706_p6, %p307_p7 }
  0x14   : > { %s314_s9 = sand.u32 (!%p308_p8), 1, %s830_s18   ;;  %s708_s10 = sshll.u32 (!%p308_p8), %s838_s20, 4 }
  0x15   : > { %311 = sbr.rel (%p308_p8) target bundleno = 282 (0x11a), region = 77  ;;  %s928_s11 = sshll.u32 (!%p308_p8), %s314_s9, 3 }
  0x16   : > { %p368_p9 = scmp.lt.s32.totalorder (!%p308_p8), %s708_s10, 143  ;;  %s316_s16 = scalar_lea.vmem (!%p308_p8), [#allocation3], %s928_s11 }
  0x17   : > { %p710_p10 = scmp.ne.s32.totalorder (!%p308_p8), %s838_s20, 0 }
  0x1a   : > { %s994_s10 = smov (!%p368_p9, %s708_s10), 143  ;;  %404 = sbr.rel (%p710_p10) target bundleno = 33 (0x21), region = 85 }
  0x1b   : > { %s709_s12 = sshll.u32 %s994_s10, 2 }
  0x1c   : > { %s933_s15 = scalar_lea.vmem %s982_s1, %s709_s12 }
  0x1f   : > { %v848_v2 = vmov 0.0  }
  0x20   : > { %405 = vst [vmem:[#allocation2] sm:$0xff] %v848_v2  ;;  %406 = vst [vmem:[#allocation2 + $0x8] sm:$0xff] %v848_v2 }
  0x21 PF: > { %v799_v3 = vld [vmem:[%s933_s15 + $0x38] sm:$0xff]   ;;  %v849_v4 = vmov 0.0   ;;  %v800_v5 = vld [vmem:[%s933_s15 + $0x30] sm:$0xff]   ;;  %vm850_vm0 = vmmov 0   ;;  %v801_v6 = vld [vmem:[%s933_s15 + $0x28] sm:$0xff]   ;;  %p720_p11 = scmp.ne.s32.totalorder %s838_s20, 8 }
  0x22   : > { %736 = vmatprep.subr.bf16.mxu0 %v849_v4  ;;  %752 = vmatprep.mubr.msk.bf16.mxu0 %vm850_vm0, %v849_v4  ;;  %v802_v7 = vld [vmem:[%s933_s15 + $0x20] sm:$0xff]   ;;  %v803_v8 = vld [vmem:[%s933_s15 + $0x18] sm:$0xff]   ;;  %v804_v9 = vld [vmem:[%s933_s15 + $0x10] sm:$0xff]  }
  0x23   : > { %737 = vmatpush3.bf16.msra.mxu0 %v799_v3  ;;  %v805_v10 = vld [vmem:[%s933_s15 + $0x8] sm:$0xff]   ;;  %v806_v11 = vld [vmem:[%s933_s15] sm:$0xff]   ;;  %v807_v12 = vld [vmem:[%s316_s16] sm:$0xff]  }
  0x24   : > { %738 = vmatprep.subr.bf16.mxu0 %v849_v4 }
  0x27   : > { %739 = vmatpush3.bf16.msra.mxu0 %v800_v5  ;;  %v407_v13 = vld [vmem:[#allocation2] sm:$0xff]  ;;  %v408_v17 = vld [vmem:[#allocation2 + $0x8] sm:$0xff] }
  0x28   : > { %740 = vmatprep.subr.bf16.mxu0 %v849_v4 }
  0x2b   : > { %741 = vmatpush3.bf16.msra.mxu0 %v801_v6 }
  0x2c   : > { %742 = vmatprep.subr.bf16.mxu0 %v849_v4 }
  0x2f   : > { %743 = vmatpush3.bf16.msra.mxu0 %v802_v7 }
  0x30   : > { %744 = vmatprep.subr.bf16.mxu0 %v849_v4 }
  0x33   : > { %745 = vmatpush3.bf16.msra.mxu0 %v803_v8 }
  0x34   : > { %746 = vmatprep.subr.bf16.mxu0 %v849_v4 }
  0x37   : > { %747 = vmatpush3.bf16.msra.mxu0 %v804_v9 }
  0x38   : > { %748 = vmatprep.subr.bf16.mxu0 %v849_v4 }
  0x3b   : > { %749 = vmatpush3.bf16.msra.mxu0 %v805_v10 }
  0x3c   : > { %750 = vmatprep.subr.bf16.mxu0 %v849_v4 }
  0x3f   : > { %751 = vmatpush3.bf16.msra.mxu0 %v806_v11 }
  0x42   : > { %753 = vmatmul.mubr.bf16.vlgmr.msra.gmra.mxu0 %v807_v12 }
 0x102   : > { %v515_v14 = vpop.f32.mrf.mxu0 }
 0x103   : > { %v522_v15 = vadd.f32 %v515_v14, %v407_v13 }
 0x104   : > { %v754_v16 = vpop.f32.mrf.mxu0 }
 0x105   : > { %524 = vst [vmem:[#allocation2] sm:$0xff] %v522_v15  ;;  %529 = sbr.rel (%p720_p11) target bundleno = 282 (0x11a), region = 89 }
 0x106   : > { %v518_v18 = vpop.f32.mrf.mxu0 }
 0x107   : > { %v523_v19 = vadd.f32 %v518_v18, %v408_v17 }
 0x108   : > { %v755_v20 = vpop.f32.mrf.mxu0 }
 0x109   : > { %525 = vst [vmem:[#allocation2 + $0x8] sm:$0xff] %v523_v19 }
 0x10a   : > { %v721_v22 = vld [vmem:[%s983_s2] ss:$0 sm:$0xff]  ;;  %v551_v29 = vld [vmem:[%s985_s4 + $0x8] sm:$0xff] }
 0x10b   : > { %v722_v23 = vld [vmem:[%s984_s3] ss:$0 sm:$0xff] }
 0x10c   : > { %v530_v21 = vld [vmem:[#allocation2] sm:$0xff] }
 0x10d   : > { %v539_v24 = vmul.f32 %v721_v22, %v530_v21  ;;  %v550_v26 = vld [vmem:[%s985_s4] sm:$0xff] }
 0x10f   : > { %v548_v28 = vadd.f32 %v722_v23, %v539_v24 }
 0x110   : > { %v531_v25 = vld [vmem:[#allocation2 + $0x8] sm:$0xff] }
 0x111   : > { %v540_v27 = vmul.f32 %v721_v22, %v531_v25  ;;  %v552_v31 = vadd.f32 %v550_v26, %v548_v28 }
 0x113   : > { %v549_v30 = vadd.f32 %v722_v23, %v540_v27  ;;  %v554_v33 = vmax.f32 %v552_v31, 0.0 }
 0x115   : > { %v553_v32 = vadd.f32 %v551_v29, %v549_v30  ;;  %556 = vst [vmem:[%s986_s5] sm:$0xff] %v554_v33 }
 0x117   : > { %v555_v34 = vmax.f32 %v553_v32, 0.0 }
 0x119   : > { %557 = vst [vmem:[%s986_s5 + $0x8] sm:$0xff] %v555_v34 }
 0x11a PF: > { %s15_s22 = sadd.s32 1, %s846_s22   ;;  %s987_s18 = smov %s834_s19 }
 0x11b   : > { %p12_p12 = scmp.ge.s32.totalorder %s15_s22, 11   ;;  %s988_s19 = smov %s916_s26 }
 0x11c   : > { %s989_s20 = smov %s842_s21  ;;  %s990_s21 = smov %s992_s23 }
 0x11d   :  { %14 = sbr.rel (!%p12_p12) target bundleno = 3 (0x3), region = 136 }

// kernel: full_mil_model_feats.27
= control target key start
LH: loop header
LB: loop body
LE: loop exit
PB: predicated region body
PF: predicated region fallthrough
CT: control target
= control target key end

     0   :  { %v501_v1 = vmov 0.0   ;;  %vm502_vm0 = vmmov 0   ;;  %vm23_vm1 = vcmask 1043456   ;;  %s701_s0 = inlined_call_operand.vmem [shape: f32[2,4,128], index: 0, kind: input, shape index: {}]   ;;  %s702_s1 = inlined_call_operand.vmem [shape: f32[128,32], index: 1, kind: input, shape index: {}]   ;;  %s703_s2 = inlined_call_operand.vmem [shape: f32[32,1], index: 2, kind: input, shape index: {}]   ;;  %s704_s3 = inlined_call_operand.vmem [shape: f32[128,3], index: 3, kind: input, shape index: {}]   ;;  %s705_s4 = inlined_call_operand.vmem [shape: f32[1,3], index: 4, kind: input, shape index: {}]   ;;  %s706_s5 = inlined_call_operand.hbm [shape: f32[1,3], index: 5, kind: output, shape index: {}]  }
   0x1   :  { %v55_v0 = vld [vmem:[%s702_s1 + $0x78] sm:$0xff]  ;;  %387 = vmatprep.subr.mxu0 %v501_v1  ;;  %v54_v2 = vld [vmem:[%s702_s1 + $0x70] sm:$0xff]  ;;  %419 = vmatprep.mubr.msk.f32.mxu0 %vm502_vm0, %v501_v1  ;;  %v53_v3 = vld [vmem:[%s702_s1 + $0x68] sm:$0xff] }
   0x2   :  { %388 = vmatpush3.msra.mxu0 %v55_v0  ;;  %422 = vmatprep.subr.mxu1 %v501_v1  ;;  %v52_v4 = vld [vmem:[%s702_s1 + $0x60] sm:$0xff] }
   0x3   :  { %389 = vmatprep.subr.mxu0 %v501_v1  ;;  %430 = vmatprep.mubr.msk.f32.mxu1 %vm502_vm0, %v501_v1  ;;  %v21_v5 = vld [vmem:[%s701_s0] sm:$0xf]  ;;  %v22_v6 = vld [vmem:[%s701_s0 + $0x4] sm:$0xf] }
   0x4   :  { %390 = vmatpush3.msra.mxu0 %v54_v2  ;;  %v24_v7 = vsel %vm23_vm1, %v21_v5, 0.0  ;;  %v31_v8 = vsel %vm23_vm1, %v22_v6, 0.0 }
   0x5   :  { %391 = vmatprep.subr.mxu0 %v501_v1 }
   0x6   :  { %392 = vmatpush3.msra.mxu0 %v53_v3 }
   0x7   :  { %10 = vsyncpa [#allocation3], 0  ;;  %393 = vmatprep.subr.mxu0 %v501_v1  ;;  %v51_v9 = vld [vmem:[%s702_s1 + $0x58] sm:$0xff]  ;;  %v25_v10 = vrot.slane %v24_v7, 4  ;;  %v32_v11 = vrot.slane %v31_v8, 4  ;;  %v50_v12 = vld [vmem:[%s702_s1 + $0x50] sm:$0xff] }
   0x8   :  { %394 = vmatpush3.msra.mxu0 %v52_v4  ;;  %v49_v15 = vld [vmem:[%s702_s1 + $0x48] sm:$0xff]  ;;  %v48_v18 = vld [vmem:[%s702_s1 + $0x40] sm:$0xff]  ;;  %v47_v21 = vld [vmem:[%s702_s1 + $0x38] sm:$0xff]  ;;  %vm58_vm2 = vcmask 1041409   ;;  %vm136_vm3 = vcmask 261120   ;;  %v503_v43 = vmov 0  }
   0x9   :  { %395 = vmatprep.subr.mxu0 %v501_v1  ;;  %v26_v13 = vadd.f32 %v25_v10, %v24_v7  ;;  %v33_v14 = vadd.f32 %v32_v11, %v31_v8  ;;  %v46_v22 = vld [vmem:[%s702_s1 + $0x30] sm:$0xff]  ;;  %v45_v25 = vld [vmem:[%s702_s1 + $0x28] sm:$0xff]  ;;  %v44_v26 = vld [vmem:[%s702_s1 + $0x20] sm:$0xff]  ;;  %472 = vset.pattern.permute.xlu0 %v503_v43  ;;  %vm210_vm4 = vcmask 1024   ;;  %vm236_vm5 = vcmask 1041408  }
   0xa   :  { %396 = vmatpush3.msra.mxu0 %v51_v9  ;;  %v43_v29 = vld [vmem:[%s702_s1 + $0x18] sm:$0xff]  ;;  %v42_v30 = vld [vmem:[%s702_s1 + $0x10] sm:$0xff]  ;;  %v41_v33 = vld [vmem:[%s702_s1 + $0x8] sm:$0xff]  ;;  %vm331_vm6 = vcmask 16384  }
   0xb   :  { %397 = vmatprep.subr.mxu0 %v501_v1  ;;  %v27_v16 = vrot.slane %v26_v13, 2  ;;  %v34_v17 = vrot.slane %v33_v14, 2  ;;  %v40_v34 = vld [vmem:[%s702_s1] sm:$0xff]  ;;  %v135_v36 = vld [vmem:[%s703_s2 + $0x18] sm:$0xff]  ;;  %v134_v37 = vld [vmem:[%s703_s2 + $0x10] sm:$0xff] }
   0xc   :  { %398 = vmatpush3.msra.mxu0 %v50_v12  ;;  %423 = vmatpush3.msra.mxu1 %v135_v36  ;;  %v133_v38 = vld [vmem:[%s703_s2 + $0x8] sm:$0xff]  ;;  %v132_v39 = vld [vmem:[%s703_s2] sm:$0xff]  ;;  %v259_v44 = vld [vmem:[%s704_s3 + $0x78] sm:$0xff] }
   0xd   :  { %399 = vmatprep.subr.mxu0 %v501_v1  ;;  %v28_v19 = vadd.f32 %v27_v16, %v26_v13  ;;  %v35_v20 = vadd.f32 %v34_v17, %v33_v14  ;;  %424 = vmatprep.subr.mxu1 %v501_v1  ;;  %v258_v45 = vld [vmem:[%s704_s3 + $0x70] sm:$0xff]  ;;  %v257_v46 = vld [vmem:[%s704_s3 + $0x68] sm:$0xff]  ;;  %v256_v47 = vld [vmem:[%s704_s3 + $0x60] sm:$0xff] }
   0xe   :  { %400 = vmatpush3.msra.mxu0 %v49_v15  ;;  %425 = vmatpush3.msra.mxu1 %v134_v37  ;;  %v255_v48 = vld [vmem:[%s704_s3 + $0x58] sm:$0xff]  ;;  %v254_v49 = vld [vmem:[%s704_s3 + $0x50] sm:$0xff]  ;;  %v253_v50 = vld [vmem:[%s704_s3 + $0x48] sm:$0xff] }
   0xf   :  { %401 = vmatprep.subr.mxu0 %v501_v1  ;;  %v29_v23 = vrot.slane %v28_v19, 1  ;;  %v36_v24 = vrot.slane %v35_v20, 1  ;;  %426 = vmatprep.subr.mxu1 %v501_v1  ;;  %v252_v51 = vld [vmem:[%s704_s3 + $0x40] sm:$0xff]  ;;  %v251_v8 = vld [vmem:[%s704_s3 + $0x38] sm:$0xff]  ;;  %v250_v10 = vld [vmem:[%s704_s3 + $0x30] sm:$0xff] }
  0x10   :  { %402 = vmatpush3.msra.mxu0 %v48_v18  ;;  %427 = vmatpush3.msra.mxu1 %v133_v38  ;;  %v249_v12 = vld [vmem:[%s704_s3 + $0x28] sm:$0xff]  ;;  %v248_v13 = vld [vmem:[%s704_s3 + $0x20] sm:$0xff]  ;;  %v247_v14 = vld [vmem:[%s704_s3 + $0x18] sm:$0xff] }
  0x11   :  { %403 = vmatprep.subr.mxu0 %v501_v1  ;;  %v30_v27 = vadd.f32 %v29_v23, %v28_v19  ;;  %v37_v28 = vadd.f32 %v36_v24, %v35_v20  ;;  %428 = vmatprep.subr.mxu1 %v501_v1  ;;  %v246_v15 = vld [vmem:[%s704_s3 + $0x10] sm:$0xff]  ;;  %v245_v16 = vld [vmem:[%s704_s3 + $0x8] sm:$0xff]  ;;  %v244_v17 = vld [vmem:[%s704_s3] sm:$0xff]  ;;  %s504_s3 = smov [#allocation2]  }
  0x12   :  { %404 = vmatpush3.msra.mxu0 %v47_v21  ;;  %429 = vmatpush3.msra.mxu1 %v132_v39  ;;  %s339_s14 = sshll.u32 %s504_s3, 4  ;;  %s340_s14 = int_to_ptr.vmem [resolvable:$true] %s339_s14 }
  0x13   :  { %405 = vmatprep.subr.mxu0 %v501_v1  ;;  %v38_v31 = vmul.f32 0.25, %v30_v27  ;;  %v39_v32 = vmul.f32 0.25, %v37_v28  ;;  %433 = vmatprep.subr.mxu1 %v501_v1  ;;  %v260_v27 = vld [vmem:[%s705_s4] sm:$0x1]  ;;  %s479_s15 = scalar_lea.vmem %s340_s14, 16  ;;  %s483_s16 = scalar_lea.vmem %s340_s14, 32 }
  0x14   :  { %406 = vmatpush3.msra.mxu0 %v46_v22  ;;  %p480_p0 = scmp.ne.s32.totalorder %s340_s14, %s479_s15  ;;  %p484_p1 = scmp.lt.s32.totalorder %s340_s14, %s340_s14 }
  0x15   :  { %407 = vmatprep.subr.mxu0 %v501_v1  ;;  %v609_v35 = vsel %vm58_vm2, %v39_v32, %v38_v31  ;;  %p485_p2 = scmp.lt.s32.totalorder %s483_s16, %s479_s15 }
  0x16   :  { %408 = vmatpush3.msra.mxu0 %v45_v25 }
  0x17   :  { %409 = vmatprep.subr.mxu0 %v501_v1  ;;  %p486_p3 = por %p485_p2, %p484_p1 }
  0x18   :  { %410 = vmatpush3.msra.mxu0 %v44_v26 }
  0x19   :  { %411 = vmatprep.subr.mxu0 %v501_v1  ;;  %p487_p4 = pnand %p486_p3, %p480_p0 }
  0x1a   :  { %412 = vmatpush3.msra.mxu0 %v43_v29 }
  0x1b   :  { %413 = vmatprep.subr.mxu0 %v501_v1 }
  0x1c   :  { %414 = vmatpush3.msra.mxu0 %v42_v30 }
  0x1d   :  { %415 = vmatprep.subr.mxu0 %v501_v1 }
  0x1e   :  { %416 = vmatpush3.msra.mxu0 %v41_v33 }
  0x1f   :  { %417 = vmatprep.subr.mxu0 %v501_v1 }
  0x20   :  { %418 = vmatpush3.msra.mxu0 %v40_v34 }
  0x21   :  { %420 = vmatmul.mubr.f32.vlgmr.msra.gmra.mxu0 %v609_v35 }
  0xe1   :  { %v127_v40 = vpop.f32.mrf.mxu0 }
  0xe2   :  { %473 = vtanh.f32 %v127_v40 }
  0xe3   :  { %v421_v41 = vpop.f32.mrf.mxu0 }
  0xef   :  { %v474_v42 = vpop.eup %473 }
  0xf0   :  { %431 = vmatmul.mubr.msk.f32.vlgmr.msra.gmra.mxu1 %vm136_vm3, %v474_v42 }
  0xf1   :  { %465 = vmatprep.mubr.msk.f32.mxu1 %vm502_vm0, %v501_v1  ;;  %434 = vmatpush3.msra.mxu1 %v259_v44 }
  0xf2   :  { %435 = vmatprep.subr.mxu1 %v501_v1 }
  0xf3   :  { %436 = vmatpush3.msra.mxu1 %v258_v45 }
  0xf4   :  { %437 = vmatprep.subr.mxu1 %v501_v1 }
  0xf5   :  { %438 = vmatpush3.msra.mxu1 %v257_v46 }
  0xf6   :  { %439 = vmatprep.subr.mxu1 %v501_v1 }
  0xf7   :  { %440 = vmatpush3.msra.mxu1 %v256_v47 }
  0xf8   :  { %441 = vmatprep.subr.mxu1 %v501_v1 }
  0xf9   :  { %442 = vmatpush3.msra.mxu1 %v255_v48 }
  0xfa   :  { %443 = vmatprep.subr.mxu1 %v501_v1 }
  0xfb   :  { %444 = vmatpush3.msra.mxu1 %v254_v49 }
  0xfc   :  { %445 = vmatprep.subr.mxu1 %v501_v1 }
  0xfd   :  { %446 = vmatpush3.msra.mxu1 %v253_v50 }
  0xfe   :  { %447 = vmatprep.subr.mxu1 %v501_v1 }
  0xff   :  { %448 = vmatpush3.msra.mxu1 %v252_v51 }
 0x100   :  { %449 = vmatprep.subr.mxu1 %v501_v1 }
 0x101   :  { %450 = vmatpush3.msra.mxu1 %v251_v8 }
 0x102   :  { %451 = vmatprep.subr.mxu1 %v501_v1 }
 0x103   :  { %452 = vmatpush3.msra.mxu1 %v250_v10 }
 0x104   :  { %453 = vmatprep.subr.mxu1 %v501_v1 }
 0x105   :  { %454 = vmatpush3.msra.mxu1 %v249_v12 }
 0x106   :  { %455 = vmatprep.subr.mxu1 %v501_v1 }
 0x107   :  { %456 = vmatpush3.msra.mxu1 %v248_v13 }
 0x108   :  { %457 = vmatprep.subr.mxu1 %v501_v1 }
 0x109   :  { %458 = vmatpush3.msra.mxu1 %v247_v14 }
 0x10a   :  { %459 = vmatprep.subr.mxu1 %v501_v1 }
 0x10b   :  { %460 = vmatpush3.msra.mxu1 %v246_v15 }
 0x10c   :  { %461 = vmatprep.subr.mxu1 %v501_v1 }
 0x10d   :  { %462 = vmatpush3.msra.mxu1 %v245_v16 }
 0x10e   :  { %463 = vmatprep.subr.mxu1 %v501_v1 }
 0x10f   :  { %464 = vmatpush3.msra.mxu1 %v244_v17 }
 0x1b0   :  { %v206_v52 = vpop.f32.mrf.mxu1 }
 0x1b1   :  { %v211_v53 = vsel %vm210_vm4, %v206_v52, -inf }
 0x1b2   :  { %v212_v54 = vrot.slane %v211_v53, 4  ;;  %v432_v55 = vpop.f32.mrf.mxu1 }
 0x1b4   :  { %v213_v56 = vmax.f32 %v211_v53, %v212_v54 }
 0x1b6   :  { %v214_v57 = vrot.slane %v213_v56, 2 }
 0x1b8   :  { %v215_v58 = vmax.f32 %v213_v56, %v214_v57 }
 0x1ba   :  { %v216_v59 = vrot.slane %v215_v58, 1 }
 0x1bc   :  { %v217_v60 = vmax.f32 %v215_v58, %v216_v59 }
 0x1be   :  { %v218_v61 = vsub.f32 %v206_v52, %v217_v60 }
 0x1c0   :  { %v219_v62 = vmul.f32 1.442695, %v218_v61 }
 0x1c2   :  { %475 = vpow2.f32 %v219_v62 }
 0x1cf   :  { %v476_v63 = vpop.eup %475 }
 0x1d0   :  { %v221_v0 = vsel %vm210_vm4, %v476_v63, 0.0 }
 0x1d1   :  { %v222_v2 = vrot.slane %v221_v0, 4 }
 0x1d3   :  { %v223_v3 = vadd.f32 %v222_v2, %v221_v0 }
 0x1d5   :  { %v224_v4 = vrot.slane %v223_v3, 2 }
 0x1d7   :  { %v225_v5 = vadd.f32 %v224_v4, %v223_v3 }
 0x1d9   :  { %v226_v6 = vrot.slane %v225_v5, 1 }
 0x1db   :  { %v227_v7 = vadd.f32 %v226_v6, %v225_v5 }
 0x1dd   :  { %477 = vrcp.f32 %v227_v7 }
 0x1ea   :  { %v478_v9 = vpop.eup %477 }
 0x1eb   :  { %v229_v11 = vmul.f32 %v478_v9, %v476_v63 }
 0x1ed   :  { %232 = vperm.xlu0 %472, %v229_v11  }
 0x268   :  { %v233_v18 = vpop.permute.xlu0 %232 }
 0x269   :  { %v235_v19 = vmul.f32 %v233_v18, %v609_v35 }
 0x26b   :  { %v237_v20 = vsel %vm236_vm5, %v235_v19, 0.0 }
 0x26c   :  { %v238_v21 = vrot.slane %v237_v20, 4 }
 0x26e   :  { %v239_v22 = vadd.f32 %v238_v21, %v237_v20 }
 0x270   :  { %v240_v23 = vrot.slane %v239_v22, 2 }
 0x272   :  { %v241_v24 = vadd.f32 %v240_v23, %v239_v22 }
 0x274   :  { %v242_v25 = vrot.slane %v241_v24, 1 }
 0x276   :  { %v243_v26 = vadd.f32 %v242_v25, %v241_v24 }
 0x278   :  { %466 = vmatmul.mubr.f32.vlgmr.msra.gmra.mxu1 %v243_v26 }
 0x338   :  { %v327_v1 = vpop.f32.mrf.mxu1 }
 0x339   :  { %v328_v28 = vadd.f32 %v327_v1, %v260_v27 }
 0x33a   :  { %v467_v29 = vpop.f32.mrf.mxu1 }
 0x33b   :  { %332 = vst.msk [vmem:[#allocation2] sm:$0x1] %vm331_vm6, %v328_v28 }
 0x33c   :  { %490 = shalt.err (!%p487_p4)
}
 0x33d   :  { %342 = dma.vmem_to_hbm [thread:$0]  %s340_s14, 16, %s706_s5, [#allocation3]  }
 0x33e   :  { %499 = dma.done.wait [#allocation3], 16  }
 0x33f   :  { %500 = vsyncadd [#allocation3], 4294967280 }
 0x340   :  { %346 = vsyncpa [#allocation3], 1 }

</bundles_post_ra>
